<compile_context>
chip_gen: v5e
topology: v5e:2x2
jax: 0.10.0
libtpu: 0.0.40
codegen_flags: <defaults>
</compile_context>

<pallas_src>
import numpy as np
import jax
import jax.numpy as jnp
from jax import lax
from jax.experimental import pallas as pl
from jax.experimental.pallas import tpu as pltpu

EPS = 1e-5  # PyTorch BatchNorm2d default eps


# ----------------------------- Pallas kernels ------------------------------

def _matmul_kernel(a_ref, b_ref, o_ref):
    # Full-block GEMM on the MXU; bf16 inputs, f32 accumulate.
    o_ref[...] = jnp.dot(a_ref[...], b_ref[...],
                         preferred_element_type=jnp.float32).astype(o_ref.dtype)


def _bn_relu_kernel(x_ref, cb_ref, g_ref, b_ref, o_ref):
    # x: (N, C) channels-last.  conv-bias + training-mode BatchNorm (one-pass
    # sum / sum-of-squares batch stats per channel) + affine + ReLU.
    x = x_ref[...] + cb_ref[...]
    inv_n = 1.0 / x.shape[0]
    s1 = jnp.sum(x, axis=0, keepdims=True)
    s2 = jnp.sum(x * x, axis=0, keepdims=True)
    mean = s1 * inv_n
    var = s2 * inv_n - mean * mean
    y = (x - mean) * lax.rsqrt(var + EPS) * g_ref[...] + b_ref[...]
    o_ref[...] = jnp.maximum(y, 0.0).astype(o_ref.dtype)


def _ola_bn_relu_kernel(t_ref, s_ref, cb_ref, g_ref, b_ref, o_ref):
    # overlap-add GEMM (T @ S) + conv-bias + BatchNorm2d(1) global batch stats + ReLU.
    p = jnp.dot(t_ref[...], s_ref[...],
                preferred_element_type=jnp.float32) + cb_ref[...]
    inv_n = 1.0 / (p.shape[0] * p.shape[1])
    s1 = jnp.sum(p, axis=(0, 1), keepdims=True)
    s2 = jnp.sum(p * p, axis=(0, 1), keepdims=True)
    mean = s1 * inv_n
    var = s2 * inv_n - mean * mean
    y = (p - mean) * lax.rsqrt(var + EPS) * g_ref[...] + b_ref[...]
    o_ref[...] = jnp.maximum(y, 0.0)


# ------------------------------ pallas wrappers -----------------------------

def _full_spec(shape):
    nd = len(shape)
    return pl.BlockSpec(shape, lambda i, _nd=nd: (0,) * _nd)


def _single_block_call(kernel, out_shape, *args):
    return pl.pallas_call(
        kernel,
        out_shape=out_shape,
        grid=(1,),
        in_specs=[_full_spec(a.shape) for a in args],
        out_specs=_full_spec(out_shape.shape),
        compiler_params=pltpu.CompilerParams(dimension_semantics=("arbitrary",)),
    )(*args)


# ------------------------- one-time parameter prepack ------------------------

def prepack_params(params):
    """Hoisted, one-time weight repacking (bf16 GEMM weights + fused conv2 weight)."""
    emb_w, W1, b1, g1, be1, W2, b2, g2, be2 = params
    in_d, C1 = W1.shape[0], W1.shape[1]

    # W1: (in_d, C1, 14, 14) [d, c, i, j] -> columns ordered (j, i, c)
    W1p = jnp.transpose(W1, (0, 3, 2, 1)).reshape(in_d, 14 * 14 * C1).astype(jnp.bfloat16)

    # RA[(i*C1 + c), (kx*28 + oy)] = W2[c, 0, oy - i, kx]  (guarded 0 <= oy-i < 15)
    W2np = np.asarray(W2, np.float32)[:, 0]                       # (C1, 15, 15) [c, ky, kx]
    ky_mat = np.arange(28)[None, :] - np.arange(14)[:, None]      # (14, 28) = oy - i
    valid = ((ky_mat >= 0) & (ky_mat < 15)).astype(np.float32)
    g = W2np[:, np.clip(ky_mat, 0, 14), :]                        # (C1, 14, 28, 15) [c,i,oy,kx]
    g = g * valid[None, :, :, None]
    RA = np.transpose(g, (1, 0, 3, 2)).reshape(14 * C1, 15 * 28)  # [(i,c), (kx,oy)]
    RAp = jnp.asarray(RA, dtype=jnp.bfloat16)

    # S[(j*15 + kx), ox] = [j + kx == ox]
    S = ((np.arange(14)[:, None] + np.arange(15)[None, :])[:, :, None]
         == np.arange(28)[None, None, :]).astype(np.float32).reshape(14 * 15, 28)
    Sm = jnp.asarray(S)

    b1r = jnp.reshape(b1, (1, C1)).astype(jnp.float32)
    g1r = jnp.reshape(g1, (1, C1)).astype(jnp.float32)
    be1r = jnp.reshape(be1, (1, C1)).astype(jnp.float32)
    b2r = jnp.reshape(b2, (1, 1)).astype(jnp.float32)
    g2r = jnp.reshape(g2, (1, 1)).astype(jnp.float32)
    be2r = jnp.reshape(be2, (1, 1)).astype(jnp.float32)
    return (emb_w, W1p, b1r, g1r, be1r, RAp, Sm, b2r, g2r, be2r)


# ------------------------------ forward pass -------------------------------

def generator_forward(c, z, packed):
    emb_w, W1p, b1r, g1r, be1r, RAp, Sm, b2r, g2r, be2r = packed
    B = c.shape[0]
    C1 = b1r.shape[-1]

    # Embedding lookup + concat with latent (tiny; left to XLA glue).
    a = emb_w[c]                                                  # (B, nc)
    in_v = jnp.concatenate([z, a], axis=1).astype(jnp.bfloat16)   # (B, in_d)

    # k1: ConvTranspose2d(in_d, C1, k=14) on a 1x1 input == single GEMM
    y = _single_block_call(
        _matmul_kernel,
        jax.ShapeDtypeStruct((B, 14 * 14 * C1), jnp.float32),
        in_v, W1p)                                                # cols (j, i, c)

    # k2: conv bias + BatchNorm2d(C1) batch stats + ReLU in channels-last view
    y2 = y.reshape(B * 14 * 14, C1)                               # rows (b, j, i)
    h = _single_block_call(
        _bn_relu_kernel,
        jax.ShapeDtypeStruct((B * 14 * 14, C1), jnp.bfloat16),
        y2, b1r, g1r, be1r)

    # k3: ConvTranspose2d(C1, 1, k=15): contract (i, channel) and expand to
    # (kx, oy) in ONE GEMM against the prepacked, guarded weight RA.
    hf = h.reshape(B * 14, 14 * C1)                               # rows (b, j), cols (i, c)
    v = _single_block_call(
        _matmul_kernel,
        jax.ShapeDtypeStruct((B * 14, 15 * 28), jnp.float32),
        hf, RAp)                                                  # cols (kx, oy)

    # tiny 47 KB re-layout: (b, j, kx, oy) -> rows (b, oy), cols (j, kx)
    T = v.reshape(B, 14, 15, 28).transpose(0, 3, 1, 2).reshape(B * 28, 14 * 15)

    # k4: overlap-add over (j, kx) + conv bias + BatchNorm2d(1) + ReLU (lane-dense out)
    out = _single_block_call(
        _ola_bn_relu_kernel,
        jax.ShapeDtypeStruct((B * 28, 28), jnp.float32),
        T, Sm, b2r, g2r, be2r)                                    # rows (b, oy), cols ox

    return out.reshape(B, 1, 28, 28)                              # NCHW like PyTorch


# ------------------------- independent numpy reference ----------------------

def reference_forward(c, z, params):
    emb_w, W1, b1, g1, be1, W2, b2, g2, be2 = [np.asarray(p, np.float64) for p in params]
    c = np.asarray(c)
    z = np.asarray(z, np.float64)
    a = emb_w[c]
    in_v = np.concatenate([z, a], axis=1)
    B_ = in_v.shape[0]

    y = np.einsum('bi,iohw->bohw', in_v, W1) + b1[None, :, None, None]
    m = y.mean(axis=(0, 2, 3), keepdims=True)
    v = y.var(axis=(0, 2, 3), keepdims=True)
    y = (y - m) / np.sqrt(v + EPS) * g1[None, :, None, None] + be1[None, :, None, None]
    y = np.maximum(y, 0.0)

    yp = np.pad(y, ((0, 0), (0, 0), (14, 14), (14, 14)))
    out = np.zeros((B_, 1, 28, 28))
    for aa in range(15):
        for bb in range(15):
            out[:, 0] += np.einsum('bcyx,c->byx',
                                   yp[:, :, aa:aa + 28, bb:bb + 28],
                                   W2[:, 0, 14 - aa, 14 - bb])
    out = out + b2[None, :, None, None]
    m2 = out.mean()
    v2 = out.var()
    out = (out - m2) / np.sqrt(v2 + EPS) * g2[None, :, None, None] + be2[None, :, None, None]
    return np.maximum(out, 0.0)


# ----------------------------------- main -----------------------------------

if __name__ == "__main__":
    nz, nc, B = 8, 4, 2
    in_d = nz + nc          # 12
    C1 = in_d * 8           # 96

    key = jax.random.PRNGKey(0)
    keys = jax.random.split(key, 8)

    # Deterministic parameter init (shapes from generator.__init__).
    emb_w = jax.random.normal(keys[0], (nc, nc), jnp.float32)                 # Embedding(nc, nc)
    W1 = jax.random.normal(keys[1], (in_d, C1, 14, 14), jnp.float32) * 0.05   # ConvT2d #1 weight
    b1 = jax.random.normal(keys[2], (C1,), jnp.float32) * 0.01                # ConvT2d #1 bias
    W2 = jax.random.normal(keys[3], (C1, 1, 15, 15), jnp.float32) * 0.05      # ConvT2d #2 weight
    b2 = jax.random.normal(keys[4], (1,), jnp.float32) * 0.01                 # ConvT2d #2 bias
    g1 = jnp.ones((C1,), jnp.float32); be1 = jnp.zeros((C1,), jnp.float32)    # BN defaults
    g2 = jnp.ones((1,), jnp.float32);  be2 = jnp.zeros((1,), jnp.float32)

    c = jax.random.randint(keys[5], (B,), 0, nc)                  # class labels
    z = jax.random.normal(keys[6], (B, nz), jnp.float32)          # latent (torch.randn in forward)

    params = (emb_w, W1, b1, g1, be1, W2, b2, g2, be2)
    packed = prepack_params(params)          # one-time weight repack (hoisted out of forward)

    fwd = jax.jit(generator_forward)
    out = jax.block_until_ready(fwd(c, z, packed))
    assert out.shape == (B, 1, 28, 28) and out.dtype == jnp.float32

    ref = reference_forward(c, z, params)
    out64 = np.asarray(out, np.float64)
    # bf16 GEMM weights/activations => ~1e-2-level deviations; tolerance sized accordingly.
    if not np.allclose(out64, ref, atol=1e-1, rtol=5e-2):
        max_err = float(np.max(np.abs(out64 - ref)))
        raise AssertionError(f"Pallas output mismatch vs reference, max abs err = {max_err}")

    print("KERNEL_OK")
</pallas_src>

<mosaic_0001>
module attributes {stable_mosaic.version = 11 : i64} {
  func.func @_bn_relu_kernel(%arg0: i32, %arg1: memref<392x96xf32, #tpu.memory_space<vmem>>, %arg2: memref<1x96xf32, #tpu.memory_space<vmem>>, %arg3: memref<1x96xf32, #tpu.memory_space<vmem>>, %arg4: memref<1x96xf32, #tpu.memory_space<vmem>>, %arg5: memref<392x96xbf16, #tpu.memory_space<vmem>>) attributes {dimension_semantics = [#tpu.dimension_semantics<arbitrary>], iteration_bounds = array<i64: 1>, scalar_prefetch = 0 : i64, scratch_operands = 0 : i64, tpu.core_type = #tpu.core_type<tc>, window_params = [{pipeline_mode = #tpu.pipeline_mode<synchronous>, transform_indices = @transform_0, window_bounds = array<i64: 392, 96>}, {pipeline_mode = #tpu.pipeline_mode<synchronous>, transform_indices = @transform_1, window_bounds = array<i64: 1, 96>}, {pipeline_mode = #tpu.pipeline_mode<synchronous>, transform_indices = @transform_2, window_bounds = array<i64: 1, 96>}, {pipeline_mode = #tpu.pipeline_mode<synchronous>, transform_indices = @transform_3, window_bounds = array<i64: 1, 96>}, {pipeline_mode = #tpu.pipeline_mode<synchronous>, transform_indices = @transform_4, window_bounds = array<i64: 392, 96>}]} {
    %c0 = arith.constant 0 : index
    %c0_0 = arith.constant 0 : index
    %0 = vector.load %arg1[%c0, %c0_0] : memref<392x96xf32, #tpu.memory_space<vmem>>, vector<392x96xf32>
    %c0_1 = arith.constant 0 : index
    %c0_2 = arith.constant 0 : index
    %1 = vector.load %arg2[%c0_1, %c0_2] : memref<1x96xf32, #tpu.memory_space<vmem>>, vector<1x96xf32>
    %2 = vector.broadcast %1 : vector<1x96xf32> to vector<392x96xf32>
    %3 = arith.addf %0, %2 : vector<392x96xf32>
    %cst = arith.constant dense<0.000000e+00> : vector<96xf32>
    %4 = vector.multi_reduction <add>, %3, %cst [0] : vector<392x96xf32> to vector<96xf32>
    %5 = vector.shape_cast %4 : vector<96xf32> to vector<1x96xf32>
    %6 = arith.mulf %3, %3 : vector<392x96xf32>
    %cst_3 = arith.constant dense<0.000000e+00> : vector<96xf32>
    %7 = vector.multi_reduction <add>, %6, %cst_3 [0] : vector<392x96xf32> to vector<96xf32>
    %8 = vector.shape_cast %7 : vector<96xf32> to vector<1x96xf32>
    %cst_4 = arith.constant 0.00255102036 : f32
    %9 = vector.broadcast %cst_4 : f32 to vector<1x96xf32>
    %10 = arith.mulf %5, %9 : vector<1x96xf32>
    %cst_5 = arith.constant 0.00255102036 : f32
    %11 = vector.broadcast %cst_5 : f32 to vector<1x96xf32>
    %12 = arith.mulf %8, %11 : vector<1x96xf32>
    %13 = arith.mulf %10, %10 : vector<1x96xf32>
    %14 = arith.subf %12, %13 : vector<1x96xf32>
    %15 = vector.broadcast %10 : vector<1x96xf32> to vector<392x96xf32>
    %16 = arith.subf %3, %15 : vector<392x96xf32>
    %cst_6 = arith.constant 9.99999974E-6 : f32
    %17 = vector.broadcast %cst_6 : f32 to vector<1x96xf32>
    %18 = arith.addf %14, %17 : vector<1x96xf32>
    %19 = math.rsqrt %18 : vector<1x96xf32>
    %20 = vector.broadcast %19 : vector<1x96xf32> to vector<392x96xf32>
    %21 = arith.mulf %16, %20 : vector<392x96xf32>
    %c0_7 = arith.constant 0 : index
    %c0_8 = arith.constant 0 : index
    %22 = vector.load %arg3[%c0_7, %c0_8] : memref<1x96xf32, #tpu.memory_space<vmem>>, vector<1x96xf32>
    %23 = vector.broadcast %22 : vector<1x96xf32> to vector<392x96xf32>
    %24 = arith.mulf %21, %23 : vector<392x96xf32>
    %c0_9 = arith.constant 0 : index
    %c0_10 = arith.constant 0 : index
    %25 = vector.load %arg4[%c0_9, %c0_10] : memref<1x96xf32, #tpu.memory_space<vmem>>, vector<1x96xf32>
    %26 = vector.broadcast %25 : vector<1x96xf32> to vector<392x96xf32>
    %27 = arith.addf %24, %26 : vector<392x96xf32>
    %cst_11 = arith.constant 0.000000e+00 : f32
    %28 = vector.broadcast %cst_11 : f32 to vector<392x96xf32>
    %29 = arith.maximumf %27, %28 : vector<392x96xf32>
    %30 = arith.truncf %29 : vector<392x96xf32> to vector<392x96xbf16>
    %c0_12 = arith.constant 0 : index
    %c0_13 = arith.constant 0 : index
    %31 = vector.load %arg5[%c0_12, %c0_13] : memref<392x96xbf16, #tpu.memory_space<vmem>>, vector<392x96xbf16>
    tpu.vector_store %arg5[%c0_12, %c0_13], %30 {strides = array<i32>} : memref<392x96xbf16, #tpu.memory_space<vmem>>, vector<392x96xbf16>,
    return
  }
  func.func @transform_0(%arg0: i32) -> (i32, i32) {
    %c0_i32 = arith.constant 0 : i32
    %c0_i32_0 = arith.constant 0 : i32
    %c0_i32_1 = arith.constant 0 : i32
    return %c0_i32, %c0_i32_0 : i32, i32
  }
  func.func @transform_1(%arg0: i32) -> (i32, i32) {
    %c0_i32 = arith.constant 0 : i32
    %c0_i32_0 = arith.constant 0 : i32
    %c0_i32_1 = arith.constant 0 : i32
    return %c0_i32, %c0_i32_0 : i32, i32
  }
  func.func @transform_2(%arg0: i32) -> (i32, i32) {
    %c0_i32 = arith.constant 0 : i32
    %c0_i32_0 = arith.constant 0 : i32
    %c0_i32_1 = arith.constant 0 : i32
    return %c0_i32, %c0_i32_0 : i32, i32
  }
  func.func @transform_3(%arg0: i32) -> (i32, i32) {
    %c0_i32 = arith.constant 0 : i32
    %c0_i32_0 = arith.constant 0 : i32
    %c0_i32_1 = arith.constant 0 : i32
    return %c0_i32, %c0_i32_0 : i32, i32
  }
  func.func @transform_4(%arg0: i32) -> (i32, i32) {
    %c0_i32 = arith.constant 0 : i32
    %c0_i32_0 = arith.constant 0 : i32
    %c0_i32_1 = arith.constant 0 : i32
    return %c0_i32, %c0_i32_0 : i32, i32
  }
}

module attributes {stable_mosaic.version = 11 : i64} {
  func.func @_matmul_kernel(%arg0: i32, %arg1: memref<2x12xbf16, #tpu.memory_space<vmem>>, %arg2: memref<12x18816xbf16, #tpu.memory_space<vmem>>, %arg3: memref<2x18816xf32, #tpu.memory_space<vmem>>) attributes {dimension_semantics = [#tpu.dimension_semantics<arbitrary>], iteration_bounds = array<i64: 1>, scalar_prefetch = 0 : i64, scratch_operands = 0 : i64, tpu.core_type = #tpu.core_type<tc>, window_params = [{pipeline_mode = #tpu.pipeline_mode<synchronous>, transform_indices = @transform_0, window_bounds = array<i64: 2, 12>}, {pipeline_mode = #tpu.pipeline_mode<synchronous>, transform_indices = @transform_1, window_bounds = array<i64: 12, 18816>}, {pipeline_mode = #tpu.pipeline_mode<synchronous>, transform_indices = @transform_2, window_bounds = array<i64: 2, 18816>}]} {
    %c0 = arith.constant 0 : index
    %c0_0 = arith.constant 0 : index
    %0 = vector.load %arg1[%c0, %c0_0] : memref<2x12xbf16, #tpu.memory_space<vmem>>, vector<2x12xbf16>
    %c0_1 = arith.constant 0 : index
    %c0_2 = arith.constant 0 : index
    %1 = vector.load %arg2[%c0_1, %c0_2] : memref<12x18816xbf16, #tpu.memory_space<vmem>>, vector<12x18816xbf16>
    %cst = arith.constant dense<0.000000e+00> : vector<2x18816xf32>
    %2 = tpu.matmul %0, %1, %cst {dimension_numbers = #tpu.dot_dimension_numbers<[1], [0], [0], [1], [0, 0, 1, 1], [], []>} : vector<2x12xbf16>, vector<12x18816xbf16>, vector<2x18816xf32> -> vector<2x18816xf32>
    %c0_3 = arith.constant 0 : index
    %c0_4 = arith.constant 0 : index
    %3 = vector.load %arg3[%c0_3, %c0_4] : memref<2x18816xf32, #tpu.memory_space<vmem>>, vector<2x18816xf32>
    tpu.vector_store %arg3[%c0_3, %c0_4], %2 {strides = array<i32>} : memref<2x18816xf32, #tpu.memory_space<vmem>>, vector<2x18816xf32>,
    return
  }
  func.func @transform_0(%arg0: i32) -> (i32, i32) {
    %c0_i32 = arith.constant 0 : i32
    %c0_i32_0 = arith.constant 0 : i32
    %c0_i32_1 = arith.constant 0 : i32
    return %c0_i32, %c0_i32_0 : i32, i32
  }
  func.func @transform_1(%arg0: i32) -> (i32, i32) {
    %c0_i32 = arith.constant 0 : i32
    %c0_i32_0 = arith.constant 0 : i32
    %c0_i32_1 = arith.constant 0 : i32
    return %c0_i32, %c0_i32_0 : i32, i32
  }
  func.func @transform_2(%arg0: i32) -> (i32, i32) {
    %c0_i32 = arith.constant 0 : i32
    %c0_i32_0 = arith.constant 0 : i32
    %c0_i32_1 = arith.constant 0 : i32
    return %c0_i32, %c0_i32_0 : i32, i32
  }
}

module attributes {stable_mosaic.version = 11 : i64} {
  func.func @_matmul_kernel(%arg0: i32, %arg1: memref<28x1344xbf16, #tpu.memory_space<vmem>>, %arg2: memref<1344x420xbf16, #tpu.memory_space<vmem>>, %arg3: memref<28x420xf32, #tpu.memory_space<vmem>>) attributes {dimension_semantics = [#tpu.dimension_semantics<arbitrary>], iteration_bounds = array<i64: 1>, scalar_prefetch = 0 : i64, scratch_operands = 0 : i64, tpu.core_type = #tpu.core_type<tc>, window_params = [{pipeline_mode = #tpu.pipeline_mode<synchronous>, transform_indices = @transform_0, window_bounds = array<i64: 28, 1344>}, {pipeline_mode = #tpu.pipeline_mode<synchronous>, transform_indices = @transform_1, window_bounds = array<i64: 1344, 420>}, {pipeline_mode = #tpu.pipeline_mode<synchronous>, transform_indices = @transform_2, window_bounds = array<i64: 28, 420>}]} {
    %c0 = arith.constant 0 : index
    %c0_0 = arith.constant 0 : index
    %0 = vector.load %arg1[%c0, %c0_0] : memref<28x1344xbf16, #tpu.memory_space<vmem>>, vector<28x1344xbf16>
    %c0_1 = arith.constant 0 : index
    %c0_2 = arith.constant 0 : index
    %1 = vector.load %arg2[%c0_1, %c0_2] : memref<1344x420xbf16, #tpu.memory_space<vmem>>, vector<1344x420xbf16>
    %cst = arith.constant dense<0.000000e+00> : vector<28x420xf32>
    %2 = tpu.matmul %0, %1, %cst {dimension_numbers = #tpu.dot_dimension_numbers<[1], [0], [0], [1], [0, 0, 1, 1], [], []>} : vector<28x1344xbf16>, vector<1344x420xbf16>, vector<28x420xf32> -> vector<28x420xf32>
    %c0_3 = arith.constant 0 : index
    %c0_4 = arith.constant 0 : index
    %3 = vector.load %arg3[%c0_3, %c0_4] : memref<28x420xf32, #tpu.memory_space<vmem>>, vector<28x420xf32>
    tpu.vector_store %arg3[%c0_3, %c0_4], %2 {strides = array<i32>} : memref<28x420xf32, #tpu.memory_space<vmem>>, vector<28x420xf32>,
    return
  }
  func.func @transform_0(%arg0: i32) -> (i32, i32) {
    %c0_i32 = arith.constant 0 : i32
    %c0_i32_0 = arith.constant 0 : i32
    %c0_i32_1 = arith.constant 0 : i32
    return %c0_i32, %c0_i32_0 : i32, i32
  }
  func.func @transform_1(%arg0: i32) -> (i32, i32) {
    %c0_i32 = arith.constant 0 : i32
    %c0_i32_0 = arith.constant 0 : i32
    %c0_i32_1 = arith.constant 0 : i32
    return %c0_i32, %c0_i32_0 : i32, i32
  }
  func.func @transform_2(%arg0: i32) -> (i32, i32) {
    %c0_i32 = arith.constant 0 : i32
    %c0_i32_0 = arith.constant 0 : i32
    %c0_i32_1 = arith.constant 0 : i32
    return %c0_i32, %c0_i32_0 : i32, i32
  }
}

module attributes {stable_mosaic.version = 11 : i64} {
  func.func @_ola_bn_relu_kernel(%arg0: i32, %arg1: memref<56x210xf32, #tpu.memory_space<vmem>>, %arg2: memref<210x28xf32, #tpu.memory_space<vmem>>, %arg3: memref<1x1xf32, #tpu.memory_space<vmem>>, %arg4: memref<1x1xf32, #tpu.memory_space<vmem>>, %arg5: memref<1x1xf32, #tpu.memory_space<vmem>>, %arg6: memref<56x28xf32, #tpu.memory_space<vmem>>) attributes {dimension_semantics = [#tpu.dimension_semantics<arbitrary>], iteration_bounds = array<i64: 1>, scalar_prefetch = 0 : i64, scratch_operands = 0 : i64, tpu.core_type = #tpu.core_type<tc>, window_params = [{pipeline_mode = #tpu.pipeline_mode<synchronous>, transform_indices = @transform_0, window_bounds = array<i64: 56, 210>}, {pipeline_mode = #tpu.pipeline_mode<synchronous>, transform_indices = @transform_1, window_bounds = array<i64: 210, 28>}, {pipeline_mode = #tpu.pipeline_mode<synchronous>, transform_indices = @transform_2, window_bounds = array<i64: 1, 1>}, {pipeline_mode = #tpu.pipeline_mode<synchronous>, transform_indices = @transform_3, window_bounds = array<i64: 1, 1>}, {pipeline_mode = #tpu.pipeline_mode<synchronous>, transform_indices = @transform_4, window_bounds = array<i64: 1, 1>}, {pipeline_mode = #tpu.pipeline_mode<synchronous>, transform_indices = @transform_5, window_bounds = array<i64: 56, 28>}]} {
    %c0 = arith.constant 0 : index
    %c0_0 = arith.constant 0 : index
    %0 = vector.load %arg1[%c0, %c0_0] : memref<56x210xf32, #tpu.memory_space<vmem>>, vector<56x210xf32>
    %c0_1 = arith.constant 0 : index
    %c0_2 = arith.constant 0 : index
    %1 = vector.load %arg2[%c0_1, %c0_2] : memref<210x28xf32, #tpu.memory_space<vmem>>, vector<210x28xf32>
    %cst = arith.constant dense<0.000000e+00> : vector<56x28xf32>
    %2 = tpu.matmul %0, %1, %cst {dimension_numbers = #tpu.dot_dimension_numbers<[1], [0], [0], [1], [0, 0, 1, 1], [], []>} : vector<56x210xf32>, vector<210x28xf32>, vector<56x28xf32> -> vector<56x28xf32>
    %c0_3 = arith.constant 0 : index
    %c0_4 = arith.constant 0 : index
    %3 = vector.load %arg3[%c0_3, %c0_4] : memref<1x1xf32, #tpu.memory_space<vmem>>, vector<1x1xf32>
    %4 = vector.broadcast %3 : vector<1x1xf32> to vector<56x28xf32>
    %5 = arith.addf %2, %4 : vector<56x28xf32>
    %6 = vector.shape_cast %5 : vector<56x28xf32> to vector<1x56x28xf32>
    %cst_5 = arith.constant dense<0.000000e+00> : vector<1xf32>
    %7 = vector.multi_reduction <add>, %6, %cst_5 [1, 2] : vector<1x56x28xf32> to vector<1xf32>
    %8 = vector.shape_cast %7 : vector<1xf32> to vector<1x1x1xf32>
    %9 = vector.extract %8[0, 0, 0] : f32 from vector<1x1x1xf32>
    %10 = vector.broadcast %9 : f32 to vector<1x1xf32>
    %11 = arith.mulf %5, %5 : vector<56x28xf32>
    %12 = vector.shape_cast %11 : vector<56x28xf32> to vector<1x56x28xf32>
    %cst_6 = arith.constant dense<0.000000e+00> : vector<1xf32>
    %13 = vector.multi_reduction <add>, %12, %cst_6 [1, 2] : vector<1x56x28xf32> to vector<1xf32>
    %14 = vector.shape_cast %13 : vector<1xf32> to vector<1x1x1xf32>
    %15 = vector.extract %14[0, 0, 0] : f32 from vector<1x1x1xf32>
    %16 = vector.broadcast %15 : f32 to vector<1x1xf32>
    %cst_7 = arith.constant 6.37755089E-4 : f32
    %17 = vector.broadcast %cst_7 : f32 to vector<1x1xf32>
    %18 = arith.mulf %10, %17 : vector<1x1xf32>
    %cst_8 = arith.constant 6.37755089E-4 : f32
    %19 = vector.broadcast %cst_8 : f32 to vector<1x1xf32>
    %20 = arith.mulf %16, %19 : vector<1x1xf32>
    %21 = arith.mulf %18, %18 : vector<1x1xf32>
    %22 = arith.subf %20, %21 : vector<1x1xf32>
    %23 = vector.broadcast %18 : vector<1x1xf32> to vector<56x28xf32>
    %24 = arith.subf %5, %23 : vector<56x28xf32>
    %cst_9 = arith.constant 9.99999974E-6 : f32
    %25 = vector.broadcast %cst_9 : f32 to vector<1x1xf32>
    %26 = arith.addf %22, %25 : vector<1x1xf32>
    %27 = math.rsqrt %26 : vector<1x1xf32>
    %28 = vector.broadcast %27 : vector<1x1xf32> to vector<56x28xf32>
    %29 = arith.mulf %24, %28 : vector<56x28xf32>
    %c0_10 = arith.constant 0 : index
    %c0_11 = arith.constant 0 : index
    %30 = vector.load %arg4[%c0_10, %c0_11] : memref<1x1xf32, #tpu.memory_space<vmem>>, vector<1x1xf32>
    %31 = vector.broadcast %30 : vector<1x1xf32> to vector<56x28xf32>
    %32 = arith.mulf %29, %31 : vector<56x28xf32>
    %c0_12 = arith.constant 0 : index
    %c0_13 = arith.constant 0 : index
    %33 = vector.load %arg5[%c0_12, %c0_13] : memref<1x1xf32, #tpu.memory_space<vmem>>, vector<1x1xf32>
    %34 = vector.broadcast %33 : vector<1x1xf32> to vector<56x28xf32>
    %35 = arith.addf %32, %34 : vector<56x28xf32>
    %cst_14 = arith.constant 0.000000e+00 : f32
    %36 = vector.broadcast %cst_14 : f32 to vector<56x28xf32>
    %37 = arith.maximumf %35, %36 : vector<56x28xf32>
    %c0_15 = arith.constant 0 : index
    %c0_16 = arith.constant 0 : index
    %38 = vector.load %arg6[%c0_15, %c0_16] : memref<56x28xf32, #tpu.memory_space<vmem>>, vector<56x28xf32>
    tpu.vector_store %arg6[%c0_15, %c0_16], %37 {strides = array<i32>} : memref<56x28xf32, #tpu.memory_space<vmem>>, vector<56x28xf32>,
    return
  }
  func.func @transform_0(%arg0: i32) -> (i32, i32) {
    %c0_i32 = arith.constant 0 : i32
    %c0_i32_0 = arith.constant 0 : i32
    %c0_i32_1 = arith.constant 0 : i32
    return %c0_i32, %c0_i32_0 : i32, i32
  }
  func.func @transform_1(%arg0: i32) -> (i32, i32) {
    %c0_i32 = arith.constant 0 : i32
    %c0_i32_0 = arith.constant 0 : i32
    %c0_i32_1 = arith.constant 0 : i32
    return %c0_i32, %c0_i32_0 : i32, i32
  }
  func.func @transform_2(%arg0: i32) -> (i32, i32) {
    %c0_i32 = arith.constant 0 : i32
    %c0_i32_0 = arith.constant 0 : i32
    %c0_i32_1 = arith.constant 0 : i32
    return %c0_i32, %c0_i32_0 : i32, i32
  }
  func.func @transform_3(%arg0: i32) -> (i32, i32) {
    %c0_i32 = arith.constant 0 : i32
    %c0_i32_0 = arith.constant 0 : i32
    %c0_i32_1 = arith.constant 0 : i32
    return %c0_i32, %c0_i32_0 : i32, i32
  }
  func.func @transform_4(%arg0: i32) -> (i32, i32) {
    %c0_i32 = arith.constant 0 : i32
    %c0_i32_0 = arith.constant 0 : i32
    %c0_i32_1 = arith.constant 0 : i32
    return %c0_i32, %c0_i32_0 : i32, i32
  }
  func.func @transform_5(%arg0: i32) -> (i32, i32) {
    %c0_i32 = arith.constant 0 : i32
    %c0_i32_0 = arith.constant 0 : i32
    %c0_i32_1 = arith.constant 0 : i32
    return %c0_i32, %c0_i32_0 : i32, i32
  }
}

</mosaic_0001>

<bundles_post_ra>
// kernel: generator_forward.5
= control target key start
LH: loop header
LB: loop body
LE: loop exit
PB: predicated region body
PF: predicated region fallthrough
CT: control target
= control target key end

     0   :  { %9 = vsyncpa [#allocation3], 0  ;;  %s1965_s0 = inlined_call_operand.vmem [shape: f32[392,96], index: 0, kind: input, shape index: {}]   ;;  %s1966_s1 = inlined_call_operand.hbm [shape: f32[1,96], index: 1, kind: input, shape index: {}]   ;;  %s1967_s2 = inlined_call_operand.hbm [shape: f32[1,96], index: 2, kind: input, shape index: {}]   ;;  %s1968_s3 = inlined_call_operand.hbm [shape: f32[1,96], index: 3, kind: input, shape index: {}]   ;;  %s1969_s4 = inlined_call_operand.vmem [shape: bf16[392,96], index: 4, kind: output, shape index: {}]  }
   0x1   :  { %10 = vsyncpa [#allocation5], 0  ;;  %s29_s17 = sshll.u32 %s1967_s2, 4  ;;  %s873_s18 = smov [#allocation4]   ;;  %s30_s17 = int_to_ptr.hbm [resolvable:$true] %s29_s17 }
   0x2   :  { %s31_s19 = sshll.u32 %s873_s18, 4  ;;  %s18_s22 = sshll.u32 %s1966_s1, 4  ;;  %s32_s19 = int_to_ptr.vmem [resolvable:$true] %s31_s19  ;;  %s19_s22 = int_to_ptr.hbm [resolvable:$true] %s18_s22 }
   0x3   :  { %34 = dma.hbm_to_vmem [thread:$0]  %s30_s17, 16, %s32_s19, [#allocation5]  }
   0x4   :  { %s874_s23 = smov [#allocation2]   ;;  %s40_s27 = sshll.u32 %s1968_s3, 4  ;;  %s41_s27 = int_to_ptr.hbm [resolvable:$true] %s40_s27 }
   0x5   :  { %s20_s24 = sshll.u32 %s874_s23, 4  ;;  %s875_s2 = smov [#allocation6]   ;;  %s21_s24 = int_to_ptr.vmem [resolvable:$true] %s20_s24 }
   0x6   :  { %23 = dma.hbm_to_vmem [thread:$0]  %s19_s22, 16, %s21_s24, [#allocation3]  }
   0x7   :  { %s42_s28 = sshll.u32 %s875_s2, 4  ;;  %s43_s28 = int_to_ptr.vmem [resolvable:$true] %s42_s28 }
   0x8   :  { %45 = dma.hbm_to_vmem [thread:$0]  %s41_s27, 16, %s43_s28, [#allocation5]  }
   0x9   :  { %869 = dma.done.wait [#allocation3], 16  }
   0xa   :  { %870 = vsyncadd [#allocation3], 4294967280 }
   0xb   :  { %871 = dma.done.wait [#allocation5], 32  }
   0xc   :  { %872 = vsyncadd [#allocation5], 4294967264  ;;  %v910_v0 = vld [vmem:[#allocation2] ss:$0 sm:$0xff]  ;;  %v59_v2 = vld [vmem:[%s1965_s0 + $0x8] sm:$0xff]  ;;  %vm160_vm0 = vcmask 785408  }
   0xd   :  { %v58_v1 = vld [vmem:[%s1965_s0] sm:$0xff]  ;;  %v60_v3 = vld [vmem:[%s1965_s0 + $0x10] sm:$0xff]  ;;  %v61_v4 = vld [vmem:[%s1965_s0 + $0x18] sm:$0xff]  ;;  %v928_v6 = vadd.f32 %v910_v0, %v59_v2  ;;  %vm733_vm4 = vcmask 781312  }
   0xe   :  { %v925_v5 = vadd.f32 %v910_v0, %v58_v1  ;;  %v931_v7 = vadd.f32 %v910_v0, %v60_v3  ;;  %v62_v8 = vld [vmem:[%s1965_s0 + $0x20] sm:$0xff]  ;;  %v937_v9 = vadd.f32 %v910_v0, %v61_v4  ;;  %v63_v10 = vld [vmem:[%s1965_s0 + $0x28] sm:$0xff]  ;;  %v64_v15 = vld [vmem:[%s1965_s0 + $0x30] sm:$0xff] }
   0xf   :  { %v943_v11 = vadd.f32 %v910_v0, %v62_v8  ;;  %v162_v13 = vsel %vm160_vm0, %v928_v6, 0.0  ;;  %v955_v17 = vadd.f32 %v910_v0, %v63_v10  ;;  %v65_v19 = vld [vmem:[%s1965_s0 + $0x38] sm:$0xff]  ;;  %v963_v21 = vadd.f32 %v910_v0, %v64_v15  ;;  %v66_v23 = vld [vmem:[%s1965_s0 + $0x40] sm:$0xff]  ;;  %v67_v27 = vld [vmem:[%s1965_s0 + $0x48] sm:$0xff] }
  0x10   :  { %v161_v12 = vsel %vm160_vm0, %v925_v5, 0.0  ;;  %v164_v14 = vsel %vm160_vm0, %v931_v7, 0.0  ;;  %v166_v18 = vsel %vm160_vm0, %v937_v9, 0.0  ;;  %v971_v25 = vadd.f32 %v910_v0, %v65_v19  ;;  %v68_v31 = vld [vmem:[%s1965_s0 + $0x50] sm:$0xff]  ;;  %v69_v38 = vld [vmem:[%s1965_s0 + $0x58] sm:$0xff]  ;;  %v70_v43 = vld [vmem:[%s1965_s0 + $0x60] sm:$0xff] }
  0x11   :  { %v163_v16 = vadd.f32 %v162_v13, %v161_v12  ;;  %v168_v22 = vsel %vm160_vm0, %v943_v11, 0.0  ;;  %v170_v26 = vsel %vm160_vm0, %v955_v17, 0.0  ;;  %v979_v29 = vadd.f32 %v910_v0, %v66_v23  ;;  %v71_v52 = vld [vmem:[%s1965_s0 + $0x68] sm:$0xff]  ;;  %v72_v59 = vld [vmem:[%s1965_s0 + $0x70] sm:$0xff]  ;;  %v73_v3 = vld [vmem:[%s1965_s0 + $0x78] sm:$0xff] }
  0x12   :  { %v172_v30 = vsel %vm160_vm0, %v963_v21, 0.0  ;;  %v264_v33 = vmul.f32 %v925_v5, %v925_v5  ;;  %v265_v34 = vmul.f32 %v928_v6, %v928_v6  ;;  %v991_v35 = vadd.f32 %v910_v0, %v67_v27  ;;  %v74_v15 = vld [vmem:[%s1965_s0 + $0x80] sm:$0xff] }
  0x13   :  { %v165_v20 = vadd.f32 %v164_v14, %v163_v16  ;;  %v174_v36 = vsel %vm160_vm0, %v971_v25, 0.0  ;;  %v266_v37 = vmul.f32 %v931_v7, %v931_v7  ;;  %v267_v40 = vmul.f32 %v937_v9, %v937_v9 }
  0x14   :  { %v1003_v41 = vadd.f32 %v910_v0, %v68_v31  ;;  %v176_v42 = vsel %vm160_vm0, %v979_v29, 0.0  ;;  %v268_v45 = vmul.f32 %v943_v11, %v943_v11  ;;  %v313_v46 = vsel %vm160_vm0, %v264_v33, 0.0  ;;  %v76_v33 = vld [vmem:[%s1965_s0 + $0x90] sm:$0xff] }
  0x15   :  { %v167_v24 = vadd.f32 %v166_v18, %v165_v20  ;;  %v314_v47 = vsel %vm160_vm0, %v265_v34, 0.0  ;;  %v1015_v48 = vadd.f32 %v910_v0, %v69_v38  ;;  %v178_v49 = vsel %vm160_vm0, %v991_v35, 0.0 }
  0x16   :  { %v315_v50 = vadd.f32 %v314_v47, %v313_v46  ;;  %v316_v51 = vsel %vm160_vm0, %v266_v37, 0.0  ;;  %v269_v54 = vmul.f32 %v955_v17, %v955_v17  ;;  %v318_v55 = vsel %vm160_vm0, %v267_v40, 0.0 }
  0x17   :  { %v169_v28 = vadd.f32 %v168_v22, %v167_v24  ;;  %v1027_v56 = vadd.f32 %v910_v0, %v70_v43  ;;  %v180_v57 = vsel %vm160_vm0, %v1003_v41, 0.0  ;;  %v270_v61 = vmul.f32 %v963_v21, %v963_v21  ;;  %v75_v24 = vld [vmem:[%s1965_s0 + $0x88] sm:$0xff] }
  0x18   :  { %v317_v58 = vadd.f32 %v316_v51, %v315_v50  ;;  %v320_v62 = vsel %vm160_vm0, %v268_v45, 0.0  ;;  %v1038_v63 = vadd.f32 %v910_v0, %v71_v52  ;;  %v182_v1 = vsel %vm160_vm0, %v1015_v48, 0.0  ;;  %v78_v50 = vld [vmem:[%s1965_s0 + $0xa0] sm:$0xff] }
  0x19   :  { %v171_v32 = vadd.f32 %v170_v26, %v169_v28  ;;  %v271_v8 = vmul.f32 %v971_v25, %v971_v25  ;;  %v322_v10 = vsel %vm160_vm0, %v269_v54, 0.0  ;;  %v1049_v12 = vadd.f32 %v910_v0, %v72_v59 }
  0x1a   :  { %v319_v2 = vadd.f32 %v318_v55, %v317_v58  ;;  %v184_v13 = vsel %vm160_vm0, %v1027_v56, 0.0  ;;  %v272_v18 = vmul.f32 %v979_v29, %v979_v29  ;;  %v324_v19 = vsel %vm160_vm0, %v270_v61, 0.0  ;;  %v79_v58 = vld [vmem:[%s1965_s0 + $0xa8] sm:$0xff] }
  0x1b   :  { %v173_v39 = vadd.f32 %v172_v30, %v171_v32  ;;  %v1060_v20 = vadd.f32 %v910_v0, %v73_v3  ;;  %v186_v22 = vsel %vm160_vm0, %v1038_v63, 0.0  ;;  %v273_v27 = vmul.f32 %v991_v35, %v991_v35  ;;  %v80_v3 = vld [vmem:[%s1965_s0 + $0xb0] sm:$0xff] }
  0x1c   :  { %v321_v14 = vadd.f32 %v320_v62, %v319_v2  ;;  %v326_v28 = vsel %vm160_vm0, %v271_v8, 0.0  ;;  %v1071_v30 = vadd.f32 %v910_v0, %v74_v15  ;;  %v188_v31 = vsel %vm160_vm0, %v1049_v12, 0.0 }
  0x1d   :  { %v175_v44 = vadd.f32 %v174_v36, %v173_v39  ;;  %v274_v36 = vmul.f32 %v1003_v41, %v1003_v41  ;;  %v328_v37 = vsel %vm160_vm0, %v272_v18, 0.0  ;;  %v1082_v38 = vadd.f32 %v910_v0, %v75_v24 }
  0x1e   :  { %v323_v23 = vadd.f32 %v322_v10, %v321_v14  ;;  %v190_v39 = vsel %vm160_vm0, %v1060_v20, 0.0  ;;  %v330_v45 = vsel %vm160_vm0, %v273_v27, 0.0  ;;  %v1093_v46 = vadd.f32 %v910_v0, %v76_v33  ;;  %v82_v27 = vld [vmem:[%s1965_s0 + $0xc0] sm:$0xff] }
  0x1f   :  { %v177_v53 = vadd.f32 %v176_v42, %v175_v44  ;;  %v77_v42 = vld [vmem:[%s1965_s0 + $0x98] sm:$0xff]  ;;  %v275_v44 = vmul.f32 %v1015_v48, %v1015_v48  ;;  %v192_v47 = vsel %vm160_vm0, %v1071_v30, 0.0  ;;  %v276_v52 = vmul.f32 %v1027_v56, %v1027_v56 }
  0x20   :  { %v325_v32 = vadd.f32 %v324_v19, %v323_v23  ;;  %v1104_v54 = vadd.f32 %v910_v0, %v77_v42  ;;  %v194_v55 = vsel %vm160_vm0, %v1082_v38, 0.0  ;;  %v1115_v62 = vadd.f32 %v910_v0, %v78_v50 }
  0x21   :  { %v179_v60 = vadd.f32 %v178_v49, %v177_v53  ;;  %v332_v53 = vsel %vm160_vm0, %v274_v36, 0.0  ;;  %v334_v61 = vsel %vm160_vm0, %v275_v44, 0.0  ;;  %v278_v8 = vmul.f32 %v1049_v12, %v1049_v12 }
  0x22   :  { %v327_v40 = vadd.f32 %v326_v28, %v325_v32  ;;  %v336_v10 = vsel %vm160_vm0, %v276_v52, 0.0  ;;  %v198_v14 = vsel %vm160_vm0, %v1104_v54, 0.0  ;;  %v279_v19 = vmul.f32 %v1060_v20, %v1060_v20 }
  0x23   :  { %v181_v4 = vadd.f32 %v180_v57, %v179_v60  ;;  %v277_v60 = vmul.f32 %v1038_v63, %v1038_v63  ;;  %v1137_v23 = vadd.f32 %v910_v0, %v80_v3  ;;  %v200_v24 = vsel %vm160_vm0, %v1115_v62, 0.0  ;;  %v86_v3 = vld [vmem:[%s1965_s0 + $0xe0] sm:$0xff] }
  0x24   :  { %v329_v49 = vadd.f32 %v328_v37, %v327_v40  ;;  %v340_v32 = vsel %vm160_vm0, %v278_v8, 0.0  ;;  %v83_v37 = vld [vmem:[%s1965_s0 + $0xc8] sm:$0xff]  ;;  %v281_v40 = vmul.f32 %v1082_v38, %v1082_v38  ;;  %v342_v42 = vsel %vm160_vm0, %v279_v19, 0.0 }
  0x25   :  { %v183_v16 = vadd.f32 %v182_v1, %v181_v4  ;;  %v196_v1 = vsel %vm160_vm0, %v1093_v46, 0.0  ;;  %v204_v44 = vsel %vm160_vm0, %v1137_v23, 0.0  ;;  %v282_v50 = vmul.f32 %v1093_v46, %v1093_v46 }
  0x26   :  { %v331_v57 = vadd.f32 %v330_v45, %v329_v49  ;;  %v1170_v52 = vadd.f32 %v910_v0, %v83_v37  ;;  %v284_v8 = vmul.f32 %v1115_v62, %v1115_v62 }
  0x27   :  { %v185_v26 = vadd.f32 %v184_v13, %v183_v16  ;;  %v1126_v13 = vadd.f32 %v910_v0, %v79_v58  ;;  %v81_v16 = vld [vmem:[%s1965_s0 + $0xb8] sm:$0xff] }
  0x28   :  { %v333_v2 = vadd.f32 %v332_v53, %v331_v57  ;;  %v1148_v33 = vadd.f32 %v910_v0, %v81_v16  ;;  %v85_v57 = vld [vmem:[%s1965_s0 + $0xd8] sm:$0xff] }
  0x29   :  { %v187_v34 = vadd.f32 %v186_v22, %v185_v26  ;;  %v338_v22 = vsel %vm160_vm0, %v277_v60, 0.0  ;;  %v346_v60 = vsel %vm160_vm0, %v281_v40, 0.0 }
  0x2a   :  { %v335_v15 = vadd.f32 %v334_v61, %v333_v2  ;;  %v206_v53 = vsel %vm160_vm0, %v1148_v33, 0.0 }
  0x2b   :  { %v189_v43 = vadd.f32 %v188_v31, %v187_v34  ;;  %v280_v31 = vmul.f32 %v1071_v30, %v1071_v30  ;;  %v202_v34 = vsel %vm160_vm0, %v1126_v13, 0.0 }
  0x2c   :  { %v337_v26 = vadd.f32 %v336_v10, %v335_v15  ;;  %v348_v10 = vsel %vm160_vm0, %v282_v50, 0.0  ;;  %v210_v15 = vsel %vm160_vm0, %v1170_v52, 0.0 }
  0x2d   :  { %v191_v51 = vadd.f32 %v190_v39, %v189_v43  ;;  %v1159_v43 = vadd.f32 %v910_v0, %v82_v27 }
  0x2e   :  { %v339_v36 = vadd.f32 %v338_v22, %v337_v26  ;;  %v285_v22 = vmul.f32 %v1126_v13, %v1126_v13  ;;  %v1203_v26 = vadd.f32 %v910_v0, %v86_v3 }
  0x2f   :  { %v193_v59 = vadd.f32 %v192_v47, %v191_v51  ;;  %v84_v47 = vld [vmem:[%s1965_s0 + $0xd0] sm:$0xff]  ;;  %v344_v51 = vsel %vm160_vm0, %v280_v31, 0.0 }
  0x30   :  { %v341_v45 = vadd.f32 %v340_v32, %v339_v36  ;;  %v1181_v61 = vadd.f32 %v910_v0, %v84_v47  ;;  %v88_v31 = vld [vmem:[%s1965_s0 + $0xf0] sm:$0xff]  ;;  %v352_v36 = vsel %vm160_vm0, %v284_v8, 0.0  ;;  %v354_v47 = vsel %vm160_vm0, %v285_v22, 0.0 }
  0x31   :  { %v195_v4 = vadd.f32 %v194_v55, %v193_v59  ;;  %v283_v59 = vmul.f32 %v1104_v54, %v1104_v54  ;;  %v216_v50 = vsel %vm160_vm0, %v1203_v26, 0.0 }
  0x32   :  { %v343_v55 = vadd.f32 %v342_v42, %v341_v45  ;;  %v212_v27 = vsel %vm160_vm0, %v1181_v61, 0.0  ;;  %v89_v42 = vld [vmem:[%s1965_s0 + $0xf8] sm:$0xff]  ;;  %v287_v45 = vmul.f32 %v1148_v33, %v1148_v33  ;;  %v290_v22 = vmul.f32 %v1181_v61, %v1181_v61 }
  0x33   :  { %v197_v18 = vadd.f32 %v196_v1, %v195_v4  ;;  %v208_v1 = vsel %vm160_vm0, %v1159_v43, 0.0 }
  0x34   :  { %v345_v2 = vadd.f32 %v344_v51, %v343_v55  ;;  %v358_v8 = vsel %vm160_vm0, %v287_v45, 0.0  ;;  %v94_v45 = vld [vmem:[%s1965_s0 + $0x120] sm:$0xff] }
  0x35   :  { %v199_v28 = vadd.f32 %v198_v14, %v197_v18  ;;  %v1192_v14 = vadd.f32 %v910_v0, %v85_v57  ;;  %v87_v18 = vld [vmem:[%s1965_s0 + $0xe8] sm:$0xff]  ;;  %v288_v57 = vmul.f32 %v1159_v43, %v1159_v43 }
  0x36   :  { %v347_v16 = vadd.f32 %v346_v60, %v345_v2  ;;  %v1214_v37 = vadd.f32 %v910_v0, %v87_v18  ;;  %v91_v2 = vld [vmem:[%s1965_s0 + $0x108] sm:$0xff]  ;;  %v92_v18 = vld [vmem:[%s1965_s0 + $0x110] sm:$0xff] }
  0x37   :  { %v201_v39 = vadd.f32 %v200_v24, %v199_v28  ;;  %v350_v24 = vsel %vm160_vm0, %v283_v59, 0.0  ;;  %v1236_v59 = vadd.f32 %v910_v0, %v89_v42 }
  0x38   :  { %v349_v28 = vadd.f32 %v348_v10, %v347_v16  ;;  %v218_v60 = vsel %vm160_vm0, %v1214_v37, 0.0 }
  0x39   :  { %v203_v49 = vadd.f32 %v202_v34, %v201_v39  ;;  %v286_v34 = vmul.f32 %v1137_v23, %v1137_v23  ;;  %v214_v39 = vsel %vm160_vm0, %v1192_v14, 0.0 }
  0x3a   :  { %v351_v40 = vadd.f32 %v350_v24, %v349_v28  ;;  %v360_v24 = vsel %vm160_vm0, %v288_v57, 0.0  ;;  %v222_v28 = vsel %vm160_vm0, %v1236_v59, 0.0 }
  0x3b   :  { %v205_v58 = vadd.f32 %v204_v44, %v203_v49  ;;  %v1225_v49 = vadd.f32 %v910_v0, %v88_v31 }
  0x3c   :  { %v353_v51 = vadd.f32 %v352_v36, %v351_v40  ;;  %v291_v36 = vmul.f32 %v1192_v14, %v1192_v14  ;;  %v1269_v40 = vadd.f32 %v910_v0, %v92_v18 }
  0x3d   :  { %v207_v4 = vadd.f32 %v206_v53, %v205_v58  ;;  %v90_v53 = vld [vmem:[%s1965_s0 + $0x100] sm:$0xff]  ;;  %v356_v58 = vsel %vm160_vm0, %v286_v34, 0.0  ;;  %v294_v18 = vmul.f32 %v1225_v49, %v1225_v49 }
  0x3e   :  { %v1247_v10 = vadd.f32 %v910_v0, %v90_v53 }
  0x3f   :  { %v209_v19 = vadd.f32 %v208_v1, %v207_v4  ;;  %v355_v1 = vadd.f32 %v354_v47, %v353_v51  ;;  %v289_v4 = vmul.f32 %v1170_v52, %v1170_v52  ;;  %v364_v51 = vsel %vm160_vm0, %v290_v22, 0.0 }
  0x40   :  { %v224_v42 = vsel %vm160_vm0, %v1247_v10, 0.0 }
  0x41   :  { %v211_v32 = vadd.f32 %v210_v15, %v209_v19  ;;  %v220_v15 = vsel %vm160_vm0, %v1225_v49, 0.0  ;;  %v357_v16 = vadd.f32 %v356_v58, %v355_v1  ;;  %v95_v58 = vld [vmem:[%s1965_s0 + $0x128] sm:$0xff]  ;;  %v293_v1 = vmul.f32 %v1214_v37, %v1214_v37 }
  0x42   :  { %v1302_v22 = vadd.f32 %v910_v0, %v95_v58 }
  0x43   :  { %v213_v44 = vadd.f32 %v212_v27, %v211_v32  ;;  %v1258_v27 = vadd.f32 %v910_v0, %v91_v2  ;;  %v359_v31 = vadd.f32 %v358_v8, %v357_v16  ;;  %v93_v32 = vld [vmem:[%s1965_s0 + $0x118] sm:$0xff]  ;;  %v366_v2 = vsel %vm160_vm0, %v291_v36, 0.0 }
  0x44   :  { %v1280_v53 = vadd.f32 %v910_v0, %v93_v32  ;;  %1979 = vst [vmem:[#allocation9_spill] sm:$0xff] %v1302_v22  ;;  %v370_v36 = vsel %vm160_vm0, %v293_v1, 0.0 }
  0x45   :  { %v215_v55 = vadd.f32 %v214_v39, %v213_v44  ;;  %v362_v39 = vsel %vm160_vm0, %v289_v4, 0.0  ;;  %v361_v44 = vadd.f32 %v360_v24, %v359_v31  ;;  %v228_v4 = vsel %vm160_vm0, %v1269_v40, 0.0  ;;  %v97_v31 = vld [vmem:[%s1965_s0 + $0x138] sm:$0xff] }
  0x46   :  { %v230_v24 = vsel %vm160_vm0, %v1280_v53, 0.0 }
  0x47   :  { %v217_v3 = vadd.f32 %v216_v50, %v215_v55  ;;  %v292_v50 = vmul.f32 %v1203_v26, %v1203_v26  ;;  %v226_v55 = vsel %vm160_vm0, %v1258_v27, 0.0  ;;  %v363_v57 = vadd.f32 %v362_v39, %v361_v44 }
  0x49   :  { %v219_v19 = vadd.f32 %v218_v60, %v217_v3  ;;  %v1291_v3 = vadd.f32 %v910_v0, %v94_v45  ;;  %v365_v8 = vadd.f32 %v364_v51, %v363_v57  ;;  %v98_v45 = vld [vmem:[%s1965_s0 + $0x140] sm:$0xff]  ;;  %v372_v51 = vsel %vm160_vm0, %v294_v18, 0.0  ;;  %v100_v18 = vld [vmem:[%s1965_s0 + $0x150] sm:$0xff] }
  0x4a   :  { %v234_v57 = vsel %vm160_vm0, %v1302_v22, 0.0 }
  0x4b   :  { %v221_v34 = vadd.f32 %v220_v15, %v219_v19  ;;  %v96_v15 = vld [vmem:[%s1965_s0 + $0x130] sm:$0xff]  ;;  %v368_v19 = vsel %vm160_vm0, %v292_v50, 0.0  ;;  %v296_v50 = vmul.f32 %v1247_v10, %v1247_v10 }
  0x4c   :  { %v1313_v39 = vadd.f32 %v910_v0, %v96_v15 }
  0x4d   :  { %v223_v47 = vadd.f32 %v222_v28, %v221_v34  ;;  %v367_v28 = vadd.f32 %v366_v2, %v365_v8  ;;  %v295_v34 = vmul.f32 %v1236_v59, %v1236_v59  ;;  %v297_v2 = vmul.f32 %v1258_v27, %v1258_v27 }
  0x4e   :  { %1980 = vst [vmem:[#allocation10_spill] sm:$0xff] %v1313_v39  ;;  %v1335_v8 = vadd.f32 %v910_v0, %v98_v45  ;;  %v236_v15 = vsel %vm160_vm0, %v1313_v39, 0.0 }
  0x4f   :  { %v225_v60 = vadd.f32 %v224_v42, %v223_v47  ;;  %v232_v42 = vsel %vm160_vm0, %v1291_v3, 0.0  ;;  %v369_v44 = vadd.f32 %v368_v19, %v367_v28  ;;  %v376_v28 = vsel %vm160_vm0, %v296_v50, 0.0 }
  0x50   :  { %1982 = vst [vmem:[#allocation12_spill] sm:$0xff] %v1335_v8  ;;  %v378_v45 = vsel %vm160_vm0, %v297_v2, 0.0  ;;  %v240_v50 = vsel %vm160_vm0, %v1335_v8, 0.0 }
  0x51   :  { %v227_v16 = vadd.f32 %v226_v55, %v225_v60  ;;  %v1324_v55 = vadd.f32 %v910_v0, %v97_v31  ;;  %v371_v58 = vadd.f32 %v370_v36, %v369_v44  ;;  %v99_v60 = vld [vmem:[%s1965_s0 + $0x148] sm:$0xff]  ;;  %v101_v36 = vld [vmem:[%s1965_s0 + $0x158] sm:$0xff]  ;;  %v299_v44 = vmul.f32 %v1280_v53, %v1280_v53 }
  0x52   :  { %v1346_v31 = vadd.f32 %v910_v0, %v99_v60  ;;  %v300_v60 = vmul.f32 %v1291_v3, %v1291_v3 }
  0x53   :  { %v229_v32 = vadd.f32 %v228_v4, %v227_v16  ;;  %1981 = vst [vmem:[#allocation11_spill] sm:$0xff] %v1324_v55  ;;  %v374_v4 = vsel %vm160_vm0, %v295_v34, 0.0  ;;  %v373_v16 = vadd.f32 %v372_v51, %v371_v58 }
  0x54   :  { %v242_v2 = vsel %vm160_vm0, %v1346_v31, 0.0 }
  0x55   :  { %v231_v47 = vadd.f32 %v230_v24, %v229_v32  ;;  %v298_v24 = vmul.f32 %v1269_v40, %v1269_v40  ;;  %v238_v32 = vsel %vm160_vm0, %v1324_v55, 0.0  ;;  %v375_v34 = vadd.f32 %v374_v4, %v373_v16  ;;  %v103_v16 = vld [vmem:[%s1965_s0 + $0x168] sm:$0xff] }
  0x56   :  { %v1368_v4 = vadd.f32 %v910_v0, %v101_v36  ;;  %v104_v36 = vld [vmem:[%s1965_s0 + $0x170] sm:$0xff] }
  0x57   :  { %v233_v1 = vadd.f32 %v232_v42, %v231_v47  ;;  %v1357_v47 = vadd.f32 %v910_v0, %v100_v18  ;;  %v377_v51 = vadd.f32 %v376_v28, %v375_v34  ;;  %v382_v28 = vsel %vm160_vm0, %v299_v44, 0.0 }
  0x58   :  { %v246_v44 = vsel %vm160_vm0, %v1368_v4, 0.0 }
  0x59   :  { %v235_v19 = vadd.f32 %v234_v57, %v233_v1  ;;  %v102_v57 = vld [vmem:[%s1965_s0 + $0x160] sm:$0xff]  ;;  %v380_v1 = vsel %vm160_vm0, %v298_v24, 0.0  ;;  %v244_v24 = vsel %vm160_vm0, %v1357_v47, 0.0 }
  0x5b   :  { %v237_v42 = vadd.f32 %v236_v15, %v235_v19  ;;  %v379_v15 = vadd.f32 %v378_v45, %v377_v51  ;;  %v301_v19 = vmul.f32 %v1302_v22, %v1302_v22  ;;  %v302_v45 = vmul.f32 %v1313_v39, %v1313_v39 }
  0x5c   :  { %v1390_v51 = vadd.f32 %v910_v0, %v103_v16 }
  0x5d   :  { %v239_v58 = vadd.f32 %v238_v32, %v237_v42  ;;  %v1379_v32 = vadd.f32 %v910_v0, %v102_v57  ;;  %v381_v34 = vadd.f32 %v380_v1, %v379_v15  ;;  %v386_v15 = vsel %vm160_vm0, %v301_v19, 0.0 }
  0x5e   :  { %1984 = vst [vmem:[#allocation14_spill] sm:$0xff] %v1390_v51  ;;  %v250_v19 = vsel %vm160_vm0, %v1390_v51, 0.0 }
  0x5f   :  { %v241_v18 = vadd.f32 %v240_v50, %v239_v58  ;;  %1983 = vst [vmem:[#allocation13_spill] sm:$0xff] %v1379_v32  ;;  %v384_v50 = vsel %vm160_vm0, %v300_v60, 0.0  ;;  %v383_v57 = vadd.f32 %v382_v28, %v381_v34  ;;  %v105_v58 = vld [vmem:[%s1965_s0 + $0x178] sm:$0xff]  ;;  %v248_v60 = vsel %vm160_vm0, %v1379_v32, 0.0  ;;  %v106_v28 = vld [vmem:[%s1965_s0 + $0x180] sm:$0xff] }
  0x61   :  { %v243_v42 = vadd.f32 %v242_v2, %v241_v18  ;;  %v303_v2 = vmul.f32 %v1324_v55, %v1324_v55  ;;  %v1401_v18 = vadd.f32 %v910_v0, %v104_v36  ;;  %v385_v16 = vadd.f32 %v384_v50, %v383_v57 }
  0x62   :  { %v1412_v55 = vadd.f32 %v910_v0, %v105_v58  ;;  %v305_v50 = vmul.f32 %v1346_v31, %v1346_v31  ;;  %v306_v58 = vmul.f32 %v1357_v47, %v1357_v47 }
  0x63   :  { %v245_v1 = vadd.f32 %v244_v24, %v243_v42  ;;  %1985 = vst [vmem:[#allocation15_spill] sm:$0xff] %v1401_v18  ;;  %v304_v24 = vmul.f32 %v1335_v8, %v1335_v8  ;;  %v388_v42 = vsel %vm160_vm0, %v302_v45, 0.0  ;;  %v387_v36 = vadd.f32 %v386_v15, %v385_v16 }
  0x64   :  { %1986 = vst [vmem:[#allocation16_spill] sm:$0xff] %v1412_v55  ;;  %v390_v57 = vsel %vm160_vm0, %v303_v2, 0.0  ;;  %v254_v15 = vsel %vm160_vm0, %v1412_v55, 0.0  ;;  %v307_v2 = vmul.f32 %v1368_v4, %v1368_v4 }
  0x65   :  { %v247_v34 = vadd.f32 %v246_v44, %v245_v1  ;;  %v1420_v44 = vadd.f32 %v910_v0, %v106_v28  ;;  %v252_v1 = vsel %vm160_vm0, %v1401_v18, 0.0  ;;  %v389_v45 = vadd.f32 %v388_v42, %v387_v36 }
  0x66   :  { %v392_v22 = vsel %vm160_vm0, %v304_v24, 0.0  ;;  %v394_v0 = vsel %vm160_vm0, %v305_v50, 0.0  ;;  %v308_v42 = vmul.f32 %v1379_v32, %v1379_v32  ;;  %v396_v24 = vsel %vm160_vm0, %v306_v58, 0.0 }
  0x67   :  { %v249_v39 = vadd.f32 %v248_v60, %v247_v34  ;;  %1987 = vst [vmem:[#allocation17_spill] sm:$0xff] %v1420_v44  ;;  %v391_v60 = vadd.f32 %v390_v57, %v389_v45  ;;  %v256_v28 = vsel %vm160_vm0, %v1420_v44, 0.0  ;;  %v398_v57 = vsel %vm160_vm0, %v307_v2, 0.0 }
  0x68   :  { %v310_v50 = vmul.f32 %v1401_v18, %v1401_v18 }
  0x69   :  { %v251_v8 = vadd.f32 %v250_v19, %v249_v39  ;;  %v393_v34 = vadd.f32 %v392_v22, %v391_v60  ;;  %v400_v22 = vsel %vm160_vm0, %v308_v42, 0.0 }
  0x6a   :  { %v404_v2 = vsel %vm160_vm0, %v310_v50, 0.0 }
  0x6b   :  { %v253_v16 = vadd.f32 %v252_v1, %v251_v8  ;;  %v395_v19 = vadd.f32 %v394_v0, %v393_v34  ;;  %v309_v8 = vmul.f32 %v1390_v51, %v1390_v51  ;;  %v312_v34 = vmul.f32 %v1420_v44, %v1420_v44 }
  0x6d   :  { %v255_v39 = vadd.f32 %v254_v15, %v253_v16  ;;  %v397_v1 = vadd.f32 %v396_v24, %v395_v19  ;;  %v311_v16 = vmul.f32 %v1412_v55, %v1412_v55  ;;  %v402_v58 = vsel %vm160_vm0, %v309_v8, 0.0 }
  0x6e   :  { %v408_v42 = vsel %vm160_vm0, %v312_v34, 0.0 }
  0x6f   :  { %v257_v36 = vadd.f32 %v256_v28, %v255_v39  ;;  %v399_v15 = vadd.f32 %v398_v57, %v397_v1  ;;  %v406_v24 = vsel %vm160_vm0, %v311_v16, 0.0 }
  0x71   :  { %v258_v45 = vrot.slane %v257_v36, 4  ;;  %v401_v0 = vadd.f32 %v400_v22, %v399_v15 }
  0x73   :  { %v259_v60 = vadd.f32 %v258_v45, %v257_v36  ;;  %v403_v39 = vadd.f32 %v402_v58, %v401_v0 }
  0x75   :  { %v260_v28 = vrot.slane %v259_v60, 2  ;;  %v405_v18 = vadd.f32 %v404_v2, %v403_v39 }
  0x77   :  { %v261_v19 = vadd.f32 %v260_v28, %v259_v60  ;;  %v407_v36 = vadd.f32 %v406_v24, %v405_v18 }
  0x79   :  { %v262_v57 = vrot.slane %v261_v19, 1  ;;  %v409_v1 = vadd.f32 %v408_v42, %v407_v36 }
  0x7b   :  { %v410_v45 = vrot.slane %v409_v1, 4  ;;  %v263_v55 = vadd.f32 %v262_v57, %v261_v19 }
  0x7d   :  { %v411_v8 = vadd.f32 %v410_v45, %v409_v1  ;;  %v1451_v51 = vmul.f32 0.0025510204, %v263_v55 }
  0x7f   :  { %v412_v22 = vrot.slane %v411_v8, 2  ;;  %v418_v50 = vmul.f32 %v1451_v51, %v1451_v51  ;;  %v420_v28 = vsub.f32 %v925_v5, %v1451_v51  ;;  %v421_v2 = vsub.f32 %v928_v6, %v1451_v51 }
  0x80   :  { %v422_v55 = vsub.f32 %v931_v7, %v1451_v51  ;;  %v425_v39 = vsub.f32 %v955_v17, %v1451_v51  ;;  %v426_v24 = vsub.f32 %v963_v21, %v1451_v51  ;;  %v427_v6 = vsub.f32 %v971_v25, %v1451_v51 }
  0x81   :  { %v413_v15 = vadd.f32 %v412_v22, %v411_v8  ;;  %v428_v7 = vsub.f32 %v979_v29, %v1451_v51  ;;  %v1990_v29 = vsub.f32 %v1027_v56, %v1451_v51 }
  0x83   :  { %v414_v44 = vrot.slane %v413_v15, 1 }
  0x85   :  { %v415_v32 = vadd.f32 %v414_v44, %v413_v15  ;;  %v423_v44 = vsub.f32 %v937_v9, %v1451_v51  ;;  %v429_v9 = vsub.f32 %v991_v35, %v1451_v51  ;;  %v1518_v15 = vld [vmem:[#allocation6] ss:$0 sm:$0xff] }
  0x87   :  { %v417_v16 = vmul.f32 0.0025510204, %v415_v32  ;;  %v424_v32 = vsub.f32 %v943_v11, %v1451_v51 }
  0x89   :  { %v419_v60 = vsub.f32 %v417_v16, %v418_v50  ;;  %v1499_v16 = vld [vmem:[#allocation4] ss:$0 sm:$0xff] }
  0x8b   :  { %v469_v58 = vadd.f32 1e-05, %v419_v60 }
  0x8d   :  { %795 = vrsqrt.f32 %v469_v58  ;;  %vm476_vm1 = vweird.f32 %v469_v58 }
  0x93   :  { %v796_v0 = vpop.eup %795 }
  0x94   :  { %v471_v18 = vmul.f32 %v796_v0, %v469_v58  ;;  %vm477_vm2 = vweird.f32 %v796_v0 }
  0x95   :  { %vm478_vm3 = vmor %vm476_vm1, %vm477_vm2 }
  0x96   :  { %v472_v34 = vmul.f32 %v796_v0, %v471_v18 }
  0x98   :  { %v473_v5 = vmul.f32 0.5, %v472_v34 }
  0x9a   :  { %v474_v19 = vsub.f32 1.5, %v473_v5 }
  0x9c   :  { %v475_v8 = vmul.f32 %v796_v0, %v474_v19 }
  0x9e   :  { %v1509_v5 = vsel %vm478_vm3, %v796_v0, %v475_v8 }
  0x9f   :  { %v480_v58 = vmul.f32 %v1509_v5, %v420_v28  ;;  %v481_v18 = vmul.f32 %v1509_v5, %v421_v2  ;;  %v482_v34 = vmul.f32 %v1509_v5, %v422_v55  ;;  %v483_v0 = vmul.f32 %v1509_v5, %v423_v44 }
  0xa0   :  { %v484_v8 = vmul.f32 %v1509_v5, %v424_v32  ;;  %v485_v19 = vmul.f32 %v1509_v5, %v425_v39  ;;  %v486_v22 = vmul.f32 %v1509_v5, %v426_v24  ;;  %v487_v50 = vmul.f32 %v1509_v5, %v427_v6 }
  0xa1   :  { %v533_v60 = vmul.f32 %v1499_v16, %v480_v58  ;;  %v534_v28 = vmul.f32 %v1499_v16, %v481_v18  ;;  %v535_v45 = vmul.f32 %v1499_v16, %v482_v34  ;;  %v536_v2 = vmul.f32 %v1499_v16, %v483_v0 }
  0xa2   :  { %v537_v55 = vmul.f32 %v1499_v16, %v484_v8  ;;  %v538_v44 = vmul.f32 %v1499_v16, %v485_v19  ;;  %v539_v32 = vmul.f32 %v1499_v16, %v486_v22  ;;  %v540_v39 = vmul.f32 %v1499_v16, %v487_v50 }
  0xa3   :  { %v586_v24 = vadd.f32 %v1518_v15, %v533_v60  ;;  %v587_v6 = vadd.f32 %v1518_v15, %v534_v28  ;;  %v588_v58 = vadd.f32 %v1518_v15, %v535_v45  ;;  %v589_v18 = vadd.f32 %v1518_v15, %v536_v2 }
  0xa4   :  { %v590_v34 = vadd.f32 %v1518_v15, %v537_v55  ;;  %v591_v0 = vadd.f32 %v1518_v15, %v538_v44  ;;  %v592_v8 = vadd.f32 %v1518_v15, %v539_v32  ;;  %v593_v19 = vadd.f32 %v1518_v15, %v540_v39 }
  0xa5   :  { %v635_v1 = vmax.f32 %v586_v24, 0.0  ;;  %v636_v22 = vmax.f32 %v587_v6, 0.0  ;;  %v637_v57 = vmax.f32 %v588_v58, 0.0  ;;  %v638_v50 = vmax.f32 %v589_v18, 0.0 }
  0xa6   :  { %v639_v36 = vmax.f32 %v590_v34, 0.0  ;;  %v640_v60 = vmax.f32 %v591_v0, 0.0  ;;  %v641_v25 = vmax.f32 %v592_v8, 0.0  ;;  %v642_v28 = vmax.f32 %v593_v19, 0.0 }
  0xa7   :  { %v684_v42 = vpack.c.bf16 %v635_v1, %v635_v1  ;;  %v685_v45 = vpack.c.bf16 %v636_v22, %v636_v22  ;;  %v686_v21 = vpack.c.bf16 %v637_v57, %v637_v57  ;;  %v687_v2 = vpack.c.bf16 %v638_v50, %v638_v50 }
  0xa8   :  { %v688_v17 = vpack.c.bf16 %v639_v36, %v639_v36  ;;  %v689_v55 = vpack.c.bf16 %v640_v60, %v640_v60  ;;  %v690_v11 = vpack.c.bf16 %v641_v25, %v641_v25  ;;  %v691_v44 = vpack.c.bf16 %v642_v28, %v642_v28 }
  0xa9   :  { %734 = vst.msk [vmem:[%s1969_s4] sm:$0xf] %vm733_vm4, %v684_v42  ;;  %v488_v32 = vmul.f32 %v1509_v5, %v428_v7  ;;  %v489_v57 = vmul.f32 %v1509_v5, %v429_v9  ;;  %v1988_v36 = vsub.f32 %v1003_v41, %v1451_v51  ;;  %v1989_v1 = vsub.f32 %v1015_v48, %v1451_v51 }
  0xaa   :  { %735 = vst.msk [vmem:[%s1969_s4 + $0x4] sm:$0xf] %vm733_vm4, %v685_v45  ;;  %v492_v35 = vmul.f32 %v1509_v5, %v1990_v29  ;;  %v1991_v41 = vsub.f32 %v1038_v63, %v1451_v51  ;;  %v1992_v48 = vsub.f32 %v1049_v12, %v1451_v51  ;;  %v1993_v39 = vsub.f32 %v1060_v20, %v1451_v51 }
  0xab   :  { %v490_v25 = vmul.f32 %v1509_v5, %v1988_v36  ;;  %v491_v42 = vmul.f32 %v1509_v5, %v1989_v1  ;;  %736 = vst.msk [vmem:[%s1969_s4 + $0x8] sm:$0xf] %vm733_vm4, %v686_v21  ;;  %v541_v56 = vmul.f32 %v1499_v16, %v488_v32  ;;  %v542_v63 = vmul.f32 %v1499_v16, %v489_v57 }
  0xac   :  { %v493_v7 = vmul.f32 %v1509_v5, %v1991_v41  ;;  %v494_v9 = vmul.f32 %v1509_v5, %v1992_v48  ;;  %v495_v24 = vmul.f32 %v1509_v5, %v1993_v39  ;;  %737 = vst.msk [vmem:[%s1969_s4 + $0xc] sm:$0xf] %vm733_vm4, %v687_v2  ;;  %v545_v20 = vmul.f32 %v1499_v16, %v492_v35 }
  0xad   :  { %v543_v6 = vmul.f32 %v1499_v16, %v490_v25  ;;  %v544_v12 = vmul.f32 %v1499_v16, %v491_v42  ;;  %738 = vst.msk [vmem:[%s1969_s4 + $0x10] sm:$0xf] %vm733_vm4, %v688_v17  ;;  %v594_v34 = vadd.f32 %v1518_v15, %v541_v56  ;;  %v595_v0 = vadd.f32 %v1518_v15, %v542_v63 }
  0xae   :  { %v546_v58 = vmul.f32 %v1499_v16, %v493_v7  ;;  %v547_v18 = vmul.f32 %v1499_v16, %v494_v9  ;;  %v548_v21 = vmul.f32 %v1499_v16, %v495_v24  ;;  %739 = vst.msk [vmem:[%s1969_s4 + $0x14] sm:$0xf] %vm733_vm4, %v689_v55  ;;  %v598_v22 = vadd.f32 %v1518_v15, %v545_v20 }
  0xaf   :  { %v596_v8 = vadd.f32 %v1518_v15, %v543_v6  ;;  %v597_v19 = vadd.f32 %v1518_v15, %v544_v12  ;;  %740 = vst.msk [vmem:[%s1969_s4 + $0x18] sm:$0xf] %vm733_vm4, %v690_v11  ;;  %v643_v28 = vmax.f32 %v594_v34, 0.0  ;;  %v644_v45 = vmax.f32 %v595_v0, 0.0 }
  0xb0   :  { %v599_v50 = vadd.f32 %v1518_v15, %v546_v58  ;;  %v600_v60 = vadd.f32 %v1518_v15, %v547_v18  ;;  %v601_v17 = vadd.f32 %v1518_v15, %v548_v21  ;;  %741 = vst.msk [vmem:[%s1969_s4 + $0x1c] sm:$0xf] %vm733_vm4, %v691_v44  ;;  %v647_v55 = vmax.f32 %v598_v22, 0.0 }
  0xb1   :  { %v645_v2 = vmax.f32 %v596_v8, 0.0  ;;  %v646_v32 = vmax.f32 %v597_v19, 0.0  ;;  %v692_v1 = vpack.c.bf16 %v643_v28, %v643_v28  ;;  %v693_v42 = vpack.c.bf16 %v644_v45, %v644_v45 }
  0xb2   :  { %v648_v57 = vmax.f32 %v599_v50, 0.0  ;;  %v649_v36 = vmax.f32 %v600_v60, 0.0  ;;  %v650_v25 = vmax.f32 %v601_v17, 0.0  ;;  %v696_v41 = vpack.c.bf16 %v647_v55, %v647_v55 }
  0xb3   :  { %v694_v29 = vpack.c.bf16 %v645_v2, %v645_v2  ;;  %v695_v35 = vpack.c.bf16 %v646_v32, %v646_v32  ;;  %742 = vst.msk [vmem:[%s1969_s4 + $0x20] sm:$0xf] %vm733_vm4, %v692_v1  ;;  %v1994_v44 = vsub.f32 %v1071_v30, %v1451_v51  ;;  %v1995_v39 = vsub.f32 %v1082_v38, %v1451_v51 }
  0xb4   :  { %v697_v7 = vpack.c.bf16 %v648_v57, %v648_v57  ;;  %v698_v11 = vpack.c.bf16 %v649_v36, %v649_v36  ;;  %v699_v48 = vpack.c.bf16 %v650_v25, %v650_v25  ;;  %v1996_v56 = vsub.f32 %v1093_v46, %v1451_v51  ;;  %743 = vst.msk [vmem:[%s1969_s4 + $0x24] sm:$0xf] %vm733_vm4, %v693_v42 }
  0xb5   :  { %v496_v9 = vmul.f32 %v1509_v5, %v1994_v44  ;;  %v497_v24 = vmul.f32 %v1509_v5, %v1995_v39  ;;  %v1997_v6 = vsub.f32 %v1104_v54, %v1451_v51  ;;  %v1998_v30 = vsub.f32 %v1115_v62, %v1451_v51  ;;  %744 = vst.msk [vmem:[%s1969_s4 + $0x28] sm:$0xf] %vm733_vm4, %v694_v29 }
  0xb6   :  { %v498_v63 = vmul.f32 %v1509_v5, %v1996_v56  ;;  %v1999_v46 = vsub.f32 %v1126_v13, %v1451_v51  ;;  %v2000_v54 = vsub.f32 %v1137_v23, %v1451_v51  ;;  %v2001_v18 = vsub.f32 %v1148_v33, %v1451_v51  ;;  %745 = vst.msk [vmem:[%s1969_s4 + $0x2c] sm:$0xf] %vm733_vm4, %v695_v35 }
  0xb7   :  { %v499_v12 = vmul.f32 %v1509_v5, %v1997_v6  ;;  %v500_v38 = vmul.f32 %v1509_v5, %v1998_v30  ;;  %v549_v62 = vmul.f32 %v1499_v16, %v496_v9  ;;  %v550_v13 = vmul.f32 %v1499_v16, %v497_v24  ;;  %746 = vst.msk [vmem:[%s1969_s4 + $0x30] sm:$0xf] %vm733_vm4, %v696_v41 }
  0xb8   :  { %v501_v20 = vmul.f32 %v1509_v5, %v1999_v46  ;;  %v502_v58 = vmul.f32 %v1509_v5, %v2000_v54  ;;  %v503_v21 = vmul.f32 %v1509_v5, %v2001_v18  ;;  %v551_v34 = vmul.f32 %v1499_v16, %v498_v63  ;;  %747 = vst.msk [vmem:[%s1969_s4 + $0x34] sm:$0xf] %vm733_vm4, %v697_v7 }
  0xb9   :  { %v552_v23 = vmul.f32 %v1499_v16, %v499_v12  ;;  %v553_v33 = vmul.f32 %v1499_v16, %v500_v38  ;;  %v602_v22 = vadd.f32 %v1518_v15, %v549_v62  ;;  %v603_v50 = vadd.f32 %v1518_v15, %v550_v13  ;;  %748 = vst.msk [vmem:[%s1969_s4 + $0x38] sm:$0xf] %vm733_vm4, %v698_v11 }
  0xba   :  { %v554_v0 = vmul.f32 %v1499_v16, %v501_v20  ;;  %v555_v8 = vmul.f32 %v1499_v16, %v502_v58  ;;  %v556_v19 = vmul.f32 %v1499_v16, %v503_v21  ;;  %v604_v60 = vadd.f32 %v1518_v15, %v551_v34  ;;  %749 = vst.msk [vmem:[%s1969_s4 + $0x3c] sm:$0xf] %vm733_vm4, %v699_v48 }
  0xbb   :  { %v605_v17 = vadd.f32 %v1518_v15, %v552_v23  ;;  %v606_v28 = vadd.f32 %v1518_v15, %v553_v33  ;;  %v651_v55 = vmax.f32 %v602_v22, 0.0  ;;  %v652_v57 = vmax.f32 %v603_v50, 0.0 }
  0xbc   :  { %v607_v45 = vadd.f32 %v1518_v15, %v554_v0  ;;  %v608_v2 = vadd.f32 %v1518_v15, %v555_v8  ;;  %v609_v32 = vadd.f32 %v1518_v15, %v556_v19  ;;  %v653_v36 = vmax.f32 %v604_v60, 0.0 }
  0xbd   :  { %v654_v25 = vmax.f32 %v605_v17, 0.0  ;;  %v655_v1 = vmax.f32 %v606_v28, 0.0  ;;  %v700_v41 = vpack.c.bf16 %v651_v55, %v651_v55  ;;  %v701_v7 = vpack.c.bf16 %v652_v57, %v652_v57 }
  0xbe   :  { %v656_v42 = vmax.f32 %v607_v45, 0.0  ;;  %v657_v29 = vmax.f32 %v608_v2, 0.0  ;;  %v658_v35 = vmax.f32 %v609_v32, 0.0  ;;  %v702_v44 = vpack.c.bf16 %v653_v36, %v653_v36 }
  0xbf   :  { %v703_v9 = vpack.c.bf16 %v654_v25, %v654_v25  ;;  %v704_v39 = vpack.c.bf16 %v655_v1, %v655_v1  ;;  %750 = vst.msk [vmem:[%s1969_s4 + $0x40] sm:$0xf] %vm733_vm4, %v700_v41  ;;  %v2002_v48 = vsub.f32 %v1159_v43, %v1451_v51  ;;  %v2003_v6 = vsub.f32 %v1170_v52, %v1451_v51 }
  0xc0   :  { %v705_v24 = vpack.c.bf16 %v656_v42, %v656_v42  ;;  %v706_v11 = vpack.c.bf16 %v657_v29, %v657_v29  ;;  %v707_v56 = vpack.c.bf16 %v658_v35, %v658_v35  ;;  %v2004_v30 = vsub.f32 %v1181_v61, %v1451_v51  ;;  %751 = vst.msk [vmem:[%s1969_s4 + $0x44] sm:$0xf] %vm733_vm4, %v701_v7 }
  0xc1   :  { %v504_v63 = vmul.f32 %v1509_v5, %v2002_v48  ;;  %v505_v12 = vmul.f32 %v1509_v5, %v2003_v6  ;;  %v2005_v46 = vsub.f32 %v1192_v14, %v1451_v51  ;;  %v2006_v43 = vsub.f32 %v1203_v26, %v1451_v51  ;;  %752 = vst.msk [vmem:[%s1969_s4 + $0x48] sm:$0xf] %vm733_vm4, %v702_v44 }
  0xc2   :  { %v506_v38 = vmul.f32 %v1509_v5, %v2004_v30  ;;  %v449_v61 = vsub.f32 %v1214_v37, %v1451_v51  ;;  %v450_v54 = vsub.f32 %v1225_v49, %v1451_v51  ;;  %v451_v14 = vsub.f32 %v1236_v59, %v1451_v51  ;;  %753 = vst.msk [vmem:[%s1969_s4 + $0x4c] sm:$0xf] %vm733_vm4, %v703_v9 }
  0xc3   :  { %v507_v20 = vmul.f32 %v1509_v5, %v2005_v46  ;;  %v508_v52 = vmul.f32 %v1509_v5, %v2006_v43  ;;  %v557_v58 = vmul.f32 %v1499_v16, %v504_v63  ;;  %v558_v26 = vmul.f32 %v1499_v16, %v505_v12  ;;  %754 = vst.msk [vmem:[%s1969_s4 + $0x50] sm:$0xf] %vm733_vm4, %v704_v39  ;;  %v2007_v63 = vld [vmem:[#allocation9_spill] sm:$0xff]  ;;  %v2008_v12 = vld [vmem:[#allocation10_spill] sm:$0xff] }
  0xc4   :  { %v559_v18 = vmul.f32 %v1499_v16, %v506_v38  ;;  %v509_v49 = vmul.f32 %v1509_v5, %v449_v61  ;;  %v510_v59 = vmul.f32 %v1509_v5, %v450_v54  ;;  %v511_v62 = vmul.f32 %v1509_v5, %v451_v14  ;;  %755 = vst.msk [vmem:[%s1969_s4 + $0x54] sm:$0xf] %vm733_vm4, %v705_v24  ;;  %v2009_v38 = vld [vmem:[#allocation11_spill] sm:$0xff] }
  0xc5   :  { %v560_v21 = vmul.f32 %v1499_v16, %v507_v20  ;;  %v561_v37 = vmul.f32 %v1499_v16, %v508_v52  ;;  %v610_v13 = vadd.f32 %v1518_v15, %v557_v58  ;;  %v611_v34 = vadd.f32 %v1518_v15, %v558_v26  ;;  %756 = vst.msk [vmem:[%s1969_s4 + $0x58] sm:$0xf] %vm733_vm4, %v706_v11 }
  0xc6   :  { %v612_v23 = vadd.f32 %v1518_v15, %v559_v18  ;;  %v562_v8 = vmul.f32 %v1499_v16, %v509_v49  ;;  %v563_v19 = vmul.f32 %v1499_v16, %v510_v59  ;;  %v564_v22 = vmul.f32 %v1499_v16, %v511_v62  ;;  %757 = vst.msk [vmem:[%s1969_s4 + $0x5c] sm:$0xf] %vm733_vm4, %v707_v56 }
  0xc7   :  { %v613_v33 = vadd.f32 %v1518_v15, %v560_v21  ;;  %v614_v0 = vadd.f32 %v1518_v15, %v561_v37  ;;  %v659_v50 = vmax.f32 %v610_v13, 0.0  ;;  %v660_v60 = vmax.f32 %v611_v34, 0.0 }
  0xc8   :  { %v661_v17 = vmax.f32 %v612_v23, 0.0  ;;  %v615_v2 = vadd.f32 %v1518_v15, %v562_v8  ;;  %v616_v32 = vadd.f32 %v1518_v15, %v563_v19  ;;  %v617_v55 = vadd.f32 %v1518_v15, %v564_v22 }
  0xc9   :  { %v662_v28 = vmax.f32 %v613_v33, 0.0  ;;  %v663_v45 = vmax.f32 %v614_v0, 0.0  ;;  %v708_v57 = vpack.c.bf16 %v659_v50, %v659_v50  ;;  %v709_v36 = vpack.c.bf16 %v660_v60, %v660_v60 }
  0xca   :  { %v710_v25 = vpack.c.bf16 %v661_v17, %v661_v17  ;;  %v664_v29 = vmax.f32 %v615_v2, 0.0  ;;  %v665_v35 = vmax.f32 %v616_v32, 0.0  ;;  %v666_v41 = vmax.f32 %v617_v55, 0.0 }
  0xcb   :  { %v711_v1 = vpack.c.bf16 %v662_v28, %v662_v28  ;;  %v712_v42 = vpack.c.bf16 %v663_v45, %v663_v45  ;;  %758 = vst.msk [vmem:[%s1969_s4 + $0x60] sm:$0xf] %vm733_vm4, %v708_v57  ;;  %v452_v7 = vsub.f32 %v1247_v10, %v1451_v51  ;;  %v453_v44 = vsub.f32 %v1258_v27, %v1451_v51 }
  0xcc   :  { %v454_v9 = vsub.f32 %v1269_v40, %v1451_v51  ;;  %v455_v39 = vsub.f32 %v1280_v53, %v1451_v51  ;;  %759 = vst.msk [vmem:[%s1969_s4 + $0x64] sm:$0xf] %vm733_vm4, %v709_v36  ;;  %v713_v24 = vpack.c.bf16 %v664_v29, %v664_v29  ;;  %v714_v11 = vpack.c.bf16 %v665_v35, %v665_v35 }
  0xcd   :  { %v715_v56 = vpack.c.bf16 %v666_v41, %v666_v41  ;;  %v456_v10 = vsub.f32 %v1291_v3, %v1451_v51  ;;  %760 = vst.msk [vmem:[%s1969_s4 + $0x68] sm:$0xf] %vm733_vm4, %v710_v25  ;;  %v512_v27 = vmul.f32 %v1509_v5, %v452_v7  ;;  %v513_v40 = vmul.f32 %v1509_v5, %v453_v44  ;;  %v2010_v25 = vld [vmem:[#allocation12_spill] sm:$0xff] }
  0xce   :  { %v514_v53 = vmul.f32 %v1509_v5, %v454_v9  ;;  %v515_v48 = vmul.f32 %v1509_v5, %v455_v39  ;;  %761 = vst.msk [vmem:[%s1969_s4 + $0x6c] sm:$0xf] %vm733_vm4, %v711_v1  ;;  %v457_v6 = vsub.f32 %v2007_v63, %v1451_v51  ;;  %v458_v30 = vsub.f32 %v2008_v12, %v1451_v51  ;;  %v2011_v9 = vld [vmem:[#allocation13_spill] sm:$0xff] }
  0xcf   :  { %v516_v3 = vmul.f32 %v1509_v5, %v456_v10  ;;  %v459_v46 = vsub.f32 %v2009_v38, %v1451_v51  ;;  %762 = vst.msk [vmem:[%s1969_s4 + $0x70] sm:$0xf] %vm733_vm4, %v712_v42  ;;  %v565_v20 = vmul.f32 %v1499_v16, %v512_v27  ;;  %v566_v43 = vmul.f32 %v1499_v16, %v513_v40  ;;  %v2013_v27 = vld [vmem:[#allocation15_spill] sm:$0xff] }
  0xd0   :  { %v567_v52 = vmul.f32 %v1499_v16, %v514_v53  ;;  %v568_v61 = vmul.f32 %v1499_v16, %v515_v48  ;;  %763 = vst.msk [vmem:[%s1969_s4 + $0x74] sm:$0xf] %vm733_vm4, %v713_v24  ;;  %v517_v14 = vmul.f32 %v1509_v5, %v457_v6  ;;  %v518_v58 = vmul.f32 %v1509_v5, %v458_v30  ;;  %v2014_v53 = vld [vmem:[#allocation16_spill] sm:$0xff] }
  0xd1   :  { %v569_v54 = vmul.f32 %v1499_v16, %v516_v3  ;;  %v519_v26 = vmul.f32 %v1509_v5, %v459_v46  ;;  %764 = vst.msk [vmem:[%s1969_s4 + $0x78] sm:$0xf] %vm733_vm4, %v714_v11  ;;  %v618_v18 = vadd.f32 %v1518_v15, %v565_v20  ;;  %v619_v21 = vadd.f32 %v1518_v15, %v566_v43 }
  0xd2   :  { %v620_v37 = vadd.f32 %v1518_v15, %v567_v52  ;;  %v621_v49 = vadd.f32 %v1518_v15, %v568_v61  ;;  %765 = vst.msk [vmem:[%s1969_s4 + $0x7c] sm:$0xf] %vm733_vm4, %v715_v56  ;;  %v570_v62 = vmul.f32 %v1499_v16, %v517_v14  ;;  %v571_v13 = vmul.f32 %v1499_v16, %v518_v58  ;;  %v2012_v56 = vld [vmem:[#allocation14_spill] sm:$0xff] }
  0xd3   :  { %v622_v59 = vadd.f32 %v1518_v15, %v569_v54  ;;  %v572_v34 = vmul.f32 %v1499_v16, %v519_v26  ;;  %v667_v23 = vmax.f32 %v618_v18, 0.0  ;;  %v668_v33 = vmax.f32 %v619_v21, 0.0 }
  0xd4   :  { %v669_v0 = vmax.f32 %v620_v37, 0.0  ;;  %v670_v8 = vmax.f32 %v621_v49, 0.0  ;;  %v623_v22 = vadd.f32 %v1518_v15, %v570_v62  ;;  %v624_v50 = vadd.f32 %v1518_v15, %v571_v13 }
  0xd5   :  { %v671_v19 = vmax.f32 %v622_v59, 0.0  ;;  %v625_v60 = vadd.f32 %v1518_v15, %v572_v34  ;;  %v716_v17 = vpack.c.bf16 %v667_v23, %v667_v23  ;;  %v717_v28 = vpack.c.bf16 %v668_v33, %v668_v33 }
  0xd6   :  { %v718_v45 = vpack.c.bf16 %v669_v0, %v669_v0  ;;  %v719_v2 = vpack.c.bf16 %v670_v8, %v670_v8  ;;  %v672_v55 = vmax.f32 %v623_v22, 0.0  ;;  %v673_v57 = vmax.f32 %v624_v50, 0.0 }
  0xd7   :  { %v720_v32 = vpack.c.bf16 %v671_v19, %v671_v19  ;;  %v674_v36 = vmax.f32 %v625_v60, 0.0  ;;  %766 = vst.msk [vmem:[%s1969_s4 + $0x80] sm:$0xf] %vm733_vm4, %v716_v17  ;;  %v460_v1 = vsub.f32 %v2010_v25, %v1451_v51  ;;  %v461_v42 = vsub.f32 %v1346_v31, %v1451_v51 }
  0xd8   :  { %v462_v29 = vsub.f32 %v1357_v47, %v1451_v51  ;;  %v463_v35 = vsub.f32 %v1368_v4, %v1451_v51  ;;  %767 = vst.msk [vmem:[%s1969_s4 + $0x84] sm:$0xf] %vm733_vm4, %v717_v28  ;;  %v721_v41 = vpack.c.bf16 %v672_v55, %v672_v55  ;;  %v722_v7 = vpack.c.bf16 %v673_v57, %v673_v57  ;;  %v2015_v28 = vld [vmem:[#allocation17_spill] sm:$0xff] }
  0xd9   :  { %v723_v44 = vpack.c.bf16 %v674_v36, %v674_v36  ;;  %v464_v39 = vsub.f32 %v2011_v9, %v1451_v51  ;;  %768 = vst.msk [vmem:[%s1969_s4 + $0x88] sm:$0xf] %vm733_vm4, %v718_v45  ;;  %v520_v31 = vmul.f32 %v1509_v5, %v460_v1  ;;  %v521_v47 = vmul.f32 %v1509_v5, %v461_v42 }
  0xda   :  { %v522_v4 = vmul.f32 %v1509_v5, %v462_v29  ;;  %v523_v24 = vmul.f32 %v1509_v5, %v463_v35  ;;  %769 = vst.msk [vmem:[%s1969_s4 + $0x8c] sm:$0xf] %vm733_vm4, %v719_v2  ;;  %v465_v10 = vsub.f32 %v2012_v56, %v1451_v51  ;;  %v466_v40 = vsub.f32 %v2013_v27, %v1451_v51 }
  0xdb   :  { %v524_v11 = vmul.f32 %v1509_v5, %v464_v39  ;;  %v467_v48 = vsub.f32 %v2014_v53, %v1451_v51  ;;  %770 = vst.msk [vmem:[%s1969_s4 + $0x90] sm:$0xf] %vm733_vm4, %v720_v32  ;;  %v573_v3 = vmul.f32 %v1499_v16, %v520_v31  ;;  %v574_v63 = vmul.f32 %v1499_v16, %v521_v47 }
  0xdc   :  { %v575_v6 = vmul.f32 %v1499_v16, %v522_v4  ;;  %v576_v12 = vmul.f32 %v1499_v16, %v523_v24  ;;  %771 = vst.msk [vmem:[%s1969_s4 + $0x94] sm:$0xf] %vm733_vm4, %v721_v41  ;;  %v525_v38 = vmul.f32 %v1509_v5, %v465_v10  ;;  %v526_v46 = vmul.f32 %v1509_v5, %v466_v40 }
  0xdd   :  { %v577_v30 = vmul.f32 %v1499_v16, %v524_v11  ;;  %v527_v20 = vmul.f32 %v1509_v5, %v467_v48  ;;  %772 = vst.msk [vmem:[%s1969_s4 + $0x98] sm:$0xf] %vm733_vm4, %v722_v7  ;;  %v626_v43 = vadd.f32 %v1518_v15, %v573_v3  ;;  %v627_v52 = vadd.f32 %v1518_v15, %v574_v63 }
  0xde   :  { %v628_v61 = vadd.f32 %v1518_v15, %v575_v6  ;;  %v629_v54 = vadd.f32 %v1518_v15, %v576_v12  ;;  %773 = vst.msk [vmem:[%s1969_s4 + $0x9c] sm:$0xf] %vm733_vm4, %v723_v44  ;;  %v578_v58 = vmul.f32 %v1499_v16, %v525_v38  ;;  %v579_v26 = vmul.f32 %v1499_v16, %v526_v46 }
  0xdf   :  { %v630_v14 = vadd.f32 %v1518_v15, %v577_v30  ;;  %v580_v18 = vmul.f32 %v1499_v16, %v527_v20  ;;  %v675_v21 = vmax.f32 %v626_v43, 0.0  ;;  %v676_v37 = vmax.f32 %v627_v52, 0.0 }
  0xe0   :  { %v677_v49 = vmax.f32 %v628_v61, 0.0  ;;  %v678_v59 = vmax.f32 %v629_v54, 0.0  ;;  %v631_v13 = vadd.f32 %v1518_v15, %v578_v58  ;;  %v632_v34 = vadd.f32 %v1518_v15, %v579_v26 }
  0xe1   :  { %v679_v62 = vmax.f32 %v630_v14, 0.0  ;;  %v633_v23 = vadd.f32 %v1518_v15, %v580_v18  ;;  %v724_v33 = vpack.c.bf16 %v675_v21, %v675_v21  ;;  %v725_v0 = vpack.c.bf16 %v676_v37, %v676_v37 }
  0xe2   :  { %v726_v8 = vpack.c.bf16 %v677_v49, %v677_v49  ;;  %v727_v19 = vpack.c.bf16 %v678_v59, %v678_v59  ;;  %v680_v22 = vmax.f32 %v631_v13, 0.0  ;;  %v681_v50 = vmax.f32 %v632_v34, 0.0 }
  0xe3   :  { %v682_v60 = vmax.f32 %v633_v23, 0.0  ;;  %774 = vst.msk [vmem:[%s1969_s4 + $0xa0] sm:$0xf] %vm733_vm4, %v724_v33  ;;  %v728_v17 = vpack.c.bf16 %v679_v62, %v679_v62  ;;  %v468_v45 = vsub.f32 %v2015_v28, %v1451_v51 }
  0xe4   :  { %775 = vst.msk [vmem:[%s1969_s4 + $0xa4] sm:$0xf] %vm733_vm4, %v725_v0  ;;  %v729_v2 = vpack.c.bf16 %v680_v22, %v680_v22  ;;  %v730_v32 = vpack.c.bf16 %v681_v50, %v681_v50 }
  0xe5   :  { %776 = vst.msk [vmem:[%s1969_s4 + $0xa8] sm:$0xf] %vm733_vm4, %v726_v8  ;;  %v528_v55 = vmul.f32 %v1509_v5, %v468_v45  ;;  %v731_v51 = vpack.c.bf16 %v682_v60, %v682_v60 }
  0xe6   :  { %777 = vst.msk [vmem:[%s1969_s4 + $0xac] sm:$0xf] %vm733_vm4, %v727_v19 }
  0xe7   :  { %778 = vst.msk [vmem:[%s1969_s4 + $0xb0] sm:$0xf] %vm733_vm4, %v728_v17  ;;  %v581_v57 = vmul.f32 %v1499_v16, %v528_v55 }
  0xe8   :  { %779 = vst.msk [vmem:[%s1969_s4 + $0xb4] sm:$0xf] %vm733_vm4, %v729_v2 }
  0xe9   :  { %780 = vst.msk [vmem:[%s1969_s4 + $0xb8] sm:$0xf] %vm733_vm4, %v730_v32  ;;  %v634_v5 = vadd.f32 %v1518_v15, %v581_v57 }
  0xea   :  { %781 = vst.msk [vmem:[%s1969_s4 + $0xbc] sm:$0xf] %vm733_vm4, %v731_v51 }
  0xeb   :  { %v683_v36 = vmax.f32 %v634_v5, 0.0 }
  0xed   :  { %v732_v25 = vpack.c.bf16 %v683_v36, %v683_v36 }
  0xef   :  { %782 = vst.msk [vmem:[%s1969_s4 + $0xc0] sm:$0xf] %vm733_vm4, %v732_v25 }
  0xf0   :  { %787 = vsyncpa [#allocation3], 1 }
  0xf1   :  { %788 = vsyncpa [#allocation5], 1 }

// kernel: generator_forward.4
= control target key start
LH: loop header
LB: loop body
LE: loop exit
PB: predicated region body
PF: predicated region fallthrough
CT: control target
= control target key end

     0   :  { %7 = vsyncpa [#allocation3], 0  ;;  %s4485_s12 = smov [#allocation2]   ;;  %s4486_s14 = smov 9408   ;;  %s5183_s0 = inlined_call_operand.vmem [shape: bf16[2,12], index: 0, kind: input, shape index: {}]   ;;  %s5184_s1 = inlined_call_operand.hbm [shape: bf16[12,18816], index: 1, kind: input, shape index: {}]   ;;  %s5185_s2 = inlined_call_operand.vmem [shape: f32[2,18816], index: 2, kind: output, shape index: {}]  }
   0x1   :  { %s14_s11 = sshll.u32 %s5184_s1, 4  ;;  %s16_s13 = sshll.u32 %s4485_s12, 4  ;;  %s15_s11 = int_to_ptr.hbm [resolvable:$true] %s14_s11  ;;  %s17_s13 = int_to_ptr.vmem [resolvable:$true] %s16_s13 }
   0x2   :  { %s4487_s15 = smov 588  }
   0x3   :  { %22 = dma.hbm_to_vmem [thread:$0]  %s15_s11, 18816, %s17_s13, [#allocation3], %s4486_s14, %s4486_s14, %s4487_s15  }
   0x4   :  { %4483 = dma.done.wait [#allocation3], 18816  }
   0x5   :  { %4484 = vsyncadd [#allocation3], 4294948480  ;;  %vm770_vm0 = vcmask 1045504   ;;  %v3574_v0 = vld [vmem:[#allocation2] sm:$0xf]  ;;  %vm766_vm1 = vcmask 97280  }
   0x6   :  { %v4380_v1 = vld [vmem:[#allocation2 + $0x248] sm:$0x30]  ;;  %v4307_v2 = vld [vmem:[#allocation2 + $0x4] sm:$0xf]  ;;  %v3576_v4 = vld [vmem:[#allocation2 + $0x24c] sm:$0x30] }
   0x7   :  { %v3575_v3 = vor.u32 %v4380_v1, %v3574_v0  ;;  %v3582_v5 = vld [vmem:[#allocation2 + $0x8] sm:$0xf]  ;;  %v4381_v6 = vld [vmem:[#allocation2 + $0x250] sm:$0x30]  ;;  %v3579_v7 = vor.u32 %v4307_v2, %v3576_v4  ;;  %v4308_v9 = vld [vmem:[#allocation2 + $0xc] sm:$0xf] }
   0x8   :  { %v3583_v8 = vor.u32 %v4381_v6, %v3582_v5  ;;  %v3584_v10 = vld [vmem:[#allocation2 + $0x254] sm:$0x30]  ;;  %v4509_v11 = vld [vmem:[%s5183_s0] sm:$0x1]  ;;  %v4383_v15 = vld [vmem:[#allocation2 + $0x260] sm:$0x30] }
   0x9   :  { %v772_v12 = vsel %vm770_vm0, %v3575_v3, 0  ;;  %v3587_v13 = vor.u32 %v4308_v9, %v3584_v10  ;;  %v3598_v14 = vld [vmem:[#allocation2 + $0x18] sm:$0xf]  ;;  %v775_v16 = vsel %vm770_vm0, %v3579_v7, 0  ;;  %v3590_v19 = vld [vmem:[#allocation2 + $0x10] sm:$0xf] }
   0xa   :  { %1219 = vmatpush.bf16.msra.mxu0 %v772_v12  ;;  %v778_v17 = vsel %vm770_vm0, %v3583_v8, 0  ;;  %v3599_v18 = vor.u32 %v4383_v15, %v3598_v14  ;;  %v4382_v20 = vld [vmem:[#allocation2 + $0x258] sm:$0x30]  ;;  %1232 = vmatpush.bf16.msra.mxu1 %v775_v16  ;;  %v4309_v23 = vld [vmem:[#allocation2 + $0x14] sm:$0xf]  ;;  %vm3380_vm2 = vcmask 1041408  }
   0xb   :  { %1245 = vmatpush.bf16.msra.mxu2 %v778_v17  ;;  %v781_v21 = vsel %vm770_vm0, %v3587_v13, 0  ;;  %v3591_v22 = vor.u32 %v4382_v20, %v3590_v19  ;;  %v3592_v24 = vld [vmem:[#allocation2 + $0x25c] sm:$0x30]  ;;  %v4310_v27 = vld [vmem:[#allocation2 + $0x1c] sm:$0xf]  ;;  %vm3382_vm3 = vcmask 1045508  }
   0xc   :  { %1258 = vmatpush.bf16.msra.mxu3 %v781_v21  ;;  %v790_v25 = vsel %vm770_vm0, %v3599_v18, 0  ;;  %v3595_v26 = vor.u32 %v4309_v23, %v3592_v24  ;;  %v3600_v28 = vld [vmem:[#allocation2 + $0x264] sm:$0x30]  ;;  %v4385_v32 = vld [vmem:[#allocation2 + $0x270] sm:$0x30]  ;;  %vm3384_vm4 = vcmask 1043456  }
   0xd   :  { %4160 = vmatmul.msk.bf16.vlgmr.msra.gmra.mxu0 %vm766_vm1, %v4509_v11  ;;  %v784_v29 = vsel %vm770_vm0, %v3591_v22, 0  ;;  %v3603_v30 = vor.u32 %v4310_v27, %v3600_v28  ;;  %v3614_v31 = vld [vmem:[#allocation2 + $0x28] sm:$0xf]  ;;  %4161 = vmatmul.msk.bf16.vlgmr.msra.gmra.mxu1 %vm766_vm1, %v4509_v11  ;;  %v3606_v35 = vld [vmem:[#allocation2 + $0x20] sm:$0xf] }
   0xe   :  { %4162 = vmatmul.msk.bf16.vlgmr.msra.gmra.mxu2 %vm766_vm1, %v4509_v11  ;;  %v787_v33 = vsel %vm770_vm0, %v3595_v26, 0  ;;  %v3615_v34 = vor.u32 %v4385_v32, %v3614_v31  ;;  %v4384_v36 = vld [vmem:[#allocation2 + $0x268] sm:$0x30]  ;;  %1271 = vmatpush.bf16.msrb.mxu0 %v784_v29  ;;  %v4311_v39 = vld [vmem:[#allocation2 + $0x24] sm:$0xf] }
   0xf   :  { %1297 = vmatpush.bf16.msrb.mxu2 %v790_v25  ;;  %4163 = vmatmul.msk.bf16.vlgmr.msra.gmra.mxu3 %vm766_vm1, %v4509_v11  ;;  %v793_v37 = vsel %vm770_vm0, %v3603_v30, 0  ;;  %v3607_v38 = vor.u32 %v4384_v36, %v3606_v35  ;;  %v3608_v40 = vld [vmem:[#allocation2 + $0x26c] sm:$0x30]  ;;  %v4312_v43 = vld [vmem:[#allocation2 + $0x2c] sm:$0xf] }
  0x10   :  { %1284 = vmatpush.bf16.msrb.mxu1 %v787_v33  ;;  %1310 = vmatpush.bf16.msrb.mxu3 %v793_v37  ;;  %v802_v41 = vsel %vm770_vm0, %v3615_v34, 0  ;;  %v3611_v42 = vor.u32 %v4311_v39, %v3608_v40  ;;  %v3616_v44 = vld [vmem:[#allocation2 + $0x274] sm:$0x30]  ;;  %v4387_v50 = vld [vmem:[#allocation2 + $0x280] sm:$0x30] }
  0x11   :  { %v796_v45 = vsel %vm770_vm0, %v3607_v38, 0  ;;  %v3619_v46 = vor.u32 %v4312_v43, %v3616_v44  ;;  %v3630_v49 = vld [vmem:[#allocation2 + $0x38] sm:$0xf]  ;;  %v3622_v51 = vld [vmem:[#allocation2 + $0x30] sm:$0xf] }
  0x12   :  { %1323 = vmatpush.bf16.msra.mxu0 %v796_v45  ;;  %v799_v47 = vsel %vm770_vm0, %v3611_v42, 0  ;;  %v4386_v52 = vld [vmem:[#allocation2 + $0x278] sm:$0x30]  ;;  %v4313_v53 = vld [vmem:[#allocation2 + $0x34] sm:$0xf]  ;;  %v3631_v57 = vor.u32 %v4387_v50, %v3630_v49 }
  0x13   :  { %1349 = vmatpush.bf16.msra.mxu2 %v802_v41  ;;  %v805_v48 = vsel %vm770_vm0, %v3619_v46, 0  ;;  %v3624_v54 = vld [vmem:[#allocation2 + $0x27c] sm:$0x30]  ;;  %v4314_v55 = vld [vmem:[#allocation2 + $0x3c] sm:$0xf]  ;;  %v3623_v58 = vor.u32 %v4386_v52, %v3622_v51 }
  0x14   :  { %1336 = vmatpush.bf16.msra.mxu1 %v799_v47  ;;  %1362 = vmatpush.bf16.msra.mxu3 %v805_v48  ;;  %v3632_v56 = vld [vmem:[#allocation2 + $0x284] sm:$0x30]  ;;  %v3627_v59 = vor.u32 %v4313_v53, %v3624_v54  ;;  %v814_v61 = vsel %vm770_vm0, %v3631_v57, 0  ;;  %v4389_v2 = vld [vmem:[#allocation2 + $0x290] sm:$0x30] }
  0x15   :  { %v3635_v60 = vor.u32 %v4314_v55, %v3632_v56  ;;  %v808_v62 = vsel %vm770_vm0, %v3623_v58, 0  ;;  %v3646_v1 = vld [vmem:[#allocation2 + $0x48] sm:$0xf]  ;;  %v3638_v3 = vld [vmem:[#allocation2 + $0x40] sm:$0xf] }
  0x16   :  { %v811_v63 = vsel %vm770_vm0, %v3627_v59, 0  ;;  %v4388_v4 = vld [vmem:[#allocation2 + $0x288] sm:$0x30]  ;;  %v4315_v5 = vld [vmem:[#allocation2 + $0x44] sm:$0xf]  ;;  %v3647_v9 = vor.u32 %v4389_v2, %v3646_v1 }
  0x17   :  { %v817_v0 = vsel %vm770_vm0, %v3635_v60, 0  ;;  %v3640_v6 = vld [vmem:[#allocation2 + $0x28c] sm:$0x30]  ;;  %v4316_v7 = vld [vmem:[#allocation2 + $0x4c] sm:$0xf]  ;;  %v3639_v10 = vor.u32 %v4388_v4, %v3638_v3 }
  0x18   :  { %v3648_v8 = vld [vmem:[#allocation2 + $0x294] sm:$0x30]  ;;  %v3643_v12 = vor.u32 %v4315_v5, %v3640_v6  ;;  %v826_v14 = vsel %vm770_vm0, %v3647_v9, 0  ;;  %v4391_v19 = vld [vmem:[#allocation2 + $0x2a0] sm:$0x30] }
  0x19   :  { %v3651_v13 = vor.u32 %v4316_v7, %v3648_v8  ;;  %v820_v15 = vsel %vm770_vm0, %v3639_v10, 0  ;;  %v3662_v18 = vld [vmem:[#allocation2 + $0x58] sm:$0xf]  ;;  %v3654_v20 = vld [vmem:[#allocation2 + $0x50] sm:$0xf] }
  0x1a   :  { %v823_v16 = vsel %vm770_vm0, %v3643_v12, 0  ;;  %v4390_v21 = vld [vmem:[#allocation2 + $0x298] sm:$0x30]  ;;  %v4317_v22 = vld [vmem:[#allocation2 + $0x54] sm:$0xf]  ;;  %v3663_v26 = vor.u32 %v4391_v19, %v3662_v18 }
  0x1b   :  { %v829_v17 = vsel %vm770_vm0, %v3651_v13, 0  ;;  %v3656_v23 = vld [vmem:[#allocation2 + $0x29c] sm:$0x30]  ;;  %v4318_v24 = vld [vmem:[#allocation2 + $0x5c] sm:$0xf]  ;;  %v3655_v27 = vor.u32 %v4390_v21, %v3654_v20 }
  0x1c   :  { %v3664_v25 = vld [vmem:[#allocation2 + $0x2a4] sm:$0x30]  ;;  %v3659_v28 = vor.u32 %v4317_v22, %v3656_v23  ;;  %v838_v30 = vsel %vm770_vm0, %v3663_v26, 0  ;;  %v4393_v35 = vld [vmem:[#allocation2 + $0x2b0] sm:$0x30] }
  0x1d   :  { %4164 = vmatmul.msk.bf16.vlgmr.msrb.gmra.mxu0 %vm766_vm1, %v4509_v11  ;;  %4165 = vmatmul.msk.bf16.vlgmr.msrb.gmra.mxu1 %vm766_vm1, %v4509_v11  ;;  %v3667_v29 = vor.u32 %v4318_v24, %v3664_v25  ;;  %v832_v31 = vsel %vm770_vm0, %v3655_v27, 0  ;;  %v3678_v34 = vld [vmem:[#allocation2 + $0x68] sm:$0xf]  ;;  %v3670_v36 = vld [vmem:[#allocation2 + $0x60] sm:$0xf] }
  0x1e   :  { %4166 = vmatmul.msk.bf16.vlgmr.msrb.gmra.mxu2 %vm766_vm1, %v4509_v11  ;;  %1375 = vmatpush.bf16.msrb.mxu0 %v808_v62  ;;  %v835_v32 = vsel %vm770_vm0, %v3659_v28, 0  ;;  %v4392_v37 = vld [vmem:[#allocation2 + $0x2a8] sm:$0x30]  ;;  %v4319_v38 = vld [vmem:[#allocation2 + $0x64] sm:$0xf]  ;;  %v3679_v42 = vor.u32 %v4393_v35, %v3678_v34 }
  0x1f   :  { %4167 = vmatmul.msk.bf16.vlgmr.msrb.gmra.mxu3 %vm766_vm1, %v4509_v11  ;;  %1401 = vmatpush.bf16.msrb.mxu2 %v814_v61  ;;  %v841_v33 = vsel %vm770_vm0, %v3667_v29, 0  ;;  %v3672_v39 = vld [vmem:[#allocation2 + $0x2ac] sm:$0x30]  ;;  %v4320_v40 = vld [vmem:[#allocation2 + $0x6c] sm:$0xf]  ;;  %v3671_v43 = vor.u32 %v4392_v37, %v3670_v36 }
  0x20   :  { %1388 = vmatpush.bf16.msrb.mxu1 %v811_v63  ;;  %1414 = vmatpush.bf16.msrb.mxu3 %v817_v0  ;;  %v3680_v41 = vld [vmem:[#allocation2 + $0x2b4] sm:$0x30]  ;;  %v3675_v44 = vor.u32 %v4319_v38, %v3672_v39  ;;  %v850_v46 = vsel %vm770_vm0, %v3679_v42, 0  ;;  %v4395_v51 = vld [vmem:[#allocation2 + $0x2c0] sm:$0x30] }
  0x21   :  { %v3683_v45 = vor.u32 %v4320_v40, %v3680_v41  ;;  %v844_v47 = vsel %vm770_vm0, %v3671_v43, 0  ;;  %v3694_v50 = vld [vmem:[#allocation2 + $0x78] sm:$0xf]  ;;  %v3686_v52 = vld [vmem:[#allocation2 + $0x70] sm:$0xf] }
  0x22   :  { %v847_v48 = vsel %vm770_vm0, %v3675_v44, 0  ;;  %v4394_v53 = vld [vmem:[#allocation2 + $0x2b8] sm:$0x30]  ;;  %v4321_v54 = vld [vmem:[#allocation2 + $0x74] sm:$0xf]  ;;  %v3695_v58 = vor.u32 %v4395_v51, %v3694_v50 }
  0x23   :  { %v853_v49 = vsel %vm770_vm0, %v3683_v45, 0  ;;  %v3688_v55 = vld [vmem:[#allocation2 + $0x2bc] sm:$0x30]  ;;  %v4322_v56 = vld [vmem:[#allocation2 + $0x7c] sm:$0xf]  ;;  %v3687_v59 = vor.u32 %v4394_v53, %v3686_v52 }
  0x24   :  { %v3696_v57 = vld [vmem:[#allocation2 + $0x2c4] sm:$0x30]  ;;  %v3691_v60 = vor.u32 %v4321_v54, %v3688_v55  ;;  %v862_v62 = vsel %vm770_vm0, %v3695_v58, 0  ;;  %v4397_v3 = vld [vmem:[#allocation2 + $0x2d0] sm:$0x30] }
  0x25   :  { %v3699_v61 = vor.u32 %v4322_v56, %v3696_v57  ;;  %v856_v63 = vsel %vm770_vm0, %v3687_v59, 0  ;;  %v3710_v2 = vld [vmem:[#allocation2 + $0x88] sm:$0xf]  ;;  %v3702_v4 = vld [vmem:[#allocation2 + $0x80] sm:$0xf] }
  0x26   :  { %v859_v0 = vsel %vm770_vm0, %v3691_v60, 0  ;;  %v4396_v5 = vld [vmem:[#allocation2 + $0x2c8] sm:$0x30]  ;;  %v4323_v6 = vld [vmem:[#allocation2 + $0x84] sm:$0xf]  ;;  %v3711_v8 = vor.u32 %v4397_v3, %v3710_v2 }
  0x27   :  { %v865_v1 = vsel %vm770_vm0, %v3699_v61, 0  ;;  %v3704_v7 = vld [vmem:[#allocation2 + $0x2cc] sm:$0x30]  ;;  %v4324_v9 = vld [vmem:[#allocation2 + $0x8c] sm:$0xf]  ;;  %v3703_v12 = vor.u32 %v4396_v5, %v3702_v4 }
  0x28   :  { %v3712_v10 = vld [vmem:[#allocation2 + $0x2d4] sm:$0x30]  ;;  %v3707_v13 = vor.u32 %v4323_v6, %v3704_v7  ;;  %v4399_v20 = vld [vmem:[#allocation2 + $0x2e0] sm:$0x30]  ;;  %v3718_v21 = vld [vmem:[#allocation2 + $0x90] sm:$0xf] }
  0x29   :  { %v3726_v19 = vld [vmem:[#allocation2 + $0x98] sm:$0xf]  ;;  %v4398_v22 = vld [vmem:[#allocation2 + $0x2d8] sm:$0x30]  ;;  %v4325_v23 = vld [vmem:[#allocation2 + $0x94] sm:$0xf] }
  0x2a   :  { %v3727_v24 = vor.u32 %v4399_v20, %v3726_v19  ;;  %v3720_v25 = vld [vmem:[#allocation2 + $0x2dc] sm:$0x30]  ;;  %v4326_v26 = vld [vmem:[#allocation2 + $0x9c] sm:$0xf]  ;;  %v3728_v27 = vld [vmem:[#allocation2 + $0x2e4] sm:$0x30]  ;;  %v3719_v28 = vor.u32 %v4398_v22, %v3718_v21 }
  0x2b   :  { %v3723_v29 = vor.u32 %v4325_v23, %v3720_v25  ;;  %v3742_v35 = vld [vmem:[#allocation2 + $0xa8] sm:$0xf]  ;;  %v4401_v36 = vld [vmem:[#allocation2 + $0x2f0] sm:$0x30]  ;;  %v3734_v37 = vld [vmem:[#allocation2 + $0xa0] sm:$0xf] }
  0x2c   :  { %v4400_v38 = vld [vmem:[#allocation2 + $0x2e8] sm:$0x30]  ;;  %v4327_v39 = vld [vmem:[#allocation2 + $0xa4] sm:$0xf]  ;;  %v3743_v40 = vor.u32 %v4401_v36, %v3742_v35  ;;  %v3736_v41 = vld [vmem:[#allocation2 + $0x2ec] sm:$0x30] }
  0x2d   :  { %4168 = vmatmul.msk.bf16.vlgmr.msra.gmra.mxu0 %vm766_vm1, %v4509_v11  ;;  %4169 = vmatmul.msk.bf16.vlgmr.msra.gmra.mxu1 %vm766_vm1, %v4509_v11  ;;  %v4328_v42 = vld [vmem:[#allocation2 + $0xac] sm:$0xf]  ;;  %v3744_v43 = vld [vmem:[#allocation2 + $0x2f4] sm:$0x30]  ;;  %v3735_v44 = vor.u32 %v4400_v38, %v3734_v37  ;;  %v3739_v45 = vor.u32 %v4327_v39, %v3736_v41  ;;  %v4402_v2 = vld [vmem:[#allocation2 + $0x2f8] sm:$0x30] }
  0x2e   :  { %4170 = vmatmul.msk.bf16.vlgmr.msra.gmra.mxu2 %vm766_vm1, %v4509_v11  ;;  %1427 = vmatpush.bf16.msra.mxu0 %v820_v15  ;;  %v874_v15 = vsel %vm770_vm0, %v3711_v8, 0  ;;  %v4329_v3 = vld [vmem:[#allocation2 + $0xb4] sm:$0xf]  ;;  %v3752_v5 = vld [vmem:[#allocation2 + $0x2fc] sm:$0x30] }
  0x2f   :  { %4171 = vmatmul.msk.bf16.vlgmr.msra.gmra.mxu3 %vm766_vm1, %v4509_v11  ;;  %1453 = vmatpush.bf16.msra.mxu2 %v826_v14  ;;  %v3715_v14 = vor.u32 %v4324_v9, %v3712_v10  ;;  %v892_v50 = vsel %vm770_vm0, %v3735_v44, 0  ;;  %v895_v51 = vsel %vm770_vm0, %v3739_v45, 0  ;;  %v4330_v6 = vld [vmem:[#allocation2 + $0xbc] sm:$0xf]  ;;  %v3760_v7 = vld [vmem:[#allocation2 + $0x304] sm:$0x30]  ;;  %v3755_v10 = vor.u32 %v4329_v3, %v3752_v5 }
  0x30   :  { %1440 = vmatpush.bf16.msra.mxu1 %v823_v16  ;;  %1466 = vmatpush.bf16.msra.mxu3 %v829_v17  ;;  %v868_v16 = vsel %vm770_vm0, %v3703_v12, 0  ;;  %v871_v17 = vsel %vm770_vm0, %v3707_v13, 0  ;;  %v4331_v35 = vld [vmem:[#allocation2 + $0xc4] sm:$0xf]  ;;  %v3768_v36 = vld [vmem:[#allocation2 + $0x30c] sm:$0x30] }
  0x31   :  { %v877_v18 = vsel %vm770_vm0, %v3715_v14, 0  ;;  %v3763_v14 = vor.u32 %v4330_v6, %v3760_v7  ;;  %v4332_v37 = vld [vmem:[#allocation2 + $0xcc] sm:$0xf]  ;;  %v3776_v41 = vld [vmem:[#allocation2 + $0x314] sm:$0x30] }
  0x32   :  { %v3779_v44 = vor.u32 %v4332_v37, %v3776_v41  ;;  %v4334_v3 = vld [vmem:[#allocation2 + $0xdc] sm:$0xf]  ;;  %v3792_v7 = vld [vmem:[#allocation2 + $0x324] sm:$0x30] }
  0x33   :  { %v913_v19 = vsel %vm770_vm0, %v3763_v14, 0 }
  0x3d   :  { %4172 = vmatmul.msk.bf16.vlgmr.msrb.gmra.mxu0 %vm766_vm1, %v4509_v11  ;;  %4173 = vmatmul.msk.bf16.vlgmr.msrb.gmra.mxu1 %vm766_vm1, %v4509_v11 }
  0x3e   :  { %4174 = vmatmul.msk.bf16.vlgmr.msrb.gmra.mxu2 %vm766_vm1, %v4509_v11  ;;  %1479 = vmatpush.bf16.msrb.mxu0 %v832_v31  ;;  %v886_v31 = vsel %vm770_vm0, %v3727_v24, 0 }
  0x3f   :  { %4175 = vmatmul.msk.bf16.vlgmr.msrb.gmra.mxu3 %vm766_vm1, %v4509_v11  ;;  %1505 = vmatpush.bf16.msrb.mxu2 %v838_v30  ;;  %v3731_v30 = vor.u32 %v4326_v26, %v3728_v27 }
  0x40   :  { %1492 = vmatpush.bf16.msrb.mxu1 %v835_v32  ;;  %1518 = vmatpush.bf16.msrb.mxu3 %v841_v33  ;;  %v880_v32 = vsel %vm770_vm0, %v3719_v28, 0  ;;  %v883_v33 = vsel %vm770_vm0, %v3723_v29, 0  ;;  %v3774_v29 = vld [vmem:[#allocation2 + $0xc8] sm:$0xf] }
  0x41   :  { %v889_v34 = vsel %vm770_vm0, %v3731_v30, 0  ;;  %v4405_v30 = vld [vmem:[#allocation2 + $0x310] sm:$0x30] }
  0x4d   :  { %4176 = vmatmul.msk.bf16.vlgmr.msra.gmra.mxu0 %vm766_vm1, %v4509_v11  ;;  %4177 = vmatmul.msk.bf16.vlgmr.msra.gmra.mxu1 %vm766_vm1, %v4509_v11 }
  0x4e   :  { %4178 = vmatmul.msk.bf16.vlgmr.msra.gmra.mxu2 %vm766_vm1, %v4509_v11  ;;  %1531 = vmatpush.bf16.msra.mxu0 %v844_v47  ;;  %v3747_v47 = vor.u32 %v4328_v42, %v3744_v43 }
  0x4f   :  { %4179 = vmatmul.msk.bf16.vlgmr.msra.gmra.mxu3 %vm766_vm1, %v4509_v11  ;;  %1557 = vmatpush.bf16.msra.mxu2 %v850_v46 }
  0x50   :  { %1544 = vmatpush.bf16.msra.mxu1 %v847_v48  ;;  %1570 = vmatpush.bf16.msra.mxu3 %v853_v49  ;;  %v898_v49 = vsel %vm770_vm0, %v3743_v40, 0  ;;  %v901_v52 = vsel %vm770_vm0, %v3747_v47, 0  ;;  %v3771_v40 = vor.u32 %v4331_v35, %v3768_v36 }
  0x5d   :  { %4180 = vmatmul.msk.bf16.vlgmr.msrb.gmra.mxu0 %vm766_vm1, %v4509_v11  ;;  %4181 = vmatmul.msk.bf16.vlgmr.msrb.gmra.mxu1 %vm766_vm1, %v4509_v11 }
  0x5e   :  { %4182 = vmatmul.msk.bf16.vlgmr.msrb.gmra.mxu2 %vm766_vm1, %v4509_v11  ;;  %1583 = vmatpush.bf16.msrb.mxu0 %v856_v63  ;;  %v4403_v63 = vld [vmem:[#allocation2 + $0x300] sm:$0x30] }
  0x5f   :  { %4183 = vmatmul.msk.bf16.vlgmr.msrb.gmra.mxu3 %vm766_vm1, %v4509_v11  ;;  %1609 = vmatpush.bf16.msrb.mxu2 %v862_v62  ;;  %v3758_v62 = vld [vmem:[#allocation2 + $0xb8] sm:$0xf] }
  0x60   :  { %1596 = vmatpush.bf16.msrb.mxu1 %v859_v0  ;;  %1622 = vmatpush.bf16.msrb.mxu3 %v865_v1  ;;  %v3750_v1 = vld [vmem:[#allocation2 + $0xb0] sm:$0xf]  ;;  %v3759_v4 = vor.u32 %v4403_v63, %v3758_v62  ;;  %v4406_v63 = vld [vmem:[#allocation2 + $0x318] sm:$0x30] }
  0x61   :  { %v3751_v9 = vor.u32 %v4402_v2, %v3750_v1  ;;  %v3782_v62 = vld [vmem:[#allocation2 + $0xd0] sm:$0xf]  ;;  %v4333_v1 = vld [vmem:[#allocation2 + $0xd4] sm:$0xf]  ;;  %v3784_v2 = vld [vmem:[#allocation2 + $0x31c] sm:$0x30] }
  0x62   :  { %v3783_v5 = vor.u32 %v4406_v63, %v3782_v62  ;;  %v3787_v6 = vor.u32 %v4333_v1, %v3784_v2  ;;  %v4337_v62 = vld [vmem:[#allocation2 + $0xf4] sm:$0xf]  ;;  %v3816_v63 = vld [vmem:[#allocation2 + $0x33c] sm:$0x30] }
  0x64   :  { %v928_v14 = vsel %vm770_vm0, %v3783_v5, 0 }
  0x6d   :  { %4184 = vmatmul.msk.bf16.vlgmr.msra.gmra.mxu0 %vm766_vm1, %v4509_v11  ;;  %4185 = vmatmul.msk.bf16.vlgmr.msra.gmra.mxu1 %vm766_vm1, %v4509_v11 }
  0x6e   :  { %4186 = vmatmul.msk.bf16.vlgmr.msra.gmra.mxu2 %vm766_vm1, %v4509_v11  ;;  %1635 = vmatpush.bf16.msra.mxu0 %v868_v16  ;;  %v910_v16 = vsel %vm770_vm0, %v3759_v4, 0 }
  0x6f   :  { %4187 = vmatmul.msk.bf16.vlgmr.msra.gmra.mxu3 %vm766_vm1, %v4509_v11  ;;  %1661 = vmatpush.bf16.msra.mxu2 %v874_v15 }
  0x70   :  { %1648 = vmatpush.bf16.msra.mxu1 %v871_v17  ;;  %1674 = vmatpush.bf16.msra.mxu3 %v877_v18  ;;  %v904_v17 = vsel %vm770_vm0, %v3751_v9, 0  ;;  %v907_v18 = vsel %vm770_vm0, %v3755_v10, 0  ;;  %v3795_v10 = vor.u32 %v4334_v3, %v3792_v7  ;;  %v3819_v3 = vor.u32 %v4337_v62, %v3816_v63 }
  0x7d   :  { %4188 = vmatmul.msk.bf16.vlgmr.msrb.gmra.mxu0 %vm766_vm1, %v4509_v11  ;;  %4189 = vmatmul.msk.bf16.vlgmr.msrb.gmra.mxu1 %vm766_vm1, %v4509_v11 }
  0x7e   :  { %4190 = vmatmul.msk.bf16.vlgmr.msrb.gmra.mxu2 %vm766_vm1, %v4509_v11  ;;  %1687 = vmatpush.bf16.msrb.mxu0 %v880_v32  ;;  %v3766_v32 = vld [vmem:[#allocation2 + $0xc0] sm:$0xf] }
  0x7f   :  { %4191 = vmatmul.msk.bf16.vlgmr.msrb.gmra.mxu3 %vm766_vm1, %v4509_v11  ;;  %1713 = vmatpush.bf16.msrb.mxu2 %v886_v31 }
  0x80   :  { %1700 = vmatpush.bf16.msrb.mxu1 %v883_v33  ;;  %1726 = vmatpush.bf16.msrb.mxu3 %v889_v34  ;;  %v4404_v33 = vld [vmem:[#allocation2 + $0x308] sm:$0x30]  ;;  %v3775_v34 = vor.u32 %v4405_v30, %v3774_v29  ;;  %v3798_v29 = vld [vmem:[#allocation2 + $0xe0] sm:$0xf] }
  0x81   :  { %v3767_v39 = vor.u32 %v4404_v33, %v3766_v32  ;;  %v4408_v30 = vld [vmem:[#allocation2 + $0x328] sm:$0x30]  ;;  %v4335_v32 = vld [vmem:[#allocation2 + $0xe4] sm:$0xf]  ;;  %v3800_v33 = vld [vmem:[#allocation2 + $0x32c] sm:$0x30] }
  0x82   :  { %v3799_v36 = vor.u32 %v4408_v30, %v3798_v29  ;;  %v3803_v37 = vor.u32 %v4335_v32, %v3800_v33  ;;  %v4339_v29 = vld [vmem:[#allocation2 + $0x104] sm:$0xf]  ;;  %v3832_v30 = vld [vmem:[#allocation2 + $0x34c] sm:$0x30] }
  0x83   :  { %v916_v47 = vsel %vm770_vm0, %v3767_v39, 0 }
  0x8a   :  { %v1221_v46 = vpop.f32.mrf.mxu0  ;;  %v1234_v48 = vpop.f32.mrf.mxu1 }
  0x8b   :  { %v3270_v53 = vrot.slane %v1234_v48, 6  ;;  %v919_v48 = vsel %vm770_vm0, %v3771_v40, 0 }
  0x8d   :  { %4192 = vmatmul.msk.bf16.vlgmr.msra.gmra.mxu0 %vm766_vm1, %v4509_v11  ;;  %4193 = vmatmul.msk.bf16.vlgmr.msra.gmra.mxu1 %vm766_vm1, %v4509_v11  ;;  %v3381_v60 = vsel %vm3380_vm2, %v1221_v46, %v3270_v53  ;;  %v922_v46 = vsel %vm770_vm0, %v3775_v34, 0  ;;  %v4336_v34 = vld [vmem:[#allocation2 + $0xec] sm:$0xf] }
  0x8e   :  { %4194 = vmatmul.msk.bf16.vlgmr.msra.gmra.mxu2 %vm766_vm1, %v4509_v11  ;;  %1739 = vmatpush.bf16.msra.mxu0 %v892_v50 }
  0x8f   :  { %4195 = vmatmul.msk.bf16.vlgmr.msra.gmra.mxu3 %vm766_vm1, %v4509_v11  ;;  %1765 = vmatpush.bf16.msra.mxu2 %v898_v49  ;;  %v925_v49 = vsel %vm770_vm0, %v3779_v44, 0  ;;  %v940_v44 = vsel %vm770_vm0, %v3799_v36, 0 }
  0x90   :  { %1752 = vmatpush.bf16.msra.mxu1 %v895_v51  ;;  %1778 = vmatpush.bf16.msra.mxu3 %v901_v52 }
  0x91   :  { %v1247_v54 = vpop.f32.mrf.mxu2 }
  0x92   :  { %v3271_v55 = vrot.slane %v1247_v54, 4  ;;  %v1260_v56 = vpop.f32.mrf.mxu3  ;;  %v1223_v57 = vpop.f32.mrf.mxu0 }
  0x93   :  { %v3272_v58 = vrot.slane %v1260_v56, 2  ;;  %v1236_v59 = vpop.f32.mrf.mxu1 }
  0x94   :  { %v3790_v59 = vld [vmem:[#allocation2 + $0xd8] sm:$0xf] }
  0x95   :  { %v3383_v61 = vsel %vm3382_vm3, %v3271_v55, %v3272_v58 }
  0x96   :  { %v3385_v0 = vsel %vm3384_vm4, %v3381_v60, %v3383_v61  ;;  %v4407_v60 = vld [vmem:[#allocation2 + $0x320] sm:$0x30] }
  0x97   :  { %3530 = vst [vmem:[%s5185_s2] sm:$0xff] %v3385_v0  ;;  %v3791_v0 = vor.u32 %v4407_v60, %v3790_v59  ;;  %v3814_v59 = vld [vmem:[#allocation2 + $0xf0] sm:$0xf]  ;;  %v4410_v60 = vld [vmem:[#allocation2 + $0x338] sm:$0x30] }
  0x98   :  { %v3815_v2 = vor.u32 %v4410_v60, %v3814_v59  ;;  %v3848_v59 = vld [vmem:[#allocation2 + $0x35c] sm:$0x30]  ;;  %v4342_v60 = vld [vmem:[#allocation2 + $0x11c] sm:$0xf] }
  0x99   :  { %v1249_v8 = vpop.f32.mrf.mxu2 }
  0x9a   :  { %v1262_v12 = vpop.f32.mrf.mxu3  ;;  %v1273_v13 = vpop.f32.mrf.mxu0 }
  0x9b   :  { %v1286_v15 = vpop.f32.mrf.mxu1 }
  0x9c   :  { %v3273_v20 = vrot.slane %v1286_v15, 6  ;;  %v931_v15 = vsel %vm770_vm0, %v3787_v6, 0 }
  0x9d   :  { %4196 = vmatmul.msk.bf16.vlgmr.msrb.gmra.mxu0 %vm766_vm1, %v4509_v11  ;;  %4197 = vmatmul.msk.bf16.vlgmr.msrb.gmra.mxu1 %vm766_vm1, %v4509_v11 }
  0x9e   :  { %4198 = vmatmul.msk.bf16.vlgmr.msrb.gmra.mxu2 %vm766_vm1, %v4509_v11  ;;  %1791 = vmatpush.bf16.msrb.mxu0 %v904_v17  ;;  %v3386_v27 = vsel %vm3380_vm2, %v1273_v13, %v3273_v20  ;;  %v934_v13 = vsel %vm770_vm0, %v3791_v0, 0  ;;  %v4338_v0 = vld [vmem:[#allocation2 + $0xfc] sm:$0xf] }
  0x9f   :  { %4199 = vmatmul.msk.bf16.vlgmr.msrb.gmra.mxu3 %vm766_vm1, %v4509_v11  ;;  %1817 = vmatpush.bf16.msrb.mxu2 %v910_v16  ;;  %v937_v16 = vsel %vm770_vm0, %v3795_v10, 0  ;;  %v952_v10 = vsel %vm770_vm0, %v3815_v2, 0 }
  0xa0   :  { %1804 = vmatpush.bf16.msrb.mxu1 %v907_v18  ;;  %1830 = vmatpush.bf16.msrb.mxu3 %v913_v19 }
  0xa1   :  { %v1299_v21 = vpop.f32.mrf.mxu2 }
  0xa2   :  { %v3274_v22 = vrot.slane %v1299_v21, 4  ;;  %v1312_v23 = vpop.f32.mrf.mxu3  ;;  %v1275_v24 = vpop.f32.mrf.mxu0 }
  0xa3   :  { %v3275_v25 = vrot.slane %v1312_v23, 2  ;;  %v1288_v26 = vpop.f32.mrf.mxu1 }
  0xa4   :  { %v3806_v26 = vld [vmem:[#allocation2 + $0xe8] sm:$0xf] }
  0xa5   :  { %v3387_v28 = vsel %vm3382_vm3, %v3274_v22, %v3275_v25 }
  0xa6   :  { %v3388_v31 = vsel %vm3384_vm4, %v3386_v27, %v3387_v28  ;;  %v4409_v27 = vld [vmem:[#allocation2 + $0x330] sm:$0x30] }
  0xa7   :  { %3531 = vst [vmem:[%s5185_s2 + $0x8] sm:$0xff] %v3388_v31  ;;  %v3807_v31 = vor.u32 %v4409_v27, %v3806_v26  ;;  %v3830_v26 = vld [vmem:[#allocation2 + $0x100] sm:$0xf]  ;;  %v4412_v27 = vld [vmem:[#allocation2 + $0x348] sm:$0x30] }
  0xa8   :  { %v3831_v33 = vor.u32 %v4412_v27, %v3830_v26  ;;  %v4343_v26 = vld [vmem:[#allocation2 + $0x124] sm:$0xf]  ;;  %v3864_v27 = vld [vmem:[#allocation2 + $0x36c] sm:$0x30] }
  0xa9   :  { %v1301_v38 = vpop.f32.mrf.mxu2 }
  0xaa   :  { %v1314_v42 = vpop.f32.mrf.mxu3  ;;  %v1325_v43 = vpop.f32.mrf.mxu0  ;;  %v3808_v38 = vld [vmem:[#allocation2 + $0x334] sm:$0x30] }
  0xab   :  { %v1338_v45 = vpop.f32.mrf.mxu1  ;;  %v3811_v41 = vor.u32 %v4336_v34, %v3808_v38  ;;  %v3835_v34 = vor.u32 %v4339_v29, %v3832_v30 }
  0xac   :  { %v3276_v50 = vrot.slane %v1338_v45, 6  ;;  %v943_v45 = vsel %vm770_vm0, %v3803_v37, 0 }
  0xad   :  { %4200 = vmatmul.msk.bf16.vlgmr.msra.gmra.mxu0 %vm766_vm1, %v4509_v11  ;;  %4201 = vmatmul.msk.bf16.vlgmr.msra.gmra.mxu1 %vm766_vm1, %v4509_v11 }
  0xae   :  { %4202 = vmatmul.msk.bf16.vlgmr.msra.gmra.mxu2 %vm766_vm1, %v4509_v11  ;;  %1843 = vmatpush.bf16.msra.mxu0 %v916_v47  ;;  %v3389_v57 = vsel %vm3380_vm2, %v1325_v43, %v3276_v50  ;;  %v946_v43 = vsel %vm770_vm0, %v3807_v31, 0  ;;  %v4340_v31 = vld [vmem:[#allocation2 + $0x10c] sm:$0xf] }
  0xaf   :  { %4203 = vmatmul.msk.bf16.vlgmr.msra.gmra.mxu3 %vm766_vm1, %v4509_v11  ;;  %1869 = vmatpush.bf16.msra.mxu2 %v922_v46  ;;  %v949_v46 = vsel %vm770_vm0, %v3811_v41, 0  ;;  %v964_v41 = vsel %vm770_vm0, %v3831_v33, 0 }
  0xb0   :  { %1856 = vmatpush.bf16.msra.mxu1 %v919_v48  ;;  %1882 = vmatpush.bf16.msra.mxu3 %v925_v49 }
  0xb1   :  { %v1351_v51 = vpop.f32.mrf.mxu2 }
  0xb2   :  { %v3277_v52 = vrot.slane %v1351_v51, 4  ;;  %v1364_v53 = vpop.f32.mrf.mxu3  ;;  %v1327_v54 = vpop.f32.mrf.mxu0 }
  0xb3   :  { %v3278_v55 = vrot.slane %v1364_v53, 2  ;;  %v1340_v56 = vpop.f32.mrf.mxu1 }
  0xb4   :  { %v3822_v56 = vld [vmem:[#allocation2 + $0xf8] sm:$0xf] }
  0xb5   :  { %v3390_v58 = vsel %vm3382_vm3, %v3277_v52, %v3278_v55 }
  0xb6   :  { %v3391_v61 = vsel %vm3384_vm4, %v3389_v57, %v3390_v58  ;;  %v4411_v57 = vld [vmem:[#allocation2 + $0x340] sm:$0x30] }
  0xb7   :  { %3532 = vst [vmem:[%s5185_s2 + $0x10] sm:$0xff] %v3391_v61  ;;  %v3823_v61 = vor.u32 %v4411_v57, %v3822_v56  ;;  %v4414_v56 = vld [vmem:[#allocation2 + $0x358] sm:$0x30] }
  0xb9   :  { %v1353_v4 = vpop.f32.mrf.mxu2 }
  0xba   :  { %v1366_v8 = vpop.f32.mrf.mxu3  ;;  %v1377_v9 = vpop.f32.mrf.mxu0  ;;  %v3824_v4 = vld [vmem:[#allocation2 + $0x344] sm:$0x30] }
  0xbb   :  { %v1390_v12 = vpop.f32.mrf.mxu1  ;;  %v3827_v7 = vor.u32 %v4338_v0, %v3824_v4  ;;  %v3856_v0 = vld [vmem:[#allocation2 + $0x364] sm:$0x30] }
  0xbc   :  { %v3279_v17 = vrot.slane %v1390_v12, 6  ;;  %v955_v12 = vsel %vm770_vm0, %v3819_v3, 0  ;;  %v3859_v3 = vor.u32 %v4342_v60, %v3856_v0 }
  0xbd   :  { %4204 = vmatmul.msk.bf16.vlgmr.msrb.gmra.mxu0 %vm766_vm1, %v4509_v11  ;;  %4205 = vmatmul.msk.bf16.vlgmr.msrb.gmra.mxu1 %vm766_vm1, %v4509_v11 }
  0xbe   :  { %4206 = vmatmul.msk.bf16.vlgmr.msrb.gmra.mxu2 %vm766_vm1, %v4509_v11  ;;  %1895 = vmatpush.bf16.msrb.mxu0 %v928_v14  ;;  %v3392_v24 = vsel %vm3380_vm2, %v1377_v9, %v3279_v17  ;;  %v958_v9 = vsel %vm770_vm0, %v3823_v61, 0 }
  0xbf   :  { %4207 = vmatmul.msk.bf16.vlgmr.msrb.gmra.mxu3 %vm766_vm1, %v4509_v11  ;;  %1921 = vmatpush.bf16.msrb.mxu2 %v934_v13  ;;  %v961_v13 = vsel %vm770_vm0, %v3827_v7, 0 }
  0xc0   :  { %1908 = vmatpush.bf16.msrb.mxu1 %v931_v15  ;;  %1934 = vmatpush.bf16.msrb.mxu3 %v937_v16 }
  0xc1   :  { %v1403_v18 = vpop.f32.mrf.mxu2 }
  0xc2   :  { %v3280_v19 = vrot.slane %v1403_v18, 4  ;;  %v1416_v20 = vpop.f32.mrf.mxu3  ;;  %v1379_v21 = vpop.f32.mrf.mxu0 }
  0xc3   :  { %v3281_v22 = vrot.slane %v1416_v20, 2  ;;  %v1392_v23 = vpop.f32.mrf.mxu1 }
  0xc4   :  { %v3838_v23 = vld [vmem:[#allocation2 + $0x108] sm:$0xf] }
  0xc5   :  { %v3393_v25 = vsel %vm3382_vm3, %v3280_v19, %v3281_v22 }
  0xc6   :  { %v3394_v28 = vsel %vm3384_vm4, %v3392_v24, %v3393_v25  ;;  %v4413_v24 = vld [vmem:[#allocation2 + $0x350] sm:$0x30] }
  0xc7   :  { %3533 = vst [vmem:[%s5185_s2 + $0x18] sm:$0xff] %v3394_v28  ;;  %v3839_v28 = vor.u32 %v4413_v24, %v3838_v23  ;;  %v3862_v23 = vld [vmem:[#allocation2 + $0x120] sm:$0xf]  ;;  %v4416_v24 = vld [vmem:[#allocation2 + $0x368] sm:$0x30] }
  0xc8   :  { %v3863_v30 = vor.u32 %v4416_v24, %v3862_v23  ;;  %v4347_v23 = vld [vmem:[#allocation2 + $0x144] sm:$0xf]  ;;  %v3896_v24 = vld [vmem:[#allocation2 + $0x38c] sm:$0x30] }
  0xc9   :  { %v1405_v35 = vpop.f32.mrf.mxu2 }
  0xca   :  { %v1418_v39 = vpop.f32.mrf.mxu3  ;;  %v1429_v40 = vpop.f32.mrf.mxu0  ;;  %v3840_v35 = vld [vmem:[#allocation2 + $0x354] sm:$0x30] }
  0xcb   :  { %v1442_v42 = vpop.f32.mrf.mxu1  ;;  %v3843_v38 = vor.u32 %v4340_v31, %v3840_v35  ;;  %v3867_v31 = vor.u32 %v4343_v26, %v3864_v27 }
  0xcc   :  { %v3282_v47 = vrot.slane %v1442_v42, 6  ;;  %v967_v42 = vsel %vm770_vm0, %v3835_v34, 0 }
  0xcd   :  { %4208 = vmatmul.msk.bf16.vlgmr.msra.gmra.mxu0 %vm766_vm1, %v4509_v11  ;;  %4209 = vmatmul.msk.bf16.vlgmr.msra.gmra.mxu1 %vm766_vm1, %v4509_v11 }
  0xce   :  { %4210 = vmatmul.msk.bf16.vlgmr.msra.gmra.mxu2 %vm766_vm1, %v4509_v11  ;;  %1947 = vmatpush.bf16.msra.mxu0 %v940_v44  ;;  %v3395_v54 = vsel %vm3380_vm2, %v1429_v40, %v3282_v47  ;;  %v970_v40 = vsel %vm770_vm0, %v3839_v28, 0  ;;  %v4344_v28 = vld [vmem:[#allocation2 + $0x12c] sm:$0xf] }
  0xcf   :  { %4211 = vmatmul.msk.bf16.vlgmr.msra.gmra.mxu3 %vm766_vm1, %v4509_v11  ;;  %1973 = vmatpush.bf16.msra.mxu2 %v946_v43  ;;  %v973_v43 = vsel %vm770_vm0, %v3843_v38, 0  ;;  %v988_v38 = vsel %vm770_vm0, %v3863_v30, 0 }
  0xd0   :  { %1960 = vmatpush.bf16.msra.mxu1 %v943_v45  ;;  %1986 = vmatpush.bf16.msra.mxu3 %v949_v46 }
  0xd1   :  { %v1455_v48 = vpop.f32.mrf.mxu2 }
  0xd2   :  { %v3283_v49 = vrot.slane %v1455_v48, 4  ;;  %v1468_v50 = vpop.f32.mrf.mxu3  ;;  %v1431_v51 = vpop.f32.mrf.mxu0 }
  0xd3   :  { %v3284_v52 = vrot.slane %v1468_v50, 2  ;;  %v1444_v53 = vpop.f32.mrf.mxu1 }
  0xd4   :  { %v3854_v53 = vld [vmem:[#allocation2 + $0x118] sm:$0xf] }
  0xd5   :  { %v3396_v55 = vsel %vm3382_vm3, %v3283_v49, %v3284_v52 }
  0xd6   :  { %v3397_v58 = vsel %vm3384_vm4, %v3395_v54, %v3396_v55  ;;  %v4415_v54 = vld [vmem:[#allocation2 + $0x360] sm:$0x30] }
  0xd7   :  { %3534 = vst [vmem:[%s5185_s2 + $0x20] sm:$0xff] %v3397_v58  ;;  %v3855_v57 = vor.u32 %v4415_v54, %v3854_v53  ;;  %v4341_v58 = vld [vmem:[#allocation2 + $0x114] sm:$0xf]  ;;  %v3878_v53 = vld [vmem:[#allocation2 + $0x130] sm:$0xf] }
  0xd8   :  { %v3851_v63 = vor.u32 %v4341_v58, %v3848_v59  ;;  %v4418_v54 = vld [vmem:[#allocation2 + $0x378] sm:$0x30] }
  0xd9   :  { %v1457_v1 = vpop.f32.mrf.mxu2  ;;  %v3879_v59 = vor.u32 %v4418_v54, %v3878_v53  ;;  %v4349_v53 = vld [vmem:[#allocation2 + $0x154] sm:$0xf]  ;;  %v3912_v54 = vld [vmem:[#allocation2 + $0x39c] sm:$0x30] }
  0xda   :  { %v1470_v5 = vpop.f32.mrf.mxu3  ;;  %v1481_v6 = vpop.f32.mrf.mxu0 }
  0xdb   :  { %v1494_v8 = vpop.f32.mrf.mxu1  ;;  %v982_v5 = vsel %vm770_vm0, %v3855_v57, 0  ;;  %v4346_v57 = vld [vmem:[#allocation2 + $0x13c] sm:$0xf] }
  0xdc   :  { %v3285_v14 = vrot.slane %v1494_v8, 6  ;;  %v979_v8 = vsel %vm770_vm0, %v3851_v63, 0 }
  0xdd   :  { %4212 = vmatmul.msk.bf16.vlgmr.msrb.gmra.mxu0 %vm766_vm1, %v4509_v11  ;;  %4213 = vmatmul.msk.bf16.vlgmr.msrb.gmra.mxu1 %vm766_vm1, %v4509_v11 }
  0xde   :  { %4214 = vmatmul.msk.bf16.vlgmr.msrb.gmra.mxu2 %vm766_vm1, %v4509_v11  ;;  %1999 = vmatpush.bf16.msrb.mxu0 %v952_v10  ;;  %v3398_v21 = vsel %vm3380_vm2, %v1481_v6, %v3285_v14  ;;  %v4745_v6 = vld [vmem:[%s5183_s0] sm:$0x1] }
  0xdf   :  { %4215 = vmatmul.msk.bf16.vlgmr.msrb.gmra.mxu3 %vm766_vm1, %v4509_v11  ;;  %2025 = vmatpush.bf16.msrb.mxu2 %v958_v9  ;;  %v985_v9 = vsel %vm770_vm0, %v3859_v3, 0  ;;  %v1000_v3 = vsel %vm770_vm0, %v3879_v59, 0 }
  0xe0   :  { %2012 = vmatpush.bf16.msrb.mxu1 %v955_v12  ;;  %2038 = vmatpush.bf16.msrb.mxu3 %v961_v13 }
  0xe1   :  { %v1507_v15 = vpop.f32.mrf.mxu2 }
  0xe2   :  { %v3286_v16 = vrot.slane %v1507_v15, 4  ;;  %v1520_v17 = vpop.f32.mrf.mxu3  ;;  %v1483_v18 = vpop.f32.mrf.mxu0 }
  0xe3   :  { %v3287_v19 = vrot.slane %v1520_v17, 2  ;;  %v1496_v20 = vpop.f32.mrf.mxu1 }
  0xe4   :  { %v3870_v20 = vld [vmem:[#allocation2 + $0x128] sm:$0xf] }
  0xe5   :  { %v3399_v22 = vsel %vm3382_vm3, %v3286_v16, %v3287_v19 }
  0xe6   :  { %v3400_v25 = vsel %vm3384_vm4, %v3398_v21, %v3399_v22  ;;  %v4417_v21 = vld [vmem:[#allocation2 + $0x370] sm:$0x30] }
  0xe7   :  { %3535 = vst [vmem:[%s5185_s2 + $0x28] sm:$0xff] %v3400_v25  ;;  %v3871_v25 = vor.u32 %v4417_v21, %v3870_v20  ;;  %v3894_v20 = vld [vmem:[#allocation2 + $0x140] sm:$0xf]  ;;  %v4420_v21 = vld [vmem:[#allocation2 + $0x388] sm:$0x30] }
  0xe8   :  { %v3895_v27 = vor.u32 %v4420_v21, %v3894_v20  ;;  %v4351_v20 = vld [vmem:[#allocation2 + $0x164] sm:$0xf]  ;;  %v3928_v21 = vld [vmem:[#allocation2 + $0x3ac] sm:$0x30] }
  0xe9   :  { %v1509_v32 = vpop.f32.mrf.mxu2 }
  0xea   :  { %v1522_v36 = vpop.f32.mrf.mxu3  ;;  %v1533_v37 = vpop.f32.mrf.mxu0  ;;  %v3872_v32 = vld [vmem:[#allocation2 + $0x374] sm:$0x30] }
  0xeb   :  { %v1546_v39 = vpop.f32.mrf.mxu1  ;;  %v3875_v35 = vor.u32 %v4344_v28, %v3872_v32  ;;  %v3899_v28 = vor.u32 %v4347_v23, %v3896_v24 }
  0xec   :  { %v3288_v44 = vrot.slane %v1546_v39, 6  ;;  %v991_v39 = vsel %vm770_vm0, %v3867_v31, 0 }
  0xed   :  { %4216 = vmatmul.msk.bf16.vlgmr.msra.gmra.mxu0 %vm766_vm1, %v4509_v11  ;;  %4217 = vmatmul.msk.bf16.vlgmr.msra.gmra.mxu1 %vm766_vm1, %v4509_v11 }
  0xee   :  { %4218 = vmatmul.msk.bf16.vlgmr.msra.gmra.mxu2 %vm766_vm1, %v4509_v11  ;;  %2051 = vmatpush.bf16.msra.mxu0 %v964_v41  ;;  %v3401_v51 = vsel %vm3380_vm2, %v1533_v37, %v3288_v44  ;;  %v994_v37 = vsel %vm770_vm0, %v3871_v25, 0  ;;  %v4348_v25 = vld [vmem:[#allocation2 + $0x14c] sm:$0xf] }
  0xef   :  { %4219 = vmatmul.msk.bf16.vlgmr.msra.gmra.mxu3 %vm766_vm1, %v4509_v11  ;;  %2077 = vmatpush.bf16.msra.mxu2 %v970_v40  ;;  %v3846_v11 = vld [vmem:[#allocation2 + $0x110] sm:$0xf]  ;;  %v997_v40 = vsel %vm770_vm0, %v3875_v35, 0  ;;  %v1012_v35 = vsel %vm770_vm0, %v3895_v27, 0 }
  0xf0   :  { %2064 = vmatpush.bf16.msra.mxu1 %v967_v42  ;;  %2090 = vmatpush.bf16.msra.mxu3 %v973_v43  ;;  %v3847_v62 = vor.u32 %v4414_v56, %v3846_v11  ;;  %v4345_v11 = vld [vmem:[#allocation2 + $0x134] sm:$0xf]  ;;  %v3880_v56 = vld [vmem:[#allocation2 + $0x37c] sm:$0x30] }
  0xf1   :  { %v1559_v45 = vpop.f32.mrf.mxu2  ;;  %v3883_v60 = vor.u32 %v4345_v11, %v3880_v56 }
  0xf2   :  { %v3289_v46 = vrot.slane %v1559_v45, 4  ;;  %v1572_v47 = vpop.f32.mrf.mxu3  ;;  %v1535_v48 = vpop.f32.mrf.mxu0  ;;  %v976_v7 = vsel %vm770_vm0, %v3847_v62, 0 }
  0xf3   :  { %v3290_v49 = vrot.slane %v1572_v47, 2  ;;  %v1548_v50 = vpop.f32.mrf.mxu1 }
  0xf4   :  { %v3886_v50 = vld [vmem:[#allocation2 + $0x138] sm:$0xf] }
  0xf5   :  { %v3402_v52 = vsel %vm3382_vm3, %v3289_v46, %v3290_v49 }
  0xf6   :  { %v3403_v55 = vsel %vm3384_vm4, %v3401_v51, %v3402_v52  ;;  %v4419_v51 = vld [vmem:[#allocation2 + $0x380] sm:$0x30] }
  0xf7   :  { %3536 = vst [vmem:[%s5185_s2 + $0x30] sm:$0xff] %v3403_v55  ;;  %v3887_v55 = vor.u32 %v4419_v51, %v3886_v50  ;;  %v3910_v50 = vld [vmem:[#allocation2 + $0x150] sm:$0xf]  ;;  %v4422_v51 = vld [vmem:[#allocation2 + $0x398] sm:$0x30] }
  0xf8   :  { %v3911_v56 = vor.u32 %v4422_v51, %v3910_v50  ;;  %v4353_v50 = vld [vmem:[#allocation2 + $0x174] sm:$0xf]  ;;  %v3944_v51 = vld [vmem:[#allocation2 + $0x3bc] sm:$0x30] }
  0xf9   :  { %v1561_v61 = vpop.f32.mrf.mxu2 }
  0xfa   :  { %v1574_v1 = vpop.f32.mrf.mxu3  ;;  %v1585_v2 = vpop.f32.mrf.mxu0  ;;  %v3888_v61 = vld [vmem:[#allocation2 + $0x384] sm:$0x30] }
  0xfb   :  { %v1598_v4 = vpop.f32.mrf.mxu1  ;;  %v3891_v0 = vor.u32 %v4346_v57, %v3888_v61  ;;  %v3915_v57 = vor.u32 %v4349_v53, %v3912_v54 }
  0xfc   :  { %v3291_v10 = vrot.slane %v1598_v4, 6  ;;  %v1003_v4 = vsel %vm770_vm0, %v3883_v60, 0 }
  0xfd   :  { %4220 = vmatmul.msk.bf16.vlgmr.msrb.gmra.mxu0 %vm766_vm1, %v4745_v6  ;;  %4221 = vmatmul.msk.bf16.vlgmr.msrb.gmra.mxu1 %vm766_vm1, %v4745_v6 }
  0xfe   :  { %4222 = vmatmul.msk.bf16.vlgmr.msrb.gmra.mxu2 %vm766_vm1, %v4745_v6  ;;  %2103 = vmatpush.bf16.msrb.mxu0 %v976_v7  ;;  %v3404_v18 = vsel %vm3380_vm2, %v1585_v2, %v3291_v10  ;;  %v1006_v2 = vsel %vm770_vm0, %v3887_v55, 0  ;;  %v4350_v55 = vld [vmem:[#allocation2 + $0x15c] sm:$0xf] }
  0xff   :  { %4223 = vmatmul.msk.bf16.vlgmr.msrb.gmra.mxu3 %vm766_vm1, %v4745_v6  ;;  %2129 = vmatpush.bf16.msrb.mxu2 %v982_v5  ;;  %v1009_v5 = vsel %vm770_vm0, %v3891_v0, 0  ;;  %v1024_v0 = vsel %vm770_vm0, %v3911_v56, 0 }
 0x100   :  { %2116 = vmatpush.bf16.msrb.mxu1 %v979_v8  ;;  %2142 = vmatpush.bf16.msrb.mxu3 %v985_v9 }
 0x101   :  { %v1611_v12 = vpop.f32.mrf.mxu2 }
 0x102   :  { %v3292_v13 = vrot.slane %v1611_v12, 4  ;;  %v1624_v14 = vpop.f32.mrf.mxu3  ;;  %v1587_v15 = vpop.f32.mrf.mxu0 }
 0x103   :  { %v3293_v16 = vrot.slane %v1624_v14, 2  ;;  %v1600_v17 = vpop.f32.mrf.mxu1 }
 0x104   :  { %v3902_v17 = vld [vmem:[#allocation2 + $0x148] sm:$0xf] }
 0x105   :  { %v3405_v19 = vsel %vm3382_vm3, %v3292_v13, %v3293_v16 }
 0x106   :  { %v3406_v22 = vsel %vm3384_vm4, %v3404_v18, %v3405_v19  ;;  %v4421_v18 = vld [vmem:[#allocation2 + $0x390] sm:$0x30] }
 0x107   :  { %3537 = vst [vmem:[%s5185_s2 + $0x38] sm:$0xff] %v3406_v22  ;;  %v3903_v22 = vor.u32 %v4421_v18, %v3902_v17  ;;  %v3926_v17 = vld [vmem:[#allocation2 + $0x160] sm:$0xf]  ;;  %v4424_v18 = vld [vmem:[#allocation2 + $0x3a8] sm:$0x30] }
 0x108   :  { %v3927_v24 = vor.u32 %v4424_v18, %v3926_v17  ;;  %v4355_v17 = vld [vmem:[#allocation2 + $0x184] sm:$0xf]  ;;  %v3960_v18 = vld [vmem:[#allocation2 + $0x3cc] sm:$0x30] }
 0x109   :  { %v1613_v29 = vpop.f32.mrf.mxu2 }
 0x10a   :  { %v1626_v33 = vpop.f32.mrf.mxu3  ;;  %v1637_v34 = vpop.f32.mrf.mxu0  ;;  %v3904_v29 = vld [vmem:[#allocation2 + $0x394] sm:$0x30] }
 0x10b   :  { %v1650_v36 = vpop.f32.mrf.mxu1  ;;  %v3907_v32 = vor.u32 %v4348_v25, %v3904_v29  ;;  %v3931_v25 = vor.u32 %v4351_v20, %v3928_v21 }
 0x10c   :  { %v3294_v41 = vrot.slane %v1650_v36, 6  ;;  %v1015_v36 = vsel %vm770_vm0, %v3899_v28, 0 }
 0x10d   :  { %4224 = vmatmul.msk.bf16.vlgmr.msra.gmra.mxu0 %vm766_vm1, %v4745_v6  ;;  %4225 = vmatmul.msk.bf16.vlgmr.msra.gmra.mxu1 %vm766_vm1, %v4745_v6 }
 0x10e   :  { %4226 = vmatmul.msk.bf16.vlgmr.msra.gmra.mxu2 %vm766_vm1, %v4745_v6  ;;  %2155 = vmatpush.bf16.msra.mxu0 %v988_v38  ;;  %v3407_v48 = vsel %vm3380_vm2, %v1637_v34, %v3294_v41  ;;  %v1018_v34 = vsel %vm770_vm0, %v3903_v22, 0  ;;  %v4352_v22 = vld [vmem:[#allocation2 + $0x16c] sm:$0xf] }
 0x10f   :  { %4227 = vmatmul.msk.bf16.vlgmr.msra.gmra.mxu3 %vm766_vm1, %v4745_v6  ;;  %2181 = vmatpush.bf16.msra.mxu2 %v994_v37  ;;  %v1021_v37 = vsel %vm770_vm0, %v3907_v32, 0  ;;  %v1036_v32 = vsel %vm770_vm0, %v3927_v24, 0 }
 0x110   :  { %2168 = vmatpush.bf16.msra.mxu1 %v991_v39  ;;  %2194 = vmatpush.bf16.msra.mxu3 %v997_v40 }
 0x111   :  { %v1663_v42 = vpop.f32.mrf.mxu2 }
 0x112   :  { %v3295_v43 = vrot.slane %v1663_v42, 4  ;;  %v1676_v44 = vpop.f32.mrf.mxu3  ;;  %v1639_v45 = vpop.f32.mrf.mxu0 }
 0x113   :  { %v3296_v46 = vrot.slane %v1676_v44, 2  ;;  %v1652_v47 = vpop.f32.mrf.mxu1 }
 0x114   :  { %v3918_v47 = vld [vmem:[#allocation2 + $0x158] sm:$0xf] }
 0x115   :  { %v3408_v49 = vsel %vm3382_vm3, %v3295_v43, %v3296_v46 }
 0x116   :  { %v3409_v52 = vsel %vm3384_vm4, %v3407_v48, %v3408_v49  ;;  %v4423_v48 = vld [vmem:[#allocation2 + $0x3a0] sm:$0x30] }
 0x117   :  { %3538 = vst [vmem:[%s5185_s2 + $0x40] sm:$0xff] %v3409_v52  ;;  %v3919_v52 = vor.u32 %v4423_v48, %v3918_v47  ;;  %v3942_v47 = vld [vmem:[#allocation2 + $0x170] sm:$0xf]  ;;  %v4426_v48 = vld [vmem:[#allocation2 + $0x3b8] sm:$0x30] }
 0x118   :  { %v3943_v54 = vor.u32 %v4426_v48, %v3942_v47  ;;  %v4357_v47 = vld [vmem:[#allocation2 + $0x194] sm:$0xf]  ;;  %v3976_v48 = vld [vmem:[#allocation2 + $0x3dc] sm:$0x30] }
 0x119   :  { %v1665_v58 = vpop.f32.mrf.mxu2 }
 0x11a   :  { %v1678_v62 = vpop.f32.mrf.mxu3  ;;  %v1689_v63 = vpop.f32.mrf.mxu0  ;;  %v3920_v58 = vld [vmem:[#allocation2 + $0x3a4] sm:$0x30] }
 0x11b   :  { %v1702_v1 = vpop.f32.mrf.mxu1  ;;  %v3923_v61 = vor.u32 %v4350_v55, %v3920_v58  ;;  %v3947_v55 = vor.u32 %v4353_v50, %v3944_v51 }
 0x11c   :  { %v3297_v7 = vrot.slane %v1702_v1, 6  ;;  %v1027_v1 = vsel %vm770_vm0, %v3915_v57, 0 }
 0x11d   :  { %4228 = vmatmul.msk.bf16.vlgmr.msrb.gmra.mxu0 %vm766_vm1, %v4745_v6  ;;  %4229 = vmatmul.msk.bf16.vlgmr.msrb.gmra.mxu1 %vm766_vm1, %v4745_v6 }
 0x11e   :  { %4230 = vmatmul.msk.bf16.vlgmr.msrb.gmra.mxu2 %vm766_vm1, %v4745_v6  ;;  %2207 = vmatpush.bf16.msrb.mxu0 %v1000_v3  ;;  %v3410_v15 = vsel %vm3380_vm2, %v1689_v63, %v3297_v7  ;;  %v1030_v63 = vsel %vm770_vm0, %v3919_v52, 0  ;;  %v4354_v52 = vld [vmem:[#allocation2 + $0x17c] sm:$0xf] }
 0x11f   :  { %4231 = vmatmul.msk.bf16.vlgmr.msrb.gmra.mxu3 %vm766_vm1, %v4745_v6  ;;  %2233 = vmatpush.bf16.msrb.mxu2 %v1006_v2  ;;  %v1033_v2 = vsel %vm770_vm0, %v3923_v61, 0  ;;  %v1048_v61 = vsel %vm770_vm0, %v3943_v54, 0 }
 0x120   :  { %2220 = vmatpush.bf16.msrb.mxu1 %v1003_v4  ;;  %2246 = vmatpush.bf16.msrb.mxu3 %v1009_v5 }
 0x121   :  { %v1715_v8 = vpop.f32.mrf.mxu2 }
 0x122   :  { %v3298_v9 = vrot.slane %v1715_v8, 4  ;;  %v1728_v10 = vpop.f32.mrf.mxu3  ;;  %v1691_v12 = vpop.f32.mrf.mxu0 }
 0x123   :  { %v3299_v13 = vrot.slane %v1728_v10, 2  ;;  %v1704_v14 = vpop.f32.mrf.mxu1 }
 0x124   :  { %v3934_v14 = vld [vmem:[#allocation2 + $0x168] sm:$0xf] }
 0x125   :  { %v3411_v16 = vsel %vm3382_vm3, %v3298_v9, %v3299_v13 }
 0x126   :  { %v3412_v19 = vsel %vm3384_vm4, %v3410_v15, %v3411_v16  ;;  %v4425_v15 = vld [vmem:[#allocation2 + $0x3b0] sm:$0x30] }
 0x127   :  { %3539 = vst [vmem:[%s5185_s2 + $0x48] sm:$0xff] %v3412_v19  ;;  %v3935_v19 = vor.u32 %v4425_v15, %v3934_v14  ;;  %v3958_v14 = vld [vmem:[#allocation2 + $0x180] sm:$0xf]  ;;  %v4428_v15 = vld [vmem:[#allocation2 + $0x3c8] sm:$0x30] }
 0x128   :  { %v3959_v21 = vor.u32 %v4428_v15, %v3958_v14  ;;  %v4359_v14 = vld [vmem:[#allocation2 + $0x1a4] sm:$0xf]  ;;  %v3992_v15 = vld [vmem:[#allocation2 + $0x3ec] sm:$0x30] }
 0x129   :  { %v1717_v26 = vpop.f32.mrf.mxu2 }
 0x12a   :  { %v1730_v30 = vpop.f32.mrf.mxu3  ;;  %v1741_v31 = vpop.f32.mrf.mxu0  ;;  %v3936_v26 = vld [vmem:[#allocation2 + $0x3b4] sm:$0x30] }
 0x12b   :  { %v1754_v33 = vpop.f32.mrf.mxu1  ;;  %v3939_v29 = vor.u32 %v4352_v22, %v3936_v26  ;;  %v3963_v22 = vor.u32 %v4355_v17, %v3960_v18 }
 0x12c   :  { %v3300_v38 = vrot.slane %v1754_v33, 6  ;;  %v1039_v33 = vsel %vm770_vm0, %v3931_v25, 0 }
 0x12d   :  { %4232 = vmatmul.msk.bf16.vlgmr.msra.gmra.mxu0 %vm766_vm1, %v4745_v6  ;;  %4233 = vmatmul.msk.bf16.vlgmr.msra.gmra.mxu1 %vm766_vm1, %v4745_v6 }
 0x12e   :  { %4234 = vmatmul.msk.bf16.vlgmr.msra.gmra.mxu2 %vm766_vm1, %v4745_v6  ;;  %2259 = vmatpush.bf16.msra.mxu0 %v1012_v35  ;;  %v3413_v45 = vsel %vm3380_vm2, %v1741_v31, %v3300_v38  ;;  %v1042_v31 = vsel %vm770_vm0, %v3935_v19, 0  ;;  %v4356_v19 = vld [vmem:[#allocation2 + $0x18c] sm:$0xf] }
 0x12f   :  { %4235 = vmatmul.msk.bf16.vlgmr.msra.gmra.mxu3 %vm766_vm1, %v4745_v6  ;;  %2285 = vmatpush.bf16.msra.mxu2 %v1018_v34  ;;  %v1045_v34 = vsel %vm770_vm0, %v3939_v29, 0  ;;  %v1060_v29 = vsel %vm770_vm0, %v3959_v21, 0 }
 0x130   :  { %2272 = vmatpush.bf16.msra.mxu1 %v1015_v36  ;;  %2298 = vmatpush.bf16.msra.mxu3 %v1021_v37 }
 0x131   :  { %v1767_v39 = vpop.f32.mrf.mxu2 }
 0x132   :  { %v3301_v40 = vrot.slane %v1767_v39, 4  ;;  %v1780_v41 = vpop.f32.mrf.mxu3  ;;  %v1743_v42 = vpop.f32.mrf.mxu0 }
 0x133   :  { %v3302_v43 = vrot.slane %v1780_v41, 2  ;;  %v1756_v44 = vpop.f32.mrf.mxu1 }
 0x134   :  { %v3950_v44 = vld [vmem:[#allocation2 + $0x178] sm:$0xf] }
 0x135   :  { %v3414_v46 = vsel %vm3382_vm3, %v3301_v40, %v3302_v43 }
 0x136   :  { %v3415_v49 = vsel %vm3384_vm4, %v3413_v45, %v3414_v46  ;;  %v4427_v45 = vld [vmem:[#allocation2 + $0x3c0] sm:$0x30] }
 0x137   :  { %3540 = vst [vmem:[%s5185_s2 + $0x50] sm:$0xff] %v3415_v49  ;;  %v3951_v49 = vor.u32 %v4427_v45, %v3950_v44  ;;  %v3974_v44 = vld [vmem:[#allocation2 + $0x190] sm:$0xf]  ;;  %v4430_v45 = vld [vmem:[#allocation2 + $0x3d8] sm:$0x30] }
 0x138   :  { %v3975_v51 = vor.u32 %v4430_v45, %v3974_v44  ;;  %v4361_v44 = vld [vmem:[#allocation2 + $0x1b4] sm:$0xf]  ;;  %v4008_v45 = vld [vmem:[#allocation2 + $0x3fc] sm:$0x30] }
 0x139   :  { %v1769_v11 = vpop.f32.mrf.mxu2 }
 0x13a   :  { %v1782_v59 = vpop.f32.mrf.mxu3  ;;  %v1793_v60 = vpop.f32.mrf.mxu0  ;;  %v3952_v11 = vld [vmem:[#allocation2 + $0x3c4] sm:$0x30] }
 0x13b   :  { %v1806_v62 = vpop.f32.mrf.mxu1  ;;  %v3955_v58 = vor.u32 %v4354_v52, %v3952_v11  ;;  %v3979_v52 = vor.u32 %v4357_v47, %v3976_v48 }
 0x13c   :  { %v3303_v3 = vrot.slane %v1806_v62, 6  ;;  %v1051_v62 = vsel %vm770_vm0, %v3947_v55, 0 }
 0x13d   :  { %4236 = vmatmul.msk.bf16.vlgmr.msrb.gmra.mxu0 %vm766_vm1, %v4745_v6  ;;  %4237 = vmatmul.msk.bf16.vlgmr.msrb.gmra.mxu1 %vm766_vm1, %v4745_v6 }
 0x13e   :  { %4238 = vmatmul.msk.bf16.vlgmr.msrb.gmra.mxu2 %vm766_vm1, %v4745_v6  ;;  %2311 = vmatpush.bf16.msrb.mxu0 %v1024_v0  ;;  %v3416_v12 = vsel %vm3380_vm2, %v1793_v60, %v3303_v3  ;;  %v1054_v60 = vsel %vm770_vm0, %v3951_v49, 0  ;;  %v4358_v49 = vld [vmem:[#allocation2 + $0x19c] sm:$0xf] }
 0x13f   :  { %4239 = vmatmul.msk.bf16.vlgmr.msrb.gmra.mxu3 %vm766_vm1, %v4745_v6  ;;  %2337 = vmatpush.bf16.msrb.mxu2 %v1030_v63  ;;  %v1057_v63 = vsel %vm770_vm0, %v3955_v58, 0  ;;  %v1072_v58 = vsel %vm770_vm0, %v3975_v51, 0 }
 0x140   :  { %2324 = vmatpush.bf16.msrb.mxu1 %v1027_v1  ;;  %2350 = vmatpush.bf16.msrb.mxu3 %v1033_v2 }
 0x141   :  { %v1819_v4 = vpop.f32.mrf.mxu2 }
 0x142   :  { %v3304_v5 = vrot.slane %v1819_v4, 4  ;;  %v1832_v7 = vpop.f32.mrf.mxu3  ;;  %v1795_v8 = vpop.f32.mrf.mxu0 }
 0x143   :  { %v3305_v9 = vrot.slane %v1832_v7, 2  ;;  %v1808_v10 = vpop.f32.mrf.mxu1 }
 0x144   :  { %v3966_v10 = vld [vmem:[#allocation2 + $0x188] sm:$0xf] }
 0x145   :  { %v3417_v13 = vsel %vm3382_vm3, %v3304_v5, %v3305_v9 }
 0x146   :  { %v3418_v16 = vsel %vm3384_vm4, %v3416_v12, %v3417_v13  ;;  %v4429_v12 = vld [vmem:[#allocation2 + $0x3d0] sm:$0x30] }
 0x147   :  { %3541 = vst [vmem:[%s5185_s2 + $0x58] sm:$0xff] %v3418_v16  ;;  %v3967_v16 = vor.u32 %v4429_v12, %v3966_v10  ;;  %v3990_v10 = vld [vmem:[#allocation2 + $0x1a0] sm:$0xf]  ;;  %v4432_v12 = vld [vmem:[#allocation2 + $0x3e8] sm:$0x30] }
 0x148   :  { %v3991_v18 = vor.u32 %v4432_v12, %v3990_v10  ;;  %v4363_v10 = vld [vmem:[#allocation2 + $0x1c4] sm:$0xf]  ;;  %v4024_v12 = vld [vmem:[#allocation2 + $0x40c] sm:$0x30] }
 0x149   :  { %v1821_v23 = vpop.f32.mrf.mxu2 }
 0x14a   :  { %v1834_v27 = vpop.f32.mrf.mxu3  ;;  %v1845_v28 = vpop.f32.mrf.mxu0  ;;  %v3968_v23 = vld [vmem:[#allocation2 + $0x3d4] sm:$0x30] }
 0x14b   :  { %v1858_v30 = vpop.f32.mrf.mxu1  ;;  %v3971_v26 = vor.u32 %v4356_v19, %v3968_v23  ;;  %v3995_v19 = vor.u32 %v4359_v14, %v3992_v15 }
 0x14c   :  { %v3306_v35 = vrot.slane %v1858_v30, 6  ;;  %v1063_v30 = vsel %vm770_vm0, %v3963_v22, 0 }
 0x14d   :  { %4240 = vmatmul.msk.bf16.vlgmr.msra.gmra.mxu0 %vm766_vm1, %v4745_v6  ;;  %4241 = vmatmul.msk.bf16.vlgmr.msra.gmra.mxu1 %vm766_vm1, %v4745_v6 }
 0x14e   :  { %4242 = vmatmul.msk.bf16.vlgmr.msra.gmra.mxu2 %vm766_vm1, %v4745_v6  ;;  %2363 = vmatpush.bf16.msra.mxu0 %v1036_v32  ;;  %v3419_v42 = vsel %vm3380_vm2, %v1845_v28, %v3306_v35  ;;  %v1066_v28 = vsel %vm770_vm0, %v3967_v16, 0  ;;  %v4360_v16 = vld [vmem:[#allocation2 + $0x1ac] sm:$0xf] }
 0x14f   :  { %4243 = vmatmul.msk.bf16.vlgmr.msra.gmra.mxu3 %vm766_vm1, %v4745_v6  ;;  %2389 = vmatpush.bf16.msra.mxu2 %v1042_v31  ;;  %v1069_v31 = vsel %vm770_vm0, %v3971_v26, 0  ;;  %v1084_v26 = vsel %vm770_vm0, %v3991_v18, 0 }
 0x150   :  { %2376 = vmatpush.bf16.msra.mxu1 %v1039_v33  ;;  %2402 = vmatpush.bf16.msra.mxu3 %v1045_v34 }
 0x151   :  { %v1871_v36 = vpop.f32.mrf.mxu2 }
 0x152   :  { %v3307_v37 = vrot.slane %v1871_v36, 4  ;;  %v1884_v38 = vpop.f32.mrf.mxu3  ;;  %v1847_v39 = vpop.f32.mrf.mxu0 }
 0x153   :  { %v3308_v40 = vrot.slane %v1884_v38, 2  ;;  %v1860_v41 = vpop.f32.mrf.mxu1 }
 0x154   :  { %v3982_v41 = vld [vmem:[#allocation2 + $0x198] sm:$0xf] }
 0x155   :  { %v3420_v43 = vsel %vm3382_vm3, %v3307_v37, %v3308_v40 }
 0x156   :  { %v3421_v46 = vsel %vm3384_vm4, %v3419_v42, %v3420_v43  ;;  %v4431_v42 = vld [vmem:[#allocation2 + $0x3e0] sm:$0x30] }
 0x157   :  { %3542 = vst [vmem:[%s5185_s2 + $0x60] sm:$0xff] %v3421_v46  ;;  %v3983_v46 = vor.u32 %v4431_v42, %v3982_v41  ;;  %v4006_v41 = vld [vmem:[#allocation2 + $0x1b0] sm:$0xf]  ;;  %v4434_v42 = vld [vmem:[#allocation2 + $0x3f8] sm:$0x30] }
 0x158   :  { %v4007_v48 = vor.u32 %v4434_v42, %v4006_v41  ;;  %v4365_v41 = vld [vmem:[#allocation2 + $0x1d4] sm:$0xf]  ;;  %v4040_v42 = vld [vmem:[#allocation2 + $0x41c] sm:$0x30] }
 0x159   :  { %v1873_v53 = vpop.f32.mrf.mxu2 }
 0x15a   :  { %v1886_v56 = vpop.f32.mrf.mxu3  ;;  %v1897_v57 = vpop.f32.mrf.mxu0  ;;  %v3984_v53 = vld [vmem:[#allocation2 + $0x3e4] sm:$0x30] }
 0x15b   :  { %v1910_v59 = vpop.f32.mrf.mxu1  ;;  %v3987_v11 = vor.u32 %v4358_v49, %v3984_v53  ;;  %v4011_v49 = vor.u32 %v4361_v44, %v4008_v45 }
 0x15c   :  { %v3309_v0 = vrot.slane %v1910_v59, 6  ;;  %v1075_v59 = vsel %vm770_vm0, %v3979_v52, 0 }
 0x15d   :  { %4244 = vmatmul.msk.bf16.vlgmr.msrb.gmra.mxu0 %vm766_vm1, %v4745_v6  ;;  %4245 = vmatmul.msk.bf16.vlgmr.msrb.gmra.mxu1 %vm766_vm1, %v4745_v6 }
 0x15e   :  { %4246 = vmatmul.msk.bf16.vlgmr.msrb.gmra.mxu2 %vm766_vm1, %v4745_v6  ;;  %2415 = vmatpush.bf16.msrb.mxu0 %v1048_v61  ;;  %v3422_v8 = vsel %vm3380_vm2, %v1897_v57, %v3309_v0  ;;  %v1078_v57 = vsel %vm770_vm0, %v3983_v46, 0  ;;  %v4362_v46 = vld [vmem:[#allocation2 + $0x1bc] sm:$0xf] }
 0x15f   :  { %4247 = vmatmul.msk.bf16.vlgmr.msrb.gmra.mxu3 %vm766_vm1, %v4745_v6  ;;  %2441 = vmatpush.bf16.msrb.mxu2 %v1054_v60  ;;  %v1081_v60 = vsel %vm770_vm0, %v3987_v11, 0  ;;  %v1096_v11 = vsel %vm770_vm0, %v4007_v48, 0 }
 0x160   :  { %2428 = vmatpush.bf16.msrb.mxu1 %v1051_v62  ;;  %2454 = vmatpush.bf16.msrb.mxu3 %v1057_v63 }
 0x161   :  { %v1923_v1 = vpop.f32.mrf.mxu2 }
 0x162   :  { %v3310_v2 = vrot.slane %v1923_v1, 4  ;;  %v1936_v3 = vpop.f32.mrf.mxu3  ;;  %v1899_v4 = vpop.f32.mrf.mxu0 }
 0x163   :  { %v3311_v5 = vrot.slane %v1936_v3, 2  ;;  %v1912_v7 = vpop.f32.mrf.mxu1 }
 0x164   :  { %v3998_v7 = vld [vmem:[#allocation2 + $0x1a8] sm:$0xf] }
 0x165   :  { %v3423_v9 = vsel %vm3382_vm3, %v3310_v2, %v3311_v5 }
 0x166   :  { %v3424_v13 = vsel %vm3384_vm4, %v3422_v8, %v3423_v9  ;;  %v4433_v8 = vld [vmem:[#allocation2 + $0x3f0] sm:$0x30] }
 0x167   :  { %3543 = vst [vmem:[%s5185_s2 + $0x68] sm:$0xff] %v3424_v13  ;;  %v3999_v13 = vor.u32 %v4433_v8, %v3998_v7  ;;  %v4022_v7 = vld [vmem:[#allocation2 + $0x1c0] sm:$0xf]  ;;  %v4436_v8 = vld [vmem:[#allocation2 + $0x408] sm:$0x30] }
 0x168   :  { %v4023_v15 = vor.u32 %v4436_v8, %v4022_v7  ;;  %v4367_v7 = vld [vmem:[#allocation2 + $0x1e4] sm:$0xf]  ;;  %v4056_v8 = vld [vmem:[#allocation2 + $0x42c] sm:$0x30] }
 0x169   :  { %v1925_v20 = vpop.f32.mrf.mxu2 }
 0x16a   :  { %v1938_v24 = vpop.f32.mrf.mxu3  ;;  %v1949_v25 = vpop.f32.mrf.mxu0  ;;  %v4000_v20 = vld [vmem:[#allocation2 + $0x3f4] sm:$0x30] }
 0x16b   :  { %v1962_v27 = vpop.f32.mrf.mxu1  ;;  %v4003_v23 = vor.u32 %v4360_v16, %v4000_v20  ;;  %v4027_v16 = vor.u32 %v4363_v10, %v4024_v12 }
 0x16c   :  { %v3312_v32 = vrot.slane %v1962_v27, 6  ;;  %v1087_v27 = vsel %vm770_vm0, %v3995_v19, 0 }
 0x16d   :  { %4248 = vmatmul.msk.bf16.vlgmr.msra.gmra.mxu0 %vm766_vm1, %v4745_v6  ;;  %4249 = vmatmul.msk.bf16.vlgmr.msra.gmra.mxu1 %vm766_vm1, %v4745_v6 }
 0x16e   :  { %4250 = vmatmul.msk.bf16.vlgmr.msra.gmra.mxu2 %vm766_vm1, %v4745_v6  ;;  %2467 = vmatpush.bf16.msra.mxu0 %v1060_v29  ;;  %v3425_v39 = vsel %vm3380_vm2, %v1949_v25, %v3312_v32  ;;  %v1090_v25 = vsel %vm770_vm0, %v3999_v13, 0  ;;  %v4364_v13 = vld [vmem:[#allocation2 + $0x1cc] sm:$0xf] }
 0x16f   :  { %4251 = vmatmul.msk.bf16.vlgmr.msra.gmra.mxu3 %vm766_vm1, %v4745_v6  ;;  %2493 = vmatpush.bf16.msra.mxu2 %v1066_v28  ;;  %v1093_v28 = vsel %vm770_vm0, %v4003_v23, 0  ;;  %v1108_v23 = vsel %vm770_vm0, %v4023_v15, 0 }
 0x170   :  { %2480 = vmatpush.bf16.msra.mxu1 %v1063_v30  ;;  %2506 = vmatpush.bf16.msra.mxu3 %v1069_v31 }
 0x171   :  { %v1975_v33 = vpop.f32.mrf.mxu2 }
 0x172   :  { %v3313_v34 = vrot.slane %v1975_v33, 4  ;;  %v1988_v35 = vpop.f32.mrf.mxu3  ;;  %v1951_v36 = vpop.f32.mrf.mxu0 }
 0x173   :  { %v3314_v37 = vrot.slane %v1988_v35, 2  ;;  %v1964_v38 = vpop.f32.mrf.mxu1 }
 0x174   :  { %v4014_v38 = vld [vmem:[#allocation2 + $0x1b8] sm:$0xf] }
 0x175   :  { %v3426_v40 = vsel %vm3382_vm3, %v3313_v34, %v3314_v37 }
 0x176   :  { %v3427_v43 = vsel %vm3384_vm4, %v3425_v39, %v3426_v40  ;;  %v4435_v39 = vld [vmem:[#allocation2 + $0x400] sm:$0x30] }
 0x177   :  { %3544 = vst [vmem:[%s5185_s2 + $0x70] sm:$0xff] %v3427_v43  ;;  %v4015_v43 = vor.u32 %v4435_v39, %v4014_v38  ;;  %v4038_v38 = vld [vmem:[#allocation2 + $0x1d0] sm:$0xf]  ;;  %v4438_v39 = vld [vmem:[#allocation2 + $0x418] sm:$0x30] }
 0x178   :  { %v4039_v45 = vor.u32 %v4438_v39, %v4038_v38  ;;  %v4369_v38 = vld [vmem:[#allocation2 + $0x1f4] sm:$0xf]  ;;  %v4072_v39 = vld [vmem:[#allocation2 + $0x43c] sm:$0x30] }
 0x179   :  { %v1977_v50 = vpop.f32.mrf.mxu2 }
 0x17a   :  { %v1990_v54 = vpop.f32.mrf.mxu3  ;;  %v2001_v55 = vpop.f32.mrf.mxu0  ;;  %v4016_v50 = vld [vmem:[#allocation2 + $0x404] sm:$0x30] }
 0x17b   :  { %v2014_v56 = vpop.f32.mrf.mxu1  ;;  %v4019_v53 = vor.u32 %v4362_v46, %v4016_v50  ;;  %v4043_v46 = vor.u32 %v4365_v41, %v4040_v42 }
 0x17c   :  { %v3315_v61 = vrot.slane %v2014_v56, 6  ;;  %v1099_v56 = vsel %vm770_vm0, %v4011_v49, 0 }
 0x17d   :  { %4252 = vmatmul.msk.bf16.vlgmr.msrb.gmra.mxu0 %vm766_vm1, %v4745_v6  ;;  %4253 = vmatmul.msk.bf16.vlgmr.msrb.gmra.mxu1 %vm766_vm1, %v4745_v6 }
 0x17e   :  { %4254 = vmatmul.msk.bf16.vlgmr.msrb.gmra.mxu2 %vm766_vm1, %v4745_v6  ;;  %2519 = vmatpush.bf16.msrb.mxu0 %v1072_v58  ;;  %v3428_v4 = vsel %vm3380_vm2, %v2001_v55, %v3315_v61  ;;  %v1102_v55 = vsel %vm770_vm0, %v4015_v43, 0  ;;  %v4366_v43 = vld [vmem:[#allocation2 + $0x1dc] sm:$0xf] }
 0x17f   :  { %4255 = vmatmul.msk.bf16.vlgmr.msrb.gmra.mxu3 %vm766_vm1, %v4745_v6  ;;  %2545 = vmatpush.bf16.msrb.mxu2 %v1078_v57  ;;  %v1105_v57 = vsel %vm770_vm0, %v4019_v53, 0  ;;  %v1120_v53 = vsel %vm770_vm0, %v4039_v45, 0 }
 0x180   :  { %2532 = vmatpush.bf16.msrb.mxu1 %v1075_v59  ;;  %2558 = vmatpush.bf16.msrb.mxu3 %v1081_v60 }
 0x181   :  { %v2027_v62 = vpop.f32.mrf.mxu2 }
 0x182   :  { %v3316_v63 = vrot.slane %v2027_v62, 4  ;;  %v2040_v0 = vpop.f32.mrf.mxu3  ;;  %v2003_v1 = vpop.f32.mrf.mxu0 }
 0x183   :  { %v3317_v2 = vrot.slane %v2040_v0, 2  ;;  %v2016_v3 = vpop.f32.mrf.mxu1 }
 0x184   :  { %v4030_v3 = vld [vmem:[#allocation2 + $0x1c8] sm:$0xf] }
 0x185   :  { %v3429_v5 = vsel %vm3382_vm3, %v3316_v63, %v3317_v2 }
 0x186   :  { %v3430_v9 = vsel %vm3384_vm4, %v3428_v4, %v3429_v5  ;;  %v4437_v4 = vld [vmem:[#allocation2 + $0x410] sm:$0x30] }
 0x187   :  { %3545 = vst [vmem:[%s5185_s2 + $0x78] sm:$0xff] %v3430_v9  ;;  %v4031_v9 = vor.u32 %v4437_v4, %v4030_v3  ;;  %v4054_v3 = vld [vmem:[#allocation2 + $0x1e0] sm:$0xf]  ;;  %v4440_v4 = vld [vmem:[#allocation2 + $0x428] sm:$0x30] }
 0x188   :  { %v4055_v12 = vor.u32 %v4440_v4, %v4054_v3  ;;  %v4371_v3 = vld [vmem:[#allocation2 + $0x204] sm:$0xf]  ;;  %v4088_v4 = vld [vmem:[#allocation2 + $0x44c] sm:$0x30] }
 0x189   :  { %v2029_v17 = vpop.f32.mrf.mxu2 }
 0x18a   :  { %v2042_v21 = vpop.f32.mrf.mxu3  ;;  %v2053_v22 = vpop.f32.mrf.mxu0  ;;  %v4032_v17 = vld [vmem:[#allocation2 + $0x414] sm:$0x30] }
 0x18b   :  { %v2066_v24 = vpop.f32.mrf.mxu1  ;;  %v4035_v20 = vor.u32 %v4364_v13, %v4032_v17  ;;  %v4059_v13 = vor.u32 %v4367_v7, %v4056_v8 }
 0x18c   :  { %v3318_v29 = vrot.slane %v2066_v24, 6  ;;  %v1111_v24 = vsel %vm770_vm0, %v4027_v16, 0 }
 0x18d   :  { %4256 = vmatmul.msk.bf16.vlgmr.msra.gmra.mxu0 %vm766_vm1, %v4745_v6  ;;  %4257 = vmatmul.msk.bf16.vlgmr.msra.gmra.mxu1 %vm766_vm1, %v4745_v6 }
 0x18e   :  { %4258 = vmatmul.msk.bf16.vlgmr.msra.gmra.mxu2 %vm766_vm1, %v4745_v6  ;;  %2571 = vmatpush.bf16.msra.mxu0 %v1084_v26  ;;  %v3431_v36 = vsel %vm3380_vm2, %v2053_v22, %v3318_v29  ;;  %v1114_v22 = vsel %vm770_vm0, %v4031_v9, 0  ;;  %v4368_v9 = vld [vmem:[#allocation2 + $0x1ec] sm:$0xf] }
 0x18f   :  { %4259 = vmatmul.msk.bf16.vlgmr.msra.gmra.mxu3 %vm766_vm1, %v4745_v6  ;;  %2597 = vmatpush.bf16.msra.mxu2 %v1090_v25  ;;  %v1117_v25 = vsel %vm770_vm0, %v4035_v20, 0  ;;  %v1132_v20 = vsel %vm770_vm0, %v4055_v12, 0 }
 0x190   :  { %2584 = vmatpush.bf16.msra.mxu1 %v1087_v27  ;;  %2610 = vmatpush.bf16.msra.mxu3 %v1093_v28 }
 0x191   :  { %v2079_v30 = vpop.f32.mrf.mxu2 }
 0x192   :  { %v3319_v31 = vrot.slane %v2079_v30, 4  ;;  %v2092_v32 = vpop.f32.mrf.mxu3  ;;  %v2055_v33 = vpop.f32.mrf.mxu0 }
 0x193   :  { %v3320_v34 = vrot.slane %v2092_v32, 2  ;;  %v2068_v35 = vpop.f32.mrf.mxu1 }
 0x194   :  { %v4046_v35 = vld [vmem:[#allocation2 + $0x1d8] sm:$0xf] }
 0x195   :  { %v3432_v37 = vsel %vm3382_vm3, %v3319_v31, %v3320_v34 }
 0x196   :  { %v3433_v40 = vsel %vm3384_vm4, %v3431_v36, %v3432_v37  ;;  %v4439_v36 = vld [vmem:[#allocation2 + $0x420] sm:$0x30] }
 0x197   :  { %3546 = vst [vmem:[%s5185_s2 + $0x80] sm:$0xff] %v3433_v40  ;;  %v4047_v40 = vor.u32 %v4439_v36, %v4046_v35  ;;  %v4070_v35 = vld [vmem:[#allocation2 + $0x1f0] sm:$0xf]  ;;  %v4442_v36 = vld [vmem:[#allocation2 + $0x438] sm:$0x30] }
 0x198   :  { %v4071_v42 = vor.u32 %v4442_v36, %v4070_v35  ;;  %v4373_v35 = vld [vmem:[#allocation2 + $0x214] sm:$0xf]  ;;  %v4104_v36 = vld [vmem:[#allocation2 + $0x45c] sm:$0x30] }
 0x199   :  { %v2081_v47 = vpop.f32.mrf.mxu2 }
 0x19a   :  { %v2094_v51 = vpop.f32.mrf.mxu3  ;;  %v2105_v52 = vpop.f32.mrf.mxu0  ;;  %v4048_v47 = vld [vmem:[#allocation2 + $0x424] sm:$0x30] }
 0x19b   :  { %v2118_v54 = vpop.f32.mrf.mxu1  ;;  %v4051_v50 = vor.u32 %v4366_v43, %v4048_v47  ;;  %v4075_v43 = vor.u32 %v4369_v38, %v4072_v39 }
 0x19c   :  { %v3321_v58 = vrot.slane %v2118_v54, 6  ;;  %v1123_v54 = vsel %vm770_vm0, %v4043_v46, 0 }
 0x19d   :  { %4260 = vmatmul.msk.bf16.vlgmr.msrb.gmra.mxu0 %vm766_vm1, %v4745_v6  ;;  %4261 = vmatmul.msk.bf16.vlgmr.msrb.gmra.mxu1 %vm766_vm1, %v4745_v6 }
 0x19e   :  { %4262 = vmatmul.msk.bf16.vlgmr.msrb.gmra.mxu2 %vm766_vm1, %v4745_v6  ;;  %2623 = vmatpush.bf16.msrb.mxu0 %v1096_v11  ;;  %v3434_v1 = vsel %vm3380_vm2, %v2105_v52, %v3321_v58  ;;  %v1126_v52 = vsel %vm770_vm0, %v4047_v40, 0  ;;  %v4370_v40 = vld [vmem:[#allocation2 + $0x1fc] sm:$0xf] }
 0x19f   :  { %4263 = vmatmul.msk.bf16.vlgmr.msrb.gmra.mxu3 %vm766_vm1, %v4745_v6  ;;  %2649 = vmatpush.bf16.msrb.mxu2 %v1102_v55  ;;  %v1129_v55 = vsel %vm770_vm0, %v4051_v50, 0  ;;  %v1144_v50 = vsel %vm770_vm0, %v4071_v42, 0 }
 0x1a0   :  { %2636 = vmatpush.bf16.msrb.mxu1 %v1099_v56  ;;  %2662 = vmatpush.bf16.msrb.mxu3 %v1105_v57 }
 0x1a1   :  { %v2131_v59 = vpop.f32.mrf.mxu2 }
 0x1a2   :  { %v3322_v60 = vrot.slane %v2131_v59, 4  ;;  %v2144_v61 = vpop.f32.mrf.mxu3  ;;  %v2107_v62 = vpop.f32.mrf.mxu0 }
 0x1a3   :  { %v3323_v63 = vrot.slane %v2144_v61, 2  ;;  %v2120_v0 = vpop.f32.mrf.mxu1 }
 0x1a4   :  { %v4062_v0 = vld [vmem:[#allocation2 + $0x1e8] sm:$0xf] }
 0x1a5   :  { %v3435_v2 = vsel %vm3382_vm3, %v3322_v60, %v3323_v63 }
 0x1a6   :  { %v3436_v5 = vsel %vm3384_vm4, %v3434_v1, %v3435_v2  ;;  %v4441_v1 = vld [vmem:[#allocation2 + $0x430] sm:$0x30] }
 0x1a7   :  { %3547 = vst [vmem:[%s5185_s2 + $0x88] sm:$0xff] %v3436_v5  ;;  %v4063_v5 = vor.u32 %v4441_v1, %v4062_v0  ;;  %v4086_v0 = vld [vmem:[#allocation2 + $0x200] sm:$0xf]  ;;  %v4444_v1 = vld [vmem:[#allocation2 + $0x448] sm:$0x30] }
 0x1a8   :  { %v4087_v8 = vor.u32 %v4444_v1, %v4086_v0  ;;  %v4375_v0 = vld [vmem:[#allocation2 + $0x224] sm:$0xf]  ;;  %v4120_v1 = vld [vmem:[#allocation2 + $0x46c] sm:$0x30] }
 0x1a9   :  { %v2133_v14 = vpop.f32.mrf.mxu2 }
 0x1aa   :  { %v2146_v18 = vpop.f32.mrf.mxu3  ;;  %v2157_v19 = vpop.f32.mrf.mxu0  ;;  %v4064_v14 = vld [vmem:[#allocation2 + $0x434] sm:$0x30] }
 0x1ab   :  { %v2170_v21 = vpop.f32.mrf.mxu1  ;;  %v4067_v17 = vor.u32 %v4368_v9, %v4064_v14  ;;  %v4091_v9 = vor.u32 %v4371_v3, %v4088_v4 }
 0x1ac   :  { %v3324_v26 = vrot.slane %v2170_v21, 6  ;;  %v1135_v21 = vsel %vm770_vm0, %v4059_v13, 0 }
 0x1ad   :  { %4264 = vmatmul.msk.bf16.vlgmr.msra.gmra.mxu0 %vm766_vm1, %v4745_v6  ;;  %4265 = vmatmul.msk.bf16.vlgmr.msra.gmra.mxu1 %vm766_vm1, %v4745_v6 }
 0x1ae   :  { %4266 = vmatmul.msk.bf16.vlgmr.msra.gmra.mxu2 %vm766_vm1, %v4745_v6  ;;  %2675 = vmatpush.bf16.msra.mxu0 %v1108_v23  ;;  %v3437_v33 = vsel %vm3380_vm2, %v2157_v19, %v3324_v26  ;;  %v1138_v19 = vsel %vm770_vm0, %v4063_v5, 0  ;;  %v4993_v23 = vld [vmem:[%s5183_s0] sm:$0x1]  ;;  %v4372_v5 = vld [vmem:[#allocation2 + $0x20c] sm:$0xf] }
 0x1af   :  { %4267 = vmatmul.msk.bf16.vlgmr.msra.gmra.mxu3 %vm766_vm1, %v4745_v6  ;;  %2701 = vmatpush.bf16.msra.mxu2 %v1114_v22  ;;  %v1141_v22 = vsel %vm770_vm0, %v4067_v17, 0  ;;  %v1156_v17 = vsel %vm770_vm0, %v4087_v8, 0 }
 0x1b0   :  { %2688 = vmatpush.bf16.msra.mxu1 %v1111_v24  ;;  %2714 = vmatpush.bf16.msra.mxu3 %v1117_v25 }
 0x1b1   :  { %v2183_v27 = vpop.f32.mrf.mxu2 }
 0x1b2   :  { %v3325_v28 = vrot.slane %v2183_v27, 4  ;;  %v2196_v29 = vpop.f32.mrf.mxu3  ;;  %v2159_v30 = vpop.f32.mrf.mxu0 }
 0x1b3   :  { %v3326_v31 = vrot.slane %v2196_v29, 2  ;;  %v2172_v32 = vpop.f32.mrf.mxu1 }
 0x1b4   :  { %v4078_v32 = vld [vmem:[#allocation2 + $0x1f8] sm:$0xf] }
 0x1b5   :  { %v3438_v34 = vsel %vm3382_vm3, %v3325_v28, %v3326_v31 }
 0x1b6   :  { %v3439_v37 = vsel %vm3384_vm4, %v3437_v33, %v3438_v34  ;;  %v4443_v33 = vld [vmem:[#allocation2 + $0x440] sm:$0x30] }
 0x1b7   :  { %3548 = vst [vmem:[%s5185_s2 + $0x90] sm:$0xff] %v3439_v37  ;;  %v4079_v37 = vor.u32 %v4443_v33, %v4078_v32  ;;  %v4102_v32 = vld [vmem:[#allocation2 + $0x210] sm:$0xf]  ;;  %v4446_v33 = vld [vmem:[#allocation2 + $0x458] sm:$0x30] }
 0x1b8   :  { %v4103_v39 = vor.u32 %v4446_v33, %v4102_v32  ;;  %v4377_v32 = vld [vmem:[#allocation2 + $0x234] sm:$0xf]  ;;  %v4136_v33 = vld [vmem:[#allocation2 + $0x47c] sm:$0x30] }
 0x1b9   :  { %v2185_v44 = vpop.f32.mrf.mxu2 }
 0x1ba   :  { %v2198_v48 = vpop.f32.mrf.mxu3  ;;  %v2209_v49 = vpop.f32.mrf.mxu0  ;;  %v4080_v44 = vld [vmem:[#allocation2 + $0x444] sm:$0x30] }
 0x1bb   :  { %v2222_v51 = vpop.f32.mrf.mxu1  ;;  %v4083_v47 = vor.u32 %v4370_v40, %v4080_v44  ;;  %v4107_v40 = vor.u32 %v4373_v35, %v4104_v36 }
 0x1bc   :  { %v3327_v11 = vrot.slane %v2222_v51, 6  ;;  %v1147_v51 = vsel %vm770_vm0, %v4075_v43, 0 }
 0x1bd   :  { %4268 = vmatmul.msk.bf16.vlgmr.msrb.gmra.mxu0 %vm766_vm1, %v4745_v6  ;;  %4269 = vmatmul.msk.bf16.vlgmr.msrb.gmra.mxu1 %vm766_vm1, %v4745_v6 }
 0x1be   :  { %4270 = vmatmul.msk.bf16.vlgmr.msrb.gmra.mxu2 %vm766_vm1, %v4745_v6  ;;  %2727 = vmatpush.bf16.msrb.mxu0 %v1120_v53  ;;  %v3440_v62 = vsel %vm3380_vm2, %v2209_v49, %v3327_v11  ;;  %v1150_v49 = vsel %vm770_vm0, %v4079_v37, 0  ;;  %v4374_v37 = vld [vmem:[#allocation2 + $0x21c] sm:$0xf] }
 0x1bf   :  { %4271 = vmatmul.msk.bf16.vlgmr.msrb.gmra.mxu3 %vm766_vm1, %v4745_v6  ;;  %2753 = vmatpush.bf16.msrb.mxu2 %v1126_v52  ;;  %v1153_v52 = vsel %vm770_vm0, %v4083_v47, 0  ;;  %v1168_v47 = vsel %vm770_vm0, %v4103_v39, 0 }
 0x1c0   :  { %2740 = vmatpush.bf16.msrb.mxu1 %v1123_v54  ;;  %2766 = vmatpush.bf16.msrb.mxu3 %v1129_v55 }
 0x1c1   :  { %v2235_v56 = vpop.f32.mrf.mxu2 }
 0x1c2   :  { %v3328_v57 = vrot.slane %v2235_v56, 4  ;;  %v2248_v58 = vpop.f32.mrf.mxu3  ;;  %v2211_v59 = vpop.f32.mrf.mxu0 }
 0x1c3   :  { %v3329_v60 = vrot.slane %v2248_v58, 2  ;;  %v2224_v61 = vpop.f32.mrf.mxu1 }
 0x1c4   :  { %v4094_v61 = vld [vmem:[#allocation2 + $0x208] sm:$0xf] }
 0x1c5   :  { %v3441_v63 = vsel %vm3382_vm3, %v3328_v57, %v3329_v60 }
 0x1c6   :  { %v3442_v2 = vsel %vm3384_vm4, %v3440_v62, %v3441_v63  ;;  %v4445_v62 = vld [vmem:[#allocation2 + $0x450] sm:$0x30] }
 0x1c7   :  { %3549 = vst [vmem:[%s5185_s2 + $0x98] sm:$0xff] %v3442_v2  ;;  %v4095_v2 = vor.u32 %v4445_v62, %v4094_v61  ;;  %v4118_v61 = vld [vmem:[#allocation2 + $0x220] sm:$0xf]  ;;  %v4448_v62 = vld [vmem:[#allocation2 + $0x468] sm:$0x30] }
 0x1c8   :  { %v4119_v4 = vor.u32 %v4448_v62, %v4118_v61  ;;  %v4379_v61 = vld [vmem:[#allocation2 + $0x244] sm:$0xf]  ;;  %v4152_v62 = vld [vmem:[#allocation2 + $0x48c] sm:$0x30] }
 0x1c9   :  { %v2237_v10 = vpop.f32.mrf.mxu2 }
 0x1ca   :  { %v2250_v15 = vpop.f32.mrf.mxu3  ;;  %v2261_v16 = vpop.f32.mrf.mxu0  ;;  %v4096_v10 = vld [vmem:[#allocation2 + $0x454] sm:$0x30] }
 0x1cb   :  { %v2274_v18 = vpop.f32.mrf.mxu1  ;;  %v4099_v14 = vor.u32 %v4372_v5, %v4096_v10  ;;  %v4123_v5 = vor.u32 %v4375_v0, %v4120_v1  ;;  %v4155_v1 = vor.u32 %v4379_v61, %v4152_v62 }
 0x1cc   :  { %v3330_v24 = vrot.slane %v2274_v18, 6  ;;  %v1159_v18 = vsel %vm770_vm0, %v4091_v9, 0 }
 0x1cd   :  { %4272 = vmatmul.msk.bf16.vlgmr.msra.gmra.mxu0 %vm766_vm1, %v4745_v6  ;;  %4273 = vmatmul.msk.bf16.vlgmr.msra.gmra.mxu1 %vm766_vm1, %v4745_v6 }
 0x1ce   :  { %4274 = vmatmul.msk.bf16.vlgmr.msra.gmra.mxu2 %vm766_vm1, %v4745_v6  ;;  %2779 = vmatpush.bf16.msra.mxu0 %v1132_v20  ;;  %v3443_v30 = vsel %vm3380_vm2, %v2261_v16, %v3330_v24  ;;  %v1162_v16 = vsel %vm770_vm0, %v4095_v2, 0  ;;  %v4376_v2 = vld [vmem:[#allocation2 + $0x22c] sm:$0xf] }
 0x1cf   :  { %4275 = vmatmul.msk.bf16.vlgmr.msra.gmra.mxu3 %vm766_vm1, %v4993_v23  ;;  %2805 = vmatpush.bf16.msra.mxu2 %v1138_v19  ;;  %v1165_v19 = vsel %vm770_vm0, %v4099_v14, 0  ;;  %v1180_v14 = vsel %vm770_vm0, %v4119_v4, 0 }
 0x1d0   :  { %2792 = vmatpush.bf16.msra.mxu1 %v1135_v21  ;;  %2818 = vmatpush.bf16.msra.mxu3 %v1141_v22 }
 0x1d1   :  { %v2287_v25 = vpop.f32.mrf.mxu2 }
 0x1d2   :  { %v3331_v26 = vrot.slane %v2287_v25, 4  ;;  %v2300_v27 = vpop.f32.mrf.mxu3  ;;  %v2263_v28 = vpop.f32.mrf.mxu0 }
 0x1d3   :  { %v3332_v6 = vrot.slane %v2300_v27, 2  ;;  %v2276_v29 = vpop.f32.mrf.mxu1 }
 0x1d4   :  { %v4110_v29 = vld [vmem:[#allocation2 + $0x218] sm:$0xf] }
 0x1d5   :  { %v3444_v31 = vsel %vm3382_vm3, %v3331_v26, %v3332_v6 }
 0x1d6   :  { %v3445_v34 = vsel %vm3384_vm4, %v3443_v30, %v3444_v31  ;;  %v4447_v30 = vld [vmem:[#allocation2 + $0x460] sm:$0x30] }
 0x1d7   :  { %3550 = vst [vmem:[%s5185_s2 + $0xa0] sm:$0xff] %v3445_v34  ;;  %v4111_v34 = vor.u32 %v4447_v30, %v4110_v29  ;;  %v4134_v29 = vld [vmem:[#allocation2 + $0x230] sm:$0xf]  ;;  %v4450_v30 = vld [vmem:[#allocation2 + $0x478] sm:$0x30] }
 0x1d8   :  { %v4135_v36 = vor.u32 %v4450_v30, %v4134_v29 }
 0x1d9   :  { %v2289_v41 = vpop.f32.mrf.mxu2 }
 0x1da   :  { %v2302_v45 = vpop.f32.mrf.mxu3  ;;  %v2313_v46 = vpop.f32.mrf.mxu0  ;;  %v4112_v41 = vld [vmem:[#allocation2 + $0x464] sm:$0x30] }
 0x1db   :  { %v2326_v48 = vpop.f32.mrf.mxu1  ;;  %v4115_v44 = vor.u32 %v4374_v37, %v4112_v41  ;;  %v4139_v37 = vor.u32 %v4377_v32, %v4136_v33 }
 0x1dc   :  { %v3333_v53 = vrot.slane %v2326_v48, 6  ;;  %v1171_v48 = vsel %vm770_vm0, %v4107_v40, 0 }
 0x1dd   :  { %4276 = vmatmul.msk.bf16.vlgmr.msrb.gmra.mxu0 %vm766_vm1, %v4993_v23  ;;  %4277 = vmatmul.msk.bf16.vlgmr.msrb.gmra.mxu1 %vm766_vm1, %v4993_v23 }
 0x1de   :  { %4278 = vmatmul.msk.bf16.vlgmr.msrb.gmra.mxu2 %vm766_vm1, %v4993_v23  ;;  %2831 = vmatpush.bf16.msrb.mxu0 %v1144_v50  ;;  %v3446_v59 = vsel %vm3380_vm2, %v2313_v46, %v3333_v53  ;;  %v1174_v46 = vsel %vm770_vm0, %v4111_v34, 0  ;;  %v4378_v34 = vld [vmem:[#allocation2 + $0x23c] sm:$0xf] }
 0x1df   :  { %4279 = vmatmul.msk.bf16.vlgmr.msrb.gmra.mxu3 %vm766_vm1, %v4993_v23  ;;  %2857 = vmatpush.bf16.msrb.mxu2 %v1150_v49  ;;  %v1177_v49 = vsel %vm770_vm0, %v4115_v44, 0  ;;  %v1192_v44 = vsel %vm770_vm0, %v4135_v36, 0 }
 0x1e0   :  { %2844 = vmatpush.bf16.msrb.mxu1 %v1147_v51  ;;  %2870 = vmatpush.bf16.msrb.mxu3 %v1153_v52 }
 0x1e1   :  { %v2339_v54 = vpop.f32.mrf.mxu2 }
 0x1e2   :  { %v3334_v55 = vrot.slane %v2339_v54, 4  ;;  %v2352_v11 = vpop.f32.mrf.mxu3  ;;  %v2315_v56 = vpop.f32.mrf.mxu0 }
 0x1e3   :  { %v3335_v57 = vrot.slane %v2352_v11, 2  ;;  %v2328_v58 = vpop.f32.mrf.mxu1 }
 0x1e4   :  { %v4126_v58 = vld [vmem:[#allocation2 + $0x228] sm:$0xf] }
 0x1e5   :  { %v3447_v60 = vsel %vm3382_vm3, %v3334_v55, %v3335_v57 }
 0x1e6   :  { %v3448_v63 = vsel %vm3384_vm4, %v3446_v59, %v3447_v60  ;;  %v4449_v59 = vld [vmem:[#allocation2 + $0x470] sm:$0x30] }
 0x1e7   :  { %3551 = vst [vmem:[%s5185_s2 + $0xa8] sm:$0xff] %v3448_v63  ;;  %v4127_v63 = vor.u32 %v4449_v59, %v4126_v58  ;;  %v4150_v58 = vld [vmem:[#allocation2 + $0x240] sm:$0xf]  ;;  %v4452_v59 = vld [vmem:[#allocation2 + $0x488] sm:$0x30] }
 0x1e8   :  { %v4151_v0 = vor.u32 %v4452_v59, %v4150_v58 }
 0x1e9   :  { %v2341_v7 = vpop.f32.mrf.mxu2 }
 0x1ea   :  { %v2354_v12 = vpop.f32.mrf.mxu3  ;;  %v2365_v13 = vpop.f32.mrf.mxu0  ;;  %v4128_v7 = vld [vmem:[#allocation2 + $0x474] sm:$0x30] }
 0x1eb   :  { %v2378_v15 = vpop.f32.mrf.mxu1  ;;  %v4131_v10 = vor.u32 %v4376_v2, %v4128_v7  ;;  %v1204_v7 = vsel %vm770_vm0, %v4151_v0, 0 }
 0x1ec   :  { %v3336_v20 = vrot.slane %v2378_v15, 6  ;;  %v1183_v15 = vsel %vm770_vm0, %v4123_v5, 0 }
 0x1ed   :  { %4280 = vmatmul.msk.bf16.vlgmr.msra.gmra.mxu0 %vm766_vm1, %v4993_v23  ;;  %4281 = vmatmul.msk.bf16.vlgmr.msra.gmra.mxu1 %vm766_vm1, %v4993_v23 }
 0x1ee   :  { %4282 = vmatmul.msk.bf16.vlgmr.msra.gmra.mxu2 %vm766_vm1, %v4993_v23  ;;  %2883 = vmatpush.bf16.msra.mxu0 %v1156_v17  ;;  %v3449_v28 = vsel %vm3380_vm2, %v2365_v13, %v3336_v20  ;;  %v1186_v13 = vsel %vm770_vm0, %v4127_v63, 0 }
 0x1ef   :  { %4283 = vmatmul.msk.bf16.vlgmr.msra.gmra.mxu3 %vm766_vm1, %v4993_v23  ;;  %2909 = vmatpush.bf16.msra.mxu2 %v1162_v16  ;;  %v1189_v16 = vsel %vm770_vm0, %v4131_v10, 0 }
 0x1f0   :  { %2896 = vmatpush.bf16.msra.mxu1 %v1159_v18  ;;  %2922 = vmatpush.bf16.msra.mxu3 %v1165_v19 }
 0x1f1   :  { %v2391_v21 = vpop.f32.mrf.mxu2 }
 0x1f2   :  { %v3337_v22 = vrot.slane %v2391_v21, 4  ;;  %v2404_v24 = vpop.f32.mrf.mxu3  ;;  %v2367_v25 = vpop.f32.mrf.mxu0 }
 0x1f3   :  { %v3338_v26 = vrot.slane %v2404_v24, 2  ;;  %v2380_v27 = vpop.f32.mrf.mxu1 }
 0x1f4   :  { %v4142_v27 = vld [vmem:[#allocation2 + $0x238] sm:$0xf] }
 0x1f5   :  { %v3450_v6 = vsel %vm3382_vm3, %v3337_v22, %v3338_v26 }
 0x1f6   :  { %v3451_v31 = vsel %vm3384_vm4, %v3449_v28, %v3450_v6  ;;  %v4451_v28 = vld [vmem:[#allocation2 + $0x480] sm:$0x30] }
 0x1f7   :  { %3552 = vst [vmem:[%s5185_s2 + $0xb0] sm:$0xff] %v3451_v31  ;;  %v4143_v31 = vor.u32 %v4451_v28, %v4142_v27 }
 0x1f9   :  { %v2393_v38 = vpop.f32.mrf.mxu2 }
 0x1fa   :  { %v2406_v42 = vpop.f32.mrf.mxu3  ;;  %v2417_v43 = vpop.f32.mrf.mxu0  ;;  %v4144_v38 = vld [vmem:[#allocation2 + $0x484] sm:$0x30] }
 0x1fb   :  { %v2430_v45 = vpop.f32.mrf.mxu1  ;;  %v4147_v41 = vor.u32 %v4378_v34, %v4144_v38 }
 0x1fc   :  { %v3339_v50 = vrot.slane %v2430_v45, 6  ;;  %v1195_v45 = vsel %vm770_vm0, %v4139_v37, 0 }
 0x1fd   :  { %4284 = vmatmul.msk.bf16.vlgmr.msrb.gmra.mxu0 %vm766_vm1, %v4993_v23  ;;  %4285 = vmatmul.msk.bf16.vlgmr.msrb.gmra.mxu1 %vm766_vm1, %v4993_v23 }
 0x1fe   :  { %4286 = vmatmul.msk.bf16.vlgmr.msrb.gmra.mxu2 %vm766_vm1, %v4993_v23  ;;  %2935 = vmatpush.bf16.msrb.mxu0 %v1168_v47  ;;  %v3452_v56 = vsel %vm3380_vm2, %v2417_v43, %v3339_v50  ;;  %v1198_v43 = vsel %vm770_vm0, %v4143_v31, 0 }
 0x1ff   :  { %4287 = vmatmul.msk.bf16.vlgmr.msrb.gmra.mxu3 %vm766_vm1, %v4993_v23  ;;  %2961 = vmatpush.bf16.msrb.mxu2 %v1174_v46  ;;  %v1201_v46 = vsel %vm770_vm0, %v4147_v41, 0 }
 0x200   :  { %2948 = vmatpush.bf16.msrb.mxu1 %v1171_v48  ;;  %2974 = vmatpush.bf16.msrb.mxu3 %v1177_v49 }
 0x201   :  { %v2443_v51 = vpop.f32.mrf.mxu2 }
 0x202   :  { %v3340_v52 = vrot.slane %v2443_v51, 4  ;;  %v2456_v53 = vpop.f32.mrf.mxu3  ;;  %v2419_v54 = vpop.f32.mrf.mxu0 }
 0x203   :  { %v3341_v55 = vrot.slane %v2456_v53, 2  ;;  %v2432_v11 = vpop.f32.mrf.mxu1 }
 0x204   :  { %v4158_v11 = vld [vmem:[#allocation2 + $0x248] sm:$0xf] }
 0x205   :  { %v3453_v57 = vsel %vm3382_vm3, %v3340_v52, %v3341_v55 }
 0x206   :  { %v3454_v60 = vsel %vm3384_vm4, %v3452_v56, %v3453_v57  ;;  %v4453_v56 = vld [vmem:[#allocation2 + $0x490] sm:$0x30] }
 0x207   :  { %3553 = vst [vmem:[%s5185_s2 + $0xb8] sm:$0xff] %v3454_v60  ;;  %v4159_v60 = vor.u32 %v4453_v56, %v4158_v11 }
 0x209   :  { %v2445_v3 = vpop.f32.mrf.mxu2  ;;  %v1210_v5 = vsel %vm770_vm0, %v4159_v60, 0 }
 0x20a   :  { %v2458_v8 = vpop.f32.mrf.mxu3  ;;  %v2469_v9 = vpop.f32.mrf.mxu0 }
 0x20b   :  { %v2482_v12 = vpop.f32.mrf.mxu1  ;;  %v1207_v8 = vsel %vm770_vm0, %v4155_v1, 0 }
 0x20c   :  { %v3342_v17 = vrot.slane %v2482_v12, 6 }
 0x20d   :  { %4288 = vmatmul.msk.bf16.vlgmr.msra.gmra.mxu0 %vm766_vm1, %v4993_v23  ;;  %4289 = vmatmul.msk.bf16.vlgmr.msra.gmra.mxu1 %vm766_vm1, %v4993_v23 }
 0x20e   :  { %4290 = vmatmul.msk.bf16.vlgmr.msra.gmra.mxu2 %vm766_vm1, %v4993_v23  ;;  %2987 = vmatpush.bf16.msra.mxu0 %v1180_v14  ;;  %v3455_v25 = vsel %vm3380_vm2, %v2469_v9, %v3342_v17 }
 0x20f   :  { %4291 = vmatmul.msk.bf16.vlgmr.msra.gmra.mxu3 %vm766_vm1, %v4993_v23  ;;  %3013 = vmatpush.bf16.msra.mxu2 %v1186_v13 }
 0x210   :  { %3000 = vmatpush.bf16.msra.mxu1 %v1183_v15  ;;  %3026 = vmatpush.bf16.msra.mxu3 %v1189_v16 }
 0x211   :  { %v2495_v18 = vpop.f32.mrf.mxu2 }
 0x212   :  { %v3343_v19 = vrot.slane %v2495_v18, 4  ;;  %v2508_v20 = vpop.f32.mrf.mxu3  ;;  %v2471_v21 = vpop.f32.mrf.mxu0 }
 0x213   :  { %v3344_v22 = vrot.slane %v2508_v20, 2  ;;  %v2484_v24 = vpop.f32.mrf.mxu1 }
 0x215   :  { %v3456_v26 = vsel %vm3382_vm3, %v3343_v19, %v3344_v22 }
 0x216   :  { %v3457_v6 = vsel %vm3384_vm4, %v3455_v25, %v3456_v26 }
 0x217   :  { %3554 = vst [vmem:[%s5185_s2 + $0xc0] sm:$0xff] %v3457_v6 }
 0x219   :  { %v2497_v35 = vpop.f32.mrf.mxu2 }
 0x21a   :  { %v2510_v39 = vpop.f32.mrf.mxu3  ;;  %v2521_v40 = vpop.f32.mrf.mxu0 }
 0x21b   :  { %v2534_v42 = vpop.f32.mrf.mxu1 }
 0x21c   :  { %v3345_v47 = vrot.slane %v2534_v42, 6 }
 0x21d   :  { %4292 = vmatmul.msk.bf16.vlgmr.msrb.gmra.mxu0 %vm766_vm1, %v4993_v23  ;;  %4293 = vmatmul.msk.bf16.vlgmr.msrb.gmra.mxu1 %vm766_vm1, %v4993_v23 }
 0x21e   :  { %4294 = vmatmul.msk.bf16.vlgmr.msrb.gmra.mxu2 %vm766_vm1, %v4993_v23  ;;  %3039 = vmatpush.bf16.msrb.mxu0 %v1192_v44  ;;  %v3458_v54 = vsel %vm3380_vm2, %v2521_v40, %v3345_v47 }
 0x21f   :  { %4295 = vmatmul.msk.bf16.vlgmr.msrb.gmra.mxu3 %vm766_vm1, %v4993_v23  ;;  %3065 = vmatpush.bf16.msrb.mxu2 %v1198_v43 }
 0x220   :  { %3052 = vmatpush.bf16.msrb.mxu1 %v1195_v45  ;;  %3078 = vmatpush.bf16.msrb.mxu3 %v1201_v46 }
 0x221   :  { %v2547_v48 = vpop.f32.mrf.mxu2 }
 0x222   :  { %v3346_v49 = vrot.slane %v2547_v48, 4  ;;  %v2560_v50 = vpop.f32.mrf.mxu3  ;;  %v2523_v51 = vpop.f32.mrf.mxu0 }
 0x223   :  { %v3347_v52 = vrot.slane %v2560_v50, 2  ;;  %v2536_v53 = vpop.f32.mrf.mxu1 }
 0x225   :  { %v3459_v55 = vsel %vm3382_vm3, %v3346_v49, %v3347_v52 }
 0x226   :  { %v3460_v57 = vsel %vm3384_vm4, %v3458_v54, %v3459_v55 }
 0x227   :  { %3555 = vst [vmem:[%s5185_s2 + $0xc8] sm:$0xff] %v3460_v57 }
 0x229   :  { %v2549_v63 = vpop.f32.mrf.mxu2 }
 0x22a   :  { %v2562_v2 = vpop.f32.mrf.mxu3  ;;  %v2573_v3 = vpop.f32.mrf.mxu0 }
 0x22b   :  { %v2586_v4 = vpop.f32.mrf.mxu1 }
 0x22c   :  { %v3348_v9 = vrot.slane %v2586_v4, 6 }
 0x22d   :  { %4296 = vmatmul.msk.bf16.vlgmr.msra.gmra.mxu0 %vm766_vm1, %v4993_v23  ;;  %4297 = vmatmul.msk.bf16.vlgmr.msra.gmra.mxu1 %vm766_vm1, %v4993_v23 }
 0x22e   :  { %4298 = vmatmul.msk.bf16.vlgmr.msra.gmra.mxu2 %vm766_vm1, %v4993_v23  ;;  %3091 = vmatpush.bf16.msra.mxu0 %v1204_v7  ;;  %v3461_v17 = vsel %vm3380_vm2, %v2573_v3, %v3348_v9 }
 0x22f   :  { %4299 = vmatmul.msk.bf16.vlgmr.msra.gmra.mxu3 %vm766_vm1, %v4993_v23  ;;  %3117 = vmatpush.bf16.msra.mxu2 %v1210_v5 }
 0x230   :  { %3104 = vmatpush.bf16.msra.mxu1 %v1207_v8 }
 0x231   :  { %v2599_v10 = vpop.f32.mrf.mxu2 }
 0x232   :  { %v3349_v12 = vrot.slane %v2599_v10, 4  ;;  %v2612_v13 = vpop.f32.mrf.mxu3  ;;  %v2575_v14 = vpop.f32.mrf.mxu0 }
 0x233   :  { %v3350_v15 = vrot.slane %v2612_v13, 2  ;;  %v2588_v16 = vpop.f32.mrf.mxu1 }
 0x235   :  { %v3462_v18 = vsel %vm3382_vm3, %v3349_v12, %v3350_v15 }
 0x236   :  { %v3463_v19 = vsel %vm3384_vm4, %v3461_v17, %v3462_v18 }
 0x237   :  { %3556 = vst [vmem:[%s5185_s2 + $0xd0] sm:$0xff] %v3463_v19 }
 0x239   :  { %v2601_v20 = vpop.f32.mrf.mxu2 }
 0x23a   :  { %v2614_v21 = vpop.f32.mrf.mxu3  ;;  %v2625_v22 = vpop.f32.mrf.mxu0 }
 0x23b   :  { %v2638_v24 = vpop.f32.mrf.mxu1 }
 0x23c   :  { %v3351_v25 = vrot.slane %v2638_v24, 6 }
 0x23d   :  { %4300 = vmatmul.msk.bf16.vlgmr.msrb.gmra.mxu0 %vm766_vm1, %v4993_v23  ;;  %4301 = vmatmul.msk.bf16.vlgmr.msrb.gmra.mxu1 %vm766_vm1, %v4993_v23 }
 0x23e   :  { %4302 = vmatmul.msk.bf16.vlgmr.msrb.gmra.mxu2 %vm766_vm1, %v4993_v23  ;;  %v3464_v31 = vsel %vm3380_vm2, %v2625_v22, %v3351_v25 }
 0x23f   :  { %4303 = vmatmul.msk.bf16.vlgmr.msrb.gmra.mxu3 %vm766_vm1, %v4993_v23 }
 0x241   :  { %v2651_v26 = vpop.f32.mrf.mxu2 }
 0x242   :  { %v3352_v27 = vrot.slane %v2651_v26, 4  ;;  %v2664_v28 = vpop.f32.mrf.mxu3  ;;  %v2627_v6 = vpop.f32.mrf.mxu0 }
 0x243   :  { %v3353_v29 = vrot.slane %v2664_v28, 2  ;;  %v2640_v30 = vpop.f32.mrf.mxu1 }
 0x245   :  { %v3465_v32 = vsel %vm3382_vm3, %v3352_v27, %v3353_v29 }
 0x246   :  { %v3466_v33 = vsel %vm3384_vm4, %v3464_v31, %v3465_v32 }
 0x247   :  { %3557 = vst [vmem:[%s5185_s2 + $0xd8] sm:$0xff] %v3466_v33 }
 0x249   :  { %v2653_v34 = vpop.f32.mrf.mxu2 }
 0x24a   :  { %v2666_v35 = vpop.f32.mrf.mxu3  ;;  %v2677_v36 = vpop.f32.mrf.mxu0 }
 0x24b   :  { %v2690_v37 = vpop.f32.mrf.mxu1 }
 0x24c   :  { %v3354_v38 = vrot.slane %v2690_v37, 6 }
 0x24d   :  { %4304 = vmatmul.msk.bf16.vlgmr.msra.gmra.mxu0 %vm766_vm1, %v4993_v23  ;;  %4305 = vmatmul.msk.bf16.vlgmr.msra.gmra.mxu1 %vm766_vm1, %v4993_v23 }
 0x24e   :  { %4306 = vmatmul.msk.bf16.vlgmr.msra.gmra.mxu2 %vm766_vm1, %v4993_v23  ;;  %v3467_v45 = vsel %vm3380_vm2, %v2677_v36, %v3354_v38 }
 0x251   :  { %v2703_v39 = vpop.f32.mrf.mxu2 }
 0x252   :  { %v3355_v40 = vrot.slane %v2703_v39, 4  ;;  %v2716_v41 = vpop.f32.mrf.mxu3  ;;  %v2679_v42 = vpop.f32.mrf.mxu0 }
 0x253   :  { %v3356_v43 = vrot.slane %v2716_v41, 2  ;;  %v2692_v44 = vpop.f32.mrf.mxu1 }
 0x255   :  { %v3468_v46 = vsel %vm3382_vm3, %v3355_v40, %v3356_v43 }
 0x256   :  { %v3469_v47 = vsel %vm3384_vm4, %v3467_v45, %v3468_v46 }
 0x257   :  { %3558 = vst [vmem:[%s5185_s2 + $0xe0] sm:$0xff] %v3469_v47 }
 0x259   :  { %v2705_v48 = vpop.f32.mrf.mxu2 }
 0x25a   :  { %v2718_v49 = vpop.f32.mrf.mxu3  ;;  %v2729_v23 = vpop.f32.mrf.mxu0 }
 0x25b   :  { %v2742_v50 = vpop.f32.mrf.mxu1 }
 0x25c   :  { %v3357_v51 = vrot.slane %v2742_v50, 6 }
 0x25e   :  { %v3470_v57 = vsel %vm3380_vm2, %v2729_v23, %v3357_v51 }
 0x261   :  { %v2755_v52 = vpop.f32.mrf.mxu2 }
 0x262   :  { %v3358_v53 = vrot.slane %v2755_v52, 4  ;;  %v2768_v54 = vpop.f32.mrf.mxu3  ;;  %v2731_v55 = vpop.f32.mrf.mxu0 }
 0x263   :  { %v3359_v11 = vrot.slane %v2768_v54, 2  ;;  %v2744_v56 = vpop.f32.mrf.mxu1 }
 0x265   :  { %v3471_v58 = vsel %vm3382_vm3, %v3358_v53, %v3359_v11 }
 0x266   :  { %v3472_v59 = vsel %vm3384_vm4, %v3470_v57, %v3471_v58 }
 0x267   :  { %3559 = vst [vmem:[%s5185_s2 + $0xe8] sm:$0xff] %v3472_v59 }
 0x269   :  { %v2757_v60 = vpop.f32.mrf.mxu2 }
 0x26a   :  { %v2770_v61 = vpop.f32.mrf.mxu3  ;;  %v2781_v62 = vpop.f32.mrf.mxu0 }
 0x26b   :  { %v2794_v63 = vpop.f32.mrf.mxu1 }
 0x26c   :  { %v3360_v0 = vrot.slane %v2794_v63, 6 }
 0x26e   :  { %v3473_v8 = vsel %vm3380_vm2, %v2781_v62, %v3360_v0 }
 0x271   :  { %v2807_v1 = vpop.f32.mrf.mxu2 }
 0x272   :  { %v3361_v2 = vrot.slane %v2807_v1, 4  ;;  %v2820_v3 = vpop.f32.mrf.mxu3  ;;  %v2783_v4 = vpop.f32.mrf.mxu0 }
 0x273   :  { %v3362_v5 = vrot.slane %v2820_v3, 2  ;;  %v2796_v7 = vpop.f32.mrf.mxu1 }
 0x275   :  { %v3474_v9 = vsel %vm3382_vm3, %v3361_v2, %v3362_v5 }
 0x276   :  { %v3475_v10 = vsel %vm3384_vm4, %v3473_v8, %v3474_v9 }
 0x277   :  { %3560 = vst [vmem:[%s5185_s2 + $0xf0] sm:$0xff] %v3475_v10 }
 0x279   :  { %v2809_v12 = vpop.f32.mrf.mxu2 }
 0x27a   :  { %v2822_v13 = vpop.f32.mrf.mxu3  ;;  %v2833_v14 = vpop.f32.mrf.mxu0 }
 0x27b   :  { %v2846_v15 = vpop.f32.mrf.mxu1 }
 0x27c   :  { %v3363_v16 = vrot.slane %v2846_v15, 6 }
 0x27e   :  { %v3476_v24 = vsel %vm3380_vm2, %v2833_v14, %v3363_v16 }
 0x281   :  { %v2859_v17 = vpop.f32.mrf.mxu2 }
 0x282   :  { %v3364_v18 = vrot.slane %v2859_v17, 4  ;;  %v2872_v19 = vpop.f32.mrf.mxu3  ;;  %v2835_v20 = vpop.f32.mrf.mxu0 }
 0x283   :  { %v3365_v21 = vrot.slane %v2872_v19, 2  ;;  %v2848_v22 = vpop.f32.mrf.mxu1 }
 0x285   :  { %v3477_v25 = vsel %vm3382_vm3, %v3364_v18, %v3365_v21 }
 0x286   :  { %v3478_v26 = vsel %vm3384_vm4, %v3476_v24, %v3477_v25 }
 0x287   :  { %3561 = vst [vmem:[%s5185_s2 + $0xf8] sm:$0xff] %v3478_v26 }
 0x289   :  { %v2861_v27 = vpop.f32.mrf.mxu2 }
 0x28a   :  { %v2874_v28 = vpop.f32.mrf.mxu3  ;;  %v2885_v6 = vpop.f32.mrf.mxu0 }
 0x28b   :  { %v2898_v29 = vpop.f32.mrf.mxu1 }
 0x28c   :  { %v3366_v30 = vrot.slane %v2898_v29, 6 }
 0x28e   :  { %v3479_v37 = vsel %vm3380_vm2, %v2885_v6, %v3366_v30 }
 0x291   :  { %v2911_v31 = vpop.f32.mrf.mxu2 }
 0x292   :  { %v3367_v32 = vrot.slane %v2911_v31, 4  ;;  %v2924_v33 = vpop.f32.mrf.mxu3  ;;  %v2887_v34 = vpop.f32.mrf.mxu0 }
 0x293   :  { %v3368_v35 = vrot.slane %v2924_v33, 2  ;;  %v2900_v36 = vpop.f32.mrf.mxu1 }
 0x295   :  { %v3480_v38 = vsel %vm3382_vm3, %v3367_v32, %v3368_v35 }
 0x296   :  { %v3481_v39 = vsel %vm3384_vm4, %v3479_v37, %v3480_v38 }
 0x297   :  { %3562 = vst [vmem:[%s5185_s2 + $0x100] sm:$0xff] %v3481_v39 }
 0x299   :  { %v2913_v40 = vpop.f32.mrf.mxu2 }
 0x29a   :  { %v2926_v41 = vpop.f32.mrf.mxu3  ;;  %v2937_v42 = vpop.f32.mrf.mxu0 }
 0x29b   :  { %v2950_v43 = vpop.f32.mrf.mxu1 }
 0x29c   :  { %v3369_v44 = vrot.slane %v2950_v43, 6 }
 0x29e   :  { %v3482_v50 = vsel %vm3380_vm2, %v2937_v42, %v3369_v44 }
 0x2a1   :  { %v2963_v45 = vpop.f32.mrf.mxu2 }
 0x2a2   :  { %v3370_v46 = vrot.slane %v2963_v45, 4  ;;  %v2976_v47 = vpop.f32.mrf.mxu3  ;;  %v2939_v48 = vpop.f32.mrf.mxu0 }
 0x2a3   :  { %v3371_v49 = vrot.slane %v2976_v47, 2  ;;  %v2952_v23 = vpop.f32.mrf.mxu1 }
 0x2a5   :  { %v3483_v51 = vsel %vm3382_vm3, %v3370_v46, %v3371_v49 }
 0x2a6   :  { %v3484_v52 = vsel %vm3384_vm4, %v3482_v50, %v3483_v51 }
 0x2a7   :  { %3563 = vst [vmem:[%s5185_s2 + $0x108] sm:$0xff] %v3484_v52 }
 0x2a9   :  { %v2965_v53 = vpop.f32.mrf.mxu2 }
 0x2aa   :  { %v2978_v54 = vpop.f32.mrf.mxu3  ;;  %v2989_v55 = vpop.f32.mrf.mxu0 }
 0x2ab   :  { %v3002_v11 = vpop.f32.mrf.mxu1 }
 0x2ac   :  { %v3372_v56 = vrot.slane %v3002_v11, 6 }
 0x2ae   :  { %v3485_v63 = vsel %vm3380_vm2, %v2989_v55, %v3372_v56 }
 0x2b1   :  { %v3015_v57 = vpop.f32.mrf.mxu2 }
 0x2b2   :  { %v3373_v58 = vrot.slane %v3015_v57, 4  ;;  %v3028_v59 = vpop.f32.mrf.mxu3  ;;  %v2991_v60 = vpop.f32.mrf.mxu0 }
 0x2b3   :  { %v3374_v61 = vrot.slane %v3028_v59, 2  ;;  %v3004_v62 = vpop.f32.mrf.mxu1 }
 0x2b5   :  { %v3486_v0 = vsel %vm3382_vm3, %v3373_v58, %v3374_v61 }
 0x2b6   :  { %v3487_v1 = vsel %vm3384_vm4, %v3485_v63, %v3486_v0 }
 0x2b7   :  { %3564 = vst [vmem:[%s5185_s2 + $0x110] sm:$0xff] %v3487_v1 }
 0x2b9   :  { %v3017_v2 = vpop.f32.mrf.mxu2 }
 0x2ba   :  { %v3030_v3 = vpop.f32.mrf.mxu3  ;;  %v3041_v4 = vpop.f32.mrf.mxu0 }
 0x2bb   :  { %v3054_v5 = vpop.f32.mrf.mxu1 }
 0x2bc   :  { %v3375_v7 = vrot.slane %v3054_v5, 6 }
 0x2be   :  { %v3488_v15 = vsel %vm3380_vm2, %v3041_v4, %v3375_v7 }
 0x2c1   :  { %v3067_v8 = vpop.f32.mrf.mxu2 }
 0x2c2   :  { %v3376_v9 = vrot.slane %v3067_v8, 4  ;;  %v3080_v10 = vpop.f32.mrf.mxu3  ;;  %v3043_v12 = vpop.f32.mrf.mxu0 }
 0x2c3   :  { %v3377_v13 = vrot.slane %v3080_v10, 2  ;;  %v3056_v14 = vpop.f32.mrf.mxu1 }
 0x2c5   :  { %v3489_v16 = vsel %vm3382_vm3, %v3376_v9, %v3377_v13 }
 0x2c6   :  { %v3490_v17 = vsel %vm3384_vm4, %v3488_v15, %v3489_v16 }
 0x2c7   :  { %3565 = vst [vmem:[%s5185_s2 + $0x118] sm:$0xff] %v3490_v17 }
 0x2c9   :  { %v3069_v18 = vpop.f32.mrf.mxu2 }
 0x2ca   :  { %v3093_v19 = vpop.f32.mrf.mxu0  ;;  %v3082_v20 = vpop.f32.mrf.mxu3 }
 0x2cb   :  { %v3106_v21 = vpop.f32.mrf.mxu1 }
 0x2cc   :  { %v3378_v22 = vrot.slane %v3106_v21, 6 }
 0x2ce   :  { %v3491_v24 = vsel %vm3380_vm2, %v3093_v19, %v3378_v22 }
 0x2d1   :  { %v3119_v25 = vpop.f32.mrf.mxu2 }
 0x2d2   :  { %v3379_v26 = vrot.slane %v3119_v25, 4  ;;  %v3095_v27 = vpop.f32.mrf.mxu0 }
 0x2d3   :  { %v3108_v28 = vpop.f32.mrf.mxu1 }
 0x2d4   :  { %v3492_v6 = vsel %vm3384_vm4, %v3491_v24, %v3379_v26 }
 0x2d5   :  { %3566 = vst [vmem:[%s5185_s2 + $0x120] sm:$0x3f] %v3492_v6 }
 0x2d9   :  { %v3121_v29 = vpop.f32.mrf.mxu2 }
 0x2da   :  { %3571 = vsyncpa [#allocation3], 1 }

// kernel: generator_forward.6
= control target key start
LH: loop header
LB: loop body
LE: loop exit
PB: predicated region body
PF: predicated region fallthrough
CT: control target
= control target key end

     0   :  { %vm2162_vm0 = vcmask 523264   ;;  %vm3008_vm1 = vcmask 293888   ;;  %vm3021_vm2 = vcmask 289792   ;;  %s7386_s1 = inlined_call_operand.vmem [shape: bf16[1344,420], index: 1, kind: input, shape index: {}]   ;;  %s7387_s0 = inlined_call_operand.vmem [shape: bf16[28,1344], index: 0, kind: input, shape index: {}]   ;;  %s7388_s2 = inlined_call_operand.vmem [shape: f32[28,420], index: 2, kind: output, shape index: {}]  }
   0x1   :  { %v3229_v0 = vld [vmem:[%s7386_s1 + $0xe0] sm:$0xf]  ;;  %v4519_v1 = vld [vmem:[%s7386_s1 + $0xec] sm:$0xf0] }
   0x2   :  { %v3357_v2 = vld [vmem:[%s7386_s1 + $0x1e0] sm:$0xf]  ;;  %v3230_v3 = vor.u32 %v4519_v1, %v3229_v0  ;;  %v4551_v4 = vld [vmem:[%s7386_s1 + $0x1ec] sm:$0xf0] }
   0x3   :  { %v3485_v5 = vld [vmem:[%s7386_s1 + $0x2e0] sm:$0xf]  ;;  %v4583_v6 = vld [vmem:[%s7386_s1 + $0x2ec] sm:$0xf0]  ;;  %v3358_v7 = vor.u32 %v4551_v4, %v3357_v2 }
   0x4   :  { %v3486_v8 = vor.u32 %v4583_v6, %v3485_v5  ;;  %v3613_v9 = vld [vmem:[%s7386_s1 + $0x3e0] sm:$0xf]  ;;  %v4615_v10 = vld [vmem:[%s7386_s1 + $0x3ec] sm:$0xf0]  ;;  %2169 = vmatpush.bf16.msra.mxu0 %v3230_v3 }
   0x5   :  { %v3213_v11 = vld [vmem:[%s7386_s1 + $0xc0] sm:$0xf]  ;;  %v3614_v12 = vor.u32 %v4615_v10, %v3613_v9  ;;  %v4515_v13 = vld [vmem:[%s7386_s1 + $0xcc] sm:$0xf0]  ;;  %2188 = vmatpush.bf16.msra.mxu1 %v3358_v7 }
   0x6   :  { %v3341_v14 = vld [vmem:[%s7386_s1 + $0x1c0] sm:$0xf]  ;;  %v4547_v15 = vld [vmem:[%s7386_s1 + $0x1cc] sm:$0xf0]  ;;  %2207 = vmatpush.bf16.msra.mxu2 %v3486_v8  ;;  %v3214_v16 = vor.u32 %v4515_v13, %v3213_v11 }
   0x7   :  { %v3342_v17 = vor.u32 %v4547_v15, %v3341_v14  ;;  %v3469_v18 = vld [vmem:[%s7386_s1 + $0x2c0] sm:$0xf]  ;;  %v4579_v19 = vld [vmem:[%s7386_s1 + $0x2cc] sm:$0xf0]  ;;  %2226 = vmatpush.bf16.msra.mxu3 %v3614_v12 }
   0x8   :  { %v3597_v20 = vld [vmem:[%s7386_s1 + $0x3c0] sm:$0xf]  ;;  %v3470_v21 = vor.u32 %v4579_v19, %v3469_v18  ;;  %v4611_v22 = vld [vmem:[%s7386_s1 + $0x3cc] sm:$0xf0]  ;;  %2170 = vmatpush.bf16.msra.mxu0 %v3214_v16 }
   0x9   :  { %v3197_v23 = vld [vmem:[%s7386_s1 + $0xa0] sm:$0xf]  ;;  %v4511_v24 = vld [vmem:[%s7386_s1 + $0xac] sm:$0xf0]  ;;  %v3598_v25 = vor.u32 %v4611_v22, %v3597_v20  ;;  %2189 = vmatpush.bf16.msra.mxu1 %v3342_v17 }
   0xa   :  { %v3325_v26 = vld [vmem:[%s7386_s1 + $0x1a0] sm:$0xf]  ;;  %v4543_v27 = vld [vmem:[%s7386_s1 + $0x1ac] sm:$0xf0]  ;;  %v3198_v29 = vor.u32 %v4511_v24, %v3197_v23  ;;  %2208 = vmatpush.bf16.msra.mxu2 %v3470_v21 }
   0xb   :  { %v3453_v28 = vld [vmem:[%s7386_s1 + $0x2a0] sm:$0xf]  ;;  %v4575_v30 = vld [vmem:[%s7386_s1 + $0x2ac] sm:$0xf0]  ;;  %v3326_v33 = vor.u32 %v4543_v27, %v3325_v26  ;;  %2227 = vmatpush.bf16.msra.mxu3 %v3598_v25 }
   0xc   :  { %v3581_v31 = vld [vmem:[%s7386_s1 + $0x3a0] sm:$0xf]  ;;  %v4607_v32 = vld [vmem:[%s7386_s1 + $0x3ac] sm:$0xf0]  ;;  %v3454_v34 = vor.u32 %v4575_v30, %v3453_v28  ;;  %2171 = vmatpush.bf16.msra.mxu0 %v3198_v29  ;;  %v4472_v29 = vld [vmem:[%s7387_s0 + $0x28] sm:$0xf0] }
   0xd   :  { %v3181_v35 = vld [vmem:[%s7386_s1 + $0x80] sm:$0xf]  ;;  %v4507_v36 = vld [vmem:[%s7386_s1 + $0x8c] sm:$0xf0]  ;;  %v3582_v38 = vor.u32 %v4607_v32, %v3581_v31  ;;  %2190 = vmatpush.bf16.msra.mxu1 %v3326_v33  ;;  %v4467_v30 = vld [vmem:[%s7387_s0 + $0x4] sm:$0xf] }
   0xe   :  { %v3309_v37 = vld [vmem:[%s7386_s1 + $0x180] sm:$0xf]  ;;  %v4539_v39 = vld [vmem:[%s7386_s1 + $0x18c] sm:$0xf0]  ;;  %v3182_v44 = vor.u32 %v4507_v36, %v3181_v35  ;;  %2209 = vmatpush.bf16.msra.mxu2 %v3454_v34  ;;  %v3037_v35 = vld [vmem:[%s7387_s0 + $0x8] sm:$0xf] }
   0xf   :  { %v3437_v40 = vld [vmem:[%s7386_s1 + $0x280] sm:$0xf]  ;;  %v4571_v41 = vld [vmem:[%s7386_s1 + $0x28c] sm:$0xf0]  ;;  %v3310_v45 = vor.u32 %v4539_v39, %v3309_v37  ;;  %2228 = vmatpush.bf16.msra.mxu3 %v3582_v38 }
  0x10   :  { %v3565_v42 = vld [vmem:[%s7386_s1 + $0x380] sm:$0xf]  ;;  %v4603_v43 = vld [vmem:[%s7386_s1 + $0x38c] sm:$0xf0]  ;;  %v3438_v46 = vor.u32 %v4571_v41, %v3437_v40  ;;  %2172 = vmatpush.bf16.msra.mxu0 %v3182_v44  ;;  %v4473_v40 = vld [vmem:[%s7387_s0 + $0x30] sm:$0xf0] }
  0x11   :  { %v3165_v47 = vld [vmem:[%s7386_s1 + $0x60] sm:$0xf]  ;;  %v4503_v48 = vld [vmem:[%s7386_s1 + $0x6c] sm:$0xf0]  ;;  %v3566_v50 = vor.u32 %v4603_v43, %v3565_v42  ;;  %2191 = vmatpush.bf16.msra.mxu1 %v3310_v45  ;;  %v4468_v41 = vld [vmem:[%s7387_s0 + $0xc] sm:$0xf] }
  0x12   :  { %v3293_v49 = vld [vmem:[%s7386_s1 + $0x160] sm:$0xf]  ;;  %v4535_v51 = vld [vmem:[%s7386_s1 + $0x16c] sm:$0xf0]  ;;  %v3166_v56 = vor.u32 %v4503_v48, %v3165_v47  ;;  %2210 = vmatpush.bf16.msra.mxu2 %v3438_v46  ;;  %v3039_v42 = vld [vmem:[%s7387_s0 + $0x34] sm:$0xf0] }
  0x13   :  { %v3421_v52 = vld [vmem:[%s7386_s1 + $0x260] sm:$0xf]  ;;  %v4567_v53 = vld [vmem:[%s7386_s1 + $0x26c] sm:$0xf0]  ;;  %v3294_v57 = vor.u32 %v4535_v51, %v3293_v49  ;;  %2229 = vmatpush.bf16.msra.mxu3 %v3566_v50 }
  0x14   :  { %v3549_v54 = vld [vmem:[%s7386_s1 + $0x360] sm:$0xf]  ;;  %v4599_v55 = vld [vmem:[%s7386_s1 + $0x36c] sm:$0xf0]  ;;  %v3422_v58 = vor.u32 %v4567_v53, %v3421_v52  ;;  %2173 = vmatpush.bf16.msra.mxu0 %v3166_v56 }
  0x15   :  { %v3149_v59 = vld [vmem:[%s7386_s1 + $0x40] sm:$0xf]  ;;  %v4499_v60 = vld [vmem:[%s7386_s1 + $0x4c] sm:$0xf0]  ;;  %v3550_v62 = vor.u32 %v4599_v55, %v3549_v54  ;;  %2192 = vmatpush.bf16.msra.mxu1 %v3294_v57  ;;  %v5090_v54 = vor.u32 %v4473_v40, %v3037_v35  ;;  %v5098_v57 = vor.u32 %v4468_v41, %v3039_v42 }
  0x16   :  { %v3277_v61 = vld [vmem:[%s7386_s1 + $0x140] sm:$0xf]  ;;  %v4531_v63 = vld [vmem:[%s7386_s1 + $0x14c] sm:$0xf0]  ;;  %v3150_v4 = vor.u32 %v4499_v60, %v3149_v59  ;;  %2211 = vmatpush.bf16.msra.mxu2 %v3422_v58 }
  0x17   :  { %v3405_v0 = vld [vmem:[%s7386_s1 + $0x240] sm:$0xf]  ;;  %v4563_v1 = vld [vmem:[%s7386_s1 + $0x24c] sm:$0xf0]  ;;  %v3278_v5 = vor.u32 %v4531_v63, %v3277_v61  ;;  %2230 = vmatpush.bf16.msra.mxu3 %v3550_v62 }
  0x18   :  { %v3533_v2 = vld [vmem:[%s7386_s1 + $0x340] sm:$0xf]  ;;  %v4595_v3 = vld [vmem:[%s7386_s1 + $0x34c] sm:$0xf0]  ;;  %v3406_v6 = vor.u32 %v4563_v1, %v3405_v0  ;;  %2174 = vmatpush.bf16.msra.mxu0 %v3150_v4 }
  0x19   :  { %v3133_v7 = vld [vmem:[%s7386_s1 + $0x20] sm:$0xf]  ;;  %v4495_v8 = vld [vmem:[%s7386_s1 + $0x2c] sm:$0xf0]  ;;  %v3534_v10 = vor.u32 %v4595_v3, %v3533_v2  ;;  %2193 = vmatpush.bf16.msra.mxu1 %v3278_v5 }
  0x1a   :  { %v3261_v9 = vld [vmem:[%s7386_s1 + $0x120] sm:$0xf]  ;;  %v4527_v11 = vld [vmem:[%s7386_s1 + $0x12c] sm:$0xf0]  ;;  %v3134_v17 = vor.u32 %v4495_v8, %v3133_v7  ;;  %2212 = vmatpush.bf16.msra.mxu2 %v3406_v6 }
  0x1b   :  { %v3389_v12 = vld [vmem:[%s7386_s1 + $0x220] sm:$0xf]  ;;  %v4559_v13 = vld [vmem:[%s7386_s1 + $0x22c] sm:$0xf0]  ;;  %v3262_v21 = vor.u32 %v4527_v11, %v3261_v9  ;;  %2231 = vmatpush.bf16.msra.mxu3 %v3534_v10 }
  0x1c   :  { %v3517_v14 = vld [vmem:[%s7386_s1 + $0x320] sm:$0xf]  ;;  %v4591_v15 = vld [vmem:[%s7386_s1 + $0x32c] sm:$0xf0]  ;;  %v3390_v22 = vor.u32 %v4559_v13, %v3389_v12  ;;  %2175 = vmatpush.bf16.msra.mxu0 %v3134_v17 }
  0x1d   :  { %v3117_v16 = vld [vmem:[%s7386_s1] sm:$0xf]  ;;  %v4491_v18 = vld [vmem:[%s7386_s1 + $0xc] sm:$0xf0]  ;;  %v3518_v26 = vor.u32 %v4591_v15, %v3517_v14  ;;  %2194 = vmatpush.bf16.msra.mxu1 %v3262_v21 }
  0x1e   :  { %v3245_v19 = vld [vmem:[%s7386_s1 + $0x100] sm:$0xf]  ;;  %v4523_v20 = vld [vmem:[%s7386_s1 + $0x10c] sm:$0xf0]  ;;  %v3118_v34 = vor.u32 %v4491_v18, %v3117_v16  ;;  %2213 = vmatpush.bf16.msra.mxu2 %v3390_v22 }
  0x1f   :  { %v3373_v23 = vld [vmem:[%s7386_s1 + $0x200] sm:$0xf]  ;;  %v4555_v24 = vld [vmem:[%s7386_s1 + $0x20c] sm:$0xf0]  ;;  %v3246_v38 = vor.u32 %v4523_v20, %v3245_v19  ;;  %2232 = vmatpush.bf16.msra.mxu3 %v3518_v26  ;;  %v4483_v26 = vld [vmem:[%s7387_s0 + $0x80] sm:$0x30] }
  0x20   :  { %v3501_v25 = vld [vmem:[%s7386_s1 + $0x300] sm:$0xf]  ;;  %v4587_v27 = vld [vmem:[%s7386_s1 + $0x30c] sm:$0xf0]  ;;  %v3374_v39 = vor.u32 %v4555_v24, %v3373_v23  ;;  %2176 = vmatpush.bf16.msra.mxu0 %v3118_v34 }
  0x21   :  { %v3029_v28 = vld [vmem:[%s7387_s0] sm:$0xf]  ;;  %v3031_v31 = vld [vmem:[%s7387_s0 + $0x2c] sm:$0xf0]  ;;  %v3502_v43 = vor.u32 %v4587_v27, %v3501_v25  ;;  %2195 = vmatpush.bf16.msra.mxu1 %v3246_v38  ;;  %v3073_v25 = vld [vmem:[%s7387_s0 + $0x58] sm:$0xf] }
  0x22   :  { %v3997_v32 = vld [vmem:[%s7386_s1 + $0x6e0] sm:$0xf]  ;;  %v4711_v33 = vld [vmem:[%s7386_s1 + $0x6ec] sm:$0xf0]  ;;  %v5077_v48 = vor.u32 %v4472_v29, %v3029_v28  ;;  %v5088_v53 = vor.u32 %v4467_v30, %v3031_v31  ;;  %2214 = vmatpush.bf16.msra.mxu2 %v3374_v39  ;;  %v4478_v28 = vld [vmem:[%s7387_s0 + $0x5c] sm:$0xf] }
  0x23   :  { %v3869_v36 = vld [vmem:[%s7386_s1 + $0x5e0] sm:$0xf]  ;;  %v4679_v37 = vld [vmem:[%s7386_s1 + $0x5ec] sm:$0xf0]  ;;  %v3998_v44 = vor.u32 %v4711_v33, %v3997_v32  ;;  %2233 = vmatpush.bf16.msra.mxu3 %v3502_v43  ;;  %v3075_v29 = vld [vmem:[%s7387_s0 + $0x84] sm:$0x30] }
  0x24   :  { %v3741_v45 = vld [vmem:[%s7386_s1 + $0x4e0] sm:$0xf]  ;;  %v4647_v46 = vld [vmem:[%s7386_s1 + $0x4ec] sm:$0xf0]  ;;  %7397 = vst [vmem:[#allocation2_spill] sm:$0xff] %v5077_v48  ;;  %v3870_v49 = vor.u32 %v4679_v37, %v3869_v36  ;;  %2177 = vmatmul.bf16.vlgmr.msra.gmra.mxu0 %v5077_v48  ;;  %2196 = vmatmul.bf16.vlgmr.msra.gmra.mxu1 %v5088_v53 }
  0x25   :  { %v4125_v47 = vld [vmem:[%s7386_s1 + $0x7e0] sm:$0xf]  ;;  %v4743_v50 = vld [vmem:[%s7386_s1 + $0x7ec] sm:$0xf0]  ;;  %7398 = vst [vmem:[#allocation3_spill] sm:$0xff] %v5088_v53  ;;  %v3742_v58 = vor.u32 %v4647_v46, %v3741_v45  ;;  %2215 = vmatmul.bf16.vlgmr.msra.gmra.mxu2 %v5090_v54 }
  0x26   :  { %v3981_v51 = vld [vmem:[%s7386_s1 + $0x6c0] sm:$0xf]  ;;  %v4707_v52 = vld [vmem:[%s7386_s1 + $0x6cc] sm:$0xf0]  ;;  %2283 = vmatpush.bf16.msrb.mxu2 %v3998_v44  ;;  %v4126_v59 = vor.u32 %v4743_v50, %v4125_v47  ;;  %2264 = vmatpush.bf16.msrb.mxu1 %v3870_v49  ;;  %v4484_v36 = vld [vmem:[%s7387_s0 + $0x88] sm:$0x30]  ;;  %v5209_v44 = vor.u32 %v4483_v26, %v3073_v25  ;;  %v5220_v50 = vor.u32 %v4478_v28, %v3075_v29 }
  0x27   :  { %v3853_v55 = vld [vmem:[%s7386_s1 + $0x5c0] sm:$0xf]  ;;  %v4675_v56 = vld [vmem:[%s7386_s1 + $0x5cc] sm:$0xf0]  ;;  %v3982_v60 = vor.u32 %v4707_v52, %v3981_v51  ;;  %2234 = vmatmul.bf16.vlgmr.msra.gmra.mxu3 %v5098_v57  ;;  %2245 = vmatpush.bf16.msrb.mxu0 %v3742_v58  ;;  %v4479_v37 = vld [vmem:[%s7387_s0 + $0x64] sm:$0xf] }
  0x28   :  { %v3725_v61 = vld [vmem:[%s7386_s1 + $0x4c0] sm:$0xf]  ;;  %v4643_v62 = vld [vmem:[%s7386_s1 + $0x4cc] sm:$0xf0]  ;;  %v3854_v0 = vor.u32 %v4675_v56, %v3853_v55  ;;  %2302 = vmatpush.bf16.msrb.mxu3 %v4126_v59 }
  0x29   :  { %v4109_v63 = vld [vmem:[%s7386_s1 + $0x7c0] sm:$0xf]  ;;  %v4739_v1 = vld [vmem:[%s7386_s1 + $0x7cc] sm:$0xf0]  ;;  %v3726_v6 = vor.u32 %v4643_v62, %v3725_v61 }
  0x2a   :  { %v3965_v2 = vld [vmem:[%s7386_s1 + $0x6a0] sm:$0xf]  ;;  %v4703_v3 = vld [vmem:[%s7386_s1 + $0x6ac] sm:$0xf0]  ;;  %2284 = vmatpush.bf16.msrb.mxu2 %v3982_v60  ;;  %v4110_v7 = vor.u32 %v4739_v1, %v4109_v63  ;;  %2265 = vmatpush.bf16.msrb.mxu1 %v3854_v0 }
  0x2b   :  { %v3837_v4 = vld [vmem:[%s7386_s1 + $0x5a0] sm:$0xf]  ;;  %v4671_v5 = vld [vmem:[%s7386_s1 + $0x5ac] sm:$0xf0]  ;;  %v3966_v8 = vor.u32 %v4703_v3, %v3965_v2  ;;  %2246 = vmatpush.bf16.msrb.mxu0 %v3726_v6 }
  0x2c   :  { %v3709_v9 = vld [vmem:[%s7386_s1 + $0x4a0] sm:$0xf]  ;;  %v4639_v10 = vld [vmem:[%s7386_s1 + $0x4ac] sm:$0xf0]  ;;  %v3838_v12 = vor.u32 %v4671_v5, %v3837_v4  ;;  %2303 = vmatpush.bf16.msrb.mxu3 %v4110_v7 }
  0x2d   :  { %v4093_v11 = vld [vmem:[%s7386_s1 + $0x7a0] sm:$0xf]  ;;  %v4735_v13 = vld [vmem:[%s7386_s1 + $0x7ac] sm:$0xf0]  ;;  %v3710_v18 = vor.u32 %v4639_v10, %v3709_v9 }
  0x2e   :  { %v3949_v14 = vld [vmem:[%s7386_s1 + $0x680] sm:$0xf]  ;;  %v4699_v15 = vld [vmem:[%s7386_s1 + $0x68c] sm:$0xf0]  ;;  %2285 = vmatpush.bf16.msrb.mxu2 %v3966_v8  ;;  %v4094_v22 = vor.u32 %v4735_v13, %v4093_v11  ;;  %2266 = vmatpush.bf16.msrb.mxu1 %v3838_v12 }
  0x2f   :  { %v3821_v16 = vld [vmem:[%s7386_s1 + $0x580] sm:$0xf]  ;;  %v4667_v17 = vld [vmem:[%s7386_s1 + $0x58c] sm:$0xf0]  ;;  %v3950_v23 = vor.u32 %v4699_v15, %v3949_v14  ;;  %2247 = vmatpush.bf16.msrb.mxu0 %v3710_v18 }
  0x30   :  { %v3693_v19 = vld [vmem:[%s7386_s1 + $0x480] sm:$0xf]  ;;  %v4635_v20 = vld [vmem:[%s7386_s1 + $0x48c] sm:$0xf0]  ;;  %v3822_v27 = vor.u32 %v4667_v17, %v3821_v16  ;;  %2304 = vmatpush.bf16.msrb.mxu3 %v4094_v22 }
  0x31   :  { %v4077_v21 = vld [vmem:[%s7386_s1 + $0x780] sm:$0xf]  ;;  %v4731_v24 = vld [vmem:[%s7386_s1 + $0x78c] sm:$0xf0]  ;;  %v3694_v35 = vor.u32 %v4635_v20, %v3693_v19 }
  0x32   :  { %v3933_v30 = vld [vmem:[%s7386_s1 + $0x660] sm:$0xf]  ;;  %v4695_v31 = vld [vmem:[%s7386_s1 + $0x66c] sm:$0xf0]  ;;  %2286 = vmatpush.bf16.msrb.mxu2 %v3950_v23  ;;  %v4078_v39 = vor.u32 %v4731_v24, %v4077_v21  ;;  %2267 = vmatpush.bf16.msrb.mxu1 %v3822_v27 }
  0x33   :  { %v3081_v32 = vld [vmem:[%s7387_s0 + $0x60] sm:$0xf]  ;;  %v4663_v34 = vld [vmem:[%s7386_s1 + $0x56c] sm:$0xf0]  ;;  %v3934_v40 = vor.u32 %v4695_v31, %v3933_v30  ;;  %2248 = vmatpush.bf16.msrb.mxu0 %v3694_v35  ;;  %v4474_v31 = vld [vmem:[%s7387_s0 + $0x38] sm:$0xf0] }
  0x34   :  { %v3805_v33 = vld [vmem:[%s7386_s1 + $0x560] sm:$0xf]  ;;  %v3083_v38 = vld [vmem:[%s7387_s0 + $0x8c] sm:$0x30]  ;;  %v5222_v51 = vor.u32 %v4484_v36, %v3081_v32  ;;  %2305 = vmatpush.bf16.msrb.mxu3 %v4078_v39  ;;  %2182 = vmatmul.bf16.gmra.mxu0 %v5209_v44  ;;  %v4469_v32 = vld [vmem:[%s7387_s0 + $0x14] sm:$0xf] }
  0x35   :  { %v3677_v41 = vld [vmem:[%s7386_s1 + $0x460] sm:$0xf]  ;;  %v4631_v42 = vld [vmem:[%s7386_s1 + $0x46c] sm:$0xf0]  ;;  %v3806_v45 = vor.u32 %v4663_v34, %v3805_v33  ;;  %v5230_v56 = vor.u32 %v4479_v37, %v3083_v38  ;;  %2201 = vmatmul.bf16.gmra.mxu1 %v5220_v50  ;;  %v4517_v37 = vld [vmem:[%s7386_s1 + $0xe4] sm:$0xf] }
  0x36   :  { %v4061_v43 = vld [vmem:[%s7386_s1 + $0x760] sm:$0xf]  ;;  %v4727_v46 = vld [vmem:[%s7386_s1 + $0x76c] sm:$0xf0]  ;;  %v3678_v58 = vor.u32 %v4631_v42, %v3677_v41  ;;  %2287 = vmatpush.bf16.msrb.mxu2 %v3934_v40  ;;  %v3231_v39 = vld [vmem:[%s7386_s1 + $0xf0] sm:$0xf0] }
  0x37   :  { %v3917_v47 = vld [vmem:[%s7386_s1 + $0x640] sm:$0xf]  ;;  %v4691_v49 = vld [vmem:[%s7386_s1 + $0x64c] sm:$0xf0]  ;;  %v4062_v59 = vor.u32 %v4727_v46, %v4061_v43  ;;  %2268 = vmatpush.bf16.msrb.mxu1 %v3806_v45  ;;  %2220 = vmatmul.bf16.gmra.mxu2 %v5222_v51  ;;  %v3053_v43 = vld [vmem:[%s7387_s0 + $0x18] sm:$0xf] }
  0x38   :  { %v3789_v52 = vld [vmem:[%s7386_s1 + $0x540] sm:$0xf]  ;;  %v4659_v55 = vld [vmem:[%s7386_s1 + $0x54c] sm:$0xf0]  ;;  %v3918_v60 = vor.u32 %v4691_v49, %v3917_v47  ;;  %2239 = vmatmul.bf16.gmra.mxu3 %v5230_v56  ;;  %2249 = vmatpush.bf16.msrb.mxu0 %v3678_v58  ;;  %v4475_v45 = vld [vmem:[%s7387_s0 + $0x40] sm:$0xf0] }
  0x39   :  { %v3661_v61 = vld [vmem:[%s7386_s1 + $0x440] sm:$0xf]  ;;  %v4627_v62 = vld [vmem:[%s7386_s1 + $0x44c] sm:$0xf0]  ;;  %v3790_v0 = vor.u32 %v4659_v55, %v3789_v52  ;;  %2306 = vmatpush.bf16.msrb.mxu3 %v4062_v59  ;;  %v4470_v46 = vld [vmem:[%s7387_s0 + $0x1c] sm:$0xf]  ;;  %v3234_v59 = vor.u32 %v4517_v37, %v3231_v39 }
  0x3a   :  { %v4045_v63 = vld [vmem:[%s7386_s1 + $0x740] sm:$0xf]  ;;  %v4723_v1 = vld [vmem:[%s7386_s1 + $0x74c] sm:$0xf0]  ;;  %v3662_v6 = vor.u32 %v4627_v62, %v3661_v61  ;;  %2288 = vmatpush.bf16.msrb.mxu2 %v3918_v60  ;;  %v3055_v49 = vld [vmem:[%s7387_s0 + $0x44] sm:$0xf0] }
  0x3b   :  { %v3901_v2 = vld [vmem:[%s7386_s1 + $0x620] sm:$0xf]  ;;  %v4687_v3 = vld [vmem:[%s7386_s1 + $0x62c] sm:$0xf0]  ;;  %v4046_v8 = vor.u32 %v4723_v1, %v4045_v63  ;;  %2269 = vmatpush.bf16.msrb.mxu1 %v3790_v0  ;;  %v4513_v62 = vld [vmem:[%s7386_s1 + $0xc4] sm:$0xf] }
  0x3c   :  { %v3773_v4 = vld [vmem:[%s7386_s1 + $0x520] sm:$0xf]  ;;  %v4655_v5 = vld [vmem:[%s7386_s1 + $0x52c] sm:$0xf0]  ;;  %v3902_v9 = vor.u32 %v4687_v3, %v3901_v2  ;;  %2250 = vmatpush.bf16.msrb.mxu0 %v3662_v6  ;;  %v3215_v2 = vld [vmem:[%s7386_s1 + $0xd0] sm:$0xf0]  ;;  %v5380_v6 = vor.u32 %v4470_v46, %v3055_v49 }
  0x3d   :  { %v3645_v7 = vld [vmem:[%s7386_s1 + $0x420] sm:$0xf]  ;;  %v4623_v10 = vld [vmem:[%s7386_s1 + $0x42c] sm:$0xf0]  ;;  %v3774_v13 = vor.u32 %v4655_v5, %v3773_v4  ;;  %2307 = vmatpush.bf16.msrb.mxu3 %v4046_v8  ;;  %v5378_v5 = vor.u32 %v4475_v45, %v3053_v43  ;;  %v4480_v37 = vld [vmem:[%s7387_s0 + $0x6c] sm:$0xf] }
  0x3e   :  { %v4029_v11 = vld [vmem:[%s7386_s1 + $0x720] sm:$0xf]  ;;  %v4719_v12 = vld [vmem:[%s7386_s1 + $0x72c] sm:$0xf0]  ;;  %v3646_v20 = vor.u32 %v4623_v10, %v3645_v7  ;;  %2289 = vmatpush.bf16.msrb.mxu2 %v3902_v9  ;;  %v4501_v43 = vld [vmem:[%s7386_s1 + $0x64] sm:$0xf] }
  0x3f   :  { %v3885_v14 = vld [vmem:[%s7386_s1 + $0x600] sm:$0xf]  ;;  %v4683_v15 = vld [vmem:[%s7386_s1 + $0x60c] sm:$0xf0]  ;;  %v4030_v24 = vor.u32 %v4719_v12, %v4029_v11  ;;  %2270 = vmatpush.bf16.msrb.mxu1 %v3774_v13  ;;  %v3218_v11 = vor.u32 %v4513_v62, %v3215_v2  ;;  %v3167_v45 = vld [vmem:[%s7386_s1 + $0x70] sm:$0xf0] }
  0x40   :  { %v3757_v16 = vld [vmem:[%s7386_s1 + $0x500] sm:$0xf]  ;;  %v4651_v17 = vld [vmem:[%s7386_s1 + $0x50c] sm:$0xf0]  ;;  %v3886_v25 = vor.u32 %v4683_v15, %v3885_v14  ;;  %2251 = vmatpush.bf16.msrb.mxu0 %v3646_v20  ;;  %v4509_v14 = vld [vmem:[%s7386_s1 + $0xa4] sm:$0xf]  ;;  %v3170_v62 = vor.u32 %v4501_v43, %v3167_v45 }
  0x41   :  { %v4445_v18 = vld [vmem:[%s7386_s1 + $0xa60] sm:$0xf]  ;;  %v4823_v19 = vld [vmem:[%s7386_s1 + $0xa6c] sm:$0xf0]  ;;  %v3758_v29 = vor.u32 %v4651_v17, %v3757_v16  ;;  %2308 = vmatpush.bf16.msrb.mxu3 %v4030_v24  ;;  %v3199_v16 = vld [vmem:[%s7386_s1 + $0xb0] sm:$0xf0] }
  0x42   :  { %v3629_v21 = vld [vmem:[%s7386_s1 + $0x400] sm:$0xf]  ;;  %v4807_v23 = vld [vmem:[%s7386_s1 + $0x9ec] sm:$0xf0]  ;;  %v4446_v34 = vor.u32 %v4823_v19, %v4445_v18  ;;  %2290 = vmatpush.bf16.msrb.mxu2 %v3886_v25  ;;  %v4481_v49 = vld [vmem:[%s7387_s0 + $0x74] sm:$0xf] }
  0x43   :  { %v4381_v22 = vld [vmem:[%s7386_s1 + $0x9e0] sm:$0xf]  ;;  %v4619_v26 = vld [vmem:[%s7386_s1 + $0x40c] sm:$0xf0]  ;;  %2271 = vmatpush.bf16.msrb.mxu1 %v3758_v29 }
  0x44   :  { %v4013_v27 = vld [vmem:[%s7386_s1 + $0x700] sm:$0xf]  ;;  %v4715_v28 = vld [vmem:[%s7386_s1 + $0x70c] sm:$0xf0]  ;;  %v4382_v38 = vor.u32 %v4807_v23, %v4381_v22  ;;  %v3630_v42 = vor.u32 %v4619_v26, %v3629_v21  ;;  %v3202_v22 = vor.u32 %v4509_v14, %v3199_v16  ;;  %v3583_v14 = vld [vmem:[%s7386_s1 + $0x3b0] sm:$0xf0] }
  0x45   :  { %v3045_v30 = vld [vmem:[%s7387_s0 + $0x10] sm:$0xf]  ;;  %v3047_v33 = vld [vmem:[%s7387_s0 + $0x3c] sm:$0xf0]  ;;  %v4014_v47 = vor.u32 %v4715_v28, %v4013_v27  ;;  %v4505_v27 = vld [vmem:[%s7386_s1 + $0x84] sm:$0xf] }
  0x46   :  { %v4253_v35 = vld [vmem:[%s7386_s1 + $0x8e0] sm:$0xf]  ;;  %v4775_v36 = vld [vmem:[%s7386_s1 + $0x8ec] sm:$0xf0]  ;;  %2363 = vmatpush.bf16.msra.mxu2 %v4446_v34  ;;  %v5365_v0 = vor.u32 %v4474_v31, %v3045_v30  ;;  %v5367_v1 = vor.u32 %v4469_v32, %v3047_v33  ;;  %2252 = vmatpush.bf16.msrb.mxu0 %v3630_v42  ;;  %v3183_v28 = vld [vmem:[%s7386_s1 + $0x90] sm:$0xf0] }
  0x47   :  { %v4429_v40 = vld [vmem:[%s7386_s1 + $0xa40] sm:$0xf]  ;;  %v4819_v41 = vld [vmem:[%s7386_s1 + $0xa4c] sm:$0xf0]  ;;  %v4254_v52 = vor.u32 %v4775_v36, %v4253_v35  ;;  %2340 = vmatpush.bf16.msra.mxu1 %v4382_v38  ;;  %2309 = vmatpush.bf16.msrb.mxu3 %v4014_v47  ;;  %v3186_v34 = vor.u32 %v4505_v27, %v3183_v28  ;;  %v3089_v35 = vld [vmem:[%s7387_s0 + $0x68] sm:$0xf] }
  0x48   :  { %v4237_v55 = vld [vmem:[%s7386_s1 + $0x8c0] sm:$0xf]  ;;  %v4771_v58 = vld [vmem:[%s7386_s1 + $0x8cc] sm:$0xf0]  ;;  %v4430_v63 = vor.u32 %v4819_v41, %v4429_v40  ;;  %2272 = vmatmul.bf16.vlgmr.msrb.gmra.mxu1 %v5367_v1  ;;  %2291 = vmatmul.bf16.vlgmr.msrb.gmra.mxu2 %v5378_v5  ;;  %v4485_v36 = vld [vmem:[%s7387_s0 + $0x90] sm:$0x30] }
  0x49   :  { %v4365_v60 = vld [vmem:[%s7386_s1 + $0x9c0] sm:$0xf]  ;;  %v4803_v61 = vld [vmem:[%s7386_s1 + $0x9cc] sm:$0xf0]  ;;  %v4238_v7 = vor.u32 %v4771_v58, %v4237_v55  ;;  %2253 = vmatmul.bf16.vlgmr.msrb.gmra.mxu0 %v5365_v0  ;;  %v3091_v38 = vld [vmem:[%s7387_s0 + $0x94] sm:$0x30] }
  0x4a   :  { %v4413_v3 = vld [vmem:[%s7386_s1 + $0xa20] sm:$0xf]  ;;  %v4815_v4 = vld [vmem:[%s7386_s1 + $0xa2c] sm:$0xf0]  ;;  %2321 = vmatpush.bf16.msra.mxu0 %v4254_v52  ;;  %v4366_v8 = vor.u32 %v4803_v61, %v4365_v60  ;;  %2364 = vmatpush.bf16.msra.mxu2 %v4430_v63  ;;  %v4613_v40 = vld [vmem:[%s7386_s1 + $0x3e4] sm:$0xf] }
  0x4b   :  { %v4221_v9 = vld [vmem:[%s7386_s1 + $0x8a0] sm:$0xf]  ;;  %v4767_v10 = vld [vmem:[%s7386_s1 + $0x8ac] sm:$0xf0]  ;;  %2378 = vmatpush.bf16.msra.mxu3 %v3234_v59  ;;  %v4414_v15 = vor.u32 %v4815_v4, %v4413_v3  ;;  %v3615_v41 = vld [vmem:[%s7386_s1 + $0x3f0] sm:$0xf0] }
  0x4c   :  { %v4349_v12 = vld [vmem:[%s7386_s1 + $0x9a0] sm:$0xf]  ;;  %v4799_v13 = vld [vmem:[%s7386_s1 + $0x9ac] sm:$0xf0]  ;;  %2310 = vmatmul.bf16.vlgmr.msrb.gmra.mxu3 %v5380_v6  ;;  %2341 = vmatpush.bf16.msra.mxu1 %v4366_v8  ;;  %v4222_v19 = vor.u32 %v4767_v10, %v4221_v9  ;;  %v3618_v46 = vor.u32 %v4613_v40, %v3615_v41  ;;  %v4486_v47 = vld [vmem:[%s7387_s0 + $0x98] sm:$0x30]  ;;  %v5496_v8 = vor.u32 %v4480_v37, %v3091_v38 }
  0x4d   :  { %v4397_v17 = vld [vmem:[%s7386_s1 + $0xa00] sm:$0xf]  ;;  %v4811_v18 = vld [vmem:[%s7386_s1 + $0xa0c] sm:$0xf0]  ;;  %v4350_v20 = vor.u32 %v4799_v13, %v4349_v12  ;;  %v4609_v60 = vld [vmem:[%s7386_s1 + $0x3c4] sm:$0xf] }
  0x4e   :  { %2322 = vmatpush.bf16.msra.mxu0 %v4238_v7  ;;  %v4205_v21 = vld [vmem:[%s7386_s1 + $0x880] sm:$0xf]  ;;  %v4763_v23 = vld [vmem:[%s7386_s1 + $0x88c] sm:$0xf0]  ;;  %2365 = vmatpush.bf16.msra.mxu2 %v4414_v15  ;;  %v4398_v26 = vor.u32 %v4811_v18, %v4397_v17  ;;  %v3599_v61 = vld [vmem:[%s7386_s1 + $0x3d0] sm:$0xf0]  ;;  %v5494_v7 = vor.u32 %v4485_v36, %v3089_v35 }
  0x4f   :  { %2379 = vmatpush.bf16.msra.mxu3 %v3218_v11  ;;  %v4333_v24 = vld [vmem:[%s7386_s1 + $0x980] sm:$0xf]  ;;  %v4795_v25 = vld [vmem:[%s7386_s1 + $0x98c] sm:$0xf0]  ;;  %v4206_v29 = vor.u32 %v4763_v23, %v4205_v21  ;;  %v3602_v4 = vor.u32 %v4609_v60, %v3599_v61  ;;  %v4497_v9 = vld [vmem:[%s7386_s1 + $0x44] sm:$0xf] }
  0x50   :  { %2342 = vmatpush.bf16.msra.mxu1 %v4350_v20  ;;  %v4334_v30 = vor.u32 %v4795_v25, %v4333_v24  ;;  %v4189_v31 = vld [vmem:[%s7386_s1 + $0x860] sm:$0xf]  ;;  %v4759_v32 = vld [vmem:[%s7386_s1 + $0x86c] sm:$0xf0]  ;;  %v3151_v10 = vld [vmem:[%s7386_s1 + $0x50] sm:$0xf0] }
  0x51   :  { %v4317_v33 = vld [vmem:[%s7386_s1 + $0x960] sm:$0xf]  ;;  %v4791_v39 = vld [vmem:[%s7386_s1 + $0x96c] sm:$0xf0]  ;;  %v4190_v55 = vor.u32 %v4759_v32, %v4189_v31  ;;  %v4605_v11 = vld [vmem:[%s7386_s1 + $0x3a4] sm:$0xf] }
  0x52   :  { %2323 = vmatpush.bf16.msra.mxu0 %v4222_v19  ;;  %2366 = vmatpush.bf16.msra.mxu2 %v4398_v26  ;;  %v3097_v42 = vld [vmem:[%s7387_s0 + $0x70] sm:$0xf]  ;;  %v3099_v52 = vld [vmem:[%s7387_s0 + $0x9c] sm:$0x30]  ;;  %v4318_v58 = vor.u32 %v4791_v39, %v4317_v33  ;;  %v3154_v19 = vor.u32 %v4497_v9, %v3151_v10  ;;  %v3586_v23 = vor.u32 %v4605_v11, %v3583_v14  ;;  %v3135_v24 = vld [vmem:[%s7386_s1 + $0x30] sm:$0xf0] }
  0x53   :  { %2380 = vmatpush.bf16.msra.mxu3 %v3202_v22  ;;  %v4173_v59 = vld [vmem:[%s7386_s1 + $0x840] sm:$0xf]  ;;  %v4755_v63 = vld [vmem:[%s7386_s1 + $0x84c] sm:$0xf0]  ;;  %v5507_v12 = vor.u32 %v4486_v47, %v3097_v42  ;;  %v5509_v13 = vor.u32 %v4481_v49, %v3099_v52  ;;  %v4493_v22 = vld [vmem:[%s7386_s1 + $0x24] sm:$0xf] }
  0x54   :  { %2343 = vmatpush.bf16.msra.mxu1 %v4334_v30  ;;  %v4301_v2 = vld [vmem:[%s7386_s1 + $0x940] sm:$0xf]  ;;  %v4787_v3 = vld [vmem:[%s7386_s1 + $0x94c] sm:$0xf0]  ;;  %v4174_v15 = vor.u32 %v4755_v63, %v4173_v59  ;;  %v4601_v25 = vld [vmem:[%s7386_s1 + $0x384] sm:$0xf]  ;;  %v3138_v32 = vor.u32 %v4493_v22, %v3135_v24 }
  0x55   :  { %7399 = vst [vmem:[#allocation4_spill] sm:$0xff] %v5509_v13  ;;  %v4302_v16 = vor.u32 %v4787_v3, %v4301_v2  ;;  %v4157_v17 = vld [vmem:[%s7386_s1 + $0x820] sm:$0xf]  ;;  %v4751_v18 = vld [vmem:[%s7386_s1 + $0x82c] sm:$0xf0] }
  0x56   :  { %2324 = vmatpush.bf16.msra.mxu0 %v4206_v29  ;;  %2435 = vmatpush.bf16.msrb.mxu2 %v3618_v46  ;;  %v4285_v20 = vld [vmem:[%s7386_s1 + $0x920] sm:$0xf]  ;;  %v4783_v21 = vld [vmem:[%s7386_s1 + $0x92c] sm:$0xf0]  ;;  %v3567_v26 = vld [vmem:[%s7386_s1 + $0x390] sm:$0xf0]  ;;  %v4158_v27 = vor.u32 %v4751_v18, %v4157_v17 }
  0x57   :  { %2381 = vmatpush.bf16.msra.mxu3 %v3186_v34  ;;  %v4286_v28 = vor.u32 %v4783_v21, %v4285_v20  ;;  %v4141_v29 = vld [vmem:[%s7386_s1 + $0x800] sm:$0xf]  ;;  %v4747_v30 = vld [vmem:[%s7386_s1 + $0x80c] sm:$0xf0]  ;;  %v4489_v34 = vld [vmem:[%s7386_s1 + $0x4] sm:$0xf]  ;;  %v3570_v36 = vor.u32 %v4601_v25, %v3567_v26 }
  0x58   :  { %2344 = vmatpush.bf16.msra.mxu1 %v4318_v58  ;;  %2296 = vmatmul.bf16.gmra.mxu2 %v5507_v12  ;;  %v4269_v31 = vld [vmem:[%s7386_s1 + $0x900] sm:$0xf]  ;;  %v4779_v33 = vld [vmem:[%s7386_s1 + $0x90c] sm:$0xf0]  ;;  %v3119_v35 = vld [vmem:[%s7386_s1 + $0x10] sm:$0xf0]  ;;  %v4142_v43 = vor.u32 %v4747_v30, %v4141_v29 }
  0x59   :  { %2258 = vmatmul.bf16.gmra.mxu0 %v5494_v7  ;;  %2277 = vmatmul.bf16.gmra.mxu1 %v5496_v8  ;;  %v4549_v37 = vld [vmem:[%s7386_s1 + $0x1e4] sm:$0xf]  ;;  %v3359_v38 = vld [vmem:[%s7386_s1 + $0x1f0] sm:$0xf0]  ;;  %v4270_v45 = vor.u32 %v4779_v33, %v4269_v31  ;;  %v3122_v49 = vor.u32 %v4489_v34, %v3119_v35  ;;  %v3061_v52 = vld [vmem:[%s7387_s0 + $0x20] sm:$0xf] }
  0x5a   :  { %2325 = vmatpush.bf16.msra.mxu0 %v4190_v55  ;;  %2436 = vmatpush.bf16.msrb.mxu2 %v3602_v4  ;;  %v4581_v39 = vld [vmem:[%s7386_s1 + $0x2e4] sm:$0xf]  ;;  %v3487_v40 = vld [vmem:[%s7386_s1 + $0x2f0] sm:$0xf0]  ;;  %v3362_v55 = vor.u32 %v4549_v37, %v3359_v38  ;;  %v4476_v58 = vld [vmem:[%s7387_s0 + $0x48] sm:$0xf0] }
  0x5b   :  { %2382 = vmatpush.bf16.msra.mxu3 %v3170_v62  ;;  %v4645_v41 = vld [vmem:[%s7386_s1 + $0x4e4] sm:$0xf]  ;;  %v3743_v42 = vld [vmem:[%s7386_s1 + $0x4f0] sm:$0xf0]  ;;  %v3490_v59 = vor.u32 %v4581_v39, %v3487_v40  ;;  %v3063_v2 = vld [vmem:[%s7387_s0 + $0x4c] sm:$0xf0]  ;;  %v5623_v18 = vor.u32 %v4476_v58, %v3061_v52 }
  0x5c   :  { %2315 = vmatmul.bf16.gmra.mxu3 %v5509_v13  ;;  %2345 = vmatpush.bf16.msra.mxu1 %v4302_v16  ;;  %v4597_v46 = vld [vmem:[%s7386_s1 + $0x364] sm:$0xf]  ;;  %v3551_v47 = vld [vmem:[%s7386_s1 + $0x370] sm:$0xf0]  ;;  %v3746_v60 = vor.u32 %v4645_v41, %v3743_v42  ;;  %v3069_v3 = vld [vmem:[%s7387_s0 + $0x28] sm:$0xf] }
  0x5d   :  { %v4545_v61 = vld [vmem:[%s7386_s1 + $0x1c4] sm:$0xf]  ;;  %v3343_v62 = vld [vmem:[%s7386_s1 + $0x1d0] sm:$0xf0]  ;;  %v3554_v4 = vor.u32 %v4597_v46, %v3551_v47 }
  0x5e   :  { %2326 = vmatpush.bf16.msra.mxu0 %v4174_v15  ;;  %2437 = vmatpush.bf16.msrb.mxu2 %v3586_v23  ;;  %v4471_v63 = vld [vmem:[%s7387_s0 + $0x24] sm:$0xf]  ;;  %v4477_v9 = vld [vmem:[%s7387_s0 + $0x50] sm:$0xf0]  ;;  %v3346_v14 = vor.u32 %v4545_v61, %v3343_v62  ;;  %v3105_v61 = vld [vmem:[%s7387_s0 + $0x78] sm:$0xf] }
  0x5f   :  { %2383 = vmatpush.bf16.msra.mxu3 %v3154_v19  ;;  %v4577_v10 = vld [vmem:[%s7386_s1 + $0x2c4] sm:$0xf]  ;;  %v3471_v11 = vld [vmem:[%s7386_s1 + $0x2d0] sm:$0xf0]  ;;  %v5625_v19 = vor.u32 %v4471_v63, %v3063_v2  ;;  %v5636_v23 = vor.u32 %v4477_v9, %v3069_v3 }
  0x60   :  { %2346 = vmatpush.bf16.msra.mxu1 %v4286_v28  ;;  %v4641_v15 = vld [vmem:[%s7386_s1 + $0x4c4] sm:$0xf]  ;;  %v3727_v16 = vld [vmem:[%s7386_s1 + $0x4d0] sm:$0xf0]  ;;  %v3474_v24 = vor.u32 %v4577_v10, %v3471_v11 }
  0x61   :  { %v4541_v17 = vld [vmem:[%s7386_s1 + $0x1a4] sm:$0xf]  ;;  %v3327_v20 = vld [vmem:[%s7386_s1 + $0x1b0] sm:$0xf0]  ;;  %7400 = vst [vmem:[#allocation5_spill] sm:$0xff] %v5636_v23  ;;  %v3730_v25 = vor.u32 %v4641_v15, %v3727_v16 }
  0x62   :  { %2327 = vmatpush.bf16.msra.mxu0 %v4158_v27  ;;  %2438 = vmatpush.bf16.msrb.mxu2 %v3570_v36  ;;  %v4593_v21 = vld [vmem:[%s7386_s1 + $0x344] sm:$0xf]  ;;  %v3535_v22 = vld [vmem:[%s7386_s1 + $0x350] sm:$0xf0]  ;;  %v3330_v28 = vor.u32 %v4541_v17, %v3327_v20  ;;  %v4482_v15 = vld [vmem:[%s7387_s0 + $0x7c] sm:$0xf] }
  0x63   :  { %2384 = vmatpush.bf16.msra.mxu3 %v3138_v32  ;;  %v4573_v26 = vld [vmem:[%s7386_s1 + $0x2a4] sm:$0xf]  ;;  %v3455_v27 = vld [vmem:[%s7386_s1 + $0x2b0] sm:$0xf0]  ;;  %v3538_v32 = vor.u32 %v4593_v21, %v3535_v22  ;;  %v3107_v16 = vld [vmem:[%s7387_s0 + $0xa4] sm:$0x30] }
  0x64   :  { %2347 = vmatpush.bf16.msra.mxu1 %v4270_v45  ;;  %v4637_v29 = vld [vmem:[%s7386_s1 + $0x4a4] sm:$0xf]  ;;  %v3711_v30 = vld [vmem:[%s7386_s1 + $0x4b0] sm:$0xf0]  ;;  %v3458_v36 = vor.u32 %v4573_v26, %v3455_v27  ;;  %v3113_v17 = vld [vmem:[%s7387_s0 + $0x80] sm:$0xf] }
  0x65   :  { %v4537_v31 = vld [vmem:[%s7386_s1 + $0x184] sm:$0xf]  ;;  %v3311_v33 = vld [vmem:[%s7386_s1 + $0x190] sm:$0xf0]  ;;  %v3714_v37 = vor.u32 %v4637_v29, %v3711_v30  ;;  %v4488_v20 = vld [vmem:[%s7387_s0 + $0xa8] sm:$0x30] }
  0x66   :  { %2328 = vmatpush.bf16.msra.mxu0 %v4142_v43  ;;  %2439 = vmatpush.bf16.msrb.mxu2 %v3554_v4  ;;  %v4589_v34 = vld [vmem:[%s7386_s1 + $0x324] sm:$0xf]  ;;  %v3519_v35 = vld [vmem:[%s7386_s1 + $0x330] sm:$0xf0]  ;;  %v3314_v40 = vor.u32 %v4537_v31, %v3311_v33  ;;  %v5750_v31 = vor.u32 %v4482_v15, %v3107_v16 }
  0x67   :  { %2385 = vmatpush.bf16.msra.mxu3 %v3122_v49  ;;  %v4569_v38 = vld [vmem:[%s7386_s1 + $0x284] sm:$0xf]  ;;  %v3439_v39 = vld [vmem:[%s7386_s1 + $0x290] sm:$0xf0]  ;;  %v3522_v45 = vor.u32 %v4589_v34, %v3519_v35  ;;  %v5761_v35 = vor.u32 %v4488_v20, %v3113_v17 }
  0x68   :  { %2416 = vmatpush.bf16.msrb.mxu1 %v3490_v59  ;;  %4459 = vmatmul.msk.bf16.vlgmr.msra.gmra.mxu2 %vm2162_vm0, %v5636_v23  ;;  %v4633_v41 = vld [vmem:[%s7386_s1 + $0x484] sm:$0xf]  ;;  %v3695_v42 = vld [vmem:[%s7386_s1 + $0x490] sm:$0xf0]  ;;  %v3442_v58 = vor.u32 %v4569_v38, %v3439_v39  ;;  %7402 = vst [vmem:[#allocation7_spill] sm:$0xff] %v5750_v31 }
  0x69   :  { %2329 = vmatmul.bf16.vlgmr.msra.gmra.mxu0 %v5623_v18  ;;  %2348 = vmatmul.bf16.vlgmr.msra.gmra.mxu1 %v5625_v19  ;;  %v4533_v43 = vld [vmem:[%s7386_s1 + $0x164] sm:$0xf]  ;;  %v3295_v46 = vld [vmem:[%s7386_s1 + $0x170] sm:$0xf0]  ;;  %v3698_v59 = vor.u32 %v4633_v41, %v3695_v42 }
  0x6a   :  { %2397 = vmatpush.bf16.msrb.mxu0 %v3362_v55  ;;  %2440 = vmatpush.bf16.msrb.mxu2 %v3538_v32  ;;  %v4585_v47 = vld [vmem:[%s7386_s1 + $0x304] sm:$0xf]  ;;  %v3503_v49 = vld [vmem:[%s7386_s1 + $0x310] sm:$0xf0]  ;;  %v3298_v62 = vor.u32 %v4533_v43, %v3295_v46 }
  0x6b   :  { %2454 = vmatpush.bf16.msrb.mxu3 %v3746_v60  ;;  %v4741_v52 = vld [vmem:[%s7386_s1 + $0x7e4] sm:$0xf]  ;;  %v4127_v55 = vld [vmem:[%s7386_s1 + $0x7f0] sm:$0xf0]  ;;  %v3506_v4 = vor.u32 %v4585_v47, %v3503_v49 }
  0x6c   :  { %2386 = vmatmul.bf16.vlgmr.msra.gmra.mxu3 %v5077_v48  ;;  %2417 = vmatpush.bf16.msrb.mxu1 %v3474_v24  ;;  %v4565_v60 = vld [vmem:[%s7386_s1 + $0x264] sm:$0xf]  ;;  %v3423_v63 = vld [vmem:[%s7386_s1 + $0x270] sm:$0xf0] }
  0x6d   :  { %v4629_v2 = vld [vmem:[%s7386_s1 + $0x464] sm:$0xf]  ;;  %v3679_v3 = vld [vmem:[%s7386_s1 + $0x470] sm:$0xf0]  ;;  %v3426_v21 = vor.u32 %v4565_v60, %v3423_v63 }
  0x6e   :  { %2398 = vmatpush.bf16.msrb.mxu0 %v3346_v14  ;;  %2441 = vmatpush.bf16.msrb.mxu2 %v3522_v45  ;;  %v4487_v9 = vld [vmem:[%s7387_s0 + $0xa0] sm:$0x30]  ;;  %v3279_v11 = vld [vmem:[%s7386_s1 + $0x150] sm:$0xf0]  ;;  %v4130_v14 = vor.u32 %v4741_v52, %v4127_v55  ;;  %v3682_v22 = vor.u32 %v4629_v2, %v3679_v3 }
  0x6f   :  { %2455 = vmatpush.bf16.msrb.mxu3 %v3730_v25  ;;  %v4529_v10 = vld [vmem:[%s7386_s1 + $0x144] sm:$0xf]  ;;  %v3407_v25 = vld [vmem:[%s7386_s1 + $0x250] sm:$0xf0]  ;;  %v5748_v30 = vor.u32 %v4487_v9, %v3105_v61 }
  0x70   :  { %2418 = vmatpush.bf16.msrb.mxu1 %v3458_v36  ;;  %v4561_v24 = vld [vmem:[%s7386_s1 + $0x244] sm:$0xf]  ;;  %v3282_v26 = vor.u32 %v4529_v10, %v3279_v11  ;;  %v3263_v32 = vld [vmem:[%s7386_s1 + $0x130] sm:$0xf0] }
  0x71   :  { %v4625_v27 = vld [vmem:[%s7386_s1 + $0x444] sm:$0xf]  ;;  %7401 = vst [vmem:[#allocation6_spill] sm:$0xff] %v5748_v30  ;;  %v4111_v34 = vld [vmem:[%s7386_s1 + $0x7d0] sm:$0xf0]  ;;  %v3410_v36 = vor.u32 %v4561_v24, %v3407_v25 }
  0x72   :  { %2399 = vmatpush.bf16.msrb.mxu0 %v3330_v28  ;;  %v3663_v28 = vld [vmem:[%s7386_s1 + $0x450] sm:$0xf0]  ;;  %v4525_v29 = vld [vmem:[%s7386_s1 + $0x124] sm:$0xf]  ;;  %2442 = vmatpush.bf16.msrb.mxu2 %v3506_v4 }
  0x73   :  { %2456 = vmatpush.bf16.msrb.mxu3 %v3714_v37  ;;  %v4737_v33 = vld [vmem:[%s7386_s1 + $0x7c4] sm:$0xf]  ;;  %v3666_v37 = vor.u32 %v4625_v27, %v3663_v28  ;;  %v3391_v39 = vld [vmem:[%s7386_s1 + $0x230] sm:$0xf0] }
  0x74   :  { %2419 = vmatpush.bf16.msrb.mxu1 %v3442_v58  ;;  %v4557_v38 = vld [vmem:[%s7386_s1 + $0x224] sm:$0xf]  ;;  %v3647_v42 = vld [vmem:[%s7386_s1 + $0x430] sm:$0xf0]  ;;  %v4114_v45 = vor.u32 %v4737_v33, %v4111_v34 }
  0x75   :  { %v4621_v41 = vld [vmem:[%s7386_s1 + $0x424] sm:$0xf]  ;;  %v3247_v46 = vld [vmem:[%s7386_s1 + $0x110] sm:$0xf0]  ;;  %v3394_v58 = vor.u32 %v4557_v38, %v3391_v39 }
  0x76   :  { %2400 = vmatpush.bf16.msrb.mxu0 %v3314_v40  ;;  %2511 = vmatpush.bf16.msra.mxu2 %v4130_v14  ;;  %v3266_v40 = vor.u32 %v4525_v29, %v3263_v32  ;;  %v4521_v43 = vld [vmem:[%s7386_s1 + $0x104] sm:$0xf]  ;;  %v4095_v49 = vld [vmem:[%s7386_s1 + $0x7b0] sm:$0xf0] }
  0x77   :  { %2457 = vmatpush.bf16.msrb.mxu3 %v3698_v59  ;;  %v4733_v47 = vld [vmem:[%s7386_s1 + $0x7a4] sm:$0xf]  ;;  %v3871_v55 = vld [vmem:[%s7386_s1 + $0x5f0] sm:$0xf0]  ;;  %v3650_v59 = vor.u32 %v4621_v41, %v3647_v42  ;;  %v3250_v63 = vor.u32 %v4521_v43, %v3247_v46 }
  0x78   :  { %2420 = vmatpush.bf16.msrb.mxu1 %v3426_v21  ;;  %4460 = vmatmul.msk.bf16.gmra.mxu2 %vm2162_vm0, %v5761_v35  ;;  %v4677_v52 = vld [vmem:[%s7386_s1 + $0x5e4] sm:$0xf]  ;;  %v3375_v61 = vld [vmem:[%s7386_s1 + $0x210] sm:$0xf0]  ;;  %v4098_v9 = vor.u32 %v4733_v47, %v4095_v49 }
  0x79   :  { %2334 = vmatmul.bf16.gmra.mxu0 %v5748_v30  ;;  %2353 = vmatmul.bf16.gmra.mxu1 %v5750_v31  ;;  %v4553_v60 = vld [vmem:[%s7386_s1 + $0x204] sm:$0xf]  ;;  %v3631_v2 = vld [vmem:[%s7386_s1 + $0x410] sm:$0xf0]  ;;  %v3874_v10 = vor.u32 %v4677_v52, %v3871_v55 }
  0x7a   :  { %2401 = vmatpush.bf16.msrb.mxu0 %v3298_v62  ;;  %v4617_v62 = vld [vmem:[%s7386_s1 + $0x404] sm:$0xf]  ;;  %v3999_v4 = vld [vmem:[%s7386_s1 + $0x6f0] sm:$0xf0]  ;;  %2512 = vmatpush.bf16.msra.mxu2 %v4114_v45  ;;  %v3378_v21 = vor.u32 %v4553_v60, %v3375_v61 }
  0x7b   :  { %2458 = vmatpush.bf16.msrb.mxu3 %v3682_v22  ;;  %v4709_v3 = vld [vmem:[%s7386_s1 + $0x6e4] sm:$0xf]  ;;  %v4255_v14 = vld [vmem:[%s7386_s1 + $0x8f0] sm:$0xf0]  ;;  %v3634_v22 = vor.u32 %v4617_v62, %v3631_v2 }
  0x7c   :  { %2391 = vmatmul.bf16.gmra.mxu3 %v5209_v44  ;;  %2421 = vmatpush.bf16.msrb.mxu1 %v3410_v36  ;;  %v4773_v11 = vld [vmem:[%s7386_s1 + $0x8e4] sm:$0xf]  ;;  %v3855_v16 = vld [vmem:[%s7386_s1 + $0x5d0] sm:$0xf0]  ;;  %v4002_v24 = vor.u32 %v4709_v3, %v3999_v4 }
  0x7d   :  { %v4673_v15 = vld [vmem:[%s7386_s1 + $0x5c4] sm:$0xf]  ;;  %v4079_v20 = vld [vmem:[%s7386_s1 + $0x790] sm:$0xf0]  ;;  %v4258_v25 = vor.u32 %v4773_v11, %v4255_v14 }
  0x7e   :  { %2402 = vmatpush.bf16.msrb.mxu0 %v3282_v26  ;;  %v4729_v17 = vld [vmem:[%s7386_s1 + $0x784] sm:$0xf]  ;;  %2513 = vmatpush.bf16.msra.mxu2 %v4098_v9  ;;  %v3858_v27 = vor.u32 %v4673_v15, %v3855_v16  ;;  %v3983_v28 = vld [vmem:[%s7386_s1 + $0x6d0] sm:$0xf0] }
  0x7f   :  { %2459 = vmatpush.bf16.msrb.mxu3 %v3666_v37  ;;  %v4705_v26 = vld [vmem:[%s7386_s1 + $0x6c4] sm:$0xf]  ;;  %v4239_v32 = vld [vmem:[%s7386_s1 + $0x8d0] sm:$0xf0]  ;;  %v4082_v33 = vor.u32 %v4729_v17, %v4079_v20 }
  0x80   :  { %2422 = vmatpush.bf16.msrb.mxu1 %v3394_v58  ;;  %v4769_v29 = vld [vmem:[%s7386_s1 + $0x8c4] sm:$0xf]  ;;  %v3839_v36 = vld [vmem:[%s7386_s1 + $0x5b0] sm:$0xf0]  ;;  %v3986_v37 = vor.u32 %v4705_v26, %v3983_v28 }
  0x81   :  { %v4669_v34 = vld [vmem:[%s7386_s1 + $0x5a4] sm:$0xf]  ;;  %v4242_v38 = vor.u32 %v4769_v29, %v4239_v32  ;;  %v4063_v41 = vld [vmem:[%s7386_s1 + $0x770] sm:$0xf0] }
  0x82   :  { %2403 = vmatpush.bf16.msrb.mxu0 %v3266_v40  ;;  %v4701_v39 = vld [vmem:[%s7386_s1 + $0x6a4] sm:$0xf]  ;;  %v3967_v42 = vld [vmem:[%s7386_s1 + $0x6b0] sm:$0xf0]  ;;  %2514 = vmatpush.bf16.msra.mxu2 %v4082_v33  ;;  %v3842_v46 = vor.u32 %v4669_v34, %v3839_v36 }
  0x83   :  { %2460 = vmatpush.bf16.msrb.mxu3 %v3650_v59  ;;  %v4725_v40 = vld [vmem:[%s7386_s1 + $0x764] sm:$0xf]  ;;  %v4223_v45 = vld [vmem:[%s7386_s1 + $0x8b0] sm:$0xf0]  ;;  %v3970_v55 = vor.u32 %v4701_v39, %v3967_v42 }
  0x84   :  { %2423 = vmatpush.bf16.msrb.mxu1 %v3378_v21  ;;  %v4765_v43 = vld [vmem:[%s7386_s1 + $0x8a4] sm:$0xf]  ;;  %v3823_v49 = vld [vmem:[%s7386_s1 + $0x590] sm:$0xf0]  ;;  %v4066_v52 = vor.u32 %v4725_v40, %v4063_v41 }
  0x85   :  { %v4665_v47 = vld [vmem:[%s7386_s1 + $0x584] sm:$0xf]  ;;  %v4226_v58 = vor.u32 %v4765_v43, %v4223_v45  ;;  %v4047_v61 = vld [vmem:[%s7386_s1 + $0x750] sm:$0xf0] }
  0x86   :  { %2404 = vmatpush.bf16.msrb.mxu0 %v3250_v63  ;;  %v4697_v59 = vld [vmem:[%s7386_s1 + $0x684] sm:$0xf]  ;;  %v3951_v62 = vld [vmem:[%s7386_s1 + $0x690] sm:$0xf0]  ;;  %v3826_v3 = vor.u32 %v4665_v47, %v3823_v49  ;;  %2515 = vmatpush.bf16.msra.mxu2 %v4066_v52  ;;  %v3237_v47 = vld [vmem:[%s7386_s1 + $0xe8] sm:$0xf] }
  0x87   :  { %2461 = vmatpush.bf16.msrb.mxu3 %v3634_v22  ;;  %v4721_v60 = vld [vmem:[%s7386_s1 + $0x744] sm:$0xf]  ;;  %v4207_v2 = vld [vmem:[%s7386_s1 + $0x890] sm:$0xf0]  ;;  %v3954_v11 = vor.u32 %v4697_v59, %v3951_v62  ;;  %v4520_v49 = vld [vmem:[%s7386_s1 + $0xf4] sm:$0xf0] }
  0x88   :  { %2492 = vmatpush.bf16.msra.mxu1 %v4002_v24  ;;  %v4761_v63 = vld [vmem:[%s7386_s1 + $0x884] sm:$0xf]  ;;  %2443 = vmatmul.bf16.vlgmr.msrb.gmra.mxu2 %v5098_v57  ;;  %v3807_v9 = vld [vmem:[%s7386_s1 + $0x570] sm:$0xf0] }
  0x89   :  { %2405 = vmatmul.bf16.vlgmr.msrb.gmra.mxu0 %v5088_v53  ;;  %2424 = vmatmul.bf16.vlgmr.msrb.gmra.mxu1 %v5090_v54  ;;  %v4661_v4 = vld [vmem:[%s7386_s1 + $0x564] sm:$0xf]  ;;  %v4210_v14 = vor.u32 %v4761_v63, %v4207_v2  ;;  %v4031_v17 = vld [vmem:[%s7386_s1 + $0x730] sm:$0xf0]  ;;  %v3238_v63 = vor.u32 %v4520_v49, %v3237_v47 }
  0x8a   :  { %2473 = vmatpush.bf16.msra.mxu0 %v3874_v10  ;;  %v4050_v10 = vor.u32 %v4721_v60, %v4047_v61  ;;  %v4693_v15 = vld [vmem:[%s7386_s1 + $0x664] sm:$0xf]  ;;  %v3935_v20 = vld [vmem:[%s7386_s1 + $0x670] sm:$0xf0]  ;;  %v3810_v24 = vor.u32 %v4661_v4, %v3807_v9  ;;  %v3221_v9 = vld [vmem:[%s7386_s1 + $0xc8] sm:$0xf] }
  0x8b   :  { %2530 = vmatpush.bf16.msra.mxu3 %v4258_v25  ;;  %v4717_v16 = vld [vmem:[%s7386_s1 + $0x724] sm:$0xf]  ;;  %v4191_v22 = vld [vmem:[%s7386_s1 + $0x870] sm:$0xf0]  ;;  %v3938_v28 = vor.u32 %v4693_v15, %v3935_v20  ;;  %v4552_v20 = vld [vmem:[%s7386_s1 + $0x1f4] sm:$0xf0] }
  0x8c   :  { %2493 = vmatpush.bf16.msra.mxu1 %v3986_v37  ;;  %2462 = vmatmul.bf16.vlgmr.msrb.gmra.mxu3 %v5365_v0  ;;  %v4757_v21 = vld [vmem:[%s7386_s1 + $0x864] sm:$0xf]  ;;  %v3791_v26 = vld [vmem:[%s7386_s1 + $0x550] sm:$0xf0] }
  0x8d   :  { %2516 = vmatpush.bf16.msra.mxu2 %v4050_v10  ;;  %v4657_v25 = vld [vmem:[%s7386_s1 + $0x544] sm:$0xf]  ;;  %v4194_v29 = vor.u32 %v4757_v21, %v4191_v22  ;;  %v4015_v34 = vld [vmem:[%s7386_s1 + $0x710] sm:$0xf0]  ;;  %v4516_v10 = vld [vmem:[%s7386_s1 + $0xd4] sm:$0xf0] }
  0x8e   :  { %2474 = vmatpush.bf16.msra.mxu0 %v3858_v27  ;;  %v4034_v27 = vor.u32 %v4717_v16, %v4031_v17  ;;  %v4689_v32 = vld [vmem:[%s7386_s1 + $0x644] sm:$0xf]  ;;  %v3919_v36 = vld [vmem:[%s7386_s1 + $0x650] sm:$0xf0]  ;;  %v3794_v39 = vor.u32 %v4657_v25, %v3791_v26  ;;  %v3365_v17 = vld [vmem:[%s7386_s1 + $0x1e8] sm:$0xf]  ;;  %v3222_v25 = vor.u32 %v4516_v10, %v3221_v9 }
  0x8f   :  { %2531 = vmatpush.bf16.msra.mxu3 %v4242_v38  ;;  %v4713_v33 = vld [vmem:[%s7386_s1 + $0x704] sm:$0xf]  ;;  %v4175_v38 = vld [vmem:[%s7386_s1 + $0x850] sm:$0xf0]  ;;  %v3922_v43 = vor.u32 %v4689_v32, %v3919_v36 }
  0x90   :  { %2494 = vmatpush.bf16.msra.mxu1 %v3970_v55  ;;  %v4753_v37 = vld [vmem:[%s7386_s1 + $0x844] sm:$0xf]  ;;  %v3775_v41 = vld [vmem:[%s7386_s1 + $0x530] sm:$0xf0]  ;;  %v4018_v42 = vor.u32 %v4713_v33, %v4015_v34  ;;  %v3366_v33 = vor.u32 %v4552_v20, %v3365_v17 }
  0x91   :  { %2517 = vmatpush.bf16.msra.mxu2 %v4034_v27  ;;  %v4653_v40 = vld [vmem:[%s7386_s1 + $0x524] sm:$0xf]  ;;  %v4178_v45 = vor.u32 %v4753_v37, %v4175_v38  ;;  %v3903_v52 = vld [vmem:[%s7386_s1 + $0x630] sm:$0xf0]  ;;  %v3349_v38 = vld [vmem:[%s7386_s1 + $0x1c8] sm:$0xf] }
  0x92   :  { %2475 = vmatpush.bf16.msra.mxu0 %v3842_v46  ;;  %v4685_v46 = vld [vmem:[%s7386_s1 + $0x624] sm:$0xf]  ;;  %v3778_v59 = vor.u32 %v4653_v40, %v3775_v41  ;;  %v3759_v61 = vld [vmem:[%s7386_s1 + $0x510] sm:$0xf0] }
  0x93   :  { %2532 = vmatpush.bf16.msra.mxu3 %v4226_v58  ;;  %v4749_v55 = vld [vmem:[%s7386_s1 + $0x824] sm:$0xf]  ;;  %v4159_v58 = vld [vmem:[%s7386_s1 + $0x830] sm:$0xf0]  ;;  %v3906_v2 = vor.u32 %v4685_v46, %v3903_v52 }
  0x94   :  { %2495 = vmatpush.bf16.msra.mxu1 %v3954_v11  ;;  %v4649_v60 = vld [vmem:[%s7386_s1 + $0x504] sm:$0xf]  ;;  %v3887_v4 = vld [vmem:[%s7386_s1 + $0x610] sm:$0xf0] }
  0x95   :  { %2518 = vmatpush.bf16.msra.mxu2 %v4018_v42  ;;  %v4681_v62 = vld [vmem:[%s7386_s1 + $0x604] sm:$0xf]  ;;  %v4383_v16 = vld [vmem:[%s7386_s1 + $0x9f0] sm:$0xf0]  ;;  %v3762_v21 = vor.u32 %v4649_v60, %v3759_v61  ;;  %v4544_v60 = vld [vmem:[%s7386_s1 + $0x1b4] sm:$0xf0] }
  0x96   :  { %2476 = vmatpush.bf16.msra.mxu0 %v3826_v3  ;;  %v4162_v3 = vor.u32 %v4749_v55, %v4159_v58  ;;  %v4745_v11 = vld [vmem:[%s7386_s1 + $0x804] sm:$0xf]  ;;  %v3890_v26 = vor.u32 %v4681_v62, %v3887_v4  ;;  %v4367_v37 = vld [vmem:[%s7386_s1 + $0x9d0] sm:$0xf0]  ;;  %v3173_v61 = vld [vmem:[%s7386_s1 + $0x68] sm:$0xf] }
  0x97   :  { %2533 = vmatpush.bf16.msra.mxu3 %v4210_v14  ;;  %v4143_v14 = vld [vmem:[%s7386_s1 + $0x810] sm:$0xf0]  ;;  %v4805_v15 = vld [vmem:[%s7386_s1 + $0x9e4] sm:$0xf] }
  0x98   :  { %2496 = vmatpush.bf16.msra.mxu1 %v3938_v28  ;;  %2448 = vmatmul.bf16.gmra.mxu2 %v5230_v56  ;;  %v4821_v22 = vld [vmem:[%s7386_s1 + $0xa64] sm:$0xf]  ;;  %v4146_v27 = vor.u32 %v4745_v11, %v4143_v14  ;;  %v3205_v28 = vld [vmem:[%s7386_s1 + $0xa8] sm:$0xf]  ;;  %v4386_v32 = vor.u32 %v4805_v15, %v4383_v16  ;;  %v4431_v42 = vld [vmem:[%s7386_s1 + $0xa50] sm:$0xf0] }
  0x99   :  { %2410 = vmatmul.bf16.gmra.mxu0 %v5220_v50  ;;  %2429 = vmatmul.bf16.gmra.mxu1 %v5222_v51  ;;  %v4801_v34 = vld [vmem:[%s7386_s1 + $0x9c4] sm:$0xf]  ;;  %v4351_v55 = vld [vmem:[%s7386_s1 + $0x9b0] sm:$0xf0]  ;;  %v3317_v15 = vld [vmem:[%s7386_s1 + $0x188] sm:$0xf] }
  0x9a   :  { %2477 = vmatpush.bf16.msra.mxu0 %v3810_v24  ;;  %2587 = vmatpush.bf16.msrb.mxu2 %v3238_v63  ;;  %v4447_v24 = vld [vmem:[%s7386_s1 + $0xa70] sm:$0xf0]  ;;  %v4817_v41 = vld [vmem:[%s7386_s1 + $0xa44] sm:$0xf]  ;;  %v4370_v46 = vor.u32 %v4801_v34, %v4367_v37  ;;  %v4504_v63 = vld [vmem:[%s7386_s1 + $0x74] sm:$0xf0] }
  0x9b   :  { %2534 = vmatpush.bf16.msra.mxu3 %v4194_v29  ;;  %v4512_v29 = vld [vmem:[%s7386_s1 + $0xb4] sm:$0xf0]  ;;  %v4450_v36 = vor.u32 %v4821_v22, %v4447_v24  ;;  %v4434_v49 = vor.u32 %v4817_v41, %v4431_v42  ;;  %v4797_v52 = vld [vmem:[%s7386_s1 + $0x9a4] sm:$0xf]  ;;  %v4335_v14 = vld [vmem:[%s7386_s1 + $0x990] sm:$0xf0]  ;;  %v3174_v17 = vor.u32 %v4504_v63, %v3173_v61 }
  0x9c   :  { %2497 = vmatpush.bf16.msra.mxu1 %v3922_v43  ;;  %2467 = vmatmul.bf16.gmra.mxu3 %v5494_v7  ;;  %v3206_v40 = vor.u32 %v4512_v29, %v3205_v28  ;;  %v3189_v43 = vld [vmem:[%s7386_s1 + $0x88] sm:$0xf]  ;;  %v4354_v9 = vor.u32 %v4797_v52, %v4351_v55  ;;  %v4793_v11 = vld [vmem:[%s7386_s1 + $0x984] sm:$0xf]  ;;  %v4540_v16 = vld [vmem:[%s7386_s1 + $0x194] sm:$0xf0] }
  0x9d   :  { %v4500_v22 = vld [vmem:[%s7386_s1 + $0x54] sm:$0xf0]  ;;  %v4809_v24 = vld [vmem:[%s7386_s1 + $0xa04] sm:$0xf]  ;;  %v4338_v28 = vor.u32 %v4793_v11, %v4335_v14  ;;  %v3318_v29 = vor.u32 %v4540_v16, %v3317_v15  ;;  %v4319_v34 = vld [vmem:[%s7386_s1 + $0x970] sm:$0xf0] }
  0x9e   :  { %2478 = vmatpush.bf16.msra.mxu0 %v3794_v39  ;;  %v4548_v39 = vld [vmem:[%s7386_s1 + $0x1d4] sm:$0xf0]  ;;  %2588 = vmatpush.bf16.msrb.mxu2 %v3222_v25  ;;  %v4399_v25 = vld [vmem:[%s7386_s1 + $0xa10] sm:$0xf0]  ;;  %v3141_v42 = vld [vmem:[%s7386_s1 + $0x28] sm:$0xf] }
  0x9f   :  { %2535 = vmatpush.bf16.msra.mxu3 %v4178_v45  ;;  %v4508_v45 = vld [vmem:[%s7386_s1 + $0x94] sm:$0xf0]  ;;  %v3350_v47 = vor.u32 %v4548_v39, %v3349_v38  ;;  %v4402_v39 = vor.u32 %v4809_v24, %v4399_v25  ;;  %v4781_v14 = vld [vmem:[%s7386_s1 + $0x924] sm:$0xf]  ;;  %v4287_v15 = vld [vmem:[%s7386_s1 + $0x930] sm:$0xf0] }
  0xa0   :  { %2498 = vmatpush.bf16.msra.mxu1 %v3906_v2  ;;  %v3190_v58 = vor.u32 %v4508_v45, %v3189_v43  ;;  %v4813_v2 = vld [vmem:[%s7386_s1 + $0xa24] sm:$0xf]  ;;  %v4536_v37 = vld [vmem:[%s7386_s1 + $0x174] sm:$0xf0] }
  0xa1   :  { %v6061_v62 = vpop.f32.mrf.mxu0  ;;  %v6072_v4 = vpop.f32.mrf.mxu1  ;;  %v4496_v43 = vld [vmem:[%s7386_s1 + $0x34] sm:$0xf0] }
  0xa2   :  { %2479 = vmatpush.bf16.msra.mxu0 %v3778_v59  ;;  %2589 = vmatpush.bf16.msrb.mxu2 %v3206_v40  ;;  %v3333_v59 = vld [vmem:[%s7386_s1 + $0x1a8] sm:$0xf]  ;;  %v4532_v61 = vld [vmem:[%s7386_s1 + $0x154] sm:$0xf0]  ;;  %v3142_v63 = vor.u32 %v4496_v43, %v3141_v42 }
  0xa3   :  { %2536 = vmatpush.bf16.msra.mxu3 %v4162_v3  ;;  %v4415_v3 = vld [vmem:[%s7386_s1 + $0xa30] sm:$0xf0]  ;;  %v3334_v10 = vor.u32 %v4544_v60, %v3333_v59  ;;  %v3285_v60 = vld [vmem:[%s7386_s1 + $0x148] sm:$0xf] }
  0xa4   :  { %2499 = vmatpush.bf16.msra.mxu1 %v3890_v26  ;;  %v4418_v20 = vor.u32 %v4813_v2, %v4415_v3  ;;  %v3621_v26 = vld [vmem:[%s7386_s1 + $0x3e8] sm:$0xf]  ;;  %v4303_v59 = vld [vmem:[%s7386_s1 + $0x950] sm:$0xf0]  ;;  %v4492_v3 = vld [vmem:[%s7386_s1 + $0x14] sm:$0xf0]  ;;  %v3286_v11 = vor.u32 %v4532_v61, %v3285_v60 }
  0xa5   :  { %v3125_v2 = vld [vmem:[%s7386_s1 + $0x8] sm:$0xf]  ;;  %v4604_v60 = vld [vmem:[%s7386_s1 + $0x394] sm:$0xf0] }
  0xa6   :  { %2480 = vmatpush.bf16.msra.mxu0 %v3762_v21  ;;  %2590 = vmatpush.bf16.msrb.mxu2 %v3190_v58  ;;  %v3157_v21 = vld [vmem:[%s7386_s1 + $0x48] sm:$0xf]  ;;  %v4785_v58 = vld [vmem:[%s7386_s1 + $0x944] sm:$0xf] }
  0xa7   :  { %2537 = vmatpush.bf16.msra.mxu3 %v4146_v27  ;;  %v4616_v27 = vld [vmem:[%s7386_s1 + $0x3f4] sm:$0xf0]  ;;  %v3158_v38 = vor.u32 %v4500_v22, %v3157_v21  ;;  %v3126_v21 = vor.u32 %v4492_v3, %v3125_v2  ;;  %v3749_v22 = vld [vmem:[%s7386_s1 + $0x4e8] sm:$0xf] }
  0xa8   :  { %2572 = vmatpush.bf16.msrb.mxu1 %v4450_v36  ;;  %2519 = vmatmul.bf16.vlgmr.msra.gmra.mxu2 %v5380_v6  ;;  %v3301_v36 = vld [vmem:[%s7386_s1 + $0x168] sm:$0xf]  ;;  %v3622_v45 = vor.u32 %v4616_v27, %v3621_v26  ;;  %v4648_v26 = vld [vmem:[%s7386_s1 + $0x4f4] sm:$0xf0] }
  0xa9   :  { %2481 = vmatmul.bf16.vlgmr.msra.gmra.mxu0 %v5367_v1  ;;  %2500 = vmatmul.bf16.vlgmr.msra.gmra.mxu1 %v5378_v5  ;;  %v6124_v41 = vpop.f32.mrf.mxu0  ;;  %v3302_v55 = vor.u32 %v4536_v37, %v3301_v36  ;;  %v3589_v27 = vld [vmem:[%s7386_s1 + $0x3a8] sm:$0xf]  ;;  %v4777_v36 = vld [vmem:[%s7386_s1 + $0x904] sm:$0xf]  ;;  %v4271_v37 = vld [vmem:[%s7386_s1 + $0x910] sm:$0xf0]  ;;  %v3750_v42 = vor.u32 %v4648_v26, %v3749_v22 }
  0xaa   :  { %2549 = vmatpush.bf16.msrb.mxu0 %v4386_v32  ;;  %v4789_v32 = vld [vmem:[%s7386_s1 + $0x964] sm:$0xf]  ;;  %2591 = vmatpush.bf16.msrb.mxu2 %v3174_v17  ;;  %v6122_v40 = vpop.f32.mrf.mxu3  ;;  %v3269_v17 = vld [vmem:[%s7386_s1 + $0x128] sm:$0xf]  ;;  %v4274_v61 = vor.u32 %v4777_v36, %v4271_v37 }
  0xab   :  { %2606 = vmatpush.bf16.msrb.mxu3 %v3366_v33  ;;  %v6111_v33 = vpop.f32.mrf.mxu2  ;;  %v4322_v52 = vor.u32 %v4789_v32, %v4319_v34  ;;  %v4290_v32 = vor.u32 %v4781_v14, %v4287_v15  ;;  %v3493_v43 = vld [vmem:[%s7386_s1 + $0x2e8] sm:$0xf] }
  0xac   :  { %2573 = vmatpush.bf16.msrb.mxu1 %v4434_v49  ;;  %2538 = vmatmul.bf16.vlgmr.msra.gmra.mxu3 %v5623_v18  ;;  %v4612_v49 = vld [vmem:[%s7386_s1 + $0x3d4] sm:$0xf0]  ;;  %v3717_v22 = vld [vmem:[%s7386_s1 + $0x4a8] sm:$0xf] }
  0xae   :  { %2550 = vmatpush.bf16.msrb.mxu0 %v4370_v46  ;;  %v6132_v46 = vpop.f32.mrf.mxu1  ;;  %2592 = vmatpush.bf16.msrb.mxu2 %v3158_v38  ;;  %v3253_v38 = vld [vmem:[%s7386_s1 + $0x108] sm:$0xf] }
  0xaf   :  { %2607 = vmatpush.bf16.msrb.mxu3 %v3350_v47  ;;  %v3605_v47 = vld [vmem:[%s7386_s1 + $0x3c8] sm:$0xf] }
  0xb0   :  { %2574 = vmatpush.bf16.msrb.mxu1 %v4418_v20  ;;  %v4528_v20 = vld [vmem:[%s7386_s1 + $0x134] sm:$0xf0] }
  0xb1   :  { %v6177_v25 = vpop.f32.mrf.mxu0  ;;  %v3270_v34 = vor.u32 %v4528_v20, %v3269_v17  ;;  %v3861_v20 = vld [vmem:[%s7386_s1 + $0x5c8] sm:$0xf] }
  0xb2   :  { %2551 = vmatpush.bf16.msrb.mxu0 %v4354_v9  ;;  %v3606_v9 = vor.u32 %v4612_v49, %v3605_v47  ;;  %2593 = vmatpush.bf16.msrb.mxu2 %v3142_v63  ;;  %v6175_v24 = vpop.f32.mrf.mxu3  ;;  %v3877_v49 = vld [vmem:[%s7386_s1 + $0x5e8] sm:$0xf] }
  0xb3   :  { %2608 = vmatpush.bf16.msrb.mxu3 %v3334_v10  ;;  %v4306_v10 = vor.u32 %v4785_v58, %v4303_v59  ;;  %v6164_v16 = vpop.f32.mrf.mxu2  ;;  %v4644_v58 = vld [vmem:[%s7386_s1 + $0x4d4] sm:$0xf0]  ;;  %v3573_v59 = vld [vmem:[%s7386_s1 + $0x388] sm:$0xf] }
  0xb4   :  { %2575 = vmatpush.bf16.msrb.mxu1 %v4402_v39  ;;  %v4524_v39 = vld [vmem:[%s7386_s1 + $0x114] sm:$0xf0]  ;;  %v3574_v26 = vor.u32 %v4604_v60, %v3573_v59  ;;  %v3445_v60 = vld [vmem:[%s7386_s1 + $0x288] sm:$0xf] }
  0xb5   :  { %v3254_v63 = vor.u32 %v4524_v39, %v3253_v38  ;;  %v3461_v38 = vld [vmem:[%s7386_s1 + $0x2a8] sm:$0xf] }
  0xb6   :  { %2552 = vmatpush.bf16.msrb.mxu0 %v4338_v28  ;;  %v4608_v28 = vld [vmem:[%s7386_s1 + $0x3b4] sm:$0xf0]  ;;  %2594 = vmatpush.bf16.msrb.mxu2 %v3126_v21 }
  0xb7   :  { %2609 = vmatpush.bf16.msrb.mxu3 %v3318_v29  ;;  %v6188_v29 = vpop.f32.mrf.mxu1  ;;  %v3590_v47 = vor.u32 %v4608_v28, %v3589_v27  ;;  %v4676_v21 = vld [vmem:[%s7386_s1 + $0x5d4] sm:$0xf0] }
  0xb8   :  { %2644 = vmatpush.bf16.msra.mxu1 %v3622_v45  ;;  %v4584_v45 = vld [vmem:[%s7386_s1 + $0x2f4] sm:$0xf0]  ;;  %2524 = vmatmul.bf16.gmra.mxu2 %v5509_v13  ;;  %v3862_v37 = vor.u32 %v4676_v21, %v3861_v20 }
  0xb9   :  { %2486 = vmatmul.bf16.gmra.mxu0 %v5496_v8  ;;  %2505 = vmatmul.bf16.gmra.mxu1 %v5507_v12  ;;  %v3494_v3 = vor.u32 %v4584_v45, %v3493_v43  ;;  %v6240_v15 = vpop.f32.mrf.mxu0  ;;  %v4640_v28 = vld [vmem:[%s7386_s1 + $0x4b4] sm:$0xf0]  ;;  %v3845_v43 = vld [vmem:[%s7386_s1 + $0x5a8] sm:$0xf] }
  0xba   :  { %2553 = vmatpush.bf16.msrb.mxu0 %v4322_v52  ;;  %v4680_v52 = vld [vmem:[%s7386_s1 + $0x5f4] sm:$0xf0]  ;;  %2663 = vmatpush.bf16.msra.mxu2 %v3750_v42  ;;  %v3718_v39 = vor.u32 %v4640_v28, %v3717_v22  ;;  %v3685_v22 = vld [vmem:[%s7386_s1 + $0x468] sm:$0xf] }
  0xbb   :  { %2610 = vmatpush.bf16.msrb.mxu3 %v3302_v55  ;;  %v3733_v55 = vld [vmem:[%s7386_s1 + $0x4c8] sm:$0xf]  ;;  %v6230_v2 = vpop.f32.mrf.mxu2  ;;  %v6238_v14 = vpop.f32.mrf.mxu3  ;;  %v4576_v42 = vld [vmem:[%s7386_s1 + $0x2b4] sm:$0xf0] }
  0xbc   :  { %2645 = vmatpush.bf16.msra.mxu1 %v3606_v9  ;;  %2543 = vmatmul.bf16.gmra.mxu3 %v5748_v30  ;;  %v3878_v9 = vor.u32 %v4680_v52, %v3877_v49  ;;  %v3734_v17 = vor.u32 %v4644_v58, %v3733_v55  ;;  %v4672_v45 = vld [vmem:[%s7386_s1 + $0x5b4] sm:$0xf0]  ;;  %v3701_v49 = vld [vmem:[%s7386_s1 + $0x488] sm:$0xf]  ;;  %v3462_v58 = vor.u32 %v4576_v42, %v3461_v38 }
  0xbd   :  { %v4636_v52 = vld [vmem:[%s7386_s1 + $0x494] sm:$0xf0]  ;;  %v3846_v59 = vor.u32 %v4672_v45, %v3845_v43  ;;  %v3813_v42 = vld [vmem:[%s7386_s1 + $0x568] sm:$0xf] }
  0xbe   :  { %2554 = vmatpush.bf16.msrb.mxu0 %v4306_v10  ;;  %v3477_v10 = vld [vmem:[%s7386_s1 + $0x2c8] sm:$0xf]  ;;  %2664 = vmatpush.bf16.msra.mxu2 %v3734_v17  ;;  %v3702_v21 = vor.u32 %v4636_v52, %v3701_v49  ;;  %v4592_v38 = vld [vmem:[%s7386_s1 + $0x334] sm:$0xf0] }
  0xbf   :  { %2611 = vmatpush.bf16.msrb.mxu3 %v3286_v11  ;;  %v4580_v11 = vld [vmem:[%s7386_s1 + $0x2d4] sm:$0xf0]  ;;  %v6251_v27 = vpop.f32.mrf.mxu1  ;;  %v4101_v30 = vld [vmem:[%s7386_s1 + $0x7a8] sm:$0xf] }
  0xc0   :  { %2646 = vmatpush.bf16.msra.mxu1 %v3590_v47  ;;  %v3478_v36 = vor.u32 %v4580_v11, %v3477_v10  ;;  %v3829_v10 = vld [vmem:[%s7386_s1 + $0x588] sm:$0xf]  ;;  %v4668_v11 = vld [vmem:[%s7386_s1 + $0x594] sm:$0xf0] }
  0xc1   :  { %v4664_v43 = vld [vmem:[%s7386_s1 + $0x574] sm:$0xf0] }
  0xc2   :  { %2555 = vmatpush.bf16.msrb.mxu0 %v4290_v32  ;;  %v3557_v32 = vld [vmem:[%s7386_s1 + $0x368] sm:$0xf]  ;;  %2665 = vmatpush.bf16.msra.mxu2 %v3718_v39  ;;  %v4568_v39 = vld [vmem:[%s7386_s1 + $0x274] sm:$0xf0] }
  0xc3   :  { %2612 = vmatpush.bf16.msrb.mxu3 %v3270_v34  ;;  %v4600_v34 = vld [vmem:[%s7386_s1 + $0x374] sm:$0xf0]  ;;  %v6280_v55 = vpop.f32.mrf.mxu2 }
  0xc4   :  { %2647 = vmatpush.bf16.msra.mxu1 %v3574_v26  ;;  %v3558_v47 = vor.u32 %v4600_v34, %v3557_v32  ;;  %v4632_v26 = vld [vmem:[%s7386_s1 + $0x474] sm:$0xf0]  ;;  %v3830_v34 = vor.u32 %v4668_v11, %v3829_v10 }
  0xc5   :  { %v3686_v45 = vor.u32 %v4632_v26, %v3685_v22  ;;  %v4628_v49 = vld [vmem:[%s7386_s1 + $0x454] sm:$0xf0] }
  0xc6   :  { %2556 = vmatpush.bf16.msrb.mxu0 %v4274_v61  ;;  %v3541_v61 = vld [vmem:[%s7386_s1 + $0x348] sm:$0xf]  ;;  %v6302_v17 = vpop.f32.mrf.mxu0  ;;  %2666 = vmatpush.bf16.msra.mxu2 %v3702_v21  ;;  %v4564_v11 = vld [vmem:[%s7386_s1 + $0x254] sm:$0xf0] }
  0xc7   :  { %2613 = vmatpush.bf16.msrb.mxu3 %v3254_v63  ;;  %v4596_v63 = vld [vmem:[%s7386_s1 + $0x354] sm:$0xf0]  ;;  %v6304_v20 = vpop.f32.mrf.mxu1  ;;  %v3797_v21 = vld [vmem:[%s7386_s1 + $0x548] sm:$0xf] }
  0xc8   :  { %2648 = vmatpush.bf16.msra.mxu1 %v3558_v47  ;;  %v3542_v28 = vor.u32 %v4596_v63, %v3541_v61  ;;  %2595 = vmatmul.bf16.vlgmr.msrb.gmra.mxu2 %v5077_v48  ;;  %v3669_v47 = vld [vmem:[%s7386_s1 + $0x448] sm:$0xf]  ;;  %v4588_v63 = vld [vmem:[%s7386_s1 + $0x314] sm:$0xf0] }
  0xc9   :  { %2557 = vmatmul.bf16.vlgmr.msrb.gmra.mxu0 %v5625_v19  ;;  %4461 = vmatmul.msk.bf16.vlgmr.msrb.gmra.mxu1 %vm2162_vm0, %v5636_v23  ;;  %v3509_v61 = vld [vmem:[%s7386_s1 + $0x308] sm:$0xf]  ;;  %v4660_v22 = vld [vmem:[%s7386_s1 + $0x554] sm:$0xf0] }
  0xca   :  { %2625 = vmatpush.bf16.msra.mxu0 %v3494_v3  ;;  %v6291_v3 = vpop.f32.mrf.mxu3  ;;  %2667 = vmatpush.bf16.msra.mxu2 %v3686_v45  ;;  %v4560_v45 = vld [vmem:[%s7386_s1 + $0x234] sm:$0xf0] }
  0xcb   :  { %2682 = vmatpush.bf16.msra.mxu3 %v3878_v9  ;;  %v4572_v9 = vld [vmem:[%s7386_s1 + $0x294] sm:$0xf0] }
  0xcc   :  { %v3446_v32 = vor.u32 %v4572_v9, %v3445_v60  ;;  %2614 = vmatmul.bf16.vlgmr.msrb.gmra.mxu3 %v5088_v53  ;;  %2649 = vmatpush.bf16.msra.mxu1 %v3542_v28  ;;  %v3413_v60 = vld [vmem:[%s7386_s1 + $0x248] sm:$0xf]  ;;  %v6350_v9 = vpop.f32.mrf.mxu2 }
  0xcd   :  { %v3397_v53 = vld [vmem:[%s7386_s1 + $0x228] sm:$0xf] }
  0xce   :  { %2626 = vmatpush.bf16.msra.mxu0 %v3478_v36  ;;  %v3429_v36 = vld [vmem:[%s7386_s1 + $0x268] sm:$0xf]  ;;  %v6363_v26 = vpop.f32.mrf.mxu0 }
  0xcf   :  { %2683 = vmatpush.bf16.msra.mxu3 %v3862_v37  ;;  %v3525_v37 = vld [vmem:[%s7386_s1 + $0x328] sm:$0xf]  ;;  %v6365_v28 = vpop.f32.mrf.mxu1 }
  0xd0   :  { %v3526_v52 = vor.u32 %v4592_v38, %v3525_v37  ;;  %v3510_v37 = vor.u32 %v4588_v63, %v3509_v61  ;;  %v3414_v38 = vor.u32 %v4564_v11, %v3413_v60  ;;  %v4620_v60 = vld [vmem:[%s7386_s1 + $0x414] sm:$0xf0]  ;;  %v3381_v61 = vld [vmem:[%s7386_s1 + $0x208] sm:$0xf]  ;;  %v2198_v63 = vadd.f32 %v6072_v4, %v6061_v62 }
  0xd1   :  { %v3398_v11 = vor.u32 %v4560_v45, %v3397_v53  ;;  %v3765_v53 = vld [vmem:[%s7386_s1 + $0x508] sm:$0xf]  ;;  %v4652_v62 = vld [vmem:[%s7386_s1 + $0x514] sm:$0xf0] }
  0xd2   :  { %2627 = vmatpush.bf16.msra.mxu0 %v3462_v58  ;;  %v3430_v58 = vor.u32 %v4568_v39, %v3429_v36  ;;  %v6352_v10 = vpop.f32.mrf.mxu3  ;;  %v3670_v36 = vor.u32 %v4628_v49, %v3669_v47  ;;  %2650 = vmatpush.bf16.msra.mxu1 %v3526_v52  ;;  %v3798_v39 = vor.u32 %v4660_v22, %v3797_v21  ;;  %v3781_v47 = vld [vmem:[%s7386_s1 + $0x528] sm:$0xf]  ;;  %v4656_v49 = vld [vmem:[%s7386_s1 + $0x534] sm:$0xf0] }
  0xd3   :  { %2684 = vmatpush.bf16.msra.mxu3 %v3846_v59  ;;  %v3814_v59 = vor.u32 %v4664_v43, %v3813_v42  ;;  %v3653_v42 = vld [vmem:[%s7386_s1 + $0x428] sm:$0xf]  ;;  %v4624_v43 = vld [vmem:[%s7386_s1 + $0x434] sm:$0xf0]  ;;  %v3782_v21 = vor.u32 %v4656_v49, %v3781_v47  ;;  %v3766_v23 = vor.u32 %v4652_v62, %v3765_v53 }
  0xd4   :  { %2668 = vmatpush.bf16.msra.mxu2 %v3670_v36  ;;  %v4556_v22 = vld [vmem:[%s7386_s1 + $0x214] sm:$0xf0]  ;;  %v6411_v36 = vpop.f32.mrf.mxu2  ;;  %v4261_v4 = vld [vmem:[%s7386_s1 + $0x8e8] sm:$0xf] }
  0xd5   :  { %v4005_v45 = vld [vmem:[%s7386_s1 + $0x6e8] sm:$0xf]  ;;  %v4712_v47 = vld [vmem:[%s7386_s1 + $0x6f4] sm:$0xf0]  ;;  %v3382_v48 = vor.u32 %v4556_v22, %v3381_v61 }
  0xd6   :  { %2628 = vmatpush.bf16.msra.mxu0 %v3446_v32  ;;  %v4133_v32 = vld [vmem:[%s7386_s1 + $0x7e8] sm:$0xf]  ;;  %2651 = vmatpush.bf16.msra.mxu1 %v3510_v37  ;;  %v4772_v22 = vld [vmem:[%s7386_s1 + $0x8d4] sm:$0xf0] }
  0xd7   :  { %2685 = vmatpush.bf16.msra.mxu3 %v3830_v34  ;;  %v4744_v34 = vld [vmem:[%s7386_s1 + $0x7f4] sm:$0xf0]  ;;  %v4245_v61 = vld [vmem:[%s7386_s1 + $0x8c8] sm:$0xf] }
  0xd8   :  { %v4134_v52 = vor.u32 %v4744_v34, %v4133_v32  ;;  %v4117_v32 = vld [vmem:[%s7386_s1 + $0x7c8] sm:$0xf]  ;;  %v4740_v34 = vld [vmem:[%s7386_s1 + $0x7d4] sm:$0xf0]  ;;  %2600 = vmatmul.bf16.gmra.mxu2 %v5209_v44 }
  0xd9   :  { %2562 = vmatmul.bf16.gmra.mxu0 %v5750_v31  ;;  %4462 = vmatmul.msk.bf16.gmra.mxu1 %vm2162_vm0, %v5761_v35  ;;  %v4804_v53 = vld [vmem:[%s7386_s1 + $0x9d4] sm:$0xf0] }
  0xda   :  { %2629 = vmatpush.bf16.msra.mxu0 %v3430_v58  ;;  %v3654_v58 = vor.u32 %v4624_v43, %v3653_v42  ;;  %v6413_v37 = vpop.f32.mrf.mxu3  ;;  %2720 = vmatpush.bf16.msrb.mxu1 %v4134_v52  ;;  %v6427_v42 = vpop.f32.mrf.mxu1  ;;  %v4776_v43 = vld [vmem:[%s7386_s1 + $0x8f4] sm:$0xf0] }
  0xdb   :  { %2686 = vmatpush.bf16.msra.mxu3 %v3814_v59  ;;  %v3637_v59 = vld [vmem:[%s7386_s1 + $0x408] sm:$0xf]  ;;  %v4808_v52 = vld [vmem:[%s7386_s1 + $0x9f4] sm:$0xf0] }
  0xdc   :  { %2669 = vmatpush.bf16.msra.mxu2 %v3654_v58  ;;  %v3638_v49 = vor.u32 %v4620_v60, %v3637_v59  ;;  %v4736_v58 = vld [vmem:[%s7386_s1 + $0x7b4] sm:$0xf0]  ;;  %v4262_v59 = vor.u32 %v4776_v43, %v4261_v4  ;;  %v4006_v60 = vor.u32 %v4712_v47, %v4005_v45  ;;  %2619 = vmatmul.bf16.gmra.mxu3 %v5220_v50  ;;  %v4085_v43 = vld [vmem:[%s7386_s1 + $0x788] sm:$0xf]  ;;  %v6483_v47 = vpop.f32.mrf.mxu2 }
  0xdd   :  { %v4102_v62 = vor.u32 %v4736_v58, %v4101_v30  ;;  %v2200_v4 = vadd.f32 %v6132_v46, %v6124_v41  ;;  %v4732_v45 = vld [vmem:[%s7386_s1 + $0x794] sm:$0xf0]  ;;  %v4246_v30 = vor.u32 %v4772_v22, %v4245_v61 }
  0xde   :  { %2630 = vmatpush.bf16.msra.mxu0 %v3414_v38  ;;  %v2217_v38 = vadd.f32 %v6111_v33, %v2198_v63  ;;  %v4389_v33 = vld [vmem:[%s7386_s1 + $0x9e8] sm:$0xf]  ;;  %v4118_v63 = vor.u32 %v4740_v34, %v4117_v32  ;;  %v4708_v34 = vld [vmem:[%s7386_s1 + $0x6d4] sm:$0xf0] }
  0xdf   :  { %2687 = vmatpush.bf16.msra.mxu3 %v3798_v39  ;;  %v6425_v39 = vpop.f32.mrf.mxu0  ;;  %v3989_v32 = vld [vmem:[%s7386_s1 + $0x6c8] sm:$0xf]  ;;  %v4704_v58 = vld [vmem:[%s7386_s1 + $0x6b4] sm:$0xf0] }
  0xe0   :  { %2670 = vmatpush.bf16.msra.mxu2 %v3638_v49  ;;  %2721 = vmatpush.bf16.msrb.mxu1 %v4118_v63  ;;  %v3990_v41 = vor.u32 %v4708_v34, %v3989_v32  ;;  %v3973_v63 = vld [vmem:[%s7386_s1 + $0x6a8] sm:$0xf] }
  0xe1   :  { %v3974_v32 = vor.u32 %v4704_v58, %v3973_v63  ;;  %v4197_v58 = vld [vmem:[%s7386_s1 + $0x868] sm:$0xf] }
  0xe2   :  { %2631 = vmatpush.bf16.msra.mxu0 %v3398_v11  ;;  %v2236_v11 = vadd.f32 %v6122_v40, %v2217_v38  ;;  %v4373_v40 = vld [vmem:[%s7386_s1 + $0x9c8] sm:$0xf]  ;;  %v6485_v49 = vpop.f32.mrf.mxu3 }
  0xe3   :  { %2688 = vmatpush.bf16.msra.mxu3 %v3782_v21  ;;  %v4390_v21 = vor.u32 %v4808_v52, %v4389_v33  ;;  %v4374_v33 = vor.u32 %v4804_v53, %v4373_v40  ;;  %v4768_v52 = vld [vmem:[%s7386_s1 + $0x8b4] sm:$0xf0] }
  0xe4   :  { %v2255_v38 = vadd.f32 %v6302_v17, %v2236_v11  ;;  %2739 = vmatpush.bf16.msrb.mxu2 %v4262_v59  ;;  %v6493_v17 = vpop.f32.mrf.mxu1  ;;  %2722 = vmatpush.bf16.msrb.mxu1 %v4102_v62  ;;  %v4800_v59 = vld [vmem:[%s7386_s1 + $0x9b4] sm:$0xf0]  ;;  %v4069_v11 = vld [vmem:[%s7386_s1 + $0x768] sm:$0xf] }
  0xe5   :  { %v4213_v62 = vld [vmem:[%s7386_s1 + $0x888] sm:$0xf] }
  0xe6   :  { %2632 = vmatpush.bf16.msra.mxu0 %v3382_v48  ;;  %v4229_v48 = vld [vmem:[%s7386_s1 + $0x8a8] sm:$0xf]  ;;  %v2274_v61 = vadd.f32 %v6304_v20, %v2255_v38  ;;  %v2203_v20 = vadd.f32 %v6188_v29, %v6177_v25  ;;  %v4700_v25 = vld [vmem:[%s7386_s1 + $0x694] sm:$0xf0] }
  0xe7   :  { %2689 = vmatpush.bf16.msra.mxu3 %v3766_v23  ;;  %v2219_v23 = vadd.f32 %v6164_v16, %v2200_v4  ;;  %v6491_v46 = vpop.f32.mrf.mxu0  ;;  %v4357_v16 = vld [vmem:[%s7386_s1 + $0x9a8] sm:$0xf]  ;;  %v4230_v22 = vor.u32 %v4768_v52, %v4229_v48  ;;  %v4764_v4 = vld [vmem:[%s7386_s1 + $0x894] sm:$0xf0] }
  0xe8   :  { %2740 = vmatpush.bf16.msrb.mxu2 %v4246_v30  ;;  %v2293_v40 = vadd.f32 %v6350_v9, %v2274_v61  ;;  %v4358_v53 = vor.u32 %v4800_v59, %v4357_v16  ;;  %v4341_v29 = vld [vmem:[%s7386_s1 + $0x988] sm:$0xf]  ;;  %v2222_v9 = vadd.f32 %v6230_v2, %v2203_v20  ;;  %v4724_v48 = vld [vmem:[%s7386_s1 + $0x754] sm:$0xf0]  ;;  %v4214_v52 = vor.u32 %v4764_v4, %v4213_v62 }
  0xe9   :  { %v2238_v34 = vadd.f32 %v6175_v24, %v2219_v23  ;;  %v3957_v24 = vld [vmem:[%s7386_s1 + $0x688] sm:$0xf]  ;;  %v4760_v16 = vld [vmem:[%s7386_s1 + $0x874] sm:$0xf0]  ;;  %2633 = vmatmul.bf16.vlgmr.msra.gmra.mxu0 %v5090_v54  ;;  %2652 = vmatmul.bf16.vlgmr.msra.gmra.mxu1 %v5098_v57 }
  0xea   :  { %2701 = vmatpush.bf16.msrb.mxu0 %v4006_v60  ;;  %v4086_v60 = vor.u32 %v4732_v45, %v4085_v43  ;;  %v6538_v45 = vpop.f32.mrf.mxu2  ;;  %v6540_v30 = vpop.f32.mrf.mxu3  ;;  %v2312_v2 = vadd.f32 %v6352_v10, %v2293_v40  ;;  %v3958_v63 = vor.u32 %v4700_v25, %v3957_v24  ;;  %v3941_v10 = vld [vmem:[%s7386_s1 + $0x668] sm:$0xf]  ;;  %v4720_v40 = vld [vmem:[%s7386_s1 + $0x734] sm:$0xf0]  ;;  %2671 = vmatmul.bf16.vlgmr.msra.gmra.mxu2 %v5365_v0 }
  0xeb   :  { %2758 = vmatpush.bf16.msrb.mxu3 %v4390_v21  ;;  %v4728_v21 = vld [vmem:[%s7386_s1 + $0x774] sm:$0xf0]  ;;  %v2257_v43 = vadd.f32 %v6363_v26, %v2238_v34  ;;  %v4037_v34 = vld [vmem:[%s7386_s1 + $0x728] sm:$0xf]  ;;  %v4198_v62 = vor.u32 %v4760_v16, %v4197_v58  ;;  %v3239_v58 = vld [vmem:[%s7386_s1 + $0xf8] sm:$0xf0] }
  0xec   :  { %2723 = vmatpush.bf16.msrb.mxu1 %v4086_v60  ;;  %v4070_v38 = vor.u32 %v4728_v21, %v4069_v11  ;;  %2741 = vmatpush.bf16.msrb.mxu2 %v4230_v22  ;;  %v4796_v26 = vld [vmem:[%s7386_s1 + $0x994] sm:$0xf0]  ;;  %v4325_v21 = vld [vmem:[%s7386_s1 + $0x968] sm:$0xf]  ;;  %v4038_v25 = vor.u32 %v4720_v40, %v4037_v34 }
  0xed   :  { %v2276_v59 = vadd.f32 %v6365_v28, %v2257_v43  ;;  %v4342_v61 = vor.u32 %v4796_v26, %v4341_v29  ;;  %v4696_v11 = vld [vmem:[%s7386_s1 + $0x674] sm:$0xf0]  ;;  %2690 = vmatmul.bf16.vlgmr.msra.gmra.mxu3 %v5367_v1  ;;  %v3925_v43 = vld [vmem:[%s7386_s1 + $0x648] sm:$0xf] }
  0xee   :  { %2702 = vmatpush.bf16.msrb.mxu0 %v3990_v41  ;;  %v4053_v41 = vld [vmem:[%s7386_s1 + $0x748] sm:$0xf]  ;;  %v4792_v28 = vld [vmem:[%s7386_s1 + $0x974] sm:$0xf0]  ;;  %v3942_v4 = vor.u32 %v4696_v11, %v3941_v10 }
  0xef   :  { %2759 = vmatpush.bf16.msrb.mxu3 %v4374_v33  ;;  %v2330_v23 = vpop.f32.mrf.mxu0  ;;  %v2349_v33 = vpop.f32.mrf.mxu1  ;;  %v4054_v22 = vor.u32 %v4724_v48, %v4053_v41  ;;  %v4309_v24 = vld [vmem:[%s7386_s1 + $0x948] sm:$0xf]  ;;  %v4788_v41 = vld [vmem:[%s7386_s1 + $0x954] sm:$0xf0] }
  0xf0   :  { %2724 = vmatpush.bf16.msrb.mxu1 %v4070_v38  ;;  %v2331_v60 = vadd.f32 %v2330_v23, %v2312_v2  ;;  %2742 = vmatpush.bf16.msrb.mxu2 %v4214_v52  ;;  %v4181_v38 = vld [vmem:[%s7386_s1 + $0x848] sm:$0xf]  ;;  %v4716_v2 = vld [vmem:[%s7386_s1 + $0x714] sm:$0xf0]  ;;  %v4310_v10 = vor.u32 %v4788_v41, %v4309_v24  ;;  %v4550_v24 = vld [vmem:[%s7386_s1 + $0x1ec] sm:$0xf] }
  0xf1   :  { %v4021_v48 = vld [vmem:[%s7386_s1 + $0x708] sm:$0xf]  ;;  %v4752_v11 = vld [vmem:[%s7386_s1 + $0x834] sm:$0xf0] }
  0xf2   :  { %2703 = vmatpush.bf16.msrb.mxu0 %v3974_v32  ;;  %v2241_v32 = vadd.f32 %v6238_v14, %v2222_v9  ;;  %v2295_v14 = vadd.f32 %v6411_v36, %v2276_v59  ;;  %v4326_v36 = vor.u32 %v4792_v28, %v4325_v21  ;;  %v2368_v9 = vpop.f32.mrf.mxu2  ;;  %v6602_v26 = vpop.f32.mrf.mxu3  ;;  %v4688_v21 = vld [vmem:[%s7386_s1 + $0x634] sm:$0xf0]  ;;  %v4293_v28 = vld [vmem:[%s7386_s1 + $0x928] sm:$0xf] }
  0xf3   :  { %2760 = vmatpush.bf16.msrb.mxu3 %v4358_v53  ;;  %v2205_v53 = vadd.f32 %v6251_v27, %v6240_v15  ;;  %v4756_v15 = vld [vmem:[%s7386_s1 + $0x854] sm:$0xf0]  ;;  %v2350_v27 = vadd.f32 %v2349_v33, %v2331_v60 }
  0xf4   :  { %v2260_v20 = vadd.f32 %v6425_v39, %v2241_v32  ;;  %v4692_v39 = vld [vmem:[%s7386_s1 + $0x654] sm:$0xf0]  ;;  %2725 = vmatpush.bf16.msrb.mxu1 %v4054_v22  ;;  %v2314_v23 = vadd.f32 %v6413_v37, %v2295_v14  ;;  %2743 = vmatpush.bf16.msrb.mxu2 %v4198_v62  ;;  %v4182_v59 = vor.u32 %v4756_v15, %v4181_v38  ;;  %v4165_v37 = vld [vmem:[%s7386_s1 + $0x828] sm:$0xf] }
  0xf5   :  { %v2224_v29 = vadd.f32 %v6280_v55, %v2205_v53  ;;  %v2369_v33 = vadd.f32 %v2368_v9, %v2350_v27  ;;  %v3926_v60 = vor.u32 %v4692_v39, %v3925_v43  ;;  %v4022_v22 = vor.u32 %v4716_v2, %v4021_v48  ;;  %v4784_v34 = vld [vmem:[%s7386_s1 + $0x934] sm:$0xf0]  ;;  %v3893_v38 = vld [vmem:[%s7386_s1 + $0x608] sm:$0xf] }
  0xf6   :  { %2704 = vmatpush.bf16.msrb.mxu0 %v3958_v63  ;;  %v4518_v63 = vld [vmem:[%s7386_s1 + $0xec] sm:$0xf]  ;;  %v2279_v16 = vadd.f32 %v6427_v42, %v2260_v20  ;;  %v3909_v42 = vld [vmem:[%s7386_s1 + $0x628] sm:$0xf]  ;;  %v4166_v20 = vor.u32 %v4752_v11, %v4165_v37  ;;  %v3351_v11 = vld [vmem:[%s7386_s1 + $0x1d8] sm:$0xf0] }
  0xf7   :  { %2761 = vmatpush.bf16.msrb.mxu3 %v4342_v61  ;;  %v2332_v52 = vpop.f32.mrf.mxu0  ;;  %v2351_v55 = vpop.f32.mrf.mxu1  ;;  %3005 = vst [vmem:[%s7388_s2] sm:$0xff] %v2369_v33  ;;  %v2243_v32 = vadd.f32 %v6291_v3, %v2224_v29  ;;  %v3242_v40 = vor.u32 %v4518_v63, %v3239_v58  ;;  %v3910_v62 = vor.u32 %v4688_v21, %v3909_v42  ;;  %v4149_v3 = vld [vmem:[%s7386_s1 + $0x808] sm:$0xf]  ;;  %v4582_v29 = vld [vmem:[%s7386_s1 + $0x2ec] sm:$0xf] }
  0xf8   :  { %v2333_v61 = vadd.f32 %v2332_v52, %v2314_v23  ;;  %2726 = vmatpush.bf16.msrb.mxu1 %v4038_v25  ;;  %v2298_v53 = vadd.f32 %v6483_v47, %v2279_v16  ;;  %2744 = vmatpush.bf16.msrb.mxu2 %v4182_v59  ;;  %v4294_v47 = vor.u32 %v4784_v34, %v4293_v28  ;;  %v4277_v27 = vld [vmem:[%s7386_s1 + $0x908] sm:$0xf]  ;;  %v3367_v25 = vld [vmem:[%s7386_s1 + $0x1f8] sm:$0xf0]  ;;  %v4824_v52 = vld [vmem:[%s7386_s1 + $0xa74] sm:$0xf0] }
  0xf9   :  { %v2262_v14 = vadd.f32 %v6491_v46, %v2243_v32  ;;  %v4684_v46 = vld [vmem:[%s7386_s1 + $0x614] sm:$0xf0]  ;;  %v3495_v23 = vld [vmem:[%s7386_s1 + $0x2f8] sm:$0xf0]  ;;  %v4453_v33 = vld [vmem:[%s7386_s1 + $0xa68] sm:$0xf]  ;;  %2638 = vmatmul.bf16.gmra.mxu0 %v5222_v51  ;;  %2657 = vmatmul.bf16.gmra.mxu1 %v5230_v56 }
  0xfa   :  { %2705 = vmatpush.bf16.msrb.mxu0 %v3942_v4  ;;  %v4748_v4 = vld [vmem:[%s7386_s1 + $0x814] sm:$0xf0]  ;;  %v2352_v15 = vadd.f32 %v2351_v55, %v2333_v61  ;;  %v2370_v43 = vpop.f32.mrf.mxu2  ;;  %v6663_v39 = vpop.f32.mrf.mxu3  ;;  %v2317_v9 = vadd.f32 %v6485_v49, %v2298_v53  ;;  %v3894_v63 = vor.u32 %v4684_v46, %v3893_v38  ;;  %v4514_v58 = vld [vmem:[%s7386_s1 + $0xcc] sm:$0xf]  ;;  %v3223_v16 = vld [vmem:[%s7386_s1 + $0xd8] sm:$0xf0]  ;;  %v3498_v37 = vor.u32 %v4582_v29, %v3495_v23 }
  0xfb   :  { %2762 = vmatpush.bf16.msrb.mxu3 %v4326_v36  ;;  %v4780_v36 = vld [vmem:[%s7386_s1 + $0x914] sm:$0xf0]  ;;  %v2281_v55 = vadd.f32 %v6493_v17, %v2262_v14  ;;  %v4150_v49 = vor.u32 %v4748_v4, %v4149_v3  ;;  %v3370_v17 = vor.u32 %v4550_v24, %v3367_v25  ;;  %v4454_v61 = vor.u32 %v4824_v52, %v4453_v33  ;;  %v4578_v42 = vld [vmem:[%s7386_s1 + $0x2cc] sm:$0xf]  ;;  %v3479_v32 = vld [vmem:[%s7386_s1 + $0x2d8] sm:$0xf0] }
  0xfc   :  { %2727 = vmatpush.bf16.msrb.mxu1 %v4022_v22  ;;  %v2371_v41 = vadd.f32 %v2370_v43, %v2352_v15  ;;  %2745 = vmatpush.bf16.msrb.mxu2 %v4166_v20  ;;  %v3226_v22 = vor.u32 %v4514_v58, %v3223_v16  ;;  %v4437_v28 = vld [vmem:[%s7386_s1 + $0xa48] sm:$0xf]  ;;  %v4820_v34 = vld [vmem:[%s7386_s1 + $0xa54] sm:$0xf0]  ;;  %v3482_v3 = vor.u32 %v4578_v42, %v3479_v32  ;;  %v4542_v4 = vld [vmem:[%s7386_s1 + $0x1ac] sm:$0xf] }
  0xfd   :  { %v2300_v21 = vadd.f32 %v6538_v45, %v2281_v55  ;;  %2676 = vmatmul.bf16.gmra.mxu2 %v5494_v7  ;;  %2695 = vmatmul.bf16.gmra.mxu3 %v5496_v8  ;;  %v4510_v45 = vld [vmem:[%s7386_s1 + $0xac] sm:$0xf]  ;;  %v3335_v38 = vld [vmem:[%s7386_s1 + $0x1b8] sm:$0xf0]  ;;  %v4421_v29 = vld [vmem:[%s7386_s1 + $0xa28] sm:$0xf] }
  0xfe   :  { %2706 = vmatpush.bf16.msrb.mxu0 %v3926_v60  ;;  %3010 = vst [vmem:[%s7388_s2 + $0x20] sm:$0xff] %v2371_v41  ;;  %v4278_v60 = vor.u32 %v4780_v36, %v4277_v27  ;;  %v4574_v15 = vld [vmem:[%s7386_s1 + $0x2ac] sm:$0xf]  ;;  %v3463_v25 = vld [vmem:[%s7386_s1 + $0x2b8] sm:$0xf0] }
  0xff   :  { %2763 = vmatpush.bf16.msrb.mxu3 %v4310_v10  ;;  %v2335_v48 = vpop.f32.mrf.mxu0  ;;  %v2354_v2 = vpop.f32.mrf.mxu1  ;;  %v4546_v10 = vld [vmem:[%s7386_s1 + $0x1cc] sm:$0xf]  ;;  %v2319_v46 = vadd.f32 %v6540_v30, %v2300_v21  ;;  %v3191_v41 = vld [vmem:[%s7386_s1 + $0x98] sm:$0xf0]  ;;  %v3466_v23 = vor.u32 %v4574_v15, %v3463_v25  ;;  %v4405_v42 = vld [vmem:[%s7386_s1 + $0xa08] sm:$0xf] }
 0x100   :  { %2796 = vmatpush.bf16.msra.mxu1 %v3242_v40  ;;  %v2336_v59 = vadd.f32 %v2335_v48, %v2317_v9  ;;  %2746 = vmatpush.bf16.msrb.mxu2 %v4150_v49  ;;  %v3207_v40 = vld [vmem:[%s7386_s1 + $0xb8] sm:$0xf0]  ;;  %v3354_v14 = vor.u32 %v4546_v10, %v3351_v11  ;;  %v4816_v9 = vld [vmem:[%s7386_s1 + $0xa34] sm:$0xf0]  ;;  %v4506_v30 = vld [vmem:[%s7386_s1 + $0x8c] sm:$0xf] }
 0x101   :  { %v3210_v24 = vor.u32 %v4510_v45, %v3207_v40  ;;  %v4538_v33 = vld [vmem:[%s7386_s1 + $0x18c] sm:$0xf]  ;;  %v3319_v52 = vld [vmem:[%s7386_s1 + $0x198] sm:$0xf0]  ;;  %v4422_v55 = vor.u32 %v4816_v9, %v4421_v29  ;;  %v3194_v49 = vor.u32 %v4506_v30, %v3191_v41  ;;  %v4812_v21 = vld [vmem:[%s7386_s1 + $0xa14] sm:$0xf0] }
 0x102   :  { %2707 = vmatpush.bf16.msrb.mxu0 %v3910_v62  ;;  %v2355_v53 = vadd.f32 %v2354_v2, %v2336_v59  ;;  %v2373_v20 = vpop.f32.mrf.mxu2  ;;  %v6723_v62 = vpop.f32.mrf.mxu3  ;;  %v3338_v2 = vor.u32 %v4542_v4, %v3335_v38  ;;  %v3447_v58 = vld [vmem:[%s7386_s1 + $0x298] sm:$0xf0]  ;;  %v3322_v59 = vor.u32 %v4538_v33, %v3319_v52  ;;  %v4566_v40 = vld [vmem:[%s7386_s1 + $0x26c] sm:$0xf]  ;;  %v4406_v38 = vor.u32 %v4812_v21, %v4405_v42 }
 0x103   :  { %2764 = vmatpush.bf16.msrb.mxu3 %v4294_v47  ;;  %v4438_v47 = vor.u32 %v4820_v34, %v4437_v28  ;;  %v3303_v11 = vld [vmem:[%s7386_s1 + $0x178] sm:$0xf0]  ;;  %v4494_v9 = vld [vmem:[%s7386_s1 + $0x2c] sm:$0xf] }
 0x104   :  { %2815 = vmatpush.bf16.msra.mxu2 %v3370_v17  ;;  %v2374_v27 = vadd.f32 %v2373_v20, %v2355_v53  ;;  %2797 = vmatpush.bf16.msra.mxu1 %v3226_v22  ;;  %v4502_v17 = vld [vmem:[%s7386_s1 + $0x6c] sm:$0xf]  ;;  %v3431_v53 = vld [vmem:[%s7386_s1 + $0x278] sm:$0xf0] }
 0x105   :  { %v3159_v4 = vld [vmem:[%s7386_s1 + $0x58] sm:$0xf0]  ;;  %v4610_v41 = vld [vmem:[%s7386_s1 + $0x3cc] sm:$0xf] }
 0x106   :  { %2708 = vmatpush.bf16.msrb.mxu0 %v3894_v63  ;;  %3014 = vst [vmem:[%s7388_s2 + $0x40] sm:$0xff] %v2374_v27  ;;  %v4570_v63 = vld [vmem:[%s7386_s1 + $0x28c] sm:$0xf]  ;;  %v3287_v15 = vld [vmem:[%s7386_s1 + $0x158] sm:$0xf0] }
 0x107   :  { %2765 = vmatpush.bf16.msrb.mxu3 %v4278_v60  ;;  %v2337_v36 = vpop.f32.mrf.mxu0  ;;  %v2356_v43 = vpop.f32.mrf.mxu1  ;;  %v4534_v60 = vld [vmem:[%s7386_s1 + $0x16c] sm:$0xf]  ;;  %v3450_v34 = vor.u32 %v4570_v63, %v3447_v58  ;;  %v3415_v25 = vld [vmem:[%s7386_s1 + $0x258] sm:$0xf0] }
 0x108   :  { %v2338_v48 = vadd.f32 %v2337_v36, %v2319_v46  ;;  %2816 = vmatpush.bf16.msra.mxu2 %v3354_v14  ;;  %2798 = vmatpush.bf16.msra.mxu1 %v3210_v24  ;;  %v4530_v14 = vld [vmem:[%s7386_s1 + $0x14c] sm:$0xf]  ;;  %v3306_v20 = vor.u32 %v4534_v60, %v3303_v11  ;;  %v3623_v46 = vld [vmem:[%s7386_s1 + $0x3f8] sm:$0xf0]  ;;  %v3434_v36 = vor.u32 %v4566_v40, %v3431_v53 }
 0x109   :  { %2709 = vmatmul.bf16.vlgmr.msrb.gmra.mxu0 %v5378_v5  ;;  %2728 = vmatmul.bf16.vlgmr.msrb.gmra.mxu1 %v5380_v6  ;;  %v4562_v24 = vld [vmem:[%s7386_s1 + $0x24c] sm:$0xf]  ;;  %v3290_v29 = vor.u32 %v4530_v14, %v3287_v15  ;;  %v3143_v30 = vld [vmem:[%s7386_s1 + $0x38] sm:$0xf0] }
 0x10a   :  { %2781 = vmatpush.bf16.msra.mxu0 %v4454_v61  ;;  %v2357_v16 = vadd.f32 %v2356_v43, %v2338_v48  ;;  %v2375_v61 = vpop.f32.mrf.mxu2  ;;  %v6774_v10 = vpop.f32.mrf.mxu3  ;;  %v3271_v33 = vld [vmem:[%s7386_s1 + $0x138] sm:$0xf0]  ;;  %v4558_v63 = vld [vmem:[%s7386_s1 + $0x22c] sm:$0xf] }
 0x10b   :  { %2834 = vmatpush.bf16.msra.mxu3 %v3498_v37  ;;  %v3175_v37 = vld [vmem:[%s7386_s1 + $0x78] sm:$0xf0]  ;;  %v4490_v11 = vld [vmem:[%s7386_s1 + $0xc] sm:$0xf] }
 0x10c   :  { %2817 = vmatpush.bf16.msra.mxu2 %v3338_v2  ;;  %v2376_v22 = vadd.f32 %v2375_v61, %v2357_v16  ;;  %2799 = vmatpush.bf16.msra.mxu1 %v3194_v49  ;;  %v3178_v45 = vor.u32 %v4502_v17, %v3175_v37  ;;  %v3607_v52 = vld [vmem:[%s7386_s1 + $0x3d8] sm:$0xf0]  ;;  %v3418_v16 = vor.u32 %v4562_v24, %v3415_v25  ;;  %v4522_v17 = vld [vmem:[%s7386_s1 + $0x10c] sm:$0xf] }
 0x10d   :  { %2747 = vmatmul.bf16.vlgmr.msrb.gmra.mxu2 %v5623_v18  ;;  %2766 = vmatmul.bf16.vlgmr.msrb.gmra.mxu3 %v5625_v19  ;;  %v3610_v58 = vor.u32 %v4610_v41, %v3607_v52  ;;  %v3399_v60 = vld [vmem:[%s7386_s1 + $0x238] sm:$0xf0]  ;;  %v4606_v21 = vld [vmem:[%s7386_s1 + $0x3ac] sm:$0xf] }
 0x10e   :  { %2782 = vmatpush.bf16.msra.mxu0 %v4438_v47  ;;  %3018 = vst [vmem:[%s7388_s2 + $0x60] sm:$0xf] %v2376_v22  ;;  %v4614_v47 = vld [vmem:[%s7386_s1 + $0x3ec] sm:$0xf]  ;;  %v3255_v37 = vld [vmem:[%s7386_s1 + $0x118] sm:$0xf0]  ;;  %v3402_v53 = vor.u32 %v4558_v63, %v3399_v60 }
 0x10f   :  { %2835 = vmatpush.bf16.msra.mxu3 %v3482_v3  ;;  %v6785_v32 = vpop.f32.mrf.mxu0  ;;  %v6787_v28 = vpop.f32.mrf.mxu1  ;;  %v4498_v3 = vld [vmem:[%s7386_s1 + $0x4c] sm:$0xf]  ;;  %v3626_v27 = vor.u32 %v4614_v47, %v3623_v46  ;;  %v3127_v42 = vld [vmem:[%s7386_s1 + $0x18] sm:$0xf0] }
 0x110   :  { %2818 = vmatpush.bf16.msra.mxu2 %v3322_v59  ;;  %2800 = vmatpush.bf16.msra.mxu1 %v3178_v45  ;;  %v3162_v43 = vor.u32 %v4498_v3, %v3159_v4  ;;  %v3146_v59 = vor.u32 %v4494_v9, %v3143_v30  ;;  %v4646_v22 = vld [vmem:[%s7386_s1 + $0x4ec] sm:$0xf]  ;;  %v3591_v45 = vld [vmem:[%s7386_s1 + $0x3b8] sm:$0xf0]  ;;  %v3130_v14 = vor.u32 %v4490_v11, %v3127_v42  ;;  %v7403_v11 = vld [vmem:[#allocation6_spill] sm:$0xff] }
 0x111   :  { %v3594_v40 = vor.u32 %v4606_v21, %v3591_v45  ;;  %v3383_v3 = vld [vmem:[%s7386_s1 + $0x218] sm:$0xf0]  ;;  %v3258_v4 = vor.u32 %v4522_v17, %v3255_v37  ;;  %v4710_v46 = vld [vmem:[%s7386_s1 + $0x6ec] sm:$0xf] }
 0x112   :  { %2783 = vmatpush.bf16.msra.mxu0 %v4422_v55  ;;  %v6835_v48 = vpop.f32.mrf.mxu2  ;;  %v6837_v2 = vpop.f32.mrf.mxu3  ;;  %v3879_v15 = vld [vmem:[%s7386_s1 + $0x5f8] sm:$0xf0]  ;;  %v4642_v24 = vld [vmem:[%s7386_s1 + $0x4cc] sm:$0xf] }
 0x113   :  { %2836 = vmatpush.bf16.msra.mxu3 %v3466_v23  ;;  %v4526_v23 = vld [vmem:[%s7386_s1 + $0x12c] sm:$0xf]  ;;  %v3735_v25 = vld [vmem:[%s7386_s1 + $0x4d8] sm:$0xf0] }
 0x114   :  { %2819 = vmatpush.bf16.msra.mxu2 %v3306_v20  ;;  %2801 = vmatpush.bf16.msra.mxu1 %v3162_v43  ;;  %v3274_v61 = vor.u32 %v4526_v23, %v3271_v33  ;;  %v4554_v20 = vld [vmem:[%s7386_s1 + $0x20c] sm:$0xf]  ;;  %v4007_v43 = vld [vmem:[%s7386_s1 + $0x6f8] sm:$0xf0] }
 0x115   :  { %v4602_v30 = vld [vmem:[%s7386_s1 + $0x38c] sm:$0xf]  ;;  %v3575_v41 = vld [vmem:[%s7386_s1 + $0x398] sm:$0xf0]  ;;  %v3386_v23 = vor.u32 %v4554_v20, %v3383_v3  ;;  %v4010_v52 = vor.u32 %v4710_v46, %v4007_v43 }
 0x116   :  { %2784 = vmatpush.bf16.msra.mxu0 %v4406_v38  ;;  %v4678_v38 = vld [vmem:[%s7386_s1 + $0x5ec] sm:$0xf]  ;;  %v3991_v60 = vld [vmem:[%s7386_s1 + $0x6d8] sm:$0xf0] }
 0x117   :  { %2837 = vmatpush.bf16.msra.mxu3 %v3450_v34  ;;  %v6848_v55 = vpop.f32.mrf.mxu0  ;;  %v6850_v49 = vpop.f32.mrf.mxu1  ;;  %v3751_v34 = vld [vmem:[%s7386_s1 + $0x4f8] sm:$0xf0]  ;;  %v3882_v33 = vor.u32 %v4678_v38, %v3879_v15  ;;  %v4674_v63 = vld [vmem:[%s7386_s1 + $0x5cc] sm:$0xf] }
 0x118   :  { %2820 = vmatpush.bf16.msra.mxu2 %v3290_v29  ;;  %2802 = vmatpush.bf16.msra.mxu1 %v3146_v59  ;;  %v3754_v47 = vor.u32 %v4646_v22, %v3751_v34  ;;  %v4706_v59 = vld [vmem:[%s7386_s1 + $0x6cc] sm:$0xf]  ;;  %v3719_v37 = vld [vmem:[%s7386_s1 + $0x4b8] sm:$0xf0] }
 0x119   :  { %2714 = vmatmul.bf16.gmra.mxu0 %v5507_v12  ;;  %2733 = vmatmul.bf16.gmra.mxu1 %v5509_v13  ;;  %v4638_v17 = vld [vmem:[%s7386_s1 + $0x4ac] sm:$0xf]  ;;  %v3559_v21 = vld [vmem:[%s7386_s1 + $0x378] sm:$0xf0]  ;;  %v3994_v34 = vor.u32 %v4706_v59, %v3991_v60 }
 0x11a   :  { %2853 = vmatpush.bf16.msrb.mxu0 %v3626_v27  ;;  %v6897_v27 = vpop.f32.mrf.mxu2  ;;  %v4598_v42 = vld [vmem:[%s7386_s1 + $0x36c] sm:$0xf]  ;;  %v3703_v15 = vld [vmem:[%s7386_s1 + $0x498] sm:$0xf0] }
 0x11b   :  { %2838 = vmatpush.bf16.msra.mxu3 %v3434_v36  ;;  %v6899_v36 = vpop.f32.mrf.mxu3  ;;  %v4670_v45 = vld [vmem:[%s7386_s1 + $0x5ac] sm:$0xf]  ;;  %v3687_v59 = vld [vmem:[%s7386_s1 + $0x478] sm:$0xf0] }
 0x11c   :  { %2821 = vmatpush.bf16.msra.mxu2 %v3274_v61  ;;  %2803 = vmatpush.bf16.msra.mxu1 %v3130_v14  ;;  %v3578_v61 = vor.u32 %v4602_v30, %v3575_v41  ;;  %v4702_v14 = vld [vmem:[%s7386_s1 + $0x6ac] sm:$0xf] }
 0x11d   :  { %2752 = vmatmul.bf16.gmra.mxu2 %v7403_v11  ;;  %2771 = vmatmul.bf16.gmra.mxu3 %v5750_v31  ;;  %v4634_v38 = vld [vmem:[%s7386_s1 + $0x48c] sm:$0xf]  ;;  %v3767_v31 = vld [vmem:[%s7386_s1 + $0x518] sm:$0xf0] }
 0x11e   :  { %2854 = vmatpush.bf16.msrb.mxu0 %v3610_v58  ;;  %v3863_v58 = vld [vmem:[%s7386_s1 + $0x5d8] sm:$0xf0]  ;;  %v4682_v13 = vld [vmem:[%s7386_s1 + $0x60c] sm:$0xf] }
 0x11f   :  { %2839 = vmatpush.bf16.msra.mxu3 %v3418_v16  ;;  %v6910_v29 = vpop.f32.mrf.mxu0  ;;  %v6912_v9 = vpop.f32.mrf.mxu1  ;;  %v3738_v16 = vor.u32 %v4642_v24, %v3735_v25  ;;  %v3866_v22 = vor.u32 %v4674_v63, %v3863_v58  ;;  %v4594_v24 = vld [vmem:[%s7386_s1 + $0x34c] sm:$0xf]  ;;  %v3543_v25 = vld [vmem:[%s7386_s1 + $0x358] sm:$0xf0] }
 0x120   :  { %2822 = vmatpush.bf16.msra.mxu2 %v3258_v4  ;;  %2872 = vmatpush.bf16.msrb.mxu1 %v3754_v47  ;;  %v3975_v4 = vld [vmem:[%s7386_s1 + $0x6b8] sm:$0xf0]  ;;  %v3562_v47 = vor.u32 %v4598_v42, %v3559_v21  ;;  %v4698_v63 = vld [vmem:[%s7386_s1 + $0x68c] sm:$0xf]  ;;  %v3546_v60 = vor.u32 %v4594_v24, %v3543_v25 }
 0x121   :  { %v3978_v41 = vor.u32 %v4702_v14, %v3975_v4  ;;  %v3959_v58 = vld [vmem:[%s7386_s1 + $0x698] sm:$0xf0]  ;;  %v4626_v4 = vld [vmem:[%s7386_s1 + $0x44c] sm:$0xf] }
 0x122   :  { %2855 = vmatpush.bf16.msrb.mxu0 %v3594_v40  ;;  %v3847_v40 = vld [vmem:[%s7386_s1 + $0x5b8] sm:$0xf0]  ;;  %v6957_v20 = vpop.f32.mrf.mxu2  ;;  %v3962_v42 = vor.u32 %v4698_v63, %v3959_v58  ;;  %v4658_v25 = vld [vmem:[%s7386_s1 + $0x54c] sm:$0xf] }
 0x123   :  { %2840 = vmatpush.bf16.msra.mxu3 %v3402_v53  ;;  %v3722_v53 = vor.u32 %v4638_v17, %v3719_v37  ;;  %v6959_v3 = vpop.f32.mrf.mxu3  ;;  %v3850_v30 = vor.u32 %v4670_v45, %v3847_v40  ;;  %v4662_v37 = vld [vmem:[%s7386_s1 + $0x56c] sm:$0xf]  ;;  %v3527_v45 = vld [vmem:[%s7386_s1 + $0x338] sm:$0xf0] }
 0x124   :  { %2891 = vmatpush.bf16.msrb.mxu2 %v3882_v33  ;;  %2873 = vmatpush.bf16.msrb.mxu1 %v3738_v16  ;;  %v3831_v33 = vld [vmem:[%s7386_s1 + $0x598] sm:$0xf0]  ;;  %v4630_v16 = vld [vmem:[%s7386_s1 + $0x46c] sm:$0xf] }
 0x125   :  { %v3690_v21 = vor.u32 %v4630_v16, %v3687_v59  ;;  %v3943_v14 = vld [vmem:[%s7386_s1 + $0x678] sm:$0xf0]  ;;  %v4586_v63 = vld [vmem:[%s7386_s1 + $0x30c] sm:$0xf]  ;;  %v7405_v59 = vld [vmem:[#allocation2_spill] sm:$0xff] }
 0x126   :  { %2856 = vmatpush.bf16.msrb.mxu0 %v3578_v61  ;;  %v3815_v61 = vld [vmem:[%s7386_s1 + $0x578] sm:$0xf0] }
 0x127   :  { %2841 = vmatpush.bf16.msra.mxu3 %v3386_v23  ;;  %v6970_v46 = vpop.f32.mrf.mxu0  ;;  %v6972_v43 = vpop.f32.mrf.mxu1  ;;  %v4666_v23 = vld [vmem:[%s7386_s1 + $0x58c] sm:$0xf]  ;;  %v3818_v24 = vor.u32 %v4662_v37, %v3815_v61  ;;  %v3511_v58 = vld [vmem:[%s7386_s1 + $0x318] sm:$0xf0] }
 0x128   :  { %2892 = vmatpush.bf16.msrb.mxu2 %v3866_v22  ;;  %2874 = vmatpush.bf16.msrb.mxu1 %v3722_v53  ;;  %v3834_v17 = vor.u32 %v4666_v23, %v3831_v33  ;;  %v4694_v22 = vld [vmem:[%s7386_s1 + $0x66c] sm:$0xf]  ;;  %v7404_v16 = vld [vmem:[#allocation5_spill] sm:$0xff] }
 0x129   :  { %v3946_v23 = vor.u32 %v4694_v22, %v3943_v14  ;;  %4463 = vmatmul.msk.bf16.vlgmr.msra.gmra.mxu0 %vm2162_vm0, %v7404_v16  ;;  %2804 = vmatmul.bf16.vlgmr.msra.gmra.mxu1 %v7405_v59  ;;  %v3655_v37 = vld [vmem:[%s7386_s1 + $0x438] sm:$0xf0]  ;;  %v7406_v61 = vld [vmem:[#allocation3_spill] sm:$0xff] }
 0x12a   :  { %2857 = vmatpush.bf16.msrb.mxu0 %v3562_v47  ;;  %v7013_v40 = vpop.f32.mrf.mxu2  ;;  %v4263_v59 = vld [vmem:[%s7386_s1 + $0x8f8] sm:$0xf0] }
 0x12b   :  { %2910 = vmatpush.bf16.msrb.mxu3 %v4010_v52  ;;  %v3706_v52 = vor.u32 %v4634_v38, %v3703_v15  ;;  %v7015_v53 = vpop.f32.mrf.mxu3  ;;  %v3671_v38 = vld [vmem:[%s7386_s1 + $0x458] sm:$0xf0] }
 0x12c   :  { %2893 = vmatpush.bf16.msrb.mxu2 %v3850_v30  ;;  %v3799_v30 = vld [vmem:[%s7386_s1 + $0x558] sm:$0xf0]  ;;  %v3674_v33 = vor.u32 %v4626_v4, %v3671_v38  ;;  %v4686_v38 = vld [vmem:[%s7386_s1 + $0x62c] sm:$0xf] }
 0x12d   :  { %2875 = vmatpush.bf16.msrb.mxu1 %v3706_v52  ;;  %v4690_v52 = vld [vmem:[%s7386_s1 + $0x64c] sm:$0xf]  ;;  %2823 = vmatmul.bf16.vlgmr.msra.gmra.mxu2 %v7406_v61  ;;  %v3802_v22 = vor.u32 %v4658_v25, %v3799_v30 }
 0x12e   :  { %2858 = vmatpush.bf16.msrb.mxu0 %v3546_v60  ;;  %v3927_v60 = vld [vmem:[%s7386_s1 + $0x658] sm:$0xf0]  ;;  %2842 = vmatmul.bf16.vlgmr.msra.gmra.mxu3 %v5090_v54 }
 0x12f   :  { %2911 = vmatpush.bf16.msrb.mxu3 %v3994_v34  ;;  %v4590_v34 = vld [vmem:[%s7386_s1 + $0x32c] sm:$0xf]  ;;  %v7026_v15 = vpop.f32.mrf.mxu0  ;;  %v7028_v47 = vpop.f32.mrf.mxu1  ;;  %v3930_v14 = vor.u32 %v4690_v52, %v3927_v60  ;;  %v3783_v54 = vld [vmem:[%s7386_s1 + $0x538] sm:$0xf0] }
 0x130   :  { %2894 = vmatpush.bf16.msrb.mxu2 %v3834_v17  ;;  %v4622_v17 = vld [vmem:[%s7386_s1 + $0x42c] sm:$0xf] }
 0x131   :  { %2876 = vmatpush.bf16.msrb.mxu1 %v3690_v21  ;;  %v4135_v21 = vld [vmem:[%s7386_s1 + $0x7f8] sm:$0xf0]  ;;  %v3658_v4 = vor.u32 %v4622_v17, %v3655_v37  ;;  %v4774_v52 = vld [vmem:[%s7386_s1 + $0x8ec] sm:$0xf]  ;;  %v2407_v37 = vadd.f32 %v6785_v32, %v6602_v26 }
 0x132   :  { %v7077_v25 = vpop.f32.mrf.mxu2  ;;  %v4738_v60 = vld [vmem:[%s7386_s1 + $0x7cc] sm:$0xf]  ;;  %v4119_v17 = vld [vmem:[%s7386_s1 + $0x7d8] sm:$0xf0] }
 0x133   :  { %2912 = vmatpush.bf16.msrb.mxu3 %v3978_v41  ;;  %v3530_v41 = vor.u32 %v4590_v34, %v3527_v45  ;;  %v4654_v34 = vld [vmem:[%s7386_s1 + $0x52c] sm:$0xf]  ;;  %v3514_v45 = vor.u32 %v4586_v63, %v3511_v58  ;;  %v7079_v30 = vpop.f32.mrf.mxu3  ;;  %v3895_v26 = vld [vmem:[%s7386_s1 + $0x618] sm:$0xf0] }
 0x134   :  { %2895 = vmatpush.bf16.msrb.mxu2 %v3818_v24  ;;  %v3911_v24 = vld [vmem:[%s7386_s1 + $0x638] sm:$0xf0]  ;;  %v3786_v61 = vor.u32 %v4654_v34, %v3783_v54  ;;  %v4806_v32 = vld [vmem:[%s7386_s1 + $0x9ec] sm:$0xf]  ;;  %v4266_v34 = vor.u32 %v4774_v52, %v4263_v59 }
 0x135   :  { %2859 = vmatpush.bf16.msrb.mxu0 %v3530_v41  ;;  %2877 = vmatpush.bf16.msrb.mxu1 %v3674_v33  ;;  %v4618_v41 = vld [vmem:[%s7386_s1 + $0x40c] sm:$0xf] }
 0x137   :  { %2913 = vmatpush.bf16.msrb.mxu3 %v3962_v42  ;;  %v4742_v42 = vld [vmem:[%s7386_s1 + $0x7ec] sm:$0xf]  ;;  %v7090_v63 = vpop.f32.mrf.mxu0  ;;  %v7092_v58 = vpop.f32.mrf.mxu1 }
 0x138   :  { %v4138_v33 = vor.u32 %v4742_v42, %v4135_v21  ;;  %2896 = vmatpush.bf16.msrb.mxu2 %v3802_v22  ;;  %v3914_v42 = vor.u32 %v4686_v38, %v3911_v24  ;;  %v4650_v21 = vld [vmem:[%s7386_s1 + $0x50c] sm:$0xf]  ;;  %v4391_v22 = vld [vmem:[%s7386_s1 + $0x9f8] sm:$0xf0]  ;;  %v3898_v24 = vor.u32 %v4682_v13, %v3895_v26 }
 0x139   :  { %2860 = vmatpush.bf16.msrb.mxu0 %v3514_v45  ;;  %2878 = vmatpush.bf16.msrb.mxu1 %v3658_v4  ;;  %v4122_v45 = vor.u32 %v4738_v60, %v4119_v17  ;;  %v3770_v54 = vor.u32 %v4650_v21, %v3767_v31  ;;  %v4822_v4 = vld [vmem:[%s7386_s1 + $0xa6c] sm:$0xf]  ;;  %v4455_v38 = vld [vmem:[%s7386_s1 + $0xa78] sm:$0xf0] }
 0x13a   :  { %v4770_v31 = vld [vmem:[%s7386_s1 + $0x8cc] sm:$0xf]  ;;  %v7140_v52 = vpop.f32.mrf.mxu2  ;;  %v4375_v13 = vld [vmem:[%s7386_s1 + $0x9d8] sm:$0xf0]  ;;  %4464 = vmatmul.msk.bf16.gmra.mxu0 %vm2162_vm0, %v5761_v35  ;;  %2809 = vmatmul.bf16.gmra.mxu1 %v5209_v44 }
 0x13b   :  { %2914 = vmatpush.bf16.msrb.mxu3 %v3946_v23  ;;  %v3639_v23 = vld [vmem:[%s7386_s1 + $0x418] sm:$0xf0]  ;;  %v7142_v59 = vpop.f32.mrf.mxu3  ;;  %v4798_v21 = vld [vmem:[%s7386_s1 + $0x9ac] sm:$0xf] }
 0x13c   :  { %v3642_v11 = vor.u32 %v4618_v41, %v3639_v23  ;;  %2897 = vmatpush.bf16.msrb.mxu2 %v3786_v61  ;;  %v4394_v41 = vor.u32 %v4806_v32, %v4391_v22  ;;  %v4802_v23 = vld [vmem:[%s7386_s1 + $0x9cc] sm:$0xf]  ;;  %v4103_v60 = vld [vmem:[%s7386_s1 + $0x7b8] sm:$0xf0]  ;;  %v4458_v61 = vor.u32 %v4822_v4, %v4455_v38 }
 0x13d   :  { %2929 = vmatpush.bf16.msra.mxu0 %v4138_v33  ;;  %v4766_v26 = vld [vmem:[%s7386_s1 + $0x8ac] sm:$0xf]  ;;  %v4378_v32 = vor.u32 %v4802_v23, %v4375_v13  ;;  %v4087_v4 = vld [vmem:[%s7386_s1 + $0x798] sm:$0xf0]  ;;  %2828 = vmatmul.bf16.gmra.mxu2 %v5220_v50 }
 0x13e   :  { %2879 = vmatpush.bf16.msrb.mxu1 %v3642_v11  ;;  %v4734_v11 = vld [vmem:[%s7386_s1 + $0x7ac] sm:$0xf]  ;;  %2847 = vmatmul.bf16.gmra.mxu3 %v5222_v51  ;;  %v4215_v51 = vld [vmem:[%s7386_s1 + $0x898] sm:$0xf0] }
 0x13f   :  { %2915 = vmatpush.bf16.msrb.mxu3 %v3930_v14  ;;  %v2426_v14 = vadd.f32 %v6787_v28, %v2407_v37  ;;  %v4247_v28 = vld [vmem:[%s7386_s1 + $0x8d8] sm:$0xf0]  ;;  %v7155_v17 = vpop.f32.mrf.mxu0  ;;  %v7157_v37 = vpop.f32.mrf.mxu1  ;;  %v4106_v22 = vor.u32 %v4734_v11, %v4103_v60  ;;  %v4762_v23 = vld [vmem:[%s7386_s1 + $0x88c] sm:$0xf] }
 0x140   :  { %2898 = vmatpush.bf16.msrb.mxu2 %v3770_v54  ;;  %v4730_v54 = vld [vmem:[%s7386_s1 + $0x78c] sm:$0xf]  ;;  %v4343_v11 = vld [vmem:[%s7386_s1 + $0x998] sm:$0xf0] }
 0x141   :  { %v2445_v33 = vadd.f32 %v6835_v48, %v2426_v14  ;;  %2930 = vmatpush.bf16.msra.mxu0 %v4122_v45  ;;  %v2409_v48 = vadd.f32 %v6848_v55, %v6663_v39  ;;  %v4231_v39 = vld [vmem:[%s7386_s1 + $0x8b8] sm:$0xf0]  ;;  %v4818_v55 = vld [vmem:[%s7386_s1 + $0xa4c] sm:$0xf]  ;;  %v4090_v50 = vor.u32 %v4730_v54, %v4087_v4 }
 0x142   :  { %2948 = vmatpush.bf16.msra.mxu1 %v4266_v34  ;;  %v4439_v34 = vld [vmem:[%s7386_s1 + $0xa58] sm:$0xf0]  ;;  %v4726_v60 = vld [vmem:[%s7386_s1 + $0x76c] sm:$0xf] }
 0x143   :  { %2916 = vmatpush.bf16.msrb.mxu3 %v3914_v42  ;;  %v4250_v42 = vor.u32 %v4770_v31, %v4247_v28  ;;  %v2464_v45 = vadd.f32 %v6837_v2, %v2445_v33  ;;  %v4359_v14 = vld [vmem:[%s7386_s1 + $0x9b8] sm:$0xf0]  ;;  %v2428_v38 = vadd.f32 %v6850_v49, %v2409_v48  ;;  %v4234_v2 = vor.u32 %v4766_v26, %v4231_v39  ;;  %v7207_v33 = vpop.f32.mrf.mxu2  ;;  %v7209_v13 = vpop.f32.mrf.mxu3  ;;  %v4790_v39 = vld [vmem:[%s7386_s1 + $0x96c] sm:$0xf] }
 0x144   :  { %2967 = vmatpush.bf16.msra.mxu2 %v4394_v41  ;;  %v4794_v41 = vld [vmem:[%s7386_s1 + $0x98c] sm:$0xf]  ;;  %v4362_v49 = vor.u32 %v4798_v21, %v4359_v14  ;;  %v4423_v31 = vld [vmem:[%s7386_s1 + $0xa38] sm:$0xf0]  ;;  %v4218_v26 = vor.u32 %v4762_v23, %v4215_v51 }
 0x145   :  { %v2483_v44 = vadd.f32 %v7026_v15, %v2464_v45  ;;  %2931 = vmatpush.bf16.msra.mxu0 %v4106_v22  ;;  %v4814_v15 = vld [vmem:[%s7386_s1 + $0xa2c] sm:$0xf]  ;;  %v2447_v28 = vadd.f32 %v6897_v27, %v2428_v38  ;;  %v4071_v48 = vld [vmem:[%s7386_s1 + $0x778] sm:$0xf0]  ;;  %v4346_v22 = vor.u32 %v4794_v41, %v4343_v11 }
 0x146   :  { %2949 = vmatpush.bf16.msra.mxu1 %v4250_v42  ;;  %v4327_v45 = vld [vmem:[%s7386_s1 + $0x978] sm:$0xf0]  ;;  %v4722_v14 = vld [vmem:[%s7386_s1 + $0x74c] sm:$0xf] }
 0x147   :  { %2917 = vmatpush.bf16.msrb.mxu3 %v3898_v24  ;;  %v4442_v24 = vor.u32 %v4818_v55, %v4439_v34  ;;  %v7222_v27 = vpop.f32.mrf.mxu0  ;;  %v7224_v42 = vpop.f32.mrf.mxu1  ;;  %v2502_v21 = vadd.f32 %v7028_v47, %v2483_v44  ;;  %v4074_v55 = vor.u32 %v4726_v60, %v4071_v48  ;;  %v2466_v47 = vadd.f32 %v6899_v36, %v2447_v28  ;;  %v4055_v54 = vld [vmem:[%s7386_s1 + $0x758] sm:$0xf0]  ;;  %v4718_v28 = vld [vmem:[%s7386_s1 + $0x72c] sm:$0xf] }
 0x148   :  { %2968 = vmatpush.bf16.msra.mxu2 %v4378_v32  ;;  %v4426_v32 = vor.u32 %v4814_v15, %v4423_v31  ;;  %v4407_v44 = vld [vmem:[%s7386_s1 + $0xa18] sm:$0xf0] }
 0x149   :  { %2932 = vmatpush.bf16.msra.mxu0 %v4090_v50  ;;  %v2521_v34 = vadd.f32 %v7077_v25, %v2502_v21  ;;  %v2485_v38 = vadd.f32 %v7090_v63, %v2466_v47  ;;  %v4810_v25 = vld [vmem:[%s7386_s1 + $0xa0c] sm:$0xf]  ;;  %v4183_v41 = vld [vmem:[%s7386_s1 + $0x858] sm:$0xf0] }
 0x14a   :  { %2950 = vmatpush.bf16.msra.mxu1 %v4234_v2  ;;  %v4330_v2 = vor.u32 %v4790_v39, %v4327_v45  ;;  %v4754_v63 = vld [vmem:[%s7386_s1 + $0x84c] sm:$0xf]  ;;  %v4410_v23 = vor.u32 %v4810_v25, %v4407_v44  ;;  %v4311_v31 = vld [vmem:[%s7386_s1 + $0x958] sm:$0xf0]  ;;  %2861 = vmatmul.bf16.vlgmr.msrb.gmra.mxu0 %v5098_v57 }
 0x14b   :  { %2990 = vmatpush.bf16.msra.mxu3 %v4458_v61  ;;  %v2412_v61 = vadd.f32 %v6910_v29, %v6723_v62  ;;  %v4758_v62 = vld [vmem:[%s7386_s1 + $0x86c] sm:$0xf]  ;;  %v4199_v29 = vld [vmem:[%s7386_s1 + $0x878] sm:$0xf0]  ;;  %v2540_v50 = vadd.f32 %v7079_v30, %v2521_v34  ;;  %v7266_v51 = vpop.f32.mrf.mxu2  ;;  %v7268_v15 = vpop.f32.mrf.mxu3  ;;  %v2504_v48 = vadd.f32 %v7092_v58, %v2485_v38  ;;  %v4186_v21 = vor.u32 %v4754_v63, %v4183_v41 }
 0x14c   :  { %2969 = vmatpush.bf16.msra.mxu2 %v4362_v49  ;;  %v4202_v36 = vor.u32 %v4758_v62, %v4199_v29  ;;  %v4039_v11 = vld [vmem:[%s7386_s1 + $0x738] sm:$0xf0]  ;;  %2880 = vmatmul.bf16.vlgmr.msrb.gmra.mxu1 %v5365_v0  ;;  %v4714_v29 = vld [vmem:[%s7386_s1 + $0x70c] sm:$0xf] }
 0x14d   :  { %v2431_v4 = vadd.f32 %v6912_v9, %v2412_v61  ;;  %2933 = vmatpush.bf16.msra.mxu0 %v4074_v55  ;;  %v4786_v9 = vld [vmem:[%s7386_s1 + $0x94c] sm:$0xf]  ;;  %v2523_v39 = vadd.f32 %v7140_v52, %v2504_v48  ;;  %v4295_v62 = vld [vmem:[%s7386_s1 + $0x938] sm:$0xf0]  ;;  %2899 = vmatmul.bf16.vlgmr.msrb.gmra.mxu2 %v5367_v1 }
 0x14e   :  { %2951 = vmatpush.bf16.msra.mxu1 %v4218_v26  ;;  %v4314_v26 = vor.u32 %v4786_v9, %v4311_v31  ;;  %v4023_v47 = vld [vmem:[%s7386_s1 + $0x718] sm:$0xf0]  ;;  %2918 = vmatmul.bf16.vlgmr.msrb.gmra.mxu3 %v5378_v5  ;;  %v4746_v1 = vld [vmem:[%s7386_s1 + $0x80c] sm:$0xf] }
 0x14f   :  { %2991 = vmatpush.bf16.msra.mxu3 %v4442_v24  ;;  %v4058_v24 = vor.u32 %v4722_v14, %v4055_v54  ;;  %v2450_v49 = vadd.f32 %v6957_v20, %v2431_v4  ;;  %v2414_v20 = vadd.f32 %v6970_v46, %v6774_v10  ;;  %v2558_v30 = vpop.f32.mrf.mxu0  ;;  %v2577_v60 = vpop.f32.mrf.mxu1  ;;  %v4750_v10 = vld [vmem:[%s7386_s1 + $0x82c] sm:$0xf]  ;;  %v4167_v46 = vld [vmem:[%s7386_s1 + $0x838] sm:$0xf0]  ;;  %v4026_v34 = vor.u32 %v4714_v29, %v4023_v47 }
 0x150   :  { %2970 = vmatpush.bf16.msra.mxu2 %v4346_v22  ;;  %v2559_v61 = vadd.f32 %v2558_v30, %v2540_v50  ;;  %v4042_v22 = vor.u32 %v4718_v28, %v4039_v11  ;;  %v4151_v5 = vld [vmem:[%s7386_s1 + $0x818] sm:$0xf0]  ;;  %v4778_v54 = vld [vmem:[%s7386_s1 + $0x90c] sm:$0xf] }
 0x151   :  { %2934 = vmatpush.bf16.msra.mxu0 %v4058_v24  ;;  %v2469_v58 = vadd.f32 %v6959_v3, %v2450_v49  ;;  %v2433_v57 = vadd.f32 %v6972_v43, %v2414_v20  ;;  %v4170_v3 = vor.u32 %v4750_v10, %v4167_v46  ;;  %v4279_v4 = vld [vmem:[%s7386_s1 + $0x918] sm:$0xf0] }
 0x152   :  { %2952 = vmatpush.bf16.msra.mxu1 %v4202_v36  ;;  %v2578_v55 = vadd.f32 %v2577_v60, %v2559_v61 }
 0x153   :  { %2992 = vmatpush.bf16.msra.mxu3 %v4426_v32  ;;  %v4782_v32 = vld [vmem:[%s7386_s1 + $0x92c] sm:$0xf]  ;;  %v2488_v0 = vadd.f32 %v7155_v17, %v2469_v58  ;;  %v2452_v43 = vadd.f32 %v7013_v40, %v2433_v57  ;;  %v2542_v17 = vadd.f32 %v7142_v59, %v2523_v39  ;;  %v2596_v45 = vpop.f32.mrf.mxu2  ;;  %v2615_v14 = vpop.f32.mrf.mxu3  ;;  %v4154_v40 = vor.u32 %v4746_v1, %v4151_v5 }
 0x154   :  { %2971 = vmatpush.bf16.msra.mxu2 %v4330_v2  ;;  %3006 = vst [vmem:[%s7388_s2 + $0x8] sm:$0xff] %v2578_v55  ;;  %v4298_v52 = vor.u32 %v4782_v32, %v4295_v62  ;;  %v7325_v38 = vadd.f32 %v2615_v14, %v2596_v45  ;;  %v4282_v59 = vor.u32 %v4778_v54, %v4279_v4  ;;  %v7407_v55 = vld [vmem:[#allocation4_spill] sm:$0xff]  ;;  %v7408_v62 = vld [vmem:[#allocation6_spill] sm:$0xff] }
 0x155   :  { %2935 = vmatpush.bf16.msra.mxu0 %v4042_v22  ;;  %v2507_v44 = vadd.f32 %v7157_v37, %v2488_v0  ;;  %v2471_v9 = vadd.f32 %v7015_v53, %v2452_v43 }
 0x156   :  { %2953 = vmatpush.bf16.msra.mxu1 %v4186_v21 }
 0x157   :  { %2993 = vmatpush.bf16.msra.mxu3 %v4410_v23  ;;  %v2560_v36 = vpop.f32.mrf.mxu0  ;;  %v2579_v25 = vpop.f32.mrf.mxu1  ;;  %v2526_v24 = vadd.f32 %v7207_v33, %v2507_v44  ;;  %v2490_v41 = vadd.f32 %v7222_v27, %v2471_v9 }
 0x158   :  { %2972 = vmatpush.bf16.msra.mxu2 %v4314_v26  ;;  %v2561_v2 = vadd.f32 %v2560_v36, %v2542_v17 }
 0x159   :  { %2936 = vmatpush.bf16.msra.mxu0 %v4026_v34  ;;  %v2545_v37 = vadd.f32 %v7209_v13, %v2526_v24  ;;  %v2509_v53 = vadd.f32 %v7224_v42, %v2490_v41 }
 0x15a   :  { %2954 = vmatpush.bf16.msra.mxu1 %v4170_v3  ;;  %v2580_v63 = vadd.f32 %v2579_v25, %v2561_v2  ;;  %2866 = vmatmul.bf16.gmra.mxu0 %v5230_v56 }
 0x15b   :  { %v2598_v23 = vpop.f32.mrf.mxu2  ;;  %v2617_v49 = vpop.f32.mrf.mxu3  ;;  %v2528_v33 = vadd.f32 %v7266_v51, %v2509_v53 }
 0x15c   :  { %2973 = vmatpush.bf16.msra.mxu2 %v4298_v52  ;;  %3011 = vst [vmem:[%s7388_s2 + $0x28] sm:$0xff] %v2580_v63  ;;  %v2618_v50 = vadd.f32 %v2617_v49, %v2598_v23  ;;  %2885 = vmatmul.bf16.gmra.mxu1 %v5494_v7 }
 0x15d   :  { %2904 = vmatmul.bf16.gmra.mxu2 %v5496_v8  ;;  %v2547_v13 = vadd.f32 %v7268_v15, %v2528_v33 }
 0x15e   :  { %2955 = vmatpush.bf16.msra.mxu1 %v4154_v40  ;;  %2923 = vmatmul.bf16.gmra.mxu3 %v5507_v12 }
 0x15f   :  { %v2563_v31 = vpop.f32.mrf.mxu0  ;;  %v2582_v28 = vpop.f32.mrf.mxu1 }
 0x160   :  { %2974 = vmatpush.bf16.msra.mxu2 %v4282_v59  ;;  %v2564_v11 = vadd.f32 %v2563_v31, %v2545_v37 }
 0x162   :  { %v2583_v20 = vadd.f32 %v2582_v28, %v2564_v11 }
 0x163   :  { %v2601_v27 = vpop.f32.mrf.mxu2  ;;  %v2620_v42 = vpop.f32.mrf.mxu3 }
 0x164   :  { %3015 = vst [vmem:[%s7388_s2 + $0x48] sm:$0xff] %v2583_v20  ;;  %v2621_v30 = vadd.f32 %v2620_v42, %v2601_v27 }
 0x167   :  { %v2565_v60 = vpop.f32.mrf.mxu0  ;;  %v2584_v51 = vpop.f32.mrf.mxu1 }
 0x168   :  { %v2566_v48 = vadd.f32 %v2565_v60, %v2547_v13 }
 0x16a   :  { %v2585_v61 = vadd.f32 %v2584_v51, %v2566_v48  ;;  %2937 = vmatmul.bf16.vlgmr.msra.gmra.mxu0 %v5380_v6  ;;  %v7409_v6 = vld [vmem:[#allocation7_spill] sm:$0xff] }
 0x16b   :  { %v2603_v56 = vpop.f32.mrf.mxu2  ;;  %v2622_v7 = vpop.f32.mrf.mxu3 }
 0x16c   :  { %3019 = vst [vmem:[%s7388_s2 + $0x68] sm:$0xf] %v2585_v61  ;;  %v2623_v8 = vadd.f32 %v2622_v7, %v2603_v56  ;;  %2956 = vmatmul.bf16.vlgmr.msra.gmra.mxu1 %v5623_v18 }
 0x16d   :  { %2975 = vmatmul.bf16.vlgmr.msra.gmra.mxu2 %v5625_v19 }
 0x16e   :  { %4465 = vmatmul.msk.bf16.vlgmr.msra.gmra.mxu3 %vm2162_vm0, %v7404_v16 }
 0x16f   :  { %v2634_v12 = vpop.f32.mrf.mxu0  ;;  %v2653_v21 = vpop.f32.mrf.mxu1 }
 0x170   :  { %v2635_v43 = vadd.f32 %v2634_v12, %v7325_v38 }
 0x172   :  { %v2654_v17 = vadd.f32 %v2653_v21, %v2635_v43 }
 0x173   :  { %v2672_v15 = vpop.f32.mrf.mxu2  ;;  %v2691_v26 = vpop.f32.mrf.mxu3 }
 0x174   :  { %v2673_v45 = vadd.f32 %v2672_v15, %v2654_v17 }
 0x176   :  { %v2692_v25 = vadd.f32 %v2691_v26, %v2673_v45 }
 0x177   :  { %v2636_v32 = vpop.f32.mrf.mxu0  ;;  %v2655_v22 = vpop.f32.mrf.mxu1 }
 0x178   :  { %v2637_v36 = vadd.f32 %v2636_v32, %v2618_v50 }
 0x17a   :  { %2942 = vmatmul.bf16.gmra.mxu0 %v7407_v55  ;;  %v2656_v44 = vadd.f32 %v2655_v22, %v2637_v36 }
 0x17b   :  { %v2674_v10 = vpop.f32.mrf.mxu2  ;;  %v2693_v46 = vpop.f32.mrf.mxu3 }
 0x17c   :  { %2961 = vmatmul.bf16.gmra.mxu1 %v7408_v62  ;;  %v2675_v40 = vadd.f32 %v2674_v10, %v2656_v44 }
 0x17d   :  { %2980 = vmatmul.bf16.gmra.mxu2 %v7409_v6 }
 0x17e   :  { %4466 = vmatmul.msk.bf16.gmra.mxu3 %vm2162_vm0, %v5761_v35  ;;  %v2694_v23 = vadd.f32 %v2693_v46, %v2675_v40 }
 0x17f   :  { %v2639_v58 = vpop.f32.mrf.mxu0  ;;  %v2658_v39 = vpop.f32.mrf.mxu1 }
 0x180   :  { %v2640_v41 = vadd.f32 %v2639_v58, %v2621_v30 }
 0x182   :  { %v2659_v38 = vadd.f32 %v2658_v39, %v2640_v41 }
 0x183   :  { %v2677_v18 = vpop.f32.mrf.mxu2  ;;  %v2696_v19 = vpop.f32.mrf.mxu3 }
 0x184   :  { %v2678_v28 = vadd.f32 %v2677_v18, %v2659_v38 }
 0x186   :  { %v2697_v60 = vadd.f32 %v2696_v19, %v2678_v28 }
 0x187   :  { %v2641_v16 = vpop.f32.mrf.mxu0  ;;  %v2660_v29 = vpop.f32.mrf.mxu1 }
 0x188   :  { %v2642_v13 = vadd.f32 %v2641_v16, %v2623_v8 }
 0x18a   :  { %v2661_v30 = vadd.f32 %v2660_v29, %v2642_v13 }
 0x18b   :  { %v2679_v47 = vpop.f32.mrf.mxu2  ;;  %v2698_v57 = vpop.f32.mrf.mxu3 }
 0x18c   :  { %v2680_v61 = vadd.f32 %v2679_v47, %v2661_v30 }
 0x18e   :  { %v2699_v22 = vadd.f32 %v2698_v57, %v2680_v61 }
 0x18f   :  { %v2710_v0 = vpop.f32.mrf.mxu0  ;;  %v2729_v3 = vpop.f32.mrf.mxu1 }
 0x190   :  { %v2711_v2 = vadd.f32 %v2710_v0, %v2692_v25 }
 0x192   :  { %v2730_v37 = vadd.f32 %v2729_v3, %v2711_v2 }
 0x193   :  { %v2748_v52 = vpop.f32.mrf.mxu2  ;;  %v2767_v34 = vpop.f32.mrf.mxu3 }
 0x194   :  { %v2749_v49 = vadd.f32 %v2748_v52, %v2730_v37 }
 0x196   :  { %v2768_v53 = vadd.f32 %v2767_v34, %v2749_v49 }
 0x197   :  { %v2712_v1 = vpop.f32.mrf.mxu0  ;;  %v2731_v5 = vpop.f32.mrf.mxu1 }
 0x198   :  { %v2713_v31 = vadd.f32 %v2712_v1, %v2694_v23 }
 0x19a   :  { %v2732_v27 = vadd.f32 %v2731_v5, %v2713_v31 }
 0x19b   :  { %v2750_v14 = vpop.f32.mrf.mxu2  ;;  %v2769_v54 = vpop.f32.mrf.mxu3 }
 0x19c   :  { %v2751_v51 = vadd.f32 %v2750_v14, %v2732_v27 }
 0x19e   :  { %v2770_v56 = vadd.f32 %v2769_v54, %v2751_v51 }
 0x19f   :  { %v2715_v4 = vpop.f32.mrf.mxu0  ;;  %v2734_v35 = vpop.f32.mrf.mxu1 }
 0x1a0   :  { %v2716_v48 = vadd.f32 %v2715_v4, %v2697_v60 }
 0x1a2   :  { %v2735_v26 = vadd.f32 %v2734_v35, %v2716_v48 }
 0x1a3   :  { %v2753_v59 = vpop.f32.mrf.mxu2  ;;  %v2772_v9 = vpop.f32.mrf.mxu3 }
 0x1a4   :  { %v2754_v8 = vadd.f32 %v2753_v59, %v2735_v26 }
 0x1a6   :  { %v2773_v46 = vadd.f32 %v2772_v9, %v2754_v8 }
 0x1a7   :  { %v2717_v24 = vpop.f32.mrf.mxu0  ;;  %v2736_v63 = vpop.f32.mrf.mxu1 }
 0x1a8   :  { %v2718_v10 = vadd.f32 %v2717_v24, %v2699_v22 }
 0x1aa   :  { %v2737_v6 = vadd.f32 %v2736_v63, %v2718_v10 }
 0x1ab   :  { %v2755_v11 = vpop.f32.mrf.mxu2  ;;  %v2774_v33 = vpop.f32.mrf.mxu3 }
 0x1ac   :  { %v2756_v19 = vadd.f32 %v2755_v11, %v2737_v6 }
 0x1ae   :  { %v2775_v16 = vadd.f32 %v2774_v33, %v2756_v19 }
 0x1af   :  { %v2786_v20 = vpop.f32.mrf.mxu0  ;;  %v2805_v50 = vpop.f32.mrf.mxu1 }
 0x1b0   :  { %v2787_v42 = vadd.f32 %v2786_v20, %v2768_v53 }
 0x1b2   :  { %3007 = vst [vmem:[%s7388_s2 + $0x10] sm:$0xff] %v2787_v42 }
 0x1b3   :  { %v2824_v7 = vpop.f32.mrf.mxu2  ;;  %v2843_v12 = vpop.f32.mrf.mxu3 }
 0x1b4   :  { %v2825_v35 = vadd.f32 %v2824_v7, %v2805_v50 }
 0x1b6   :  { %v2844_v44 = vadd.f32 %v2843_v12, %v2825_v35 }
 0x1b7   :  { %v2788_v21 = vpop.f32.mrf.mxu0  ;;  %v2807_v15 = vpop.f32.mrf.mxu1 }
 0x1b8   :  { %v2789_v32 = vadd.f32 %v2788_v21, %v2770_v56 }
 0x1ba   :  { %3012 = vst [vmem:[%s7388_s2 + $0x30] sm:$0xff] %v2789_v32 }
 0x1bb   :  { %v2826_v58 = vpop.f32.mrf.mxu2  ;;  %v2845_v39 = vpop.f32.mrf.mxu3 }
 0x1bc   :  { %v2827_v9 = vadd.f32 %v2826_v58, %v2807_v15 }
 0x1be   :  { %v2846_v37 = vadd.f32 %v2845_v39, %v2827_v9 }
 0x1bf   :  { %v2791_v55 = vpop.f32.mrf.mxu0  ;;  %v2810_v62 = vpop.f32.mrf.mxu1 }
 0x1c0   :  { %v2792_v18 = vadd.f32 %v2791_v55, %v2773_v46 }
 0x1c2   :  { %3016 = vst [vmem:[%s7388_s2 + $0x50] sm:$0xff] %v2792_v18 }
 0x1c3   :  { %v2829_v29 = vpop.f32.mrf.mxu2  ;;  %v2848_v47 = vpop.f32.mrf.mxu3 }
 0x1c4   :  { %v2830_v28 = vadd.f32 %v2829_v29, %v2810_v62 }
 0x1c6   :  { %v2849_v13 = vadd.f32 %v2848_v47, %v2830_v28 }
 0x1c7   :  { %v2793_v57 = vpop.f32.mrf.mxu0  ;;  %v2812_v0 = vpop.f32.mrf.mxu1 }
 0x1c8   :  { %v2794_v3 = vadd.f32 %v2793_v57, %v2775_v16 }
 0x1ca   :  { %3020 = vst [vmem:[%s7388_s2 + $0x70] sm:$0xf] %v2794_v3 }
 0x1cb   :  { %v2831_v52 = vpop.f32.mrf.mxu2  ;;  %v2850_v34 = vpop.f32.mrf.mxu3 }
 0x1cc   :  { %v2832_v48 = vadd.f32 %v2831_v52, %v2812_v0 }
 0x1ce   :  { %v2851_v32 = vadd.f32 %v2850_v34, %v2832_v48 }
 0x1cf   :  { %v2862_v1 = vpop.f32.mrf.mxu0  ;;  %v2881_v5 = vpop.f32.mrf.mxu1 }
 0x1d0   :  { %v2863_v2 = vadd.f32 %v2862_v1, %v2844_v44 }
 0x1d2   :  { %v2882_v41 = vadd.f32 %v2881_v5, %v2863_v2 }
 0x1d3   :  { %v2900_v43 = vpop.f32.mrf.mxu2  ;;  %v2919_v17 = vpop.f32.mrf.mxu3 }
 0x1d4   :  { %v2901_v23 = vadd.f32 %v2900_v43, %v2882_v41 }
 0x1d6   :  { %v2920_v53 = vadd.f32 %v2919_v17, %v2901_v23 }
 0x1d7   :  { %v2864_v45 = vpop.f32.mrf.mxu0  ;;  %v2883_v14 = vpop.f32.mrf.mxu1 }
 0x1d8   :  { %v2865_v49 = vadd.f32 %v2864_v45, %v2846_v37 }
 0x1da   :  { %v2884_v20 = vadd.f32 %v2883_v14, %v2865_v49 }
 0x1db   :  { %v2902_v54 = vpop.f32.mrf.mxu2  ;;  %v2921_v4 = vpop.f32.mrf.mxu3 }
 0x1dc   :  { %v2903_v27 = vadd.f32 %v2902_v54, %v2884_v20 }
 0x1de   :  { %v2922_v61 = vadd.f32 %v2921_v4, %v2903_v27 }
 0x1df   :  { %v2867_v36 = vpop.f32.mrf.mxu0  ;;  %v2886_v25 = vpop.f32.mrf.mxu1 }
 0x1e0   :  { %v2868_v42 = vadd.f32 %v2867_v36, %v2849_v13 }
 0x1e2   :  { %v2887_v21 = vadd.f32 %v2886_v25, %v2868_v42 }
 0x1e3   :  { %v2905_v40 = vpop.f32.mrf.mxu2  ;;  %v2924_v59 = vpop.f32.mrf.mxu3 }
 0x1e4   :  { %v2906_v22 = vadd.f32 %v2905_v40, %v2887_v21 }
 0x1e6   :  { %v2925_v39 = vadd.f32 %v2924_v59, %v2906_v22 }
 0x1e7   :  { %v2869_v24 = vpop.f32.mrf.mxu0  ;;  %v2888_v63 = vpop.f32.mrf.mxu1 }
 0x1e8   :  { %v2870_v8 = vadd.f32 %v2869_v24, %v2851_v32 }
 0x1ea   :  { %v2889_v6 = vadd.f32 %v2888_v63, %v2870_v8 }
 0x1eb   :  { %v2907_v38 = vpop.f32.mrf.mxu2  ;;  %v2926_v31 = vpop.f32.mrf.mxu3 }
 0x1ec   :  { %v2908_v29 = vadd.f32 %v2907_v38, %v2889_v6 }
 0x1ee   :  { %v2927_v3 = vadd.f32 %v2926_v31, %v2908_v29 }
 0x1ef   :  { %v2938_v11 = vpop.f32.mrf.mxu0  ;;  %v2957_v33 = vpop.f32.mrf.mxu1 }
 0x1f0   :  { %v2939_v50 = vadd.f32 %v2938_v11, %v2920_v53 }
 0x1f2   :  { %v2958_v60 = vadd.f32 %v2957_v33, %v2939_v50 }
 0x1f3   :  { %v2976_v51 = vpop.f32.mrf.mxu2  ;;  %v2995_v30 = vpop.f32.mrf.mxu3 }
 0x1f4   :  { %v2977_v56 = vadd.f32 %v2976_v51, %v2958_v60 }
 0x1f6   :  { %v2996_v15 = vadd.f32 %v2995_v30, %v2977_v56 }
 0x1f7   :  { %v2940_v7 = vpop.f32.mrf.mxu0  ;;  %v2959_v12 = vpop.f32.mrf.mxu1 }
 0x1f8   :  { %v2941_v26 = vadd.f32 %v2940_v7, %v2922_v61  ;;  %3009 = vst.msk [vmem:[%s7388_s2 + $0x18] sm:$0xff] %vm3008_vm1, %v2996_v15 }
 0x1fa   :  { %v2960_v10 = vadd.f32 %v2959_v12, %v2941_v26 }
 0x1fb   :  { %v2978_v46 = vpop.f32.mrf.mxu2  ;;  %v2997_v58 = vpop.f32.mrf.mxu3 }
 0x1fc   :  { %v2979_v55 = vadd.f32 %v2978_v46, %v2960_v10 }
 0x1fe   :  { %v2998_v18 = vadd.f32 %v2997_v58, %v2979_v55 }
 0x1ff   :  { %v2943_v62 = vpop.f32.mrf.mxu0  ;;  %v2962_v16 = vpop.f32.mrf.mxu1 }
 0x200   :  { %v2944_v19 = vadd.f32 %v2943_v62, %v2925_v39  ;;  %3013 = vst.msk [vmem:[%s7388_s2 + $0x38] sm:$0xff] %vm3008_vm1, %v2998_v18 }
 0x202   :  { %v2963_v47 = vadd.f32 %v2962_v16, %v2944_v19 }
 0x203   :  { %v2981_v57 = vpop.f32.mrf.mxu2  ;;  %v3000_v0 = vpop.f32.mrf.mxu3 }
 0x204   :  { %v2982_v52 = vadd.f32 %v2981_v57, %v2963_v47 }
 0x206   :  { %v3001_v1 = vadd.f32 %v3000_v0, %v2982_v52 }
 0x207   :  { %v2945_v34 = vpop.f32.mrf.mxu0  ;;  %v2964_v43 = vpop.f32.mrf.mxu1 }
 0x208   :  { %v2946_v5 = vadd.f32 %v2945_v34, %v2927_v3  ;;  %3017 = vst.msk [vmem:[%s7388_s2 + $0x58] sm:$0xff] %vm3008_vm1, %v3001_v1 }
 0x20a   :  { %v2965_v17 = vadd.f32 %v2964_v43, %v2946_v5 }
 0x20b   :  { %v2983_v45 = vpop.f32.mrf.mxu2  ;;  %v3002_v54 = vpop.f32.mrf.mxu3 }
 0x20c   :  { %v2984_v14 = vadd.f32 %v2983_v45, %v2965_v17 }
 0x20e   :  { %v3003_v4 = vadd.f32 %v3002_v54, %v2984_v14 }
 0x210   :  { %3022 = vst.msk [vmem:[%s7388_s2 + $0x78] sm:$0xf] %vm3021_vm2, %v3003_v4 }

// kernel: generator_forward.7
= control target key start
LH: loop header
LB: loop body
LE: loop exit
PB: predicated region body
PF: predicated region fallthrough
CT: control target
= control target key end

     0   :  { %s636_s0 = inlined_call_operand.vmem [shape: f32[56,210], index: 0, kind: input, shape index: {}]   ;;  %s637_s1 = inlined_call_operand.vmem [shape: f32[210,28], index: 1, kind: input, shape index: {}]   ;;  %s638_s2 = inlined_call_operand.<no memory space> [shape: f32[1,1], index: 2, kind: input, shape index: {}]   ;;  %s639_s5 = inlined_call_operand.hbm [shape: f32[56,28], index: 5, kind: output, shape index: {}]   ;;  %s640_s3 = inlined_call_operand.<no memory space> [shape: f32[1,1], index: 3, kind: input, shape index: {}]   ;;  %s641_s4 = inlined_call_operand.<no memory space> [shape: f32[1,1], index: 4, kind: input, shape index: {}]  }
   0x1   :  { %v10_v0 = vstv %s638_s2  ;;  %v12_v1 = vstv %s640_s3  ;;  %v14_v2 = vstv %s641_s4 }
   0x2   :  { %11 = vst [vmem:[#allocation2] sm:$0x1] %v10_v0 }
   0x3   :  { %13 = vst [vmem:[#allocation3] sm:$0x1] %v12_v1 }
   0x4   :  { %15 = vst [vmem:[#allocation4] sm:$0x1] %v14_v2 }
   0x5   :  { %v56_v3 = vld [vmem:[%s637_s1 + $0x78] sm:$0xff]  ;;  %v67_v4 = vld [vmem:[%s637_s1 + $0xd0] sm:$0x3]  ;;  %vm97_vm0 = vcmask 1041408   ;;  %v66_v6 = vld [vmem:[%s637_s1 + $0xc8] sm:$0xff] }
   0x6   :  { %v55_v5 = vld [vmem:[%s637_s1 + $0x70] sm:$0xff]  ;;  %101 = vmatpush.msra.mxu0 %v56_v3  ;;  %328 = vmatpush.msra.mxu2 %v56_v3  ;;  %v54_v7 = vld [vmem:[%s637_s1 + $0x68] sm:$0xff]  ;;  %v65_v8 = vld [vmem:[%s637_s1 + $0xc0] sm:$0xff] }
   0x7   :  { %320 = vmatpush.msk.msra.mxu1 %vm97_vm0, %v67_v4  ;;  %344 = vmatpush.msk.msra.mxu3 %vm97_vm0, %v67_v4  ;;  %v53_v9 = vld [vmem:[%s637_s1 + $0x60] sm:$0xff]  ;;  %v64_v10 = vld [vmem:[%s637_s1 + $0xb8] sm:$0xff]  ;;  %v63_v12 = vld [vmem:[%s637_s1 + $0xb0] sm:$0xff] }
   0x8   :  { %102 = vmatpush.msra.mxu0 %v55_v5  ;;  %329 = vmatpush.msra.mxu2 %v55_v5  ;;  %v52_v11 = vld [vmem:[%s637_s1 + $0x58] sm:$0xff]  ;;  %v51_v13 = vld [vmem:[%s637_s1 + $0x50] sm:$0xff]  ;;  %v62_v14 = vld [vmem:[%s637_s1 + $0xa8] sm:$0xff] }
   0x9   :  { %145 = vmatpush.msra.mxu1 %v66_v6  ;;  %345 = vmatpush.msra.mxu3 %v66_v6  ;;  %v50_v15 = vld [vmem:[%s637_s1 + $0x48] sm:$0xff]  ;;  %v61_v16 = vld [vmem:[%s637_s1 + $0xa0] sm:$0xff]  ;;  %v60_v18 = vld [vmem:[%s637_s1 + $0x98] sm:$0xff] }
   0xa   :  { %103 = vmatpush.msra.mxu0 %v54_v7  ;;  %330 = vmatpush.msra.mxu2 %v54_v7  ;;  %v49_v17 = vld [vmem:[%s637_s1 + $0x40] sm:$0xff] }
   0xb   :  { %146 = vmatpush.msra.mxu1 %v65_v8  ;;  %346 = vmatpush.msra.mxu3 %v65_v8 }
   0xc   :  { %104 = vmatpush.msra.mxu0 %v53_v9  ;;  %331 = vmatpush.msra.mxu2 %v53_v9 }
   0xd   :  { %147 = vmatpush.msra.mxu1 %v64_v10  ;;  %347 = vmatpush.msra.mxu3 %v64_v10 }
   0xe   :  { %105 = vmatpush.msra.mxu0 %v52_v11  ;;  %332 = vmatpush.msra.mxu2 %v52_v11 }
   0xf   :  { %148 = vmatpush.msra.mxu1 %v63_v12  ;;  %348 = vmatpush.msra.mxu3 %v63_v12 }
  0x10   :  { %106 = vmatpush.msra.mxu0 %v51_v13  ;;  %333 = vmatpush.msra.mxu2 %v51_v13 }
  0x11   :  { %149 = vmatpush.msra.mxu1 %v62_v14  ;;  %349 = vmatpush.msra.mxu3 %v62_v14 }
  0x12   :  { %107 = vmatpush.msra.mxu0 %v50_v15  ;;  %334 = vmatpush.msra.mxu2 %v50_v15 }
  0x13   :  { %16 = vsyncpa [#allocation6], 0  ;;  %150 = vmatpush.msra.mxu1 %v61_v16  ;;  %v48_v19 = vld [vmem:[%s637_s1 + $0x38] sm:$0xff]  ;;  %350 = vmatpush.msra.mxu3 %v61_v16  ;;  %v366_v20 = vld [vmem:[#allocation2] ss:$0 sm:$0xff]  ;;  %v397_v23 = vmov 0  }
  0x14   :  { %108 = vmatpush.msra.mxu0 %v49_v17  ;;  %335 = vmatpush.msra.mxu2 %v49_v17  ;;  %v59_v21 = vld [vmem:[%s637_s1 + $0x90] sm:$0xff]  ;;  %v58_v24 = vld [vmem:[%s637_s1 + $0x88] sm:$0xff]  ;;  %v57_v26 = vld [vmem:[%s637_s1 + $0x80] sm:$0xff]  ;;  %vm75_vm1 = vcmask 670720   ;;  %vm177_vm2 = vcmask 228352   ;;  %s398_s22 = smov [#allocation5]  }
  0x15   :  { %151 = vmatpush.msra.mxu1 %v60_v18  ;;  %v47_v22 = vld [vmem:[%s637_s1 + $0x30] sm:$0xff]  ;;  %363 = vset.pattern.permute.xlu0 %v397_v23  ;;  %v46_v25 = vld [vmem:[%s637_s1 + $0x28] sm:$0xff]  ;;  %v45_v28 = vld [vmem:[%s637_s1 + $0x20] sm:$0xff]  ;;  %s306_s23 = sshll.u32 %s398_s22, 4  ;;  %s308_s26 = sshll.u32 %s639_s5, 4  ;;  %s307_s23 = int_to_ptr.vmem [resolvable:$true] %s306_s23  ;;  %s309_s26 = int_to_ptr.hbm [resolvable:$true] %s308_s26 }
  0x16   :  { %109 = vmatpush.msra.mxu0 %v48_v19  ;;  %336 = vmatpush.msra.mxu2 %v48_v19  ;;  %v28_v27 = vld [vmem:[%s636_s0 + $0x8] sm:$0xff]  ;;  %v44_v29 = vld [vmem:[%s637_s1 + $0x18] sm:$0xff]  ;;  %v43_v30 = vld [vmem:[%s637_s1 + $0x10] sm:$0xff]  ;;  %s399_s27 = smov 128   ;;  %s400_s2 = smov 8  }
  0x17   :  { %152 = vmatpush.msra.mxu1 %v59_v21  ;;  %72 = vperm.xlu0 %363, %v366_v20   ;;  %v38_v31 = vld [vmem:[%s636_s0 + $0x58] sm:$0xff]  ;;  %v42_v32 = vld [vmem:[%s637_s1 + $0x8] sm:$0xff]  ;;  %v41_v34 = vld [vmem:[%s637_s1] sm:$0xff] }
  0x18   :  { %110 = vmatpush.msra.mxu0 %v47_v22  ;;  %337 = vmatpush.msra.mxu2 %v47_v22  ;;  %v30_v33 = vld [vmem:[%s636_s0 + $0x18] sm:$0xff]  ;;  %v27_v35 = vld [vmem:[%s636_s0] sm:$0xff]  ;;  %v33_v36 = vld [vmem:[%s636_s0 + $0x30] sm:$0xff] }
  0x19   :  { %153 = vmatpush.msra.mxu1 %v58_v24  ;;  %351 = vmatpush.msra.mxu3 %v60_v18  ;;  %v40_v37 = vld [vmem:[%s636_s0 + $0x68] sm:$0xff]  ;;  %v29_v39 = vld [vmem:[%s636_s0 + $0x10] sm:$0xff]  ;;  %v35_v40 = vld [vmem:[%s636_s0 + $0x40] sm:$0xff] }
  0x1a   :  { %111 = vmatpush.msra.mxu0 %v46_v25  ;;  %338 = vmatpush.msra.mxu2 %v46_v25  ;;  %v32_v38 = vld [vmem:[%s636_s0 + $0x28] sm:$0xff]  ;;  %v34_v41 = vld [vmem:[%s636_s0 + $0x38] sm:$0xff]  ;;  %v31_v42 = vld [vmem:[%s636_s0 + $0x20] sm:$0xff] }
  0x1b   :  { %154 = vmatpush.msra.mxu1 %v57_v26  ;;  %352 = vmatpush.msra.mxu3 %v59_v21  ;;  %v37_v43 = vld [vmem:[%s636_s0 + $0x50] sm:$0xff]  ;;  %v36_v44 = vld [vmem:[%s636_s0 + $0x48] sm:$0xff]  ;;  %v39_v45 = vld [vmem:[%s636_s0 + $0x60] sm:$0xff] }
  0x1c   :  { %321 = vmatmul.msk.f32.vlgmr.msra.gmra.mxu1 %vm75_vm1, %v28_v27  ;;  %112 = vmatpush.msra.mxu0 %v45_v28 }
  0x1d   :  { %339 = vmatpush.msra.mxu2 %v45_v28  ;;  %353 = vmatpush.msra.mxu3 %v58_v24 }
  0x1e   :  { %113 = vmatpush.msra.mxu0 %v44_v29  ;;  %364 = vset.pattern.permute.xlu1 %v397_v23 }
  0x1f   :  { %340 = vmatpush.msra.mxu2 %v44_v29  ;;  %354 = vmatpush.msra.mxu3 %v57_v26 }
  0x20   :  { %114 = vmatpush.msra.mxu0 %v43_v30  ;;  %326 = vmatmul.msk.f32.vlgmr.msra.gmra.mxu3 %vm75_vm1, %v38_v31 }
  0x21   :  { %341 = vmatpush.msra.mxu2 %v43_v30  ;;  %365 = vset.pattern.permute.xlu2 %v397_v23 }
  0x22   :  { %115 = vmatpush.msra.mxu0 %v42_v32 }
  0x23   :  { %342 = vmatpush.msra.mxu2 %v42_v32 }
  0x24   :  { %322 = vmatmul.msk.f32.gmra.mxu1 %vm75_vm1, %v30_v33  ;;  %116 = vmatpush.msra.mxu0 %v41_v34 }
  0x25   :  { %343 = vmatpush.msra.mxu2 %v41_v34  ;;  %117 = vmatmul.f32.vlgmr.msra.gmra.mxu0 %v27_v35 }
  0x26   :  { %126 = vmatmul.f32.vlgmr.msra.gmra.mxu2 %v33_v36 }
  0x28   :  { %327 = vmatmul.msk.f32.gmra.mxu3 %vm75_vm1, %v40_v37 }
  0x2c   :  { %323 = vmatmul.msk.f32.gmra.mxu1 %vm75_vm1, %v32_v38 }
  0x2d   :  { %120 = vmatmul.f32.gmra.mxu0 %v29_v39 }
  0x2e   :  { %129 = vmatmul.f32.gmra.mxu2 %v35_v40 }
  0x34   :  { %324 = vmatmul.msk.f32.gmra.mxu1 %vm75_vm1, %v34_v41 }
  0x35   :  { %123 = vmatmul.f32.gmra.mxu0 %v31_v42 }
  0x36   :  { %132 = vmatmul.f32.gmra.mxu2 %v37_v43 }
  0x3c   :  { %325 = vmatmul.msk.f32.gmra.mxu1 %vm75_vm1, %v36_v44  ;;  %v367_v44 = vld [vmem:[#allocation3] ss:$0 sm:$0xff] }
  0x3e   :  { %135 = vmatmul.f32.gmra.mxu2 %v39_v45  ;;  %v368_v45 = vld [vmem:[#allocation4] ss:$0 sm:$0xff] }
  0x3f   :  { %278 = vperm.xlu2 %365, %v368_v45  }
  0x89   :  { %v73_v49 = vpop.permute.xlu0 %72 }
  0x99   :  { %v156_v46 = vpop.f32.mrf.mxu1 }
  0xa1   :  { %v159_v47 = vpop.f32.mrf.mxu1 }
  0xa2   :  { %v118_v48 = vpop.f32.mrf.mxu0 }
  0xa3   :  { %v119_v54 = vadd.f32 %v118_v48, %v73_v49  ;;  %v171_v8 = vpop.f32.mrf.mxu3 }
  0xa5   :  { %v572_v56 = vadd.f32 %v156_v46, %v119_v54 }
  0xa7   :  { %v201_v62 = vmul.f32 %v572_v56, %v572_v56  ;;  %v178_v2 = vsel %vm177_vm2, %v572_v56, 0.0 }
  0xa9   :  { %v127_v50 = vpop.f32.mrf.mxu2  ;;  %v162_v51 = vpop.f32.mrf.mxu1  ;;  %v208_v9 = vsel %vm177_vm2, %v201_v62, 0.0 }
  0xaa   :  { %v121_v52 = vpop.f32.mrf.mxu0  ;;  %v128_v63 = vadd.f32 %v127_v50, %v73_v49 }
  0xab   :  { %v122_v53 = vadd.f32 %v121_v52, %v73_v49  ;;  %v174_v30 = vpop.f32.mrf.mxu3 }
  0xad   :  { %v570_v55 = vadd.f32 %v159_v47, %v122_v53 }
  0xaf   :  { %v202_v59 = vmul.f32 %v570_v55, %v570_v55  ;;  %v179_v0 = vsel %vm177_vm2, %v570_v55, 0.0 }
  0xb0   :  { %v180_v5 = vadd.f32 %v179_v0, %v178_v2 }
  0xb1   :  { %v130_v57 = vpop.f32.mrf.mxu2  ;;  %v165_v58 = vpop.f32.mrf.mxu1  ;;  %v209_v3 = vsel %vm177_vm2, %v202_v59, 0.0 }
  0xb2   :  { %v124_v60 = vpop.f32.mrf.mxu0  ;;  %v585_v4 = vadd.f32 %v165_v58, %v128_v63  ;;  %v131_v10 = vadd.f32 %v130_v57, %v73_v49  ;;  %v210_v14 = vadd.f32 %v209_v3, %v208_v9 }
  0xb3   :  { %v125_v61 = vadd.f32 %v124_v60, %v73_v49 }
  0xb4   :  { %v204_v16 = vmul.f32 %v585_v4, %v585_v4  ;;  %v183_v20 = vsel %vm177_vm2, %v585_v4, 0.0 }
  0xb5   :  { %v580_v1 = vadd.f32 %v162_v51, %v125_v61 }
  0xb6   :  { %v213_v25 = vsel %vm177_vm2, %v204_v16, 0.0 }
  0xb7   :  { %v181_v6 = vsel %vm177_vm2, %v580_v1, 0.0  ;;  %v203_v7 = vmul.f32 %v580_v1, %v580_v1 }
  0xb8   :  { %v182_v11 = vadd.f32 %v181_v6, %v180_v5 }
  0xb9   :  { %v133_v12 = vpop.f32.mrf.mxu2  ;;  %v168_v13 = vpop.f32.mrf.mxu1  ;;  %v211_v15 = vsel %vm177_vm2, %v203_v7, 0.0 }
  0xba   :  { %v134_v17 = vadd.f32 %v133_v12, %v73_v49  ;;  %v595_v18 = vadd.f32 %v168_v13, %v131_v10  ;;  %v212_v19 = vadd.f32 %v211_v15, %v210_v14  ;;  %v184_v23 = vadd.f32 %v183_v20, %v182_v11 }
  0xbc   :  { %v205_v21 = vmul.f32 %v595_v18, %v595_v18  ;;  %v601_v22 = vadd.f32 %v171_v8, %v134_v17  ;;  %v185_v24 = vsel %vm177_vm2, %v595_v18, 0.0  ;;  %v214_v26 = vadd.f32 %v213_v25, %v212_v19 }
  0xbd   :  { %v186_v31 = vadd.f32 %v185_v24, %v184_v23 }
  0xbe   :  { %v206_v27 = vmul.f32 %v601_v22, %v601_v22  ;;  %v215_v28 = vsel %vm177_vm2, %v205_v21, 0.0  ;;  %v187_v33 = vsel %vm177_vm2, %v601_v22, 0.0 }
  0xbf   :  { %v216_v34 = vadd.f32 %v215_v28, %v214_v26  ;;  %v188_v37 = vadd.f32 %v187_v33, %v186_v31 }
  0xc0   :  { %v217_v36 = vsel %vm177_vm2, %v206_v27, 0.0 }
  0xc1   :  { %v136_v29 = vpop.f32.mrf.mxu2  ;;  %v218_v41 = vadd.f32 %v217_v36, %v216_v34 }
  0xc2   :  { %v137_v32 = vadd.f32 %v136_v29, %v73_v49 }
  0xc4   :  { %v611_v35 = vadd.f32 %v174_v30, %v137_v32 }
  0xc6   :  { %v189_v38 = vsel %vm177_vm2, %v611_v35, 0.0  ;;  %v207_v39 = vmul.f32 %v611_v35, %v611_v35 }
  0xc7   :  { %v190_v40 = vadd.f32 %v189_v38, %v188_v37 }
  0xc8   :  { %v219_v42 = vsel %vm177_vm2, %v207_v39, 0.0 }
  0xc9   :  { %191 = vadd.xlane.f32.xlu0 %v190_v40  ;;  %v220_v43 = vadd.f32 %v219_v42, %v218_v41 }
  0xcb   :  { %221 = vadd.xlane.f32.xlu1 %v220_v43 }
  0xe4   :  { %264 = vperm.xlu1 %364, %v367_v44  }
 0x13c   :  { %v192_v46 = vpop.xlane.xlu0 %191 }
 0x13d   :  { %v193_v47 = vrot.slane %v192_v46, 4 }
 0x13e   :  { %v222_v48 = vpop.xlane.xlu1 %221 }
 0x13f   :  { %v194_v49 = vadd.f32 %v193_v47, %v192_v46  ;;  %v223_v50 = vrot.slane %v222_v48, 4 }
 0x141   :  { %v195_v51 = vrot.slane %v194_v49, 2  ;;  %v224_v52 = vadd.f32 %v223_v50, %v222_v48 }
 0x143   :  { %v225_v53 = vrot.slane %v224_v52, 2  ;;  %v196_v54 = vadd.f32 %v195_v51, %v194_v49 }
 0x145   :  { %v197_v57 = vrot.slane %v196_v54, 1  ;;  %v226_v58 = vadd.f32 %v225_v53, %v224_v52 }
 0x147   :  { %v198_v59 = vadd.f32 %v197_v57, %v196_v54  ;;  %v227_v60 = vrot.slane %v226_v58, 1 }
 0x149   :  { %355 = vpush %v198_v59  ;;  %v228_v61 = vadd.f32 %v227_v60, %v226_v58 }
 0x14b   :  { %357 = vpush %v228_v61 }
 0x156   :  { %v265_v19 = vpop.permute.xlu1 %264 }
 0x17a   :  { %s356_s0 = spop %355 }
 0x17b   :  { %v200_v62 = vstv %s356_s0 }
 0x17c   :  { %v231_v63 = vmul.f32 0.0006377551, %v200_v62  ;;  %s358_s21 = spop %357 }
 0x17d   :  { %v230_v0 = vstv %s358_s21 }
 0x17e   :  { %v232_v2 = vmul.f32 0.0006377551, %v230_v0  ;;  %v233_v3 = vmul.f32 %v231_v63, %v231_v63  ;;  %v235_v13 = vsub.f32 %v572_v56, %v231_v63  ;;  %v236_v14 = vsub.f32 %v570_v55, %v231_v63  ;;  %v279_v55 = vpop.permute.xlu2 %278 }
 0x17f   :  { %v237_v15 = vsub.f32 %v580_v1, %v231_v63  ;;  %v238_v16 = vsub.f32 %v585_v4, %v231_v63  ;;  %v239_v20 = vsub.f32 %v595_v18, %v231_v63  ;;  %v240_v21 = vsub.f32 %v601_v22, %v231_v63 }
 0x180   :  { %v234_v5 = vsub.f32 %v232_v2, %v233_v3  ;;  %v241_v23 = vsub.f32 %v611_v35, %v231_v63 }
 0x182   :  { %v242_v6 = vadd.f32 1e-05, %v234_v5 }
 0x184   :  { %369 = vrsqrt.f32 %v242_v6  ;;  %vm249_vm4 = vweird.f32 %v242_v6 }
 0x18a   :  { %v370_v7 = vpop.eup %369 }
 0x18b   :  { %v244_v8 = vmul.f32 %v370_v7, %v242_v6  ;;  %vm250_vm3 = vweird.f32 %v370_v7 }
 0x18c   :  { %vm251_vm5 = vmor %vm249_vm4, %vm250_vm3 }
 0x18d   :  { %v245_v9 = vmul.f32 %v370_v7, %v244_v8 }
 0x18f   :  { %v246_v10 = vmul.f32 0.5, %v245_v9 }
 0x191   :  { %v247_v11 = vsub.f32 1.5, %v246_v10 }
 0x193   :  { %v248_v12 = vmul.f32 %v370_v7, %v247_v11 }
 0x195   :  { %v252_v17 = vsel %vm251_vm5, %v370_v7, %v248_v12 }
 0x196   :  { %v253_v24 = vmul.f32 %v252_v17, %v235_v13  ;;  %v254_v25 = vmul.f32 %v252_v17, %v236_v14  ;;  %v255_v26 = vmul.f32 %v252_v17, %v237_v15  ;;  %v256_v27 = vmul.f32 %v252_v17, %v238_v16 }
 0x197   :  { %v257_v28 = vmul.f32 %v252_v17, %v239_v20  ;;  %v258_v56 = vmul.f32 %v252_v17, %v240_v21  ;;  %v259_v29 = vmul.f32 %v252_v17, %v241_v23 }
 0x198   :  { %v267_v30 = vmul.f32 %v265_v19, %v253_v24  ;;  %v268_v1 = vmul.f32 %v265_v19, %v254_v25  ;;  %v269_v31 = vmul.f32 %v265_v19, %v255_v26  ;;  %v270_v4 = vmul.f32 %v265_v19, %v256_v27 }
 0x199   :  { %v271_v32 = vmul.f32 %v265_v19, %v257_v28  ;;  %v272_v33 = vmul.f32 %v265_v19, %v258_v56  ;;  %v273_v34 = vmul.f32 %v265_v19, %v259_v29 }
 0x19a   :  { %v281_v18 = vadd.f32 %v279_v55, %v267_v30  ;;  %v282_v36 = vadd.f32 %v279_v55, %v268_v1  ;;  %v283_v22 = vadd.f32 %v279_v55, %v269_v31  ;;  %v284_v37 = vadd.f32 %v279_v55, %v270_v4 }
 0x19b   :  { %v285_v35 = vadd.f32 %v279_v55, %v271_v32  ;;  %v286_v38 = vadd.f32 %v279_v55, %v272_v33  ;;  %v287_v39 = vadd.f32 %v279_v55, %v273_v34 }
 0x19c   :  { %v288_v40 = vmax.f32 %v281_v18, 0.0  ;;  %v289_v41 = vmax.f32 %v282_v36, 0.0  ;;  %v290_v42 = vmax.f32 %v283_v22, 0.0  ;;  %v291_v43 = vmax.f32 %v284_v37, 0.0 }
 0x19d   :  { %v292_v44 = vmax.f32 %v285_v35, 0.0  ;;  %v293_v45 = vmax.f32 %v286_v38, 0.0  ;;  %v294_v46 = vmax.f32 %v287_v39, 0.0 }
 0x19e   :  { %295 = vst.msk [vmem:[#allocation5] sm:$0xff] %vm177_vm2, %v288_v40 }
 0x19f   :  { %296 = vst.msk [vmem:[#allocation5 + $0x8] sm:$0xff] %vm177_vm2, %v289_v41 }
 0x1a0   :  { %297 = vst.msk [vmem:[#allocation5 + $0x10] sm:$0xff] %vm177_vm2, %v290_v42 }
 0x1a1   :  { %298 = vst.msk [vmem:[#allocation5 + $0x18] sm:$0xff] %vm177_vm2, %v291_v43 }
 0x1a2   :  { %299 = vst.msk [vmem:[#allocation5 + $0x20] sm:$0xff] %vm177_vm2, %v292_v44 }
 0x1a3   :  { %300 = vst.msk [vmem:[#allocation5 + $0x28] sm:$0xff] %vm177_vm2, %v293_v45 }
 0x1a4   :  { %301 = vst.msk [vmem:[#allocation5 + $0x30] sm:$0xff] %vm177_vm2, %v294_v46 }
 0x1a5   :  { %314 = dma.vmem_to_hbm [thread:$0]  %s307_s23, 896, %s309_s26, [#allocation6], %s399_s27, %s399_s27, %s400_s2  }
 0x1a6   :  { %395 = dma.done.wait [#allocation6], 896  }
 0x1a7   :  { %396 = vsyncadd [#allocation6], 4294966400 }
 0x1a8   :  { %319 = vsyncpa [#allocation6], 1 }

</bundles_post_ra>
